<compile_context>
chip_gen: v5e
topology: v5e:2x2
jax: 0.10.0
libtpu: 0.0.40
codegen_flags: <defaults>
</compile_context>

<pallas_src>
import jax
import jax.numpy as jnp
from jax.experimental import pallas as pl
from jax.experimental.pallas import tpu as pltpu

PATCH = 16
EPS = 1e-6
_INV_SQRT2 = 0.7071067811865476

# MXU input dtype (accumulation stays f32 via preferred_element_type). Elementwise math
# (LN, GELU, residual, depthwise conv) stays f32 (v5e has no bf16 VPU/EUP).
MATMUL_DTYPE = jnp.bfloat16


def _gelu_exact(h):
    # nn.GELU() default = exact erf GELU.
    # TODO(synk): tanh-approx GELU would move this to the EUP slot on v6e/v7x, but it
    # changes numerics vs nn.GELU(); kept exact for parity.
    return 0.5 * h * (1.0 + jax.lax.erf(h * _INV_SQRT2))


def _round_up(x, m):
    return ((x + m - 1) // m) * m


def _vmem_limit_bytes():
    """Per-generation scoped VMEM limit (v5e/v6e: 128 MiB physical, v7x: 64 MiB)."""
    try:
        cap = int(pltpu.get_tpu_info().vmem_capacity_bytes)
    except Exception:
        cap = 64 * 1024 * 1024          # conservative fallback (v7x per-core size)
    return max(16 * 1024 * 1024, min(cap - 16 * 1024 * 1024, 100 * 1024 * 1024))


def _pick_group(B, Hp, Wp, Wq, Wpad, C, hidden, vmem_limit):
    """Images per grid step: as many as fit ~half the scoped VMEM budget, dividing B."""
    bytes_per_image = 4 * (
        2 * Hp * Wp * C            # double-buffered stem-token input block
        + Hp * Wq * C              # resident residual scratch
        + (Hp + 6) * Wpad * C      # halo scratch
        + Hp * Wq * hidden         # MLP hidden activation (f32)
        + 2 * Hp * Wq * C          # dwconv accumulator / temporaries headroom
    )
    weight_bytes = 2 * (49 * C * 4 + 6 * C * 4 + 2 * hidden * 4
                        + 2 * C * hidden * 2)         # double-buffered per-depth weights
    g = int(max(1, (vmem_limit // 2 - weight_bytes) // max(bytes_per_image, 1)))
    g = min(g, B)
    while B % g != 0:
        g -= 1
    return max(g, 1)


# --------------------------------------------------------------------------
# stem: 16x16 / stride-16 conv == patchify (XLA glue) + tiled matmul (Pallas, MXU)
# --------------------------------------------------------------------------

def _stem_kernel(x_ref, w_ref, b_ref, o_ref):
    o_ref[...] = (
        jnp.dot(x_ref[...], w_ref[...], preferred_element_type=jnp.float32)
        + b_ref[0, :]
    )


def stem_matmul(patches, w, b, *, tm=1024):
    """patches: (M, K) bf16, w: (K, dim) bf16, b: (1, dim) f32 -> (M, dim) f32."""
    M, K = patches.shape
    dim = w.shape[1]
    tm = min(tm, M)
    return pl.pallas_call(
        _stem_kernel,
        out_shape=jax.ShapeDtypeStruct((M, dim), jnp.float32),
        grid=(pl.cdiv(M, tm),),
        in_specs=[
            pl.BlockSpec((tm, K), lambda i: (i, 0)),
            pl.BlockSpec((K, dim), lambda i: (0, 0)),   # weight stays VMEM-resident
            pl.BlockSpec((1, dim), lambda i: (0, 0)),
        ],
        out_specs=pl.BlockSpec((tm, dim), lambda i: (i, 0)),
        compiler_params=pltpu.CompilerParams(
            dimension_semantics=("parallel",),
            vmem_limit_bytes=_vmem_limit_bytes(),
        ),
    )(patches, w, b)


# --------------------------------------------------------------------------
# fused depth loop: all blocks + global average pool in one pallas_call
#   grid = (batch_blocks, depth); residual stream resident in VMEM across depth
# --------------------------------------------------------------------------

def _blocks_kernel(x_ref, dww_ref, dwb_ref, lnw_ref, lnb_ref,
                   w1_ref, b1_ref, w2_ref, b2_ref,
                   o_ref, res_ref, xpad_ref):
    G, Hp, Wp, C = x_ref.shape
    _, _, Wq, _ = res_ref.shape          # Wq = round_up(Wp, 8): aligned token width
    _, Hpad, Wpad, _ = xpad_ref.shape    # Hpad = Hp + 6, Wpad = Wq + 8 (right zero halo)
    d = pl.program_id(1)

    # ---- once per image group (depth step 0 on whichever core owns this group) -------
    @pl.when(d == 0)
    def _init():
        xpad_ref[...] = jnp.zeros(xpad_ref.shape, jnp.float32)   # halo stays zero forever
        if Wq == Wp:
            res_ref[...] = x_ref[...]
        else:
            res_ref[...] = jnp.zeros(res_ref.shape, jnp.float32)
            res_ref[:, :, 0:Wp, :] = x_ref[...]                  # pad columns stay zero

    # ---- depthwise 7x7 conv (padding=3) over the residual stream ---------------------
    # Interior rewrite is fully aligned (W offset 0, width Wq % 8 == 0); the zero frame
    # (3 rows top/bottom, >=8 zero columns on the right) provides the conv zero padding.
    xpad_ref[:, 3:3 + Hp, 0:Wq, :] = res_ref[...]

    w = dww_ref[0]                                   # (7, 7, C)
    acc = jnp.zeros((G, Hp, Wq, C), jnp.float32)
    # TODO(synk): strip-tile over Hp for dim >= 384 so acc + the rolled operand fit the
    # 64-entry vreg file instead of spilling.
    for j in range(7):
        # shifted[w'] = xpad[w' + j - 3]; circular wrap lands in the zero halo columns.
        if j == 3:
            xs = xpad_ref[...]
        else:
            xs = pltpu.roll(
                xpad_ref[...].reshape(G * Hpad, Wpad, C),
                (3 - j) % Wpad, axis=1,
            ).reshape(G, Hpad, Wpad, C)
        for i in range(7):                            # aligned leading-H / whole-tile reads
            acc = acc + xs[:, i:i + Hp, 0:Wq, :] * w[i, j]
    dw = acc + dwb_ref[0, 0, :]                       # (G, Hp, Wq, C) f32

    # ---- LayerNorm -> Linear(dim,4dim) -> GELU -> Linear(4dim,dim) -> residual -------
    t = dw.reshape(G * Hp * Wq, C)                    # layout no-op (Wq % 8 == 0)
    mu = jnp.mean(t, axis=-1, keepdims=True)
    var = jnp.mean(jnp.square(t - mu), axis=-1, keepdims=True)
    tn = (t - mu) * jax.lax.rsqrt(var + EPS) * lnw_ref[0, 0, :] + lnb_ref[0, 0, :]

    h = jnp.dot(tn.astype(w1_ref.dtype), w1_ref[0],
                preferred_element_type=jnp.float32) + b1_ref[0, 0, :]
    h = _gelu_exact(h)
    y = jnp.dot(h.astype(w2_ref.dtype), w2_ref[0],
                preferred_element_type=jnp.float32) + b2_ref[0, 0, :]
    y = y.reshape(G, Hp, Wq, C)
    if Wq != Wp:
        col = jax.lax.broadcasted_iota(jnp.int32, (Wq, C), 0)
        y = y * (col < Wp).astype(jnp.float32)        # keep pad columns exactly zero

    # gamma (layer scale) is None and drop_path is Identity at the module defaults.
    res_ref[...] = res_ref[...] + y

    # ---- last block: global average pool over the Hp*Wp valid tokens -----------------
    @pl.when(d == pl.num_programs(1) - 1)
    def _pool():
        o_ref[...] = (jnp.sum(res_ref[...], axis=(1, 2))
                      * (1.0 / (Hp * Wp))).reshape(G, 1, C)


def convnext_blocks_and_pool(tokens, p):
    """tokens: (B, Hp, Wp, C) f32 stem output -> (B, C) f32 pooled features."""
    B, Hp, Wp, C = tokens.shape
    depth = p["dw_w"].shape[0]
    hidden = p["w1"].shape[2]
    Wq = _round_up(Wp, 8)
    Wpad = Wq + 8
    limit = _vmem_limit_bytes()
    G = _pick_group(B, Hp, Wp, Wq, Wpad, C, hidden, limit)
    nb = B // G

    pooled = pl.pallas_call(
        _blocks_kernel,
        out_shape=jax.ShapeDtypeStruct((B, 1, C), jnp.float32),
        grid=(nb, depth),
        in_specs=[
            pl.BlockSpec((G, Hp, Wp, C), lambda b, d: (b, 0, 0, 0)),  # stem tokens (per b)
            pl.BlockSpec((1, 7, 7, C), lambda b, d: (d, 0, 0, 0)),    # dw weight (per d)
            pl.BlockSpec((1, 1, C), lambda b, d: (d, 0, 0)),          # dw bias
            pl.BlockSpec((1, 1, C), lambda b, d: (d, 0, 0)),          # ln weight
            pl.BlockSpec((1, 1, C), lambda b, d: (d, 0, 0)),          # ln bias
            pl.BlockSpec((1, C, hidden), lambda b, d: (d, 0, 0)),     # w1 (bf16)
            pl.BlockSpec((1, 1, hidden), lambda b, d: (d, 0, 0)),     # b1
            pl.BlockSpec((1, hidden, C), lambda b, d: (d, 0, 0)),     # w2 (bf16)
            pl.BlockSpec((1, 1, C), lambda b, d: (d, 0, 0)),          # b2
        ],
        out_specs=pl.BlockSpec((G, 1, C), lambda b, d: (b, 0, 0)),    # pooled means
        scratch_shapes=[
            pltpu.VMEM((G, Hp, Wq, C), jnp.float32),                  # residual stream
            pltpu.VMEM((G, Hp + 6, Wpad, C), jnp.float32),            # zero-halo buffer
        ],
        compiler_params=pltpu.CompilerParams(
            dimension_semantics=("parallel", "arbitrary"),
            vmem_limit_bytes=limit,
        ),
    )(tokens, p["dw_w"], p["dw_b"], p["ln_w"], p["ln_b"],
      p["w1"], p["b1"], p["w2"], p["b2"])
    return pooled[:, 0, :]


# --------------------------------------------------------------------------
# head: LayerNorm -> Linear on the (B, C) pooled features (tiny; lane-padded output)
# --------------------------------------------------------------------------

def _head_kernel(g_ref, lnw_ref, lnb_ref, hw_ref, hb_ref, o_ref):
    g = g_ref[...]                                   # (B, C)
    mu = jnp.mean(g, axis=-1, keepdims=True)
    var = jnp.mean(jnp.square(g - mu), axis=-1, keepdims=True)
    gn = (g - mu) * jax.lax.rsqrt(var + EPS) * lnw_ref[0, :] + lnb_ref[0, :]
    o_ref[...] = (
        jnp.dot(gn, hw_ref[...], preferred_element_type=jnp.float32) + hb_ref[0, :]
    )


def head(pooled, lnw, lnb, hw_padded, hb):
    B, _ = pooled.shape
    npad = hw_padded.shape[1]
    ncls = hb.shape[1]
    hb_p = jnp.pad(hb, ((0, 0), (0, npad - ncls))) if npad != ncls else hb
    vm = pl.BlockSpec(memory_space=pltpu.MemorySpace.VMEM)
    out = pl.pallas_call(
        _head_kernel,
        out_shape=jax.ShapeDtypeStruct((B, npad), jnp.float32),
        in_specs=[vm] * 5,
        out_specs=vm,
        compiler_params=pltpu.CompilerParams(vmem_limit_bytes=_vmem_limit_bytes()),
    )(pooled, lnw, lnb, hw_padded, hb_p)
    return out[:, :ncls]


# --------------------------------------------------------------------------
# Model forward (Pallas path). Only the patchify reshape/transpose stays in XLA.
# --------------------------------------------------------------------------

def convnext_isotropic_forward(x, p):
    """x: NCHW f32; p: prepared (pre-stacked / pre-transposed / pre-cast) params."""
    B, Cin, H, W = x.shape
    Hp, Wp = H // PATCH, W // PATCH
    dim = p["stem_b"].shape[1]

    patches = (x.reshape(B, Cin, Hp, PATCH, Wp, PATCH)
                 .transpose(0, 2, 4, 1, 3, 5)
                 .reshape(B * Hp * Wp, Cin * PATCH * PATCH)
                 .astype(MATMUL_DTYPE))
    tokens = stem_matmul(patches, p["stem_w"], p["stem_b"]).reshape(B, Hp, Wp, dim)

    pooled = convnext_blocks_and_pool(tokens, p)               # (B, dim)
    return head(pooled, p["norm_w"], p["norm_b"], p["head_w"], p["head_b"])


# --------------------------------------------------------------------------
# Deterministic parameter init (mirrors the module's __init__ shapes/inits)
# and one-time weight re-layout / depth-stacking for the kernels.
# --------------------------------------------------------------------------

def init_params(key, in_chans=3, num_classes=10, depth=2, dim=128, head_init_scale=1.0):
    keys = iter(jax.random.split(key, 8 + 4 * depth))

    def tn(shape, std=0.02):
        return (std * jax.random.truncated_normal(next(keys), -2.0, 2.0, shape)).astype(jnp.float32)

    params = {
        "stem_w": tn((dim, in_chans, PATCH, PATCH)),
        "stem_b": jnp.zeros((dim,), jnp.float32),
        "blocks": [],
        "norm_w": jnp.ones((dim,), jnp.float32),
        "norm_b": jnp.zeros((dim,), jnp.float32),
        "head_w": tn((num_classes, dim)) * head_init_scale,
        "head_b": jnp.zeros((num_classes,), jnp.float32) * head_init_scale,
    }
    for _ in range(depth):
        params["blocks"].append({
            "dw_w": tn((dim, 1, 7, 7)),
            "dw_b": jnp.zeros((dim,), jnp.float32),
            "ln_w": jnp.ones((dim,), jnp.float32),
            "ln_b": jnp.zeros((dim,), jnp.float32),
            "w1": tn((4 * dim, dim)),
            "b1": jnp.zeros((4 * dim,), jnp.float32),
            "w2": tn((dim, 4 * dim)),
            "b2": jnp.zeros((dim,), jnp.float32),
        })
    return params


def prepare_params(torch_params, in_chans):
    """One-time weight re-layout / bf16 cast / depth-stacking (hoisted out of forward)."""
    dim = torch_params["stem_b"].shape[0]
    ncls = torch_params["head_b"].shape[0]
    npad = max(128, _round_up(ncls, 128))
    blocks = torch_params["blocks"]
    return {
        "stem_w": torch_params["stem_w"].reshape(dim, in_chans * PATCH * PATCH).T
                      .astype(MATMUL_DTYPE),                           # (K, dim) bf16
        "stem_b": torch_params["stem_b"].reshape(1, dim),
        "norm_w": torch_params["norm_w"].reshape(1, dim),
        "norm_b": torch_params["norm_b"].reshape(1, dim),
        "head_w": jnp.zeros((dim, npad), jnp.float32)
                      .at[:, :ncls].set(torch_params["head_w"].T),     # lane-padded
        "head_b": torch_params["head_b"].reshape(1, ncls),
        # per-block weights stacked along depth for the fused depth-loop kernel
        "dw_w": jnp.stack([b["dw_w"][:, 0].transpose(1, 2, 0) for b in blocks]),  # (D,7,7,C)
        "dw_b": jnp.stack([b["dw_b"].reshape(1, dim) for b in blocks]),           # (D,1,C)
        "ln_w": jnp.stack([b["ln_w"].reshape(1, dim) for b in blocks]),
        "ln_b": jnp.stack([b["ln_b"].reshape(1, dim) for b in blocks]),
        "w1": jnp.stack([b["w1"].T.astype(MATMUL_DTYPE) for b in blocks]),        # (D,C,4C)
        "b1": jnp.stack([b["b1"].reshape(1, -1) for b in blocks]),
        "w2": jnp.stack([b["w2"].T.astype(MATMUL_DTYPE) for b in blocks]),        # (D,4C,C)
        "b2": jnp.stack([b["b2"].reshape(1, dim) for b in blocks]),
    }


# --------------------------------------------------------------------------
# Pure-JAX (XLA, f32 HIGHEST) reference for a sanity check
# --------------------------------------------------------------------------

def reference_forward(x, params):
    hp = jax.lax.Precision.HIGHEST
    dim = params["stem_b"].shape[0]

    y = jax.lax.conv_general_dilated(
        x, params["stem_w"], (PATCH, PATCH), "VALID",
        dimension_numbers=("NCHW", "OIHW", "NCHW"), precision=hp)
    y = y + params["stem_b"][None, :, None, None]

    for blk in params["blocks"]:
        inp = y
        z = jax.lax.conv_general_dilated(
            y, blk["dw_w"], (1, 1), ((3, 3), (3, 3)),
            dimension_numbers=("NCHW", "OIHW", "NCHW"),
            feature_group_count=dim, precision=hp)
        z = z + blk["dw_b"][None, :, None, None]
        z = jnp.transpose(z, (0, 2, 3, 1))
        mu = z.mean(-1, keepdims=True)
        var = jnp.square(z - mu).mean(-1, keepdims=True)
        z = (z - mu) / jnp.sqrt(var + EPS) * blk["ln_w"] + blk["ln_b"]
        h = jnp.matmul(z, blk["w1"].T, precision=hp) + blk["b1"]
        h = 0.5 * h * (1.0 + jax.lax.erf(h * _INV_SQRT2))
        z = jnp.matmul(h, blk["w2"].T, precision=hp) + blk["b2"]
        y = inp + jnp.transpose(z, (0, 3, 1, 2))

    g = y.mean(axis=(-2, -1))
    mu = g.mean(-1, keepdims=True)
    var = jnp.square(g - mu).mean(-1, keepdims=True)
    g = (g - mu) / jnp.sqrt(var + EPS) * params["norm_w"] + params["norm_b"]
    return jnp.matmul(g, params["head_w"].T, precision=hp) + params["head_b"]


if __name__ == "__main__":
    key = jax.random.PRNGKey(0)
    k_params, k_x = jax.random.split(key)

    # Small but lane-dense shapes: dim=128 keeps the channel axis on full 128-lane vregs.
    in_chans, num_classes, depth, dim = 3, 10, 2, 128
    B, H, W = 2, 64, 64                                    # -> Hp = Wp = 4, 16 tokens/image

    torch_params = init_params(k_params, in_chans, num_classes, depth, dim)
    params = prepare_params(torch_params, in_chans)        # one-time re-layout / bf16 cast
    x = jax.random.normal(k_x, (B, in_chans, H, W), dtype=jnp.float32)  # NCHW

    fwd = jax.jit(convnext_isotropic_forward)
    out = jax.block_until_ready(fwd(x, params))
    assert out.shape == (B, num_classes)

    ref = jax.block_until_ready(reference_forward(x, torch_params))
    assert jnp.allclose(out, ref, rtol=2e-2, atol=2e-2), (out, ref)

    print("KERNEL_OK")
</pallas_src>

<mosaic_0001>
module attributes {stable_mosaic.version = 11 : i64} {
  func.func @_stem_kernel(%arg0: i32, %arg1: memref<32x768xbf16, #tpu.memory_space<vmem>>, %arg2: memref<768x128xbf16, #tpu.memory_space<vmem>>, %arg3: memref<1x128xf32, #tpu.memory_space<vmem>>, %arg4: memref<32x128xf32, #tpu.memory_space<vmem>>) attributes {dimension_semantics = [#tpu.dimension_semantics<parallel>], iteration_bounds = array<i64: 1>, scalar_prefetch = 0 : i64, scratch_operands = 0 : i64, tpu.core_type = #tpu.core_type<tc>, window_params = [{transform_indices = @transform_0, window_bounds = array<i64: 32, 768>}, {pipeline_mode = #tpu.pipeline_mode<synchronous>, transform_indices = @transform_1, window_bounds = array<i64: 768, 128>}, {pipeline_mode = #tpu.pipeline_mode<synchronous>, transform_indices = @transform_2, window_bounds = array<i64: 1, 128>}, {transform_indices = @transform_3, window_bounds = array<i64: 32, 128>}]} {
    %c0 = arith.constant 0 : index
    %c0_0 = arith.constant 0 : index
    %0 = vector.load %arg1[%c0, %c0_0] : memref<32x768xbf16, #tpu.memory_space<vmem>>, vector<32x768xbf16>
    %c0_1 = arith.constant 0 : index
    %c0_2 = arith.constant 0 : index
    %1 = vector.load %arg2[%c0_1, %c0_2] : memref<768x128xbf16, #tpu.memory_space<vmem>>, vector<768x128xbf16>
    %cst = arith.constant dense<0.000000e+00> : vector<32x128xf32>
    %2 = tpu.matmul %0, %1, %cst {dimension_numbers = #tpu.dot_dimension_numbers<[1], [0], [0], [1], [0, 0, 1, 1], [], []>} : vector<32x768xbf16>, vector<768x128xbf16>, vector<32x128xf32> -> vector<32x128xf32>
    %c0_3 = arith.constant 0 : index
    %c0_4 = arith.constant 0 : index
    %3 = vector.load %arg3[%c0_3, %c0_4] : memref<1x128xf32, #tpu.memory_space<vmem>>, vector<1x128xf32>
    %4 = vector.shape_cast %3 : vector<1x128xf32> to vector<128xf32>
    %5 = vector.shape_cast %4 : vector<128xf32> to vector<1x128xf32>
    %6 = vector.broadcast %5 : vector<1x128xf32> to vector<32x128xf32>
    %7 = arith.addf %2, %6 : vector<32x128xf32>
    %c0_5 = arith.constant 0 : index
    %c0_6 = arith.constant 0 : index
    %8 = vector.load %arg4[%c0_5, %c0_6] : memref<32x128xf32, #tpu.memory_space<vmem>>, vector<32x128xf32>
    tpu.vector_store %arg4[%c0_5, %c0_6], %7 {strides = array<i32>} : memref<32x128xf32, #tpu.memory_space<vmem>>, vector<32x128xf32>,
    return
  }
  func.func @transform_0(%arg0: i32) -> (i32, i32) {
    %c0_i32 = arith.constant 0 : i32
    %c0_i32_0 = arith.constant 0 : i32
    return %arg0, %c0_i32 : i32, i32
  }
  func.func @transform_1(%arg0: i32) -> (i32, i32) {
    %c0_i32 = arith.constant 0 : i32
    %c0_i32_0 = arith.constant 0 : i32
    %c0_i32_1 = arith.constant 0 : i32
    return %c0_i32, %c0_i32_0 : i32, i32
  }
  func.func @transform_2(%arg0: i32) -> (i32, i32) {
    %c0_i32 = arith.constant 0 : i32
    %c0_i32_0 = arith.constant 0 : i32
    %c0_i32_1 = arith.constant 0 : i32
    return %c0_i32, %c0_i32_0 : i32, i32
  }
  func.func @transform_3(%arg0: i32) -> (i32, i32) {
    %c0_i32 = arith.constant 0 : i32
    %c0_i32_0 = arith.constant 0 : i32
    return %arg0, %c0_i32 : i32, i32
  }
}

module attributes {stable_mosaic.version = 11 : i64} {
  func.func @_blocks_kernel(%arg0: i32, %arg1: i32, %arg2: memref<2x4x4x128xf32, #tpu.memory_space<vmem>>, %arg3: memref<1x7x7x128xf32, #tpu.memory_space<vmem>>, %arg4: memref<1x1x128xf32, #tpu.memory_space<vmem>>, %arg5: memref<1x1x128xf32, #tpu.memory_space<vmem>>, %arg6: memref<1x1x128xf32, #tpu.memory_space<vmem>>, %arg7: memref<1x128x512xbf16, #tpu.memory_space<vmem>>, %arg8: memref<1x1x512xf32, #tpu.memory_space<vmem>>, %arg9: memref<1x512x128xbf16, #tpu.memory_space<vmem>>, %arg10: memref<1x1x128xf32, #tpu.memory_space<vmem>>, %arg11: memref<2x1x128xf32, #tpu.memory_space<vmem>>, %arg12: memref<2x4x8x128xf32, #tpu.memory_space<vmem>>, %arg13: memref<2x10x16x128xf32, #tpu.memory_space<vmem>>) attributes {dimension_semantics = [#tpu.dimension_semantics<parallel>, #tpu.dimension_semantics<arbitrary>], iteration_bounds = array<i64: 1, 2>, scalar_prefetch = 0 : i64, scratch_operands = 2 : i64, tpu.core_type = #tpu.core_type<tc>, window_params = [{transform_indices = @transform_0, window_bounds = array<i64: 2, 4, 4, 128>}, {transform_indices = @transform_1, window_bounds = array<i64: 1, 7, 7, 128>}, {transform_indices = @transform_2, window_bounds = array<i64: 1, 1, 128>}, {transform_indices = @transform_3, window_bounds = array<i64: 1, 1, 128>}, {transform_indices = @transform_4, window_bounds = array<i64: 1, 1, 128>}, {transform_indices = @transform_5, window_bounds = array<i64: 1, 128, 512>}, {transform_indices = @transform_6, window_bounds = array<i64: 1, 1, 512>}, {transform_indices = @transform_7, window_bounds = array<i64: 1, 512, 128>}, {transform_indices = @transform_8, window_bounds = array<i64: 1, 1, 128>}, {transform_indices = @transform_9, window_bounds = array<i64: 2, 1, 128>}]} {
    %c0_i32 = arith.constant 0 : i32
    %0 = arith.cmpi eq, %arg1, %c0_i32 : i32
    %1 = arith.extui %0 : i1 to i32
    %c0_i32_0 = arith.constant 0 : i32
    %2 = arith.cmpi ne, %1, %c0_i32_0 : i32
    scf.if %2 {
      %cst_80 = arith.constant 0.000000e+00 : f32
      %451 = vector.broadcast %cst_80 : f32 to vector<2x10x16x128xf32>
      %c0_81 = arith.constant 0 : index
      %c0_82 = arith.constant 0 : index
      %c0_83 = arith.constant 0 : index
      %c0_84 = arith.constant 0 : index
      %452 = vector.load %arg13[%c0_81, %c0_82, %c0_83, %c0_84] : memref<2x10x16x128xf32, #tpu.memory_space<vmem>>, vector<2x10x16x128xf32>
      tpu.vector_store %arg13[%c0_81, %c0_82, %c0_83, %c0_84], %451 {strides = array<i32>} : memref<2x10x16x128xf32, #tpu.memory_space<vmem>>, vector<2x10x16x128xf32>,
      %cst_85 = arith.constant 0.000000e+00 : f32
      %453 = vector.broadcast %cst_85 : f32 to vector<2x4x8x128xf32>
      %c0_86 = arith.constant 0 : index
      %c0_87 = arith.constant 0 : index
      %c0_88 = arith.constant 0 : index
      %c0_89 = arith.constant 0 : index
      %454 = vector.load %arg12[%c0_86, %c0_87, %c0_88, %c0_89] : memref<2x4x8x128xf32, #tpu.memory_space<vmem>>, vector<2x4x8x128xf32>
      tpu.vector_store %arg12[%c0_86, %c0_87, %c0_88, %c0_89], %453 {strides = array<i32>} : memref<2x4x8x128xf32, #tpu.memory_space<vmem>>, vector<2x4x8x128xf32>,
      %c0_90 = arith.constant 0 : index
      %c0_91 = arith.constant 0 : index
      %c0_92 = arith.constant 0 : index
      %c0_93 = arith.constant 0 : index
      %455 = vector.load %arg2[%c0_90, %c0_91, %c0_92, %c0_93] : memref<2x4x4x128xf32, #tpu.memory_space<vmem>>, vector<2x4x4x128xf32>
      %c0_94 = arith.constant 0 : index
      %c0_95 = arith.constant 0 : index
      %c0_96 = arith.constant 0 : index
      %c0_97 = arith.constant 0 : index
      %456 = vector.load %arg12[%c0_94, %c0_95, %c0_96, %c0_97] : memref<2x4x8x128xf32, #tpu.memory_space<vmem>>, vector<2x4x4x128xf32>
      tpu.vector_store %arg12[%c0_94, %c0_95, %c0_96, %c0_97], %455 {strides = array<i32>} : memref<2x4x8x128xf32, #tpu.memory_space<vmem>>, vector<2x4x4x128xf32>,
    } else {
    }
    %c0 = arith.constant 0 : index
    %c0_1 = arith.constant 0 : index
    %c0_2 = arith.constant 0 : index
    %c0_3 = arith.constant 0 : index
    %3 = vector.load %arg12[%c0, %c0_1, %c0_2, %c0_3] : memref<2x4x8x128xf32, #tpu.memory_space<vmem>>, vector<2x4x8x128xf32>
    %c0_4 = arith.constant 0 : index
    %c3 = arith.constant 3 : index
    %c0_5 = arith.constant 0 : index
    %c0_6 = arith.constant 0 : index
    %4 = vector.load %arg13[%c0_4, %c3, %c0_5, %c0_6] : memref<2x10x16x128xf32, #tpu.memory_space<vmem>>, vector<2x4x8x128xf32>
    tpu.vector_store %arg13[%c0_4, %c3, %c0_5, %c0_6], %3 {strides = array<i32>} : memref<2x10x16x128xf32, #tpu.memory_space<vmem>>, vector<2x4x8x128xf32>,
    %c0_7 = arith.constant 0 : index
    %c0_8 = arith.constant 0 : index
    %c0_9 = arith.constant 0 : index
    %c0_10 = arith.constant 0 : index
    %5 = vector.load %arg3[%c0_7, %c0_8, %c0_9, %c0_10] : memref<1x7x7x128xf32, #tpu.memory_space<vmem>>, vector<1x7x7x128xf32>
    %6 = vector.shape_cast %5 : vector<1x7x7x128xf32> to vector<7x7x128xf32>
    %cst = arith.constant 0.000000e+00 : f32
    %7 = vector.broadcast %cst : f32 to vector<2x4x8x128xf32>
    %c0_11 = arith.constant 0 : index
    %c0_12 = arith.constant 0 : index
    %c0_13 = arith.constant 0 : index
    %c0_14 = arith.constant 0 : index
    %8 = vector.load %arg13[%c0_11, %c0_12, %c0_13, %c0_14] : memref<2x10x16x128xf32, #tpu.memory_space<vmem>>, vector<2x10x16x128xf32>
    %9 = vector.shape_cast %8 : vector<2x10x16x128xf32> to vector<20x16x128xf32>
    %c3_i32 = arith.constant 3 : i32
    %10 = tpu.dynamic_rotate %9 by %c3_i32 dim 1 : vector<20x16x128xf32>, i32 -> vector<20x16x128xf32>
    %11 = vector.shape_cast %10 : vector<20x16x128xf32> to vector<2x10x16x128xf32>
    %12 = vector.extract_strided_slice %11 {offsets = [0, 0, 0, 0], sizes = [2, 4, 8, 128], strides = [1, 1, 1, 1]} : vector<2x10x16x128xf32> to vector<2x4x8x128xf32>
    %13 = vector.extract_strided_slice %6 {offsets = [0, 0, 0], sizes = [1, 1, 128], strides = [1, 1, 1]} : vector<7x7x128xf32> to vector<1x1x128xf32>
    %14 = vector.shape_cast %13 : vector<1x1x128xf32> to vector<128xf32>
    %15 = vector.shape_cast %14 : vector<128xf32> to vector<1x1x1x128xf32>
    %16 = vector.broadcast %15 : vector<1x1x1x128xf32> to vector<2x4x8x128xf32>
    %17 = arith.mulf %12, %16 : vector<2x4x8x128xf32>
    %18 = arith.addf %7, %17 : vector<2x4x8x128xf32>
    %19 = vector.extract_strided_slice %11 {offsets = [0, 1, 0, 0], sizes = [2, 4, 8, 128], strides = [1, 1, 1, 1]} : vector<2x10x16x128xf32> to vector<2x4x8x128xf32>
    %20 = vector.extract_strided_slice %6 {offsets = [1, 0, 0], sizes = [1, 1, 128], strides = [1, 1, 1]} : vector<7x7x128xf32> to vector<1x1x128xf32>
    %21 = vector.shape_cast %20 : vector<1x1x128xf32> to vector<128xf32>
    %22 = vector.shape_cast %21 : vector<128xf32> to vector<1x1x1x128xf32>
    %23 = vector.broadcast %22 : vector<1x1x1x128xf32> to vector<2x4x8x128xf32>
    %24 = arith.mulf %19, %23 : vector<2x4x8x128xf32>
    %25 = arith.addf %18, %24 : vector<2x4x8x128xf32>
    %26 = vector.extract_strided_slice %11 {offsets = [0, 2, 0, 0], sizes = [2, 4, 8, 128], strides = [1, 1, 1, 1]} : vector<2x10x16x128xf32> to vector<2x4x8x128xf32>
    %27 = vector.extract_strided_slice %6 {offsets = [2, 0, 0], sizes = [1, 1, 128], strides = [1, 1, 1]} : vector<7x7x128xf32> to vector<1x1x128xf32>
    %28 = vector.shape_cast %27 : vector<1x1x128xf32> to vector<128xf32>
    %29 = vector.shape_cast %28 : vector<128xf32> to vector<1x1x1x128xf32>
    %30 = vector.broadcast %29 : vector<1x1x1x128xf32> to vector<2x4x8x128xf32>
    %31 = arith.mulf %26, %30 : vector<2x4x8x128xf32>
    %32 = arith.addf %25, %31 : vector<2x4x8x128xf32>
    %33 = vector.extract_strided_slice %11 {offsets = [0, 3, 0, 0], sizes = [2, 4, 8, 128], strides = [1, 1, 1, 1]} : vector<2x10x16x128xf32> to vector<2x4x8x128xf32>
    %34 = vector.extract_strided_slice %6 {offsets = [3, 0, 0], sizes = [1, 1, 128], strides = [1, 1, 1]} : vector<7x7x128xf32> to vector<1x1x128xf32>
    %35 = vector.shape_cast %34 : vector<1x1x128xf32> to vector<128xf32>
    %36 = vector.shape_cast %35 : vector<128xf32> to vector<1x1x1x128xf32>
    %37 = vector.broadcast %36 : vector<1x1x1x128xf32> to vector<2x4x8x128xf32>
    %38 = arith.mulf %33, %37 : vector<2x4x8x128xf32>
    %39 = arith.addf %32, %38 : vector<2x4x8x128xf32>
    %40 = vector.extract_strided_slice %11 {offsets = [0, 4, 0, 0], sizes = [2, 4, 8, 128], strides = [1, 1, 1, 1]} : vector<2x10x16x128xf32> to vector<2x4x8x128xf32>
    %41 = vector.extract_strided_slice %6 {offsets = [4, 0, 0], sizes = [1, 1, 128], strides = [1, 1, 1]} : vector<7x7x128xf32> to vector<1x1x128xf32>
    %42 = vector.shape_cast %41 : vector<1x1x128xf32> to vector<128xf32>
    %43 = vector.shape_cast %42 : vector<128xf32> to vector<1x1x1x128xf32>
    %44 = vector.broadcast %43 : vector<1x1x1x128xf32> to vector<2x4x8x128xf32>
    %45 = arith.mulf %40, %44 : vector<2x4x8x128xf32>
    %46 = arith.addf %39, %45 : vector<2x4x8x128xf32>
    %47 = vector.extract_strided_slice %11 {offsets = [0, 5, 0, 0], sizes = [2, 4, 8, 128], strides = [1, 1, 1, 1]} : vector<2x10x16x128xf32> to vector<2x4x8x128xf32>
    %48 = vector.extract_strided_slice %6 {offsets = [5, 0, 0], sizes = [1, 1, 128], strides = [1, 1, 1]} : vector<7x7x128xf32> to vector<1x1x128xf32>
    %49 = vector.shape_cast %48 : vector<1x1x128xf32> to vector<128xf32>
    %50 = vector.shape_cast %49 : vector<128xf32> to vector<1x1x1x128xf32>
    %51 = vector.broadcast %50 : vector<1x1x1x128xf32> to vector<2x4x8x128xf32>
    %52 = arith.mulf %47, %51 : vector<2x4x8x128xf32>
    %53 = arith.addf %46, %52 : vector<2x4x8x128xf32>
    %54 = vector.extract_strided_slice %11 {offsets = [0, 6, 0, 0], sizes = [2, 4, 8, 128], strides = [1, 1, 1, 1]} : vector<2x10x16x128xf32> to vector<2x4x8x128xf32>
    %55 = vector.extract_strided_slice %6 {offsets = [6, 0, 0], sizes = [1, 1, 128], strides = [1, 1, 1]} : vector<7x7x128xf32> to vector<1x1x128xf32>
    %56 = vector.shape_cast %55 : vector<1x1x128xf32> to vector<128xf32>
    %57 = vector.shape_cast %56 : vector<128xf32> to vector<1x1x1x128xf32>
    %58 = vector.broadcast %57 : vector<1x1x1x128xf32> to vector<2x4x8x128xf32>
    %59 = arith.mulf %54, %58 : vector<2x4x8x128xf32>
    %60 = arith.addf %53, %59 : vector<2x4x8x128xf32>
    %c0_15 = arith.constant 0 : index
    %c0_16 = arith.constant 0 : index
    %c0_17 = arith.constant 0 : index
    %c0_18 = arith.constant 0 : index
    %61 = vector.load %arg13[%c0_15, %c0_16, %c0_17, %c0_18] : memref<2x10x16x128xf32, #tpu.memory_space<vmem>>, vector<2x10x16x128xf32>
    %62 = vector.shape_cast %61 : vector<2x10x16x128xf32> to vector<20x16x128xf32>
    %c2_i32 = arith.constant 2 : i32
    %63 = tpu.dynamic_rotate %62 by %c2_i32 dim 1 : vector<20x16x128xf32>, i32 -> vector<20x16x128xf32>
    %64 = vector.shape_cast %63 : vector<20x16x128xf32> to vector<2x10x16x128xf32>
    %65 = vector.extract_strided_slice %64 {offsets = [0, 0, 0, 0], sizes = [2, 4, 8, 128], strides = [1, 1, 1, 1]} : vector<2x10x16x128xf32> to vector<2x4x8x128xf32>
    %66 = vector.extract_strided_slice %6 {offsets = [0, 1, 0], sizes = [1, 1, 128], strides = [1, 1, 1]} : vector<7x7x128xf32> to vector<1x1x128xf32>
    %67 = vector.shape_cast %66 : vector<1x1x128xf32> to vector<128xf32>
    %68 = vector.shape_cast %67 : vector<128xf32> to vector<1x1x1x128xf32>
    %69 = vector.broadcast %68 : vector<1x1x1x128xf32> to vector<2x4x8x128xf32>
    %70 = arith.mulf %65, %69 : vector<2x4x8x128xf32>
    %71 = arith.addf %60, %70 : vector<2x4x8x128xf32>
    %72 = vector.extract_strided_slice %64 {offsets = [0, 1, 0, 0], sizes = [2, 4, 8, 128], strides = [1, 1, 1, 1]} : vector<2x10x16x128xf32> to vector<2x4x8x128xf32>
    %73 = vector.extract_strided_slice %6 {offsets = [1, 1, 0], sizes = [1, 1, 128], strides = [1, 1, 1]} : vector<7x7x128xf32> to vector<1x1x128xf32>
    %74 = vector.shape_cast %73 : vector<1x1x128xf32> to vector<128xf32>
    %75 = vector.shape_cast %74 : vector<128xf32> to vector<1x1x1x128xf32>
    %76 = vector.broadcast %75 : vector<1x1x1x128xf32> to vector<2x4x8x128xf32>
    %77 = arith.mulf %72, %76 : vector<2x4x8x128xf32>
    %78 = arith.addf %71, %77 : vector<2x4x8x128xf32>
    %79 = vector.extract_strided_slice %64 {offsets = [0, 2, 0, 0], sizes = [2, 4, 8, 128], strides = [1, 1, 1, 1]} : vector<2x10x16x128xf32> to vector<2x4x8x128xf32>
    %80 = vector.extract_strided_slice %6 {offsets = [2, 1, 0], sizes = [1, 1, 128], strides = [1, 1, 1]} : vector<7x7x128xf32> to vector<1x1x128xf32>
    %81 = vector.shape_cast %80 : vector<1x1x128xf32> to vector<128xf32>
    %82 = vector.shape_cast %81 : vector<128xf32> to vector<1x1x1x128xf32>
    %83 = vector.broadcast %82 : vector<1x1x1x128xf32> to vector<2x4x8x128xf32>
    %84 = arith.mulf %79, %83 : vector<2x4x8x128xf32>
    %85 = arith.addf %78, %84 : vector<2x4x8x128xf32>
    %86 = vector.extract_strided_slice %64 {offsets = [0, 3, 0, 0], sizes = [2, 4, 8, 128], strides = [1, 1, 1, 1]} : vector<2x10x16x128xf32> to vector<2x4x8x128xf32>
    %87 = vector.extract_strided_slice %6 {offsets = [3, 1, 0], sizes = [1, 1, 128], strides = [1, 1, 1]} : vector<7x7x128xf32> to vector<1x1x128xf32>
    %88 = vector.shape_cast %87 : vector<1x1x128xf32> to vector<128xf32>
    %89 = vector.shape_cast %88 : vector<128xf32> to vector<1x1x1x128xf32>
    %90 = vector.broadcast %89 : vector<1x1x1x128xf32> to vector<2x4x8x128xf32>
    %91 = arith.mulf %86, %90 : vector<2x4x8x128xf32>
    %92 = arith.addf %85, %91 : vector<2x4x8x128xf32>
    %93 = vector.extract_strided_slice %64 {offsets = [0, 4, 0, 0], sizes = [2, 4, 8, 128], strides = [1, 1, 1, 1]} : vector<2x10x16x128xf32> to vector<2x4x8x128xf32>
    %94 = vector.extract_strided_slice %6 {offsets = [4, 1, 0], sizes = [1, 1, 128], strides = [1, 1, 1]} : vector<7x7x128xf32> to vector<1x1x128xf32>
    %95 = vector.shape_cast %94 : vector<1x1x128xf32> to vector<128xf32>
    %96 = vector.shape_cast %95 : vector<128xf32> to vector<1x1x1x128xf32>
    %97 = vector.broadcast %96 : vector<1x1x1x128xf32> to vector<2x4x8x128xf32>
    %98 = arith.mulf %93, %97 : vector<2x4x8x128xf32>
    %99 = arith.addf %92, %98 : vector<2x4x8x128xf32>
    %100 = vector.extract_strided_slice %64 {offsets = [0, 5, 0, 0], sizes = [2, 4, 8, 128], strides = [1, 1, 1, 1]} : vector<2x10x16x128xf32> to vector<2x4x8x128xf32>
    %101 = vector.extract_strided_slice %6 {offsets = [5, 1, 0], sizes = [1, 1, 128], strides = [1, 1, 1]} : vector<7x7x128xf32> to vector<1x1x128xf32>
    %102 = vector.shape_cast %101 : vector<1x1x128xf32> to vector<128xf32>
    %103 = vector.shape_cast %102 : vector<128xf32> to vector<1x1x1x128xf32>
    %104 = vector.broadcast %103 : vector<1x1x1x128xf32> to vector<2x4x8x128xf32>
    %105 = arith.mulf %100, %104 : vector<2x4x8x128xf32>
    %106 = arith.addf %99, %105 : vector<2x4x8x128xf32>
    %107 = vector.extract_strided_slice %64 {offsets = [0, 6, 0, 0], sizes = [2, 4, 8, 128], strides = [1, 1, 1, 1]} : vector<2x10x16x128xf32> to vector<2x4x8x128xf32>
    %108 = vector.extract_strided_slice %6 {offsets = [6, 1, 0], sizes = [1, 1, 128], strides = [1, 1, 1]} : vector<7x7x128xf32> to vector<1x1x128xf32>
    %109 = vector.shape_cast %108 : vector<1x1x128xf32> to vector<128xf32>
    %110 = vector.shape_cast %109 : vector<128xf32> to vector<1x1x1x128xf32>
    %111 = vector.broadcast %110 : vector<1x1x1x128xf32> to vector<2x4x8x128xf32>
    %112 = arith.mulf %107, %111 : vector<2x4x8x128xf32>
    %113 = arith.addf %106, %112 : vector<2x4x8x128xf32>
    %c0_19 = arith.constant 0 : index
    %c0_20 = arith.constant 0 : index
    %c0_21 = arith.constant 0 : index
    %c0_22 = arith.constant 0 : index
    %114 = vector.load %arg13[%c0_19, %c0_20, %c0_21, %c0_22] : memref<2x10x16x128xf32, #tpu.memory_space<vmem>>, vector<2x10x16x128xf32>
    %115 = vector.shape_cast %114 : vector<2x10x16x128xf32> to vector<20x16x128xf32>
    %c1_i32 = arith.constant 1 : i32
    %116 = tpu.dynamic_rotate %115 by %c1_i32 dim 1 : vector<20x16x128xf32>, i32 -> vector<20x16x128xf32>
    %117 = vector.shape_cast %116 : vector<20x16x128xf32> to vector<2x10x16x128xf32>
    %118 = vector.extract_strided_slice %117 {offsets = [0, 0, 0, 0], sizes = [2, 4, 8, 128], strides = [1, 1, 1, 1]} : vector<2x10x16x128xf32> to vector<2x4x8x128xf32>
    %119 = vector.extract_strided_slice %6 {offsets = [0, 2, 0], sizes = [1, 1, 128], strides = [1, 1, 1]} : vector<7x7x128xf32> to vector<1x1x128xf32>
    %120 = vector.shape_cast %119 : vector<1x1x128xf32> to vector<128xf32>
    %121 = vector.shape_cast %120 : vector<128xf32> to vector<1x1x1x128xf32>
    %122 = vector.broadcast %121 : vector<1x1x1x128xf32> to vector<2x4x8x128xf32>
    %123 = arith.mulf %118, %122 : vector<2x4x8x128xf32>
    %124 = arith.addf %113, %123 : vector<2x4x8x128xf32>
    %125 = vector.extract_strided_slice %117 {offsets = [0, 1, 0, 0], sizes = [2, 4, 8, 128], strides = [1, 1, 1, 1]} : vector<2x10x16x128xf32> to vector<2x4x8x128xf32>
    %126 = vector.extract_strided_slice %6 {offsets = [1, 2, 0], sizes = [1, 1, 128], strides = [1, 1, 1]} : vector<7x7x128xf32> to vector<1x1x128xf32>
    %127 = vector.shape_cast %126 : vector<1x1x128xf32> to vector<128xf32>
    %128 = vector.shape_cast %127 : vector<128xf32> to vector<1x1x1x128xf32>
    %129 = vector.broadcast %128 : vector<1x1x1x128xf32> to vector<2x4x8x128xf32>
    %130 = arith.mulf %125, %129 : vector<2x4x8x128xf32>
    %131 = arith.addf %124, %130 : vector<2x4x8x128xf32>
    %132 = vector.extract_strided_slice %117 {offsets = [0, 2, 0, 0], sizes = [2, 4, 8, 128], strides = [1, 1, 1, 1]} : vector<2x10x16x128xf32> to vector<2x4x8x128xf32>
    %133 = vector.extract_strided_slice %6 {offsets = [2, 2, 0], sizes = [1, 1, 128], strides = [1, 1, 1]} : vector<7x7x128xf32> to vector<1x1x128xf32>
    %134 = vector.shape_cast %133 : vector<1x1x128xf32> to vector<128xf32>
    %135 = vector.shape_cast %134 : vector<128xf32> to vector<1x1x1x128xf32>
    %136 = vector.broadcast %135 : vector<1x1x1x128xf32> to vector<2x4x8x128xf32>
    %137 = arith.mulf %132, %136 : vector<2x4x8x128xf32>
    %138 = arith.addf %131, %137 : vector<2x4x8x128xf32>
    %139 = vector.extract_strided_slice %117 {offsets = [0, 3, 0, 0], sizes = [2, 4, 8, 128], strides = [1, 1, 1, 1]} : vector<2x10x16x128xf32> to vector<2x4x8x128xf32>
    %140 = vector.extract_strided_slice %6 {offsets = [3, 2, 0], sizes = [1, 1, 128], strides = [1, 1, 1]} : vector<7x7x128xf32> to vector<1x1x128xf32>
    %141 = vector.shape_cast %140 : vector<1x1x128xf32> to vector<128xf32>
    %142 = vector.shape_cast %141 : vector<128xf32> to vector<1x1x1x128xf32>
    %143 = vector.broadcast %142 : vector<1x1x1x128xf32> to vector<2x4x8x128xf32>
    %144 = arith.mulf %139, %143 : vector<2x4x8x128xf32>
    %145 = arith.addf %138, %144 : vector<2x4x8x128xf32>
    %146 = vector.extract_strided_slice %117 {offsets = [0, 4, 0, 0], sizes = [2, 4, 8, 128], strides = [1, 1, 1, 1]} : vector<2x10x16x128xf32> to vector<2x4x8x128xf32>
    %147 = vector.extract_strided_slice %6 {offsets = [4, 2, 0], sizes = [1, 1, 128], strides = [1, 1, 1]} : vector<7x7x128xf32> to vector<1x1x128xf32>
    %148 = vector.shape_cast %147 : vector<1x1x128xf32> to vector<128xf32>
    %149 = vector.shape_cast %148 : vector<128xf32> to vector<1x1x1x128xf32>
    %150 = vector.broadcast %149 : vector<1x1x1x128xf32> to vector<2x4x8x128xf32>
    %151 = arith.mulf %146, %150 : vector<2x4x8x128xf32>
    %152 = arith.addf %145, %151 : vector<2x4x8x128xf32>
    %153 = vector.extract_strided_slice %117 {offsets = [0, 5, 0, 0], sizes = [2, 4, 8, 128], strides = [1, 1, 1, 1]} : vector<2x10x16x128xf32> to vector<2x4x8x128xf32>
    %154 = vector.extract_strided_slice %6 {offsets = [5, 2, 0], sizes = [1, 1, 128], strides = [1, 1, 1]} : vector<7x7x128xf32> to vector<1x1x128xf32>
    %155 = vector.shape_cast %154 : vector<1x1x128xf32> to vector<128xf32>
    %156 = vector.shape_cast %155 : vector<128xf32> to vector<1x1x1x128xf32>
    %157 = vector.broadcast %156 : vector<1x1x1x128xf32> to vector<2x4x8x128xf32>
    %158 = arith.mulf %153, %157 : vector<2x4x8x128xf32>
    %159 = arith.addf %152, %158 : vector<2x4x8x128xf32>
    %160 = vector.extract_strided_slice %117 {offsets = [0, 6, 0, 0], sizes = [2, 4, 8, 128], strides = [1, 1, 1, 1]} : vector<2x10x16x128xf32> to vector<2x4x8x128xf32>
    %161 = vector.extract_strided_slice %6 {offsets = [6, 2, 0], sizes = [1, 1, 128], strides = [1, 1, 1]} : vector<7x7x128xf32> to vector<1x1x128xf32>
    %162 = vector.shape_cast %161 : vector<1x1x128xf32> to vector<128xf32>
    %163 = vector.shape_cast %162 : vector<128xf32> to vector<1x1x1x128xf32>
    %164 = vector.broadcast %163 : vector<1x1x1x128xf32> to vector<2x4x8x128xf32>
    %165 = arith.mulf %160, %164 : vector<2x4x8x128xf32>
    %166 = arith.addf %159, %165 : vector<2x4x8x128xf32>
    %c0_23 = arith.constant 0 : index
    %c0_24 = arith.constant 0 : index
    %c0_25 = arith.constant 0 : index
    %c0_26 = arith.constant 0 : index
    %167 = vector.load %arg13[%c0_23, %c0_24, %c0_25, %c0_26] : memref<2x10x16x128xf32, #tpu.memory_space<vmem>>, vector<2x10x16x128xf32>
    %168 = vector.extract_strided_slice %167 {offsets = [0, 0, 0, 0], sizes = [2, 4, 8, 128], strides = [1, 1, 1, 1]} : vector<2x10x16x128xf32> to vector<2x4x8x128xf32>
    %169 = vector.extract_strided_slice %6 {offsets = [0, 3, 0], sizes = [1, 1, 128], strides = [1, 1, 1]} : vector<7x7x128xf32> to vector<1x1x128xf32>
    %170 = vector.shape_cast %169 : vector<1x1x128xf32> to vector<128xf32>
    %171 = vector.shape_cast %170 : vector<128xf32> to vector<1x1x1x128xf32>
    %172 = vector.broadcast %171 : vector<1x1x1x128xf32> to vector<2x4x8x128xf32>
    %173 = arith.mulf %168, %172 : vector<2x4x8x128xf32>
    %174 = arith.addf %166, %173 : vector<2x4x8x128xf32>
    %175 = vector.extract_strided_slice %167 {offsets = [0, 1, 0, 0], sizes = [2, 4, 8, 128], strides = [1, 1, 1, 1]} : vector<2x10x16x128xf32> to vector<2x4x8x128xf32>
    %176 = vector.extract_strided_slice %6 {offsets = [1, 3, 0], sizes = [1, 1, 128], strides = [1, 1, 1]} : vector<7x7x128xf32> to vector<1x1x128xf32>
    %177 = vector.shape_cast %176 : vector<1x1x128xf32> to vector<128xf32>
    %178 = vector.shape_cast %177 : vector<128xf32> to vector<1x1x1x128xf32>
    %179 = vector.broadcast %178 : vector<1x1x1x128xf32> to vector<2x4x8x128xf32>
    %180 = arith.mulf %175, %179 : vector<2x4x8x128xf32>
    %181 = arith.addf %174, %180 : vector<2x4x8x128xf32>
    %182 = vector.extract_strided_slice %167 {offsets = [0, 2, 0, 0], sizes = [2, 4, 8, 128], strides = [1, 1, 1, 1]} : vector<2x10x16x128xf32> to vector<2x4x8x128xf32>
    %183 = vector.extract_strided_slice %6 {offsets = [2, 3, 0], sizes = [1, 1, 128], strides = [1, 1, 1]} : vector<7x7x128xf32> to vector<1x1x128xf32>
    %184 = vector.shape_cast %183 : vector<1x1x128xf32> to vector<128xf32>
    %185 = vector.shape_cast %184 : vector<128xf32> to vector<1x1x1x128xf32>
    %186 = vector.broadcast %185 : vector<1x1x1x128xf32> to vector<2x4x8x128xf32>
    %187 = arith.mulf %182, %186 : vector<2x4x8x128xf32>
    %188 = arith.addf %181, %187 : vector<2x4x8x128xf32>
    %189 = vector.extract_strided_slice %167 {offsets = [0, 3, 0, 0], sizes = [2, 4, 8, 128], strides = [1, 1, 1, 1]} : vector<2x10x16x128xf32> to vector<2x4x8x128xf32>
    %190 = vector.extract_strided_slice %6 {offsets = [3, 3, 0], sizes = [1, 1, 128], strides = [1, 1, 1]} : vector<7x7x128xf32> to vector<1x1x128xf32>
    %191 = vector.shape_cast %190 : vector<1x1x128xf32> to vector<128xf32>
    %192 = vector.shape_cast %191 : vector<128xf32> to vector<1x1x1x128xf32>
    %193 = vector.broadcast %192 : vector<1x1x1x128xf32> to vector<2x4x8x128xf32>
    %194 = arith.mulf %189, %193 : vector<2x4x8x128xf32>
    %195 = arith.addf %188, %194 : vector<2x4x8x128xf32>
    %196 = vector.extract_strided_slice %167 {offsets = [0, 4, 0, 0], sizes = [2, 4, 8, 128], strides = [1, 1, 1, 1]} : vector<2x10x16x128xf32> to vector<2x4x8x128xf32>
    %197 = vector.extract_strided_slice %6 {offsets = [4, 3, 0], sizes = [1, 1, 128], strides = [1, 1, 1]} : vector<7x7x128xf32> to vector<1x1x128xf32>
    %198 = vector.shape_cast %197 : vector<1x1x128xf32> to vector<128xf32>
    %199 = vector.shape_cast %198 : vector<128xf32> to vector<1x1x1x128xf32>
    %200 = vector.broadcast %199 : vector<1x1x1x128xf32> to vector<2x4x8x128xf32>
    %201 = arith.mulf %196, %200 : vector<2x4x8x128xf32>
    %202 = arith.addf %195, %201 : vector<2x4x8x128xf32>
    %203 = vector.extract_strided_slice %167 {offsets = [0, 5, 0, 0], sizes = [2, 4, 8, 128], strides = [1, 1, 1, 1]} : vector<2x10x16x128xf32> to vector<2x4x8x128xf32>
    %204 = vector.extract_strided_slice %6 {offsets = [5, 3, 0], sizes = [1, 1, 128], strides = [1, 1, 1]} : vector<7x7x128xf32> to vector<1x1x128xf32>
    %205 = vector.shape_cast %204 : vector<1x1x128xf32> to vector<128xf32>
    %206 = vector.shape_cast %205 : vector<128xf32> to vector<1x1x1x128xf32>
    %207 = vector.broadcast %206 : vector<1x1x1x128xf32> to vector<2x4x8x128xf32>
    %208 = arith.mulf %203, %207 : vector<2x4x8x128xf32>
    %209 = arith.addf %202, %208 : vector<2x4x8x128xf32>
    %210 = vector.extract_strided_slice %167 {offsets = [0, 6, 0, 0], sizes = [2, 4, 8, 128], strides = [1, 1, 1, 1]} : vector<2x10x16x128xf32> to vector<2x4x8x128xf32>
    %211 = vector.extract_strided_slice %6 {offsets = [6, 3, 0], sizes = [1, 1, 128], strides = [1, 1, 1]} : vector<7x7x128xf32> to vector<1x1x128xf32>
    %212 = vector.shape_cast %211 : vector<1x1x128xf32> to vector<128xf32>
    %213 = vector.shape_cast %212 : vector<128xf32> to vector<1x1x1x128xf32>
    %214 = vector.broadcast %213 : vector<1x1x1x128xf32> to vector<2x4x8x128xf32>
    %215 = arith.mulf %210, %214 : vector<2x4x8x128xf32>
    %216 = arith.addf %209, %215 : vector<2x4x8x128xf32>
    %c0_27 = arith.constant 0 : index
    %c0_28 = arith.constant 0 : index
    %c0_29 = arith.constant 0 : index
    %c0_30 = arith.constant 0 : index
    %217 = vector.load %arg13[%c0_27, %c0_28, %c0_29, %c0_30] : memref<2x10x16x128xf32, #tpu.memory_space<vmem>>, vector<2x10x16x128xf32>
    %218 = vector.shape_cast %217 : vector<2x10x16x128xf32> to vector<20x16x128xf32>
    %c15_i32 = arith.constant 15 : i32
    %219 = tpu.dynamic_rotate %218 by %c15_i32 dim 1 : vector<20x16x128xf32>, i32 -> vector<20x16x128xf32>
    %220 = vector.shape_cast %219 : vector<20x16x128xf32> to vector<2x10x16x128xf32>
    %221 = vector.extract_strided_slice %220 {offsets = [0, 0, 0, 0], sizes = [2, 4, 8, 128], strides = [1, 1, 1, 1]} : vector<2x10x16x128xf32> to vector<2x4x8x128xf32>
    %222 = vector.extract_strided_slice %6 {offsets = [0, 4, 0], sizes = [1, 1, 128], strides = [1, 1, 1]} : vector<7x7x128xf32> to vector<1x1x128xf32>
    %223 = vector.shape_cast %222 : vector<1x1x128xf32> to vector<128xf32>
    %224 = vector.shape_cast %223 : vector<128xf32> to vector<1x1x1x128xf32>
    %225 = vector.broadcast %224 : vector<1x1x1x128xf32> to vector<2x4x8x128xf32>
    %226 = arith.mulf %221, %225 : vector<2x4x8x128xf32>
    %227 = arith.addf %216, %226 : vector<2x4x8x128xf32>
    %228 = vector.extract_strided_slice %220 {offsets = [0, 1, 0, 0], sizes = [2, 4, 8, 128], strides = [1, 1, 1, 1]} : vector<2x10x16x128xf32> to vector<2x4x8x128xf32>
    %229 = vector.extract_strided_slice %6 {offsets = [1, 4, 0], sizes = [1, 1, 128], strides = [1, 1, 1]} : vector<7x7x128xf32> to vector<1x1x128xf32>
    %230 = vector.shape_cast %229 : vector<1x1x128xf32> to vector<128xf32>
    %231 = vector.shape_cast %230 : vector<128xf32> to vector<1x1x1x128xf32>
    %232 = vector.broadcast %231 : vector<1x1x1x128xf32> to vector<2x4x8x128xf32>
    %233 = arith.mulf %228, %232 : vector<2x4x8x128xf32>
    %234 = arith.addf %227, %233 : vector<2x4x8x128xf32>
    %235 = vector.extract_strided_slice %220 {offsets = [0, 2, 0, 0], sizes = [2, 4, 8, 128], strides = [1, 1, 1, 1]} : vector<2x10x16x128xf32> to vector<2x4x8x128xf32>
    %236 = vector.extract_strided_slice %6 {offsets = [2, 4, 0], sizes = [1, 1, 128], strides = [1, 1, 1]} : vector<7x7x128xf32> to vector<1x1x128xf32>
    %237 = vector.shape_cast %236 : vector<1x1x128xf32> to vector<128xf32>
    %238 = vector.shape_cast %237 : vector<128xf32> to vector<1x1x1x128xf32>
    %239 = vector.broadcast %238 : vector<1x1x1x128xf32> to vector<2x4x8x128xf32>
    %240 = arith.mulf %235, %239 : vector<2x4x8x128xf32>
    %241 = arith.addf %234, %240 : vector<2x4x8x128xf32>
    %242 = vector.extract_strided_slice %220 {offsets = [0, 3, 0, 0], sizes = [2, 4, 8, 128], strides = [1, 1, 1, 1]} : vector<2x10x16x128xf32> to vector<2x4x8x128xf32>
    %243 = vector.extract_strided_slice %6 {offsets = [3, 4, 0], sizes = [1, 1, 128], strides = [1, 1, 1]} : vector<7x7x128xf32> to vector<1x1x128xf32>
    %244 = vector.shape_cast %243 : vector<1x1x128xf32> to vector<128xf32>
    %245 = vector.shape_cast %244 : vector<128xf32> to vector<1x1x1x128xf32>
    %246 = vector.broadcast %245 : vector<1x1x1x128xf32> to vector<2x4x8x128xf32>
    %247 = arith.mulf %242, %246 : vector<2x4x8x128xf32>
    %248 = arith.addf %241, %247 : vector<2x4x8x128xf32>
    %249 = vector.extract_strided_slice %220 {offsets = [0, 4, 0, 0], sizes = [2, 4, 8, 128], strides = [1, 1, 1, 1]} : vector<2x10x16x128xf32> to vector<2x4x8x128xf32>
    %250 = vector.extract_strided_slice %6 {offsets = [4, 4, 0], sizes = [1, 1, 128], strides = [1, 1, 1]} : vector<7x7x128xf32> to vector<1x1x128xf32>
    %251 = vector.shape_cast %250 : vector<1x1x128xf32> to vector<128xf32>
    %252 = vector.shape_cast %251 : vector<128xf32> to vector<1x1x1x128xf32>
    %253 = vector.broadcast %252 : vector<1x1x1x128xf32> to vector<2x4x8x128xf32>
    %254 = arith.mulf %249, %253 : vector<2x4x8x128xf32>
    %255 = arith.addf %248, %254 : vector<2x4x8x128xf32>
    %256 = vector.extract_strided_slice %220 {offsets = [0, 5, 0, 0], sizes = [2, 4, 8, 128], strides = [1, 1, 1, 1]} : vector<2x10x16x128xf32> to vector<2x4x8x128xf32>
    %257 = vector.extract_strided_slice %6 {offsets = [5, 4, 0], sizes = [1, 1, 128], strides = [1, 1, 1]} : vector<7x7x128xf32> to vector<1x1x128xf32>
    %258 = vector.shape_cast %257 : vector<1x1x128xf32> to vector<128xf32>
    %259 = vector.shape_cast %258 : vector<128xf32> to vector<1x1x1x128xf32>
    %260 = vector.broadcast %259 : vector<1x1x1x128xf32> to vector<2x4x8x128xf32>
    %261 = arith.mulf %256, %260 : vector<2x4x8x128xf32>
    %262 = arith.addf %255, %261 : vector<2x4x8x128xf32>
    %263 = vector.extract_strided_slice %220 {offsets = [0, 6, 0, 0], sizes = [2, 4, 8, 128], strides = [1, 1, 1, 1]} : vector<2x10x16x128xf32> to vector<2x4x8x128xf32>
    %264 = vector.extract_strided_slice %6 {offsets = [6, 4, 0], sizes = [1, 1, 128], strides = [1, 1, 1]} : vector<7x7x128xf32> to vector<1x1x128xf32>
    %265 = vector.shape_cast %264 : vector<1x1x128xf32> to vector<128xf32>
    %266 = vector.shape_cast %265 : vector<128xf32> to vector<1x1x1x128xf32>
    %267 = vector.broadcast %266 : vector<1x1x1x128xf32> to vector<2x4x8x128xf32>
    %268 = arith.mulf %263, %267 : vector<2x4x8x128xf32>
    %269 = arith.addf %262, %268 : vector<2x4x8x128xf32>
    %c0_31 = arith.constant 0 : index
    %c0_32 = arith.constant 0 : index
    %c0_33 = arith.constant 0 : index
    %c0_34 = arith.constant 0 : index
    %270 = vector.load %arg13[%c0_31, %c0_32, %c0_33, %c0_34] : memref<2x10x16x128xf32, #tpu.memory_space<vmem>>, vector<2x10x16x128xf32>
    %271 = vector.shape_cast %270 : vector<2x10x16x128xf32> to vector<20x16x128xf32>
    %c14_i32 = arith.constant 14 : i32
    %272 = tpu.dynamic_rotate %271 by %c14_i32 dim 1 : vector<20x16x128xf32>, i32 -> vector<20x16x128xf32>
    %273 = vector.shape_cast %272 : vector<20x16x128xf32> to vector<2x10x16x128xf32>
    %274 = vector.extract_strided_slice %273 {offsets = [0, 0, 0, 0], sizes = [2, 4, 8, 128], strides = [1, 1, 1, 1]} : vector<2x10x16x128xf32> to vector<2x4x8x128xf32>
    %275 = vector.extract_strided_slice %6 {offsets = [0, 5, 0], sizes = [1, 1, 128], strides = [1, 1, 1]} : vector<7x7x128xf32> to vector<1x1x128xf32>
    %276 = vector.shape_cast %275 : vector<1x1x128xf32> to vector<128xf32>
    %277 = vector.shape_cast %276 : vector<128xf32> to vector<1x1x1x128xf32>
    %278 = vector.broadcast %277 : vector<1x1x1x128xf32> to vector<2x4x8x128xf32>
    %279 = arith.mulf %274, %278 : vector<2x4x8x128xf32>
    %280 = arith.addf %269, %279 : vector<2x4x8x128xf32>
    %281 = vector.extract_strided_slice %273 {offsets = [0, 1, 0, 0], sizes = [2, 4, 8, 128], strides = [1, 1, 1, 1]} : vector<2x10x16x128xf32> to vector<2x4x8x128xf32>
    %282 = vector.extract_strided_slice %6 {offsets = [1, 5, 0], sizes = [1, 1, 128], strides = [1, 1, 1]} : vector<7x7x128xf32> to vector<1x1x128xf32>
    %283 = vector.shape_cast %282 : vector<1x1x128xf32> to vector<128xf32>
    %284 = vector.shape_cast %283 : vector<128xf32> to vector<1x1x1x128xf32>
    %285 = vector.broadcast %284 : vector<1x1x1x128xf32> to vector<2x4x8x128xf32>
    %286 = arith.mulf %281, %285 : vector<2x4x8x128xf32>
    %287 = arith.addf %280, %286 : vector<2x4x8x128xf32>
    %288 = vector.extract_strided_slice %273 {offsets = [0, 2, 0, 0], sizes = [2, 4, 8, 128], strides = [1, 1, 1, 1]} : vector<2x10x16x128xf32> to vector<2x4x8x128xf32>
    %289 = vector.extract_strided_slice %6 {offsets = [2, 5, 0], sizes = [1, 1, 128], strides = [1, 1, 1]} : vector<7x7x128xf32> to vector<1x1x128xf32>
    %290 = vector.shape_cast %289 : vector<1x1x128xf32> to vector<128xf32>
    %291 = vector.shape_cast %290 : vector<128xf32> to vector<1x1x1x128xf32>
    %292 = vector.broadcast %291 : vector<1x1x1x128xf32> to vector<2x4x8x128xf32>
    %293 = arith.mulf %288, %292 : vector<2x4x8x128xf32>
    %294 = arith.addf %287, %293 : vector<2x4x8x128xf32>
    %295 = vector.extract_strided_slice %273 {offsets = [0, 3, 0, 0], sizes = [2, 4, 8, 128], strides = [1, 1, 1, 1]} : vector<2x10x16x128xf32> to vector<2x4x8x128xf32>
    %296 = vector.extract_strided_slice %6 {offsets = [3, 5, 0], sizes = [1, 1, 128], strides = [1, 1, 1]} : vector<7x7x128xf32> to vector<1x1x128xf32>
    %297 = vector.shape_cast %296 : vector<1x1x128xf32> to vector<128xf32>
    %298 = vector.shape_cast %297 : vector<128xf32> to vector<1x1x1x128xf32>
    %299 = vector.broadcast %298 : vector<1x1x1x128xf32> to vector<2x4x8x128xf32>
    %300 = arith.mulf %295, %299 : vector<2x4x8x128xf32>
    %301 = arith.addf %294, %300 : vector<2x4x8x128xf32>
    %302 = vector.extract_strided_slice %273 {offsets = [0, 4, 0, 0], sizes = [2, 4, 8, 128], strides = [1, 1, 1, 1]} : vector<2x10x16x128xf32> to vector<2x4x8x128xf32>
    %303 = vector.extract_strided_slice %6 {offsets = [4, 5, 0], sizes = [1, 1, 128], strides = [1, 1, 1]} : vector<7x7x128xf32> to vector<1x1x128xf32>
    %304 = vector.shape_cast %303 : vector<1x1x128xf32> to vector<128xf32>
    %305 = vector.shape_cast %304 : vector<128xf32> to vector<1x1x1x128xf32>
    %306 = vector.broadcast %305 : vector<1x1x1x128xf32> to vector<2x4x8x128xf32>
    %307 = arith.mulf %302, %306 : vector<2x4x8x128xf32>
    %308 = arith.addf %301, %307 : vector<2x4x8x128xf32>
    %309 = vector.extract_strided_slice %273 {offsets = [0, 5, 0, 0], sizes = [2, 4, 8, 128], strides = [1, 1, 1, 1]} : vector<2x10x16x128xf32> to vector<2x4x8x128xf32>
    %310 = vector.extract_strided_slice %6 {offsets = [5, 5, 0], sizes = [1, 1, 128], strides = [1, 1, 1]} : vector<7x7x128xf32> to vector<1x1x128xf32>
    %311 = vector.shape_cast %310 : vector<1x1x128xf32> to vector<128xf32>
    %312 = vector.shape_cast %311 : vector<128xf32> to vector<1x1x1x128xf32>
    %313 = vector.broadcast %312 : vector<1x1x1x128xf32> to vector<2x4x8x128xf32>
    %314 = arith.mulf %309, %313 : vector<2x4x8x128xf32>
    %315 = arith.addf %308, %314 : vector<2x4x8x128xf32>
    %316 = vector.extract_strided_slice %273 {offsets = [0, 6, 0, 0], sizes = [2, 4, 8, 128], strides = [1, 1, 1, 1]} : vector<2x10x16x128xf32> to vector<2x4x8x128xf32>
    %317 = vector.extract_strided_slice %6 {offsets = [6, 5, 0], sizes = [1, 1, 128], strides = [1, 1, 1]} : vector<7x7x128xf32> to vector<1x1x128xf32>
    %318 = vector.shape_cast %317 : vector<1x1x128xf32> to vector<128xf32>
    %319 = vector.shape_cast %318 : vector<128xf32> to vector<1x1x1x128xf32>
    %320 = vector.broadcast %319 : vector<1x1x1x128xf32> to vector<2x4x8x128xf32>
    %321 = arith.mulf %316, %320 : vector<2x4x8x128xf32>
    %322 = arith.addf %315, %321 : vector<2x4x8x128xf32>
    %c0_35 = arith.constant 0 : index
    %c0_36 = arith.constant 0 : index
    %c0_37 = arith.constant 0 : index
    %c0_38 = arith.constant 0 : index
    %323 = vector.load %arg13[%c0_35, %c0_36, %c0_37, %c0_38] : memref<2x10x16x128xf32, #tpu.memory_space<vmem>>, vector<2x10x16x128xf32>
    %324 = vector.shape_cast %323 : vector<2x10x16x128xf32> to vector<20x16x128xf32>
    %c13_i32 = arith.constant 13 : i32
    %325 = tpu.dynamic_rotate %324 by %c13_i32 dim 1 : vector<20x16x128xf32>, i32 -> vector<20x16x128xf32>
    %326 = vector.shape_cast %325 : vector<20x16x128xf32> to vector<2x10x16x128xf32>
    %327 = vector.extract_strided_slice %326 {offsets = [0, 0, 0, 0], sizes = [2, 4, 8, 128], strides = [1, 1, 1, 1]} : vector<2x10x16x128xf32> to vector<2x4x8x128xf32>
    %328 = vector.extract_strided_slice %6 {offsets = [0, 6, 0], sizes = [1, 1, 128], strides = [1, 1, 1]} : vector<7x7x128xf32> to vector<1x1x128xf32>
    %329 = vector.shape_cast %328 : vector<1x1x128xf32> to vector<128xf32>
    %330 = vector.shape_cast %329 : vector<128xf32> to vector<1x1x1x128xf32>
    %331 = vector.broadcast %330 : vector<1x1x1x128xf32> to vector<2x4x8x128xf32>
    %332 = arith.mulf %327, %331 : vector<2x4x8x128xf32>
    %333 = arith.addf %322, %332 : vector<2x4x8x128xf32>
    %334 = vector.extract_strided_slice %326 {offsets = [0, 1, 0, 0], sizes = [2, 4, 8, 128], strides = [1, 1, 1, 1]} : vector<2x10x16x128xf32> to vector<2x4x8x128xf32>
    %335 = vector.extract_strided_slice %6 {offsets = [1, 6, 0], sizes = [1, 1, 128], strides = [1, 1, 1]} : vector<7x7x128xf32> to vector<1x1x128xf32>
    %336 = vector.shape_cast %335 : vector<1x1x128xf32> to vector<128xf32>
    %337 = vector.shape_cast %336 : vector<128xf32> to vector<1x1x1x128xf32>
    %338 = vector.broadcast %337 : vector<1x1x1x128xf32> to vector<2x4x8x128xf32>
    %339 = arith.mulf %334, %338 : vector<2x4x8x128xf32>
    %340 = arith.addf %333, %339 : vector<2x4x8x128xf32>
    %341 = vector.extract_strided_slice %326 {offsets = [0, 2, 0, 0], sizes = [2, 4, 8, 128], strides = [1, 1, 1, 1]} : vector<2x10x16x128xf32> to vector<2x4x8x128xf32>
    %342 = vector.extract_strided_slice %6 {offsets = [2, 6, 0], sizes = [1, 1, 128], strides = [1, 1, 1]} : vector<7x7x128xf32> to vector<1x1x128xf32>
    %343 = vector.shape_cast %342 : vector<1x1x128xf32> to vector<128xf32>
    %344 = vector.shape_cast %343 : vector<128xf32> to vector<1x1x1x128xf32>
    %345 = vector.broadcast %344 : vector<1x1x1x128xf32> to vector<2x4x8x128xf32>
    %346 = arith.mulf %341, %345 : vector<2x4x8x128xf32>
    %347 = arith.addf %340, %346 : vector<2x4x8x128xf32>
    %348 = vector.extract_strided_slice %326 {offsets = [0, 3, 0, 0], sizes = [2, 4, 8, 128], strides = [1, 1, 1, 1]} : vector<2x10x16x128xf32> to vector<2x4x8x128xf32>
    %349 = vector.extract_strided_slice %6 {offsets = [3, 6, 0], sizes = [1, 1, 128], strides = [1, 1, 1]} : vector<7x7x128xf32> to vector<1x1x128xf32>
    %350 = vector.shape_cast %349 : vector<1x1x128xf32> to vector<128xf32>
    %351 = vector.shape_cast %350 : vector<128xf32> to vector<1x1x1x128xf32>
    %352 = vector.broadcast %351 : vector<1x1x1x128xf32> to vector<2x4x8x128xf32>
    %353 = arith.mulf %348, %352 : vector<2x4x8x128xf32>
    %354 = arith.addf %347, %353 : vector<2x4x8x128xf32>
    %355 = vector.extract_strided_slice %326 {offsets = [0, 4, 0, 0], sizes = [2, 4, 8, 128], strides = [1, 1, 1, 1]} : vector<2x10x16x128xf32> to vector<2x4x8x128xf32>
    %356 = vector.extract_strided_slice %6 {offsets = [4, 6, 0], sizes = [1, 1, 128], strides = [1, 1, 1]} : vector<7x7x128xf32> to vector<1x1x128xf32>
    %357 = vector.shape_cast %356 : vector<1x1x128xf32> to vector<128xf32>
    %358 = vector.shape_cast %357 : vector<128xf32> to vector<1x1x1x128xf32>
    %359 = vector.broadcast %358 : vector<1x1x1x128xf32> to vector<2x4x8x128xf32>
    %360 = arith.mulf %355, %359 : vector<2x4x8x128xf32>
    %361 = arith.addf %354, %360 : vector<2x4x8x128xf32>
    %362 = vector.extract_strided_slice %326 {offsets = [0, 5, 0, 0], sizes = [2, 4, 8, 128], strides = [1, 1, 1, 1]} : vector<2x10x16x128xf32> to vector<2x4x8x128xf32>
    %363 = vector.extract_strided_slice %6 {offsets = [5, 6, 0], sizes = [1, 1, 128], strides = [1, 1, 1]} : vector<7x7x128xf32> to vector<1x1x128xf32>
    %364 = vector.shape_cast %363 : vector<1x1x128xf32> to vector<128xf32>
    %365 = vector.shape_cast %364 : vector<128xf32> to vector<1x1x1x128xf32>
    %366 = vector.broadcast %365 : vector<1x1x1x128xf32> to vector<2x4x8x128xf32>
    %367 = arith.mulf %362, %366 : vector<2x4x8x128xf32>
    %368 = arith.addf %361, %367 : vector<2x4x8x128xf32>
    %369 = vector.extract_strided_slice %326 {offsets = [0, 6, 0, 0], sizes = [2, 4, 8, 128], strides = [1, 1, 1, 1]} : vector<2x10x16x128xf32> to vector<2x4x8x128xf32>
    %370 = vector.extract_strided_slice %6 {offsets = [6, 6, 0], sizes = [1, 1, 128], strides = [1, 1, 1]} : vector<7x7x128xf32> to vector<1x1x128xf32>
    %371 = vector.shape_cast %370 : vector<1x1x128xf32> to vector<128xf32>
    %372 = vector.shape_cast %371 : vector<128xf32> to vector<1x1x1x128xf32>
    %373 = vector.broadcast %372 : vector<1x1x1x128xf32> to vector<2x4x8x128xf32>
    %374 = arith.mulf %369, %373 : vector<2x4x8x128xf32>
    %375 = arith.addf %368, %374 : vector<2x4x8x128xf32>
    %c0_39 = arith.constant 0 : index
    %c0_40 = arith.constant 0 : index
    %c0_41 = arith.constant 0 : index
    %376 = vector.load %arg4[%c0_39, %c0_40, %c0_41] : memref<1x1x128xf32, #tpu.memory_space<vmem>>, vector<1x1x128xf32>
    %377 = vector.shape_cast %376 : vector<1x1x128xf32> to vector<128xf32>
    %378 = vector.shape_cast %377 : vector<128xf32> to vector<1x1x1x128xf32>
    %379 = vector.broadcast %378 : vector<1x1x1x128xf32> to vector<2x4x8x128xf32>
    %380 = arith.addf %375, %379 : vector<2x4x8x128xf32>
    %381 = vector.shape_cast %380 : vector<2x4x8x128xf32> to vector<64x128xf32>
    %cst_42 = arith.constant dense<0.000000e+00> : vector<64xf32>
    %382 = vector.multi_reduction <add>, %381, %cst_42 [1] : vector<64x128xf32> to vector<64xf32>
    %383 = vector.shape_cast %382 : vector<64xf32> to vector<64x1xf32>
    %cst_43 = arith.constant 1.280000e+02 : f32
    %384 = vector.broadcast %cst_43 : f32 to vector<64x1xf32>
    %385 = arith.divf %383, %384 : vector<64x1xf32>
    %386 = vector.broadcast %385 : vector<64x1xf32> to vector<64x128xf32>
    %387 = arith.subf %381, %386 : vector<64x128xf32>
    %388 = arith.mulf %387, %387 : vector<64x128xf32>
    %cst_44 = arith.constant dense<0.000000e+00> : vector<64xf32>
    %389 = vector.multi_reduction <add>, %388, %cst_44 [1] : vector<64x128xf32> to vector<64xf32>
    %390 = vector.shape_cast %389 : vector<64xf32> to vector<64x1xf32>
    %cst_45 = arith.constant 1.280000e+02 : f32
    %391 = vector.broadcast %cst_45 : f32 to vector<64x1xf32>
    %392 = arith.divf %390, %391 : vector<64x1xf32>
    %393 = vector.broadcast %385 : vector<64x1xf32> to vector<64x128xf32>
    %394 = arith.subf %381, %393 : vector<64x128xf32>
    %cst_46 = arith.constant 9.99999997E-7 : f32
    %395 = vector.broadcast %cst_46 : f32 to vector<64x1xf32>
    %396 = arith.addf %392, %395 : vector<64x1xf32>
    %397 = math.rsqrt %396 : vector<64x1xf32>
    %398 = vector.broadcast %397 : vector<64x1xf32> to vector<64x128xf32>
    %399 = arith.mulf %394, %398 : vector<64x128xf32>
    %c0_47 = arith.constant 0 : index
    %c0_48 = arith.constant 0 : index
    %c0_49 = arith.constant 0 : index
    %400 = vector.load %arg5[%c0_47, %c0_48, %c0_49] : memref<1x1x128xf32, #tpu.memory_space<vmem>>, vector<1x1x128xf32>
    %401 = vector.shape_cast %400 : vector<1x1x128xf32> to vector<128xf32>
    %402 = vector.shape_cast %401 : vector<128xf32> to vector<1x128xf32>
    %403 = vector.broadcast %402 : vector<1x128xf32> to vector<64x128xf32>
    %404 = arith.mulf %399, %403 : vector<64x128xf32>
    %c0_50 = arith.constant 0 : index
    %c0_51 = arith.constant 0 : index
    %c0_52 = arith.constant 0 : index
    %405 = vector.load %arg6[%c0_50, %c0_51, %c0_52] : memref<1x1x128xf32, #tpu.memory_space<vmem>>, vector<1x1x128xf32>
    %406 = vector.shape_cast %405 : vector<1x1x128xf32> to vector<128xf32>
    %407 = vector.shape_cast %406 : vector<128xf32> to vector<1x128xf32>
    %408 = vector.broadcast %407 : vector<1x128xf32> to vector<64x128xf32>
    %409 = arith.addf %404, %408 : vector<64x128xf32>
    %410 = arith.truncf %409 : vector<64x128xf32> to vector<64x128xbf16>
    %c0_53 = arith.constant 0 : index
    %c0_54 = arith.constant 0 : index
    %c0_55 = arith.constant 0 : index
    %411 = vector.load %arg7[%c0_53, %c0_54, %c0_55] : memref<1x128x512xbf16, #tpu.memory_space<vmem>>, vector<1x128x512xbf16>
    %412 = vector.shape_cast %411 : vector<1x128x512xbf16> to vector<128x512xbf16>
    %cst_56 = arith.constant dense<0.000000e+00> : vector<64x512xf32>
    %413 = tpu.matmul %410, %412, %cst_56 {dimension_numbers = #tpu.dot_dimension_numbers<[1], [0], [0], [1], [0, 0, 1, 1], [], []>} : vector<64x128xbf16>, vector<128x512xbf16>, vector<64x512xf32> -> vector<64x512xf32>
    %c0_57 = arith.constant 0 : index
    %c0_58 = arith.constant 0 : index
    %c0_59 = arith.constant 0 : index
    %414 = vector.load %arg8[%c0_57, %c0_58, %c0_59] : memref<1x1x512xf32, #tpu.memory_space<vmem>>, vector<1x1x512xf32>
    %415 = vector.shape_cast %414 : vector<1x1x512xf32> to vector<512xf32>
    %416 = vector.shape_cast %415 : vector<512xf32> to vector<1x512xf32>
    %417 = vector.broadcast %416 : vector<1x512xf32> to vector<64x512xf32>
    %418 = arith.addf %413, %417 : vector<64x512xf32>
    %cst_60 = arith.constant 5.000000e-01 : f32
    %419 = vector.broadcast %cst_60 : f32 to vector<64x512xf32>
    %420 = arith.mulf %419, %418 : vector<64x512xf32>
    %cst_61 = arith.constant 0.707106769 : f32
    %421 = vector.broadcast %cst_61 : f32 to vector<64x512xf32>
    %422 = arith.mulf %418, %421 : vector<64x512xf32>
    %423 = math.erf %422 : vector<64x512xf32>
    %cst_62 = arith.constant 1.000000e+00 : f32
    %424 = vector.broadcast %cst_62 : f32 to vector<64x512xf32>
    %425 = arith.addf %424, %423 : vector<64x512xf32>
    %426 = arith.mulf %420, %425 : vector<64x512xf32>
    %427 = arith.truncf %426 : vector<64x512xf32> to vector<64x512xbf16>
    %c0_63 = arith.constant 0 : index
    %c0_64 = arith.constant 0 : index
    %c0_65 = arith.constant 0 : index
    %428 = vector.load %arg9[%c0_63, %c0_64, %c0_65] : memref<1x512x128xbf16, #tpu.memory_space<vmem>>, vector<1x512x128xbf16>
    %429 = vector.shape_cast %428 : vector<1x512x128xbf16> to vector<512x128xbf16>
    %cst_66 = arith.constant dense<0.000000e+00> : vector<64x128xf32>
    %430 = tpu.matmul %427, %429, %cst_66 {dimension_numbers = #tpu.dot_dimension_numbers<[1], [0], [0], [1], [0, 0, 1, 1], [], []>} : vector<64x512xbf16>, vector<512x128xbf16>, vector<64x128xf32> -> vector<64x128xf32>
    %c0_67 = arith.constant 0 : index
    %c0_68 = arith.constant 0 : index
    %c0_69 = arith.constant 0 : index
    %431 = vector.load %arg10[%c0_67, %c0_68, %c0_69] : memref<1x1x128xf32, #tpu.memory_space<vmem>>, vector<1x1x128xf32>
    %432 = vector.shape_cast %431 : vector<1x1x128xf32> to vector<128xf32>
    %433 = vector.shape_cast %432 : vector<128xf32> to vector<1x128xf32>
    %434 = vector.broadcast %433 : vector<1x128xf32> to vector<64x128xf32>
    %435 = arith.addf %430, %434 : vector<64x128xf32>
    %436 = vector.shape_cast %435 : vector<64x128xf32> to vector<2x4x8x128xf32>
    %437 = tpu.iota {dimensions = array<i32: 0>} : vector<8x128xi32>
    %c4_i32 = arith.constant 4 : i32
    %438 = vector.broadcast %c4_i32 : i32 to vector<8x128xi32>
    %439 = arith.cmpi slt, %437, %438 : vector<8x128xi32>
    %440 = arith.extui %439 : vector<8x128xi1> to vector<8x128xi32>
    %441 = arith.sitofp %440 : vector<8x128xi32> to vector<8x128xf32>
    %442 = vector.shape_cast %441 : vector<8x128xf32> to vector<1x1x8x128xf32>
    %443 = vector.broadcast %442 : vector<1x1x8x128xf32> to vector<2x4x8x128xf32>
    %444 = arith.mulf %436, %443 : vector<2x4x8x128xf32>
    %c0_70 = arith.constant 0 : index
    %c0_71 = arith.constant 0 : index
    %c0_72 = arith.constant 0 : index
    %c0_73 = arith.constant 0 : index
    %445 = vector.load %arg12[%c0_70, %c0_71, %c0_72, %c0_73] : memref<2x4x8x128xf32, #tpu.memory_space<vmem>>, vector<2x4x8x128xf32>
    %446 = arith.addf %445, %444 : vector<2x4x8x128xf32>
    %c0_74 = arith.constant 0 : index
    %c0_75 = arith.constant 0 : index
    %c0_76 = arith.constant 0 : index
    %c0_77 = arith.constant 0 : index
    %447 = vector.load %arg12[%c0_74, %c0_75, %c0_76, %c0_77] : memref<2x4x8x128xf32, #tpu.memory_space<vmem>>, vector<2x4x8x128xf32>
    tpu.vector_store %arg12[%c0_74, %c0_75, %c0_76, %c0_77], %446 {strides = array<i32>} : memref<2x4x8x128xf32, #tpu.memory_space<vmem>>, vector<2x4x8x128xf32>,
    %c1_i32_78 = arith.constant 1 : i32
    %448 = arith.cmpi eq, %arg1, %c1_i32_78 : i32
    %449 = arith.extui %448 : i1 to i32
    %c0_i32_79 = arith.constant 0 : i32
    %450 = arith.cmpi ne, %449, %c0_i32_79 : i32
    scf.if %450 {
      %c0_80 = arith.constant 0 : index
      %c0_81 = arith.constant 0 : index
      %c0_82 = arith.constant 0 : index
      %c0_83 = arith.constant 0 : index
      %451 = vector.load %arg12[%c0_80, %c0_81, %c0_82, %c0_83] : memref<2x4x8x128xf32, #tpu.memory_space<vmem>>, vector<2x4x8x128xf32>
      %cst_84 = arith.constant dense<0.000000e+00> : vector<2x128xf32>
      %452 = vector.multi_reduction <add>, %451, %cst_84 [1, 2] : vector<2x4x8x128xf32> to vector<2x128xf32>
      %cst_85 = arith.constant 6.250000e-02 : f32
      %453 = vector.broadcast %cst_85 : f32 to vector<2x128xf32>
      %454 = arith.mulf %452, %453 : vector<2x128xf32>
      %455 = vector.shape_cast %454 : vector<2x128xf32> to vector<2x1x128xf32>
      %c0_86 = arith.constant 0 : index
      %c0_87 = arith.constant 0 : index
      %c0_88 = arith.constant 0 : index
      %456 = vector.load %arg11[%c0_86, %c0_87, %c0_88] : memref<2x1x128xf32, #tpu.memory_space<vmem>>, vector<2x1x128xf32>
      tpu.vector_store %arg11[%c0_86, %c0_87, %c0_88], %455 {strides = array<i32>} : memref<2x1x128xf32, #tpu.memory_space<vmem>>, vector<2x1x128xf32>,
    } else {
    }
    return
  }
  func.func @transform_0(%arg0: i32, %arg1: i32) -> (i32, i32, i32, i32) {
    %c0_i32 = arith.constant 0 : i32
    %c0_i32_0 = arith.constant 0 : i32
    %c0_i32_1 = arith.constant 0 : i32
    %c0_i32_2 = arith.constant 0 : i32
    return %arg0, %c0_i32, %c0_i32_0, %c0_i32_1 : i32, i32, i32, i32
  }
  func.func @transform_1(%arg0: i32, %arg1: i32) -> (i32, i32, i32, i32) {
    %c0_i32 = arith.constant 0 : i32
    %c0_i32_0 = arith.constant 0 : i32
    %c0_i32_1 = arith.constant 0 : i32
    %c0_i32_2 = arith.constant 0 : i32
    return %arg1, %c0_i32, %c0_i32_0, %c0_i32_1 : i32, i32, i32, i32
  }
  func.func @transform_2(%arg0: i32, %arg1: i32) -> (i32, i32, i32) {
    %c0_i32 = arith.constant 0 : i32
    %c0_i32_0 = arith.constant 0 : i32
    %c0_i32_1 = arith.constant 0 : i32
    return %arg1, %c0_i32, %c0_i32_0 : i32, i32, i32
  }
  func.func @transform_3(%arg0: i32, %arg1: i32) -> (i32, i32, i32) {
    %c0_i32 = arith.constant 0 : i32
    %c0_i32_0 = arith.constant 0 : i32
    %c0_i32_1 = arith.constant 0 : i32
    return %arg1, %c0_i32, %c0_i32_0 : i32, i32, i32
  }
  func.func @transform_4(%arg0: i32, %arg1: i32) -> (i32, i32, i32) {
    %c0_i32 = arith.constant 0 : i32
    %c0_i32_0 = arith.constant 0 : i32
    %c0_i32_1 = arith.constant 0 : i32
    return %arg1, %c0_i32, %c0_i32_0 : i32, i32, i32
  }
  func.func @transform_5(%arg0: i32, %arg1: i32) -> (i32, i32, i32) {
    %c0_i32 = arith.constant 0 : i32
    %c0_i32_0 = arith.constant 0 : i32
    %c0_i32_1 = arith.constant 0 : i32
    return %arg1, %c0_i32, %c0_i32_0 : i32, i32, i32
  }
  func.func @transform_6(%arg0: i32, %arg1: i32) -> (i32, i32, i32) {
    %c0_i32 = arith.constant 0 : i32
    %c0_i32_0 = arith.constant 0 : i32
    %c0_i32_1 = arith.constant 0 : i32
    return %arg1, %c0_i32, %c0_i32_0 : i32, i32, i32
  }
  func.func @transform_7(%arg0: i32, %arg1: i32) -> (i32, i32, i32) {
    %c0_i32 = arith.constant 0 : i32
    %c0_i32_0 = arith.constant 0 : i32
    %c0_i32_1 = arith.constant 0 : i32
    return %arg1, %c0_i32, %c0_i32_0 : i32, i32, i32
  }
  func.func @transform_8(%arg0: i32, %arg1: i32) -> (i32, i32, i32) {
    %c0_i32 = arith.constant 0 : i32
    %c0_i32_0 = arith.constant 0 : i32
    %c0_i32_1 = arith.constant 0 : i32
    return %arg1, %c0_i32, %c0_i32_0 : i32, i32, i32
  }
  func.func @transform_9(%arg0: i32, %arg1: i32) -> (i32, i32, i32) {
    %c0_i32 = arith.constant 0 : i32
    %c0_i32_0 = arith.constant 0 : i32
    %c0_i32_1 = arith.constant 0 : i32
    return %arg0, %c0_i32, %c0_i32_0 : i32, i32, i32
  }
}

module attributes {stable_mosaic.version = 11 : i64} {
  func.func @_head_kernel(%arg0: memref<2x128xf32, #tpu.memory_space<vmem>>, %arg1: memref<1x128xf32, #tpu.memory_space<vmem>>, %arg2: memref<1x128xf32, #tpu.memory_space<vmem>>, %arg3: memref<128x128xf32, #tpu.memory_space<vmem>>, %arg4: memref<1x128xf32, #tpu.memory_space<vmem>>, %arg5: memref<2x128xf32, #tpu.memory_space<vmem>>) attributes {dimension_semantics = [], scalar_prefetch = 0 : i64, scratch_operands = 0 : i64, tpu.core_type = #tpu.core_type<tc>} {
    %c0 = arith.constant 0 : index
    %c0_0 = arith.constant 0 : index
    %0 = vector.load %arg0[%c0, %c0_0] : memref<2x128xf32, #tpu.memory_space<vmem>>, vector<2x128xf32>
    %cst = arith.constant dense<0.000000e+00> : vector<2xf32>
    %1 = vector.multi_reduction <add>, %0, %cst [1] : vector<2x128xf32> to vector<2xf32>
    %2 = vector.shape_cast %1 : vector<2xf32> to vector<2x1xf32>
    %cst_1 = arith.constant 1.280000e+02 : f32
    %3 = vector.broadcast %cst_1 : f32 to vector<2x1xf32>
    %4 = arith.divf %2, %3 : vector<2x1xf32>
    %5 = vector.broadcast %4 : vector<2x1xf32> to vector<2x128xf32>
    %6 = arith.subf %0, %5 : vector<2x128xf32>
    %7 = arith.mulf %6, %6 : vector<2x128xf32>
    %cst_2 = arith.constant dense<0.000000e+00> : vector<2xf32>
    %8 = vector.multi_reduction <add>, %7, %cst_2 [1] : vector<2x128xf32> to vector<2xf32>
    %9 = vector.shape_cast %8 : vector<2xf32> to vector<2x1xf32>
    %cst_3 = arith.constant 1.280000e+02 : f32
    %10 = vector.broadcast %cst_3 : f32 to vector<2x1xf32>
    %11 = arith.divf %9, %10 : vector<2x1xf32>
    %12 = vector.broadcast %4 : vector<2x1xf32> to vector<2x128xf32>
    %13 = arith.subf %0, %12 : vector<2x128xf32>
    %cst_4 = arith.constant 9.99999997E-7 : f32
    %14 = vector.broadcast %cst_4 : f32 to vector<2x1xf32>
    %15 = arith.addf %11, %14 : vector<2x1xf32>
    %16 = math.rsqrt %15 : vector<2x1xf32>
    %17 = vector.broadcast %16 : vector<2x1xf32> to vector<2x128xf32>
    %18 = arith.mulf %13, %17 : vector<2x128xf32>
    %c0_5 = arith.constant 0 : index
    %c0_6 = arith.constant 0 : index
    %19 = vector.load %arg1[%c0_5, %c0_6] : memref<1x128xf32, #tpu.memory_space<vmem>>, vector<1x128xf32>
    %20 = vector.shape_cast %19 : vector<1x128xf32> to vector<128xf32>
    %21 = vector.shape_cast %20 : vector<128xf32> to vector<1x128xf32>
    %22 = vector.broadcast %21 : vector<1x128xf32> to vector<2x128xf32>
    %23 = arith.mulf %18, %22 : vector<2x128xf32>
    %c0_7 = arith.constant 0 : index
    %c0_8 = arith.constant 0 : index
    %24 = vector.load %arg2[%c0_7, %c0_8] : memref<1x128xf32, #tpu.memory_space<vmem>>, vector<1x128xf32>
    %25 = vector.shape_cast %24 : vector<1x128xf32> to vector<128xf32>
    %26 = vector.shape_cast %25 : vector<128xf32> to vector<1x128xf32>
    %27 = vector.broadcast %26 : vector<1x128xf32> to vector<2x128xf32>
    %28 = arith.addf %23, %27 : vector<2x128xf32>
    %c0_9 = arith.constant 0 : index
    %c0_10 = arith.constant 0 : index
    %29 = vector.load %arg3[%c0_9, %c0_10] : memref<128x128xf32, #tpu.memory_space<vmem>>, vector<128x128xf32>
    %cst_11 = arith.constant dense<0.000000e+00> : vector<2x128xf32>
    %30 = tpu.matmul %28, %29, %cst_11 {dimension_numbers = #tpu.dot_dimension_numbers<[1], [0], [0], [1], [0, 0, 1, 1], [], []>} : vector<2x128xf32>, vector<128x128xf32>, vector<2x128xf32> -> vector<2x128xf32>
    %c0_12 = arith.constant 0 : index
    %c0_13 = arith.constant 0 : index
    %31 = vector.load %arg4[%c0_12, %c0_13] : memref<1x128xf32, #tpu.memory_space<vmem>>, vector<1x128xf32>
    %32 = vector.shape_cast %31 : vector<1x128xf32> to vector<128xf32>
    %33 = vector.shape_cast %32 : vector<128xf32> to vector<1x128xf32>
    %34 = vector.broadcast %33 : vector<1x128xf32> to vector<2x128xf32>
    %35 = arith.addf %30, %34 : vector<2x128xf32>
    %c0_14 = arith.constant 0 : index
    %c0_15 = arith.constant 0 : index
    %36 = vector.load %arg5[%c0_14, %c0_15] : memref<2x128xf32, #tpu.memory_space<vmem>>, vector<2x128xf32>
    tpu.vector_store %arg5[%c0_14, %c0_15], %35 {strides = array<i32>} : memref<2x128xf32, #tpu.memory_space<vmem>>, vector<2x128xf32>,
    return
  }
}

</mosaic_0001>

<bundles_post_ra>
// kernel: convnext_isotropic_forward.3
= control target key start
LH: loop header
LB: loop body
LE: loop exit
PB: predicated region body
PF: predicated region fallthrough
CT: control target
= control target key end

     0   :  { %s1164_s1 = inlined_call_operand.vmem [shape: bf16[768,128], index: 1, kind: input, shape index: {}]   ;;  %s1165_s2 = inlined_call_operand.vmem [shape: f32[1,128], index: 2, kind: input, shape index: {}]   ;;  %s1166_s0 = inlined_call_operand.vmem [shape: bf16[32,768], index: 0, kind: input, shape index: {}]   ;;  %s1167_s3 = inlined_call_operand.vmem [shape: f32[32,128], index: 3, kind: output, shape index: {}]  }
   0x1   :  { %v855_v0 = vld [vmem:[%s1164_s1 + $0x38] sm:$0xff]  ;;  %v854_v4 = vld [vmem:[%s1164_s1 + $0x30] sm:$0xff]  ;;  %v853_v8 = vld [vmem:[%s1164_s1 + $0x28] sm:$0xff] }
   0x2   :  { %v863_v1 = vld [vmem:[%s1164_s1 + $0x78] sm:$0xff]  ;;  %474 = vmatpush.bf16.msra.mxu0 %v855_v0  ;;  %v862_v5 = vld [vmem:[%s1164_s1 + $0x70] sm:$0xff]  ;;  %v861_v9 = vld [vmem:[%s1164_s1 + $0x68] sm:$0xff] }
   0x3   :  { %v871_v2 = vld [vmem:[%s1164_s1 + $0xb8] sm:$0xff]  ;;  %493 = vmatpush.bf16.msra.mxu1 %v863_v1  ;;  %v870_v6 = vld [vmem:[%s1164_s1 + $0xb0] sm:$0xff]  ;;  %v869_v10 = vld [vmem:[%s1164_s1 + $0xa8] sm:$0xff] }
   0x4   :  { %v879_v3 = vld [vmem:[%s1164_s1 + $0xf8] sm:$0xff]  ;;  %512 = vmatpush.bf16.msra.mxu2 %v871_v2  ;;  %v878_v7 = vld [vmem:[%s1164_s1 + $0xf0] sm:$0xff]  ;;  %v877_v11 = vld [vmem:[%s1164_s1 + $0xe8] sm:$0xff] }
   0x5   :  { %531 = vmatpush.bf16.msra.mxu3 %v879_v3  ;;  %v852_v12 = vld [vmem:[%s1164_s1 + $0x20] sm:$0xff]  ;;  %v851_v16 = vld [vmem:[%s1164_s1 + $0x18] sm:$0xff]  ;;  %v850_v20 = vld [vmem:[%s1164_s1 + $0x10] sm:$0xff] }
   0x6   :  { %475 = vmatpush.bf16.msra.mxu0 %v854_v4  ;;  %v860_v13 = vld [vmem:[%s1164_s1 + $0x60] sm:$0xff]  ;;  %v859_v17 = vld [vmem:[%s1164_s1 + $0x58] sm:$0xff]  ;;  %v858_v21 = vld [vmem:[%s1164_s1 + $0x50] sm:$0xff] }
   0x7   :  { %494 = vmatpush.bf16.msra.mxu1 %v862_v5  ;;  %v868_v14 = vld [vmem:[%s1164_s1 + $0xa0] sm:$0xff]  ;;  %v867_v18 = vld [vmem:[%s1164_s1 + $0x98] sm:$0xff]  ;;  %v866_v22 = vld [vmem:[%s1164_s1 + $0x90] sm:$0xff] }
   0x8   :  { %513 = vmatpush.bf16.msra.mxu2 %v870_v6  ;;  %v876_v15 = vld [vmem:[%s1164_s1 + $0xe0] sm:$0xff]  ;;  %v875_v19 = vld [vmem:[%s1164_s1 + $0xd8] sm:$0xff]  ;;  %v874_v23 = vld [vmem:[%s1164_s1 + $0xd0] sm:$0xff] }
   0x9   :  { %532 = vmatpush.bf16.msra.mxu3 %v878_v7  ;;  %v849_v24 = vld [vmem:[%s1164_s1 + $0x8] sm:$0xff]  ;;  %v848_v28 = vld [vmem:[%s1164_s1] sm:$0xff]  ;;  %v839_v33 = vld [vmem:[%s1166_s0 + $0x14] sm:$0xf0] }
   0xa   :  { %476 = vmatpush.bf16.msra.mxu0 %v853_v8  ;;  %v857_v25 = vld [vmem:[%s1164_s1 + $0x48] sm:$0xff]  ;;  %v856_v29 = vld [vmem:[%s1164_s1 + $0x40] sm:$0xff]  ;;  %v600_v35 = vld [vmem:[%s1166_s0 + $0x18] sm:$0xf0] }
   0xb   :  { %495 = vmatpush.bf16.msra.mxu1 %v861_v9  ;;  %v865_v26 = vld [vmem:[%s1164_s1 + $0x88] sm:$0xff]  ;;  %v864_v30 = vld [vmem:[%s1164_s1 + $0x80] sm:$0xff]  ;;  %v887_v40 = vld [vmem:[%s1164_s1 + $0x138] sm:$0xff] }
   0xc   :  { %514 = vmatpush.bf16.msra.mxu2 %v869_v10  ;;  %v873_v27 = vld [vmem:[%s1164_s1 + $0xc8] sm:$0xff]  ;;  %v872_v31 = vld [vmem:[%s1164_s1 + $0xc0] sm:$0xff]  ;;  %v895_v45 = vld [vmem:[%s1164_s1 + $0x178] sm:$0xff] }
   0xd   :  { %533 = vmatpush.bf16.msra.mxu3 %v877_v11  ;;  %v598_v32 = vld [vmem:[%s1166_s0] sm:$0xf]  ;;  %v836_v34 = vld [vmem:[%s1166_s0 + $0x4] sm:$0xf]  ;;  %v606_v36 = vld [vmem:[%s1166_s0 + $0x8] sm:$0xf] }
   0xe   :  { %477 = vmatpush.bf16.msra.mxu0 %v852_v12  ;;  %v840_v37 = vld [vmem:[%s1166_s0 + $0x1c] sm:$0xf0]  ;;  %v837_v38 = vld [vmem:[%s1166_s0 + $0xc] sm:$0xf]  ;;  %v608_v39 = vld [vmem:[%s1166_s0 + $0x20] sm:$0xf0]  ;;  %v599_v41 = vor.u32 %v839_v33, %v598_v32  ;;  %v603_v42 = vor.u32 %v836_v34, %v600_v35 }
   0xf   :  { %496 = vmatpush.bf16.msra.mxu1 %v860_v13  ;;  %v607_v43 = vor.u32 %v840_v37, %v606_v36  ;;  %v611_v44 = vor.u32 %v837_v38, %v608_v39  ;;  %v886_v46 = vld [vmem:[%s1164_s1 + $0x130] sm:$0xff]  ;;  %v885_v48 = vld [vmem:[%s1164_s1 + $0x128] sm:$0xff]  ;;  %v884_v50 = vld [vmem:[%s1164_s1 + $0x120] sm:$0xff] }
  0x10   :  { %515 = vmatpush.bf16.msra.mxu2 %v868_v14  ;;  %v894_v47 = vld [vmem:[%s1164_s1 + $0x170] sm:$0xff]  ;;  %v893_v49 = vld [vmem:[%s1164_s1 + $0x168] sm:$0xff]  ;;  %v892_v51 = vld [vmem:[%s1164_s1 + $0x160] sm:$0xff] }
  0x11   :  { %534 = vmatpush.bf16.msra.mxu3 %v876_v15  ;;  %v622_v52 = vld [vmem:[%s1166_s0 + $0x30] sm:$0xf]  ;;  %v845_v53 = vld [vmem:[%s1166_s0 + $0x44] sm:$0xf0]  ;;  %v842_v54 = vld [vmem:[%s1166_s0 + $0x34] sm:$0xf] }
  0x12   :  { %478 = vmatpush.bf16.msra.mxu0 %v851_v16  ;;  %v624_v55 = vld [vmem:[%s1166_s0 + $0x48] sm:$0xf0]  ;;  %v630_v56 = vld [vmem:[%s1166_s0 + $0x38] sm:$0xf]  ;;  %v846_v57 = vld [vmem:[%s1166_s0 + $0x4c] sm:$0xf0]  ;;  %v623_v61 = vor.u32 %v845_v53, %v622_v52 }
  0x13   :  { %497 = vmatpush.bf16.msra.mxu1 %v859_v17  ;;  %v843_v58 = vld [vmem:[%s1166_s0 + $0x3c] sm:$0xf]  ;;  %v632_v59 = vld [vmem:[%s1166_s0 + $0x50] sm:$0xf0]  ;;  %v627_v62 = vor.u32 %v842_v54, %v624_v55  ;;  %v631_v63 = vor.u32 %v846_v57, %v630_v56  ;;  %v881_v4 = vld [vmem:[%s1164_s1 + $0x108] sm:$0xff] }
  0x14   :  { %516 = vmatpush.bf16.msra.mxu2 %v867_v18  ;;  %v883_v60 = vld [vmem:[%s1164_s1 + $0x118] sm:$0xff]  ;;  %v635_v0 = vor.u32 %v843_v58, %v632_v59  ;;  %v882_v2 = vld [vmem:[%s1164_s1 + $0x110] sm:$0xff]  ;;  %v889_v5 = vld [vmem:[%s1164_s1 + $0x148] sm:$0xff] }
  0x15   :  { %535 = vmatpush.bf16.msra.mxu3 %v875_v19  ;;  %v891_v1 = vld [vmem:[%s1164_s1 + $0x158] sm:$0xff]  ;;  %v890_v3 = vld [vmem:[%s1164_s1 + $0x150] sm:$0xff]  ;;  %v880_v6 = vld [vmem:[%s1164_s1 + $0x100] sm:$0xff] }
  0x16   :  { %479 = vmatpush.bf16.msra.mxu0 %v850_v20  ;;  %v888_v7 = vld [vmem:[%s1164_s1 + $0x140] sm:$0xff]  ;;  %v614_v8 = vld [vmem:[%s1166_s0 + $0x10] sm:$0xf]  ;;  %v841_v9 = vld [vmem:[%s1166_s0 + $0x24] sm:$0xf0] }
  0x17   :  { %498 = vmatpush.bf16.msra.mxu1 %v858_v21  ;;  %v638_v10 = vld [vmem:[%s1166_s0 + $0x40] sm:$0xf]  ;;  %v847_v11 = vld [vmem:[%s1166_s0 + $0x54] sm:$0xf0]  ;;  %v838_v12 = vld [vmem:[%s1166_s0 + $0x14] sm:$0xf]  ;;  %v615_v16 = vor.u32 %v841_v9, %v614_v8 }
  0x18   :  { %517 = vmatpush.bf16.msra.mxu2 %v866_v22  ;;  %v616_v13 = vld [vmem:[%s1166_s0 + $0x28] sm:$0xf0]  ;;  %v844_v14 = vld [vmem:[%s1166_s0 + $0x44] sm:$0xf]  ;;  %v640_v15 = vld [vmem:[%s1166_s0 + $0x58] sm:$0xf0]  ;;  %v639_v17 = vor.u32 %v847_v11, %v638_v10 }
  0x19   :  { %536 = vmatpush.bf16.msra.mxu3 %v874_v23  ;;  %v619_v18 = vor.u32 %v838_v12, %v616_v13  ;;  %v643_v19 = vor.u32 %v844_v14, %v640_v15 }
  0x1a   :  { %480 = vmatpush.bf16.msra.mxu0 %v849_v24 }
  0x1b   :  { %499 = vmatpush.bf16.msra.mxu1 %v857_v25 }
  0x1c   :  { %518 = vmatpush.bf16.msra.mxu2 %v865_v26  ;;  %v912_v26 = vld [vmem:[%s1165_s2] ss:$0 sm:$0xff] }
  0x1d   :  { %537 = vmatpush.bf16.msra.mxu3 %v873_v27 }
  0x1e   :  { %481 = vmatpush.bf16.msra.mxu0 %v848_v28 }
  0x1f   :  { %500 = vmatpush.bf16.msra.mxu1 %v856_v29 }
  0x20   :  { %519 = vmatpush.bf16.msra.mxu2 %v864_v30 }
  0x21   :  { %538 = vmatpush.bf16.msra.mxu3 %v872_v31  ;;  %482 = vmatmul.bf16.vlgmr.msra.gmra.mxu0 %v599_v41 }
  0x22   :  { %550 = vmatpush.bf16.msrb.mxu0 %v887_v40  ;;  %501 = vmatmul.bf16.vlgmr.msra.gmra.mxu1 %v603_v42 }
  0x23   :  { %520 = vmatmul.bf16.vlgmr.msra.gmra.mxu2 %v607_v43  ;;  %569 = vmatpush.bf16.msrb.mxu1 %v895_v45 }
  0x24   :  { %896 = vmatpush.bf16.msrb.mxu2 %v887_v40  ;;  %539 = vmatmul.bf16.vlgmr.msra.gmra.mxu3 %v611_v44 }
  0x25   :  { %904 = vmatpush.bf16.msrb.mxu3 %v895_v45 }
  0x26   :  { %551 = vmatpush.bf16.msrb.mxu0 %v886_v46 }
  0x27   :  { %570 = vmatpush.bf16.msrb.mxu1 %v894_v47 }
  0x28   :  { %897 = vmatpush.bf16.msrb.mxu2 %v886_v46 }
  0x29   :  { %905 = vmatpush.bf16.msrb.mxu3 %v894_v47 }
  0x2a   :  { %552 = vmatpush.bf16.msrb.mxu0 %v885_v48 }
  0x2b   :  { %571 = vmatpush.bf16.msrb.mxu1 %v893_v49 }
  0x2c   :  { %898 = vmatpush.bf16.msrb.mxu2 %v885_v48 }
  0x2d   :  { %906 = vmatpush.bf16.msrb.mxu3 %v893_v49 }
  0x2e   :  { %553 = vmatpush.bf16.msrb.mxu0 %v884_v50 }
  0x2f   :  { %572 = vmatpush.bf16.msrb.mxu1 %v892_v51 }
  0x30   :  { %899 = vmatpush.bf16.msrb.mxu2 %v884_v50 }
  0x31   :  { %907 = vmatpush.bf16.msrb.mxu3 %v892_v51  ;;  %487 = vmatmul.bf16.gmra.mxu0 %v623_v61 }
  0x32   :  { %554 = vmatpush.bf16.msrb.mxu0 %v883_v60  ;;  %506 = vmatmul.bf16.gmra.mxu1 %v627_v62 }
  0x33   :  { %525 = vmatmul.bf16.gmra.mxu2 %v631_v63  ;;  %573 = vmatpush.bf16.msrb.mxu1 %v891_v1 }
  0x34   :  { %900 = vmatpush.bf16.msrb.mxu2 %v883_v60  ;;  %544 = vmatmul.bf16.gmra.mxu3 %v635_v0 }
  0x35   :  { %908 = vmatpush.bf16.msrb.mxu3 %v891_v1 }
  0x36   :  { %555 = vmatpush.bf16.msrb.mxu0 %v882_v2 }
  0x37   :  { %574 = vmatpush.bf16.msrb.mxu1 %v890_v3 }
  0x38   :  { %901 = vmatpush.bf16.msrb.mxu2 %v882_v2 }
  0x39   :  { %909 = vmatpush.bf16.msrb.mxu3 %v890_v3 }
  0x3a   :  { %556 = vmatpush.bf16.msrb.mxu0 %v881_v4 }
  0x3b   :  { %575 = vmatpush.bf16.msrb.mxu1 %v889_v5 }
  0x3c   :  { %902 = vmatpush.bf16.msrb.mxu2 %v881_v4 }
  0x3d   :  { %910 = vmatpush.bf16.msrb.mxu3 %v889_v5 }
  0x3e   :  { %557 = vmatpush.bf16.msrb.mxu0 %v880_v6 }
  0x3f   :  { %576 = vmatpush.bf16.msrb.mxu1 %v888_v7 }
  0x40   :  { %903 = vmatpush.bf16.msrb.mxu2 %v880_v6 }
  0x41   :  { %911 = vmatpush.bf16.msrb.mxu3 %v888_v7  ;;  %558 = vmatmul.bf16.vlgmr.msrb.gmra.mxu0 %v615_v16 }
  0x42   :  { %577 = vmatmul.bf16.vlgmr.msrb.gmra.mxu1 %v619_v18 }
  0x43   :  { %563 = vmatmul.bf16.vlgmr.msrb.gmra.mxu2 %v639_v17 }
  0x44   :  { %582 = vmatmul.bf16.vlgmr.msrb.gmra.mxu3 %v643_v19 }
  0x9e   :  { %v483_v20 = vpop.f32.mrf.mxu0 }
  0x9f   :  { %v502_v21 = vpop.f32.mrf.mxu1  ;;  %v484_v31 = vadd.f32 %v912_v26, %v483_v20 }
  0xa1   :  { %v503_v32 = vadd.f32 %v502_v21, %v484_v31 }
  0xa6   :  { %v521_v22 = vpop.f32.mrf.mxu2  ;;  %v485_v24 = vpop.f32.mrf.mxu0 }
  0xa7   :  { %v540_v23 = vpop.f32.mrf.mxu3  ;;  %v504_v25 = vpop.f32.mrf.mxu1  ;;  %v522_v38 = vadd.f32 %v521_v22, %v503_v32  ;;  %v486_v39 = vadd.f32 %v912_v26, %v485_v24 }
  0xa9   :  { %v541_v41 = vadd.f32 %v540_v23, %v522_v38  ;;  %v505_v45 = vadd.f32 %v504_v25, %v486_v39 }
  0xae   :  { %v523_v27 = vpop.f32.mrf.mxu2  ;;  %v488_v29 = vpop.f32.mrf.mxu0 }
  0xaf   :  { %v542_v28 = vpop.f32.mrf.mxu3  ;;  %v507_v30 = vpop.f32.mrf.mxu1  ;;  %v489_v37 = vadd.f32 %v912_v26, %v488_v29  ;;  %v524_v49 = vadd.f32 %v523_v27, %v505_v45 }
  0xb1   :  { %v508_v40 = vadd.f32 %v507_v30, %v489_v37  ;;  %v543_v53 = vadd.f32 %v542_v28, %v524_v49 }
  0xb6   :  { %v526_v33 = vpop.f32.mrf.mxu2  ;;  %v490_v35 = vpop.f32.mrf.mxu0 }
  0xb7   :  { %v545_v34 = vpop.f32.mrf.mxu3  ;;  %v509_v36 = vpop.f32.mrf.mxu1  ;;  %v527_v48 = vadd.f32 %v526_v33, %v508_v40  ;;  %v491_v51 = vadd.f32 %v912_v26, %v490_v35 }
  0xb9   :  { %v546_v52 = vadd.f32 %v545_v34, %v527_v48  ;;  %v510_v55 = vadd.f32 %v509_v36, %v491_v51 }
  0xbe   :  { %v528_v42 = vpop.f32.mrf.mxu2  ;;  %v559_v44 = vpop.f32.mrf.mxu0 }
  0xbf   :  { %v547_v43 = vpop.f32.mrf.mxu3  ;;  %v560_v46 = vadd.f32 %v559_v44, %v541_v41  ;;  %v578_v47 = vpop.f32.mrf.mxu1  ;;  %v529_v60 = vadd.f32 %v528_v42, %v510_v55 }
  0xc1   :  { %v579_v50 = vadd.f32 %v578_v47, %v560_v46  ;;  %v548_v0 = vadd.f32 %v547_v43, %v529_v60 }
  0xc3   :  { %588 = vst [vmem:[%s1167_s3] sm:$0xff] %v579_v50 }
  0xc6   :  { %v564_v54 = vpop.f32.mrf.mxu2  ;;  %v561_v58 = vpop.f32.mrf.mxu0 }
  0xc7   :  { %v565_v56 = vadd.f32 %v564_v54, %v546_v52  ;;  %v583_v57 = vpop.f32.mrf.mxu3  ;;  %v562_v59 = vadd.f32 %v561_v58, %v543_v53  ;;  %v580_v62 = vpop.f32.mrf.mxu1 }
  0xc9   :  { %v584_v61 = vadd.f32 %v583_v57, %v565_v56  ;;  %v581_v63 = vadd.f32 %v580_v62, %v562_v59 }
  0xcb   :  { %590 = vst [vmem:[%s1167_s3 + $0x10] sm:$0xff] %v584_v61 }
  0xcc   :  { %589 = vst [vmem:[%s1167_s3 + $0x8] sm:$0xff] %v581_v63 }
  0xce   :  { %v566_v1 = vpop.f32.mrf.mxu2 }
  0xcf   :  { %v567_v2 = vadd.f32 %v566_v1, %v548_v0  ;;  %v585_v3 = vpop.f32.mrf.mxu3 }
  0xd1   :  { %v586_v4 = vadd.f32 %v585_v3, %v567_v2 }
  0xd3   :  { %591 = vst [vmem:[%s1167_s3 + $0x18] sm:$0xff] %v586_v4 }

// kernel: convnext_isotropic_forward.5
= control target key start
LH: loop header
LB: loop body
LE: loop exit
PB: predicated region body
PF: predicated region fallthrough
CT: control target
= control target key end

     0   :  { %vm22_vm0 = vcmask 1041408   ;;  %s251_s0 = inlined_call_operand.vmem [shape: f32[2,128], index: 0, kind: input, shape index: {}]   ;;  %s252_s1 = inlined_call_operand.vmem [shape: f32[1,128], index: 1, kind: input, shape index: {}]   ;;  %s253_s2 = inlined_call_operand.vmem [shape: f32[1,128], index: 2, kind: input, shape index: {}]   ;;  %s254_s3 = inlined_call_operand.vmem [shape: f32[128,128], index: 3, kind: input, shape index: {}]   ;;  %s255_s4 = inlined_call_operand.vmem [shape: f32[1,128], index: 4, kind: input, shape index: {}]   ;;  %s256_s5 = inlined_call_operand.hbm [shape: f32[2,128], index: 5, kind: output, shape index: {}]  }
   0x1   :  { %v21_v0 = vld [vmem:[%s251_s0] sm:$0x3] }
   0x2   :  { %v23_v1 = vsel %vm22_vm0, %v21_v0, 0.0 }
   0x3   :  { %24 = vadd.xlane.f32.xlu0 %v23_v1 }
   0x4   :  { %10 = vsyncpa [#allocation3], 0  ;;  %v154_v2 = vmov 128.0   ;;  %v77_v3 = vld [vmem:[%s254_s3 + $0x78] sm:$0xff]  ;;  %v76_v4 = vld [vmem:[%s254_s3 + $0x70] sm:$0xff]  ;;  %s155_s30 = smov [#allocation2]  }
   0x5   :  { %124 = vrcp.f32 %v154_v2  ;;  %82 = vmatpush.msra.mxu0 %v77_v3  ;;  %v75_v16 = vld [vmem:[%s254_s3 + $0x68] sm:$0xff]  ;;  %v74_v17 = vld [vmem:[%s254_s3 + $0x60] sm:$0xff]  ;;  %v73_v18 = vld [vmem:[%s254_s3 + $0x58] sm:$0xff]  ;;  %s108_s6 = sshll.u32 %s155_s30, 4  ;;  %s110_s9 = sshll.u32 %s256_s5, 4  ;;  %s109_s6 = int_to_ptr.vmem [resolvable:$true] %s108_s6  ;;  %s111_s9 = int_to_ptr.hbm [resolvable:$true] %s110_s9 }
   0x6   :  { %v72_v19 = vld [vmem:[%s254_s3 + $0x50] sm:$0xff]  ;;  %v71_v20 = vld [vmem:[%s254_s3 + $0x48] sm:$0xff]  ;;  %v70_v21 = vld [vmem:[%s254_s3 + $0x40] sm:$0xff] }
   0x7   :  { %83 = vmatpush.msra.mxu0 %v76_v4  ;;  %v69_v22 = vld [vmem:[%s254_s3 + $0x38] sm:$0xff]  ;;  %v68_v23 = vld [vmem:[%s254_s3 + $0x30] sm:$0xff]  ;;  %v67_v24 = vld [vmem:[%s254_s3 + $0x28] sm:$0xff] }
   0x8   :  { %v66_v25 = vld [vmem:[%s254_s3 + $0x20] sm:$0xff]  ;;  %v65_v26 = vld [vmem:[%s254_s3 + $0x18] sm:$0xff]  ;;  %v64_v27 = vld [vmem:[%s254_s3 + $0x10] sm:$0xff] }
   0x9   :  { %84 = vmatpush.msra.mxu0 %v75_v16  ;;  %v63_v28 = vld [vmem:[%s254_s3 + $0x8] sm:$0xff]  ;;  %v62_v29 = vld [vmem:[%s254_s3] sm:$0xff] }
   0xa   :  { %v121_v39 = vld [vmem:[%s252_s1] ss:$0 sm:$0xff] }
   0xb   :  { %v125_v5 = vpop.eup %124  ;;  %85 = vmatpush.msra.mxu0 %v74_v17  ;;  %v122_v42 = vld [vmem:[%s253_s2] ss:$0 sm:$0xff] }
   0xc   :  { %v27_v6 = vmul.f32 128.0, %v125_v5  ;;  %vm31_vm1 = vweird.f32 %v125_v5  ;;  %v123_v45 = vld [vmem:[%s255_s4] ss:$0 sm:$0xff] }
   0xd   :  { %86 = vmatpush.msra.mxu0 %v73_v18 }
   0xe   :  { %v28_v7 = vsub.f32 1.0, %v27_v6 }
   0xf   :  { %87 = vmatpush.msra.mxu0 %v72_v19 }
  0x10   :  { %v29_v8 = vmul.f32 %v125_v5, %v28_v7 }
  0x11   :  { %88 = vmatpush.msra.mxu0 %v71_v20 }
  0x12   :  { %v30_v9 = vadd.f32 %v125_v5, %v29_v8 }
  0x13   :  { %89 = vmatpush.msra.mxu0 %v70_v21 }
  0x14   :  { %v32_v10 = vsel %vm31_vm1, %v125_v5, %v30_v9 }
  0x15   :  { %90 = vmatpush.msra.mxu0 %v69_v22 }
  0x17   :  { %91 = vmatpush.msra.mxu0 %v68_v23 }
  0x19   :  { %92 = vmatpush.msra.mxu0 %v67_v24 }
  0x1b   :  { %93 = vmatpush.msra.mxu0 %v66_v25 }
  0x1d   :  { %94 = vmatpush.msra.mxu0 %v65_v26 }
  0x1f   :  { %95 = vmatpush.msra.mxu0 %v64_v27 }
  0x21   :  { %96 = vmatpush.msra.mxu0 %v63_v28 }
  0x23   :  { %97 = vmatpush.msra.mxu0 %v62_v29 }
  0x76   :  { %v25_v11 = vpop.xlane.xlu0 %24 }
  0x77   :  { %v33_v12 = vmul.f32 %v32_v10, %v25_v11 }
  0x79   :  { %v34_v13 = vsub.f32 %v21_v0, %v33_v12 }
  0x7b   :  { %v35_v14 = vmul.f32 %v34_v13, %v34_v13 }
  0x7d   :  { %v36_v15 = vsel %vm22_vm0, %v35_v14, 0.0 }
  0x7e   :  { %37 = vadd.xlane.f32.xlu0 %v36_v15 }
  0xf1   :  { %v38_v30 = vpop.xlane.xlu0 %37 }
  0xf2   :  { %v39_v31 = vmul.f32 %v38_v30, %v32_v10 }
  0xf4   :  { %v40_v32 = vadd.f32 1e-06, %v39_v31 }
  0xf6   :  { %126 = vrsqrt.f32 %v40_v32  ;;  %vm47_vm3 = vweird.f32 %v40_v32 }
  0xfc   :  { %v127_v33 = vpop.eup %126 }
  0xfd   :  { %v42_v34 = vmul.f32 %v127_v33, %v40_v32  ;;  %vm48_vm2 = vweird.f32 %v127_v33 }
  0xfe   :  { %vm49_vm4 = vmor %vm47_vm3, %vm48_vm2 }
  0xff   :  { %v43_v35 = vmul.f32 %v127_v33, %v42_v34 }
 0x101   :  { %v44_v36 = vmul.f32 0.5, %v43_v35 }
 0x103   :  { %v45_v37 = vsub.f32 1.5, %v44_v36 }
 0x105   :  { %v46_v38 = vmul.f32 %v127_v33, %v45_v37 }
 0x107   :  { %v50_v40 = vsel %vm49_vm4, %v127_v33, %v46_v38 }
 0x108   :  { %v51_v41 = vmul.f32 %v50_v40, %v34_v13 }
 0x10a   :  { %v56_v43 = vmul.f32 %v121_v39, %v51_v41 }
 0x10c   :  { %v61_v44 = vadd.f32 %v122_v42, %v56_v43 }
 0x10e   :  { %98 = vmatmul.f32.vlgmr.msra.gmra.mxu0 %v61_v44 }
 0x18b   :  { %v99_v46 = vpop.f32.mrf.mxu0 }
 0x18c   :  { %v100_v47 = vadd.f32 %v123_v45, %v99_v46 }
 0x18e   :  { %102 = vst [vmem:[#allocation2] sm:$0x3] %v100_v47 }
 0x18f   :  { %113 = dma.vmem_to_hbm [thread:$0]  %s109_s6, 32, %s111_s9, [#allocation3]  }
 0x190   :  { %152 = dma.done.wait [#allocation3], 32  }
 0x191   :  { %153 = vsyncadd [#allocation3], 4294967264 }
 0x192   :  { %118 = vsyncpa [#allocation3], 1 }

// kernel: convnext_isotropic_forward.4
= control target key start
LH: loop header
LB: loop body
LE: loop exit
PB: predicated region body
PF: predicated region fallthrough
CT: control target
= control target key end

     0   :  { %s4929_s30 = smov 0   ;;  %s4931_s10 = smov 0   ;;  %s8683_s0 = inlined_call_operand.vmem [shape: f32[2,4,4,128], index: 0, kind: input, shape index: {}]   ;;  %s8684_s1 = inlined_call_operand.vmem [shape: f32[2,7,7,128], index: 1, kind: input, shape index: {}]   ;;  %s8685_s2 = inlined_call_operand.vmem [shape: f32[2,1,128], index: 2, kind: input, shape index: {}]   ;;  %s8686_s3 = inlined_call_operand.vmem [shape: f32[2,1,128], index: 3, kind: input, shape index: {}]   ;;  %s8687_s4 = inlined_call_operand.vmem [shape: f32[2,1,128], index: 4, kind: input, shape index: {}]   ;;  %s8688_s5 = inlined_call_operand.vmem [shape: bf16[2,128,512], index: 5, kind: input, shape index: {}]   ;;  %s8689_s6 = inlined_call_operand.vmem [shape: f32[2,1,512], index: 6, kind: input, shape index: {}]   ;;  %s8690_s7 = inlined_call_operand.vmem [shape: bf16[2,512,128], index: 7, kind: input, shape index: {}]   ;;  %s8691_s8 = inlined_call_operand.vmem [shape: f32[2,1,128], index: 8, kind: input, shape index: {}]   ;;  %s8692_s9 = inlined_call_operand.vmem [shape: f32[2,1,128], index: 9, kind: output, shape index: {}]  }
   0x1   :  { %9054 = sst [smem:[#allocation144_spill]] %s8685_s2  ;;  %s4933_s11 = smov 0  }
   0x2 LB: > { %s28_s12 = sadd.s32 1, %s4870_s10  ;;  %p4356_p0 = scmp.ge.s32.totalorder %s4874_s11, 1  ;;  %s4874_s11 = sphi %s4933_s11, %s19_s11   ;;  %s4870_s10 = sphi %s4931_s10, %s9718_s10   ;;  %s4866_s30 = sphi %s4929_s30, %s9717_s30  }
   0x3   : > { %p29_p1 = scmp.ge.s32.totalorder %s28_s12, 2  ;;  %p372_p2 = scmp.lt.s32.totalorder %s4874_s11, 3 }
   0x5   : > { %s9720_s12 = smov (%p29_p1, %s28_s12), 0  ;;  %p373_p3 = pnand %p4356_p0, %p372_p2 }
   0x6   : > { %9055 = sst [smem:[#allocation4_spill]] %s9720_s12 }
   0x7   : > { %376 = sbr.rel (%p373_p3) target bundleno = 1318 (0x526), region = 56 }
   0xc   : > { %p446_p4 = scmp.lt.s32.totalorder %s4866_s30, 1  ;;  %s9056_s2 = sld [smem:[#allocation144_spill]] }
   0xd   : > { %p4363_p5 = scmp.ne.s32.totalorder %s4866_s30, 0 }
   0xe   : > { %s4951_s13 = scalar_select %p446_p4, %s4866_s30, 1 }
  0x10   : > { %s4724_s14 = smul.u32 56, %s4951_s13  ;;  %s456_s20 = scalar_lea.vmem %s8686_s3, %s4951_s13 }
  0x11   : > { %s459_s23 = scalar_lea.vmem %s8687_s4, %s4951_s13  ;;  %s4658_s27 = sshll.u32 %s4951_s13, 8 }
  0x12   : > { %s4958_s17 = scalar_lea.vmem %s9056_s2, %s4951_s13  ;;  %s4971_s26 = scalar_lea.vmem %s8684_s1, %s4724_s14 }
  0x13   : > { %s4977_s15 = scalar_lea.vmem %s8688_s5, %s4658_s27  ;;  %s4360_s16 = sshll.u32 %s4951_s13, 2 }
  0x14   : > { %s4983_s18 = scalar_lea.vmem %s8689_s6, %s4360_s16  ;;  %s4988_s22 = scalar_lea.vmem %s8690_s7, %s4658_s27 }
  0x15   : > { %s476_s25 = scalar_lea.vmem %s8691_s8, %s4951_s13  ;;  %485 = sbr.rel (%p4363_p5) target bundleno = 83 (0x53), region = 60 }
  0x1a   : > { %v4876_v0 = vmov 0.0   ;;  %v534_v1 = vld [vmem:[%s8683_s0] sm:$0xf]  ;;  %v535_v2 = vld [vmem:[%s8683_s0 + $0x4] sm:$0xf] }
  0x1b   : > { %526 = vst [vmem:[#allocation2 + $0x30] sm:$0xff] %v4876_v0  ;;  %v536_v3 = vld [vmem:[%s8683_s0 + $0x8] sm:$0xf]  ;;  %v537_v4 = vld [vmem:[%s8683_s0 + $0xc] sm:$0xf] }
  0x1c   : > { %486 = vst [vmem:[#allocation3 + $0x100] sm:$0xff] %v4876_v0  ;;  %v538_v5 = vld [vmem:[%s8683_s0 + $0x10] sm:$0xf]  ;;  %v539_v6 = vld [vmem:[%s8683_s0 + $0x14] sm:$0xf] }
  0x1d   : > { %487 = vst [vmem:[#allocation3 + $0x18] sm:$0xff] %v4876_v0  ;;  %v540_v7 = vld [vmem:[%s8683_s0 + $0x18] sm:$0xf]  ;;  %v541_v8 = vld [vmem:[%s8683_s0 + $0x1c] sm:$0xf] }
  0x1e   : > { %488 = vst [vmem:[#allocation3 + $0xd8] sm:$0xff] %v4876_v0 }
  0x1f   : > { %489 = vst [vmem:[#allocation3 + $0xe0] sm:$0xff] %v4876_v0 }
  0x20   : > { %490 = vst [vmem:[#allocation3 + $0x60] sm:$0xff] %v4876_v0 }
  0x21   : > { %491 = vst [vmem:[#allocation3 + $0xe8] sm:$0xff] %v4876_v0 }
  0x22   : > { %492 = vst [vmem:[#allocation3 + $0x118] sm:$0xff] %v4876_v0 }
  0x23   : > { %493 = vst [vmem:[#allocation3 + $0xd0] sm:$0xff] %v4876_v0 }
  0x24   : > { %494 = vst [vmem:[#allocation3 + $0x28] sm:$0xff] %v4876_v0 }
  0x25   : > { %495 = vst [vmem:[#allocation3 + $0xa8] sm:$0xff] %v4876_v0 }
  0x26   : > { %496 = vst [vmem:[#allocation3 + $0x50] sm:$0xff] %v4876_v0 }
  0x27   : > { %497 = vst [vmem:[#allocation3] sm:$0xff] %v4876_v0 }
  0x28   : > { %498 = vst [vmem:[#allocation3 + $0x108] sm:$0xff] %v4876_v0 }
  0x29   : > { %499 = vst [vmem:[#allocation3 + $0xf0] sm:$0xff] %v4876_v0 }
  0x2a   : > { %500 = vst [vmem:[#allocation3 + $0xb0] sm:$0xff] %v4876_v0 }
  0x2b   : > { %501 = vst [vmem:[#allocation3 + $0x78] sm:$0xff] %v4876_v0 }
  0x2c   : > { %502 = vst [vmem:[#allocation3 + $0x88] sm:$0xff] %v4876_v0 }
  0x2d   : > { %503 = vst [vmem:[#allocation3 + $0x138] sm:$0xff] %v4876_v0 }
  0x2e   : > { %504 = vst [vmem:[#allocation3 + $0xb8] sm:$0xff] %v4876_v0 }
  0x2f   : > { %505 = vst [vmem:[#allocation3 + $0xc8] sm:$0xff] %v4876_v0 }
  0x30   : > { %506 = vst [vmem:[#allocation3 + $0x130] sm:$0xff] %v4876_v0 }
  0x31   : > { %507 = vst [vmem:[#allocation3 + $0x58] sm:$0xff] %v4876_v0 }
  0x32   : > { %508 = vst [vmem:[#allocation3 + $0x70] sm:$0xff] %v4876_v0 }
  0x33   : > { %509 = vst [vmem:[#allocation3 + $0x90] sm:$0xff] %v4876_v0 }
  0x34   : > { %510 = vst [vmem:[#allocation3 + $0xf8] sm:$0xff] %v4876_v0 }
  0x35   : > { %511 = vst [vmem:[#allocation3 + $0x110] sm:$0xff] %v4876_v0 }
  0x36   : > { %512 = vst [vmem:[#allocation3 + $0x30] sm:$0xff] %v4876_v0 }
  0x37   : > { %513 = vst [vmem:[#allocation3 + $0x98] sm:$0xff] %v4876_v0 }
  0x38   : > { %514 = vst [vmem:[#allocation3 + $0xc0] sm:$0xff] %v4876_v0 }
  0x39   : > { %515 = vst [vmem:[#allocation3 + $0x80] sm:$0xff] %v4876_v0 }
  0x3a   : > { %516 = vst [vmem:[#allocation3 + $0x68] sm:$0xff] %v4876_v0 }
  0x3b   : > { %517 = vst [vmem:[#allocation3 + $0x40] sm:$0xff] %v4876_v0 }
  0x3c   : > { %518 = vst [vmem:[#allocation3 + $0x38] sm:$0xff] %v4876_v0 }
  0x3d   : > { %519 = vst [vmem:[#allocation3 + $0x128] sm:$0xff] %v4876_v0 }
  0x3e   : > { %520 = vst [vmem:[#allocation3 + $0x8] sm:$0xff] %v4876_v0 }
  0x3f   : > { %521 = vst [vmem:[#allocation3 + $0x20] sm:$0xff] %v4876_v0 }
  0x40   : > { %522 = vst [vmem:[#allocation3 + $0x48] sm:$0xff] %v4876_v0 }
  0x41   : > { %523 = vst [vmem:[#allocation3 + $0x120] sm:$0xff] %v4876_v0 }
  0x42   : > { %524 = vst [vmem:[#allocation3 + $0xa0] sm:$0xff] %v4876_v0 }
  0x43   : > { %525 = vst [vmem:[#allocation3 + $0x10] sm:$0xff] %v4876_v0 }
  0x44   : > { %527 = vst [vmem:[#allocation2] sm:$0xff] %v4876_v0 }
  0x45   : > { %528 = vst [vmem:[#allocation2 + $0x18] sm:$0xff] %v4876_v0 }
  0x46   : > { %529 = vst [vmem:[#allocation2 + $0x10] sm:$0xff] %v4876_v0 }
  0x47   : > { %530 = vst [vmem:[#allocation2 + $0x8] sm:$0xff] %v4876_v0 }
  0x48   : > { %531 = vst [vmem:[#allocation2 + $0x20] sm:$0xff] %v4876_v0 }
  0x49   : > { %532 = vst [vmem:[#allocation2 + $0x28] sm:$0xff] %v4876_v0 }
  0x4a   : > { %533 = vst [vmem:[#allocation2 + $0x38] sm:$0xff] %v4876_v0 }
  0x4b   : > { %542 = vst [vmem:[#allocation2 + $0x30] sm:$0xf] %v534_v1 }
  0x4c   : > { %543 = vst [vmem:[#allocation2] sm:$0xf] %v535_v2 }
  0x4d   : > { %544 = vst [vmem:[#allocation2 + $0x18] sm:$0xf] %v536_v3 }
  0x4e   : > { %545 = vst [vmem:[#allocation2 + $0x10] sm:$0xf] %v537_v4 }
  0x4f   : > { %546 = vst [vmem:[#allocation2 + $0x8] sm:$0xf] %v538_v5 }
  0x50   : > { %547 = vst [vmem:[#allocation2 + $0x20] sm:$0xf] %v539_v6 }
  0x51   : > { %548 = vst [vmem:[#allocation2 + $0x28] sm:$0xf] %v540_v7 }
  0x52   : > { %549 = vst [vmem:[#allocation2 + $0x38] sm:$0xf] %v541_v8 }
  0x53 PF: > { %v5019_v9 = vld [vmem:[#allocation2 + $0x30] sm:$0xff]  ;;  %v5021_v10 = vld [vmem:[#allocation2] sm:$0xff]  ;;  %v5036_v15 = vld [vmem:[#allocation3 + $0x18] sm:$0xff]  ;;  %v654_v18 = vlaneseq  ;;  %p4653_p6 = scmp.ne.s32.totalorder %s4866_s30, 1 }
  0x54   : > { %559 = vst [vmem:[#allocation3 + $0x118] sm:$0xff] %v5019_v9  ;;  %v5024_v11 = vld [vmem:[#allocation2 + $0x18] sm:$0xff]  ;;  %v5030_v13 = vld [vmem:[#allocation3 + $0x100] sm:$0xff]  ;;  %v5043_v19 = vld [vmem:[%s4971_s26 + $0x8] sm:$0x7f]  ;;  %v634_v27 = vrot.slane %v5036_v15, 5 }
  0x55   : > { %560 = vst [vmem:[#allocation3 + $0x28] sm:$0xff] %v5021_v10  ;;  %v5027_v12 = vld [vmem:[#allocation2 + $0x10] sm:$0xff]  ;;  %v5034_v14 = vld [vmem:[%s4971_s26] sm:$0x7f]  ;;  %v5038_v16 = vld [vmem:[#allocation3 + $0xd8] sm:$0xff]  ;;  %v614_v24 = vrot.slane %v5030_v13, 5 }
  0x56   : > { %9057 = vst [vmem:[#allocation5_spill] sm:$0xff] %v5027_v12  ;;  %v5040_v17 = vld [vmem:[#allocation3 + $0xe0] sm:$0xff]  ;;  %v5047_v21 = vld [vmem:[#allocation3 + $0xe8] sm:$0xff]  ;;  %v5050_v22 = vld [vmem:[%s4971_s26 + $0x10] sm:$0x7f]  ;;  %v615_v26 = vrot.slane %v5038_v16, 5 }
  0x57   : > { %561 = vst [vmem:[#allocation3 + $0x50] sm:$0xff] %v5024_v11  ;;  %v5045_v20 = vld [vmem:[#allocation3 + $0x60] sm:$0xff]  ;;  %v5053_v23 = vld [vmem:[%s4971_s26 + $0x18] sm:$0x7f]  ;;  %v5056_v25 = vld [vmem:[#allocation3 + $0xd0] sm:$0xff]  ;;  %v635_v28 = vrot.slane %v5040_v17, 5 }
  0x58   : > { %562 = vst [vmem:[#allocation3 + $0x108] sm:$0xff] %v5027_v12  ;;  %v5062_v29 = vld [vmem:[%s4971_s26 + $0x20] sm:$0x7f]  ;;  %v616_v30 = vrot.slane %v5045_v20, 5  ;;  %v636_v31 = vrot.slane %v5047_v21, 5  ;;  %v5066_v32 = vshrl.u32 %v654_v18, 7 }
  0x59   : > { %v5068_v33 = vld [vmem:[#allocation3 + $0xa8] sm:$0xff]  ;;  %v5071_v34 = vperm.slane %v5034_v14, 0  ;;  %v5074_v35 = vperm.slane %v5043_v19, 0  ;;  %v617_v36 = vrot.slane %v5019_v9, 5  ;;  %v637_v37 = vrot.slane %v5056_v25, 5  ;;  %v5082_v39 = vld [vmem:[#allocation3] sm:$0xff] }
  0x5a   : > { %9058 = vst [vmem:[#allocation6_spill] sm:$0xff] %v5066_v32  ;;  %vm656_vm0 = vcmp.lt.s32.totalorder %v5066_v32, 3  ;;  %v5080_v38 = vperm.slane %v5050_v22, 0  ;;  %v5089_v42 = vperm.slane %v5053_v23, 0  ;;  %v5092_v43 = vld [vmem:[%s4971_s26 + $0x28] sm:$0x7f] }
  0x5b   : > { %9059 = vst [vmem:[#allocation7_spill] sm:$0xff] %v5071_v34  ;;  %v657_v40 = vsel %vm656_vm0, %v634_v27, %v614_v24  ;;  %v658_v41 = vsel %vm656_vm0, %v635_v28, %v615_v26  ;;  %v618_v44 = vrot.slane %v5021_v10, 5  ;;  %v638_v45 = vrot.slane %v5068_v33, 5  ;;  %v5101_v48 = vld [vmem:[#allocation3 + $0xf0] sm:$0xff] }
  0x5c   : > { %9060 = vst [vmem:[#allocation8_spill] sm:$0xff] %v5074_v35  ;;  %v5098_v46 = vsel %vm656_vm0, %v636_v31, %v616_v30  ;;  %v678_v47 = vmul.f32 %v5071_v34, %v657_v40  ;;  %v679_v49 = vmul.f32 %v5071_v34, %v658_v41  ;;  %v695_v50 = vmul.f32 %v5074_v35, %v658_v41  ;;  %v5111_v53 = vld [vmem:[%s4971_s26 + $0x30] sm:$0x7f] }
  0x5d   : > { %9061 = vst [vmem:[#allocation9_spill] sm:$0xff] %v5080_v38  ;;  %v696_v51 = vmul.f32 %v5074_v35, %v5098_v46  ;;  %v5108_v52 = vperm.slane %v5062_v29, 0  ;;  %v619_v54 = vrot.slane %v5024_v11, 5  ;;  %v639_v55 = vrot.slane %v5082_v39, 5 }
  0x5e   : > { %9062 = vst [vmem:[#allocation10_spill] sm:$0xff] %v5089_v42  ;;  %v5117_v56 = vsel %vm656_vm0, %v637_v37, %v617_v36  ;;  %v712_v57 = vmul.f32 %v5080_v38, %v5098_v46  ;;  %v703_v58 = vadd.f32 %v695_v50, %v678_v47  ;;  %v5126_v61 = vperm.slane %v5092_v43, 0 }
  0x5f   : > { %9063 = vst [vmem:[#allocation11_spill] sm:$0xff] %v5098_v46  ;;  %v5121_v59 = vadd.f32 %v696_v51, %v679_v49  ;;  %v729_v60 = vmul.f32 %v5089_v42, %v5117_v56  ;;  %v620_v62 = vrot.slane %v5027_v12, 5  ;;  %v640_v63 = vrot.slane %v5101_v48, 5 }
  0x60   : > { %9064 = vst [vmem:[#allocation12_spill] sm:$0xff] %v5108_v52  ;;  %v5132_v0 = vsel %vm656_vm0, %v638_v45, %v618_v44  ;;  %v720_v1 = vadd.f32 %v712_v57, %v703_v58  ;;  %v5137_v3 = vperm.slane %v5111_v53, 0  ;;  %v5141_v4 = vsel %vm656_vm0, %v639_v55, %v619_v54 }
  0x61   : > { %9065 = vst [vmem:[#allocation13_spill] sm:$0xff] %v5117_v56  ;;  %v746_v2 = vmul.f32 %v5108_v52, %v5132_v0  ;;  %v763_v6 = vmul.f32 %v5126_v61, %v5141_v4  ;;  %v796_v7 = vrot.slane %v5030_v13, 6  ;;  %v797_v8 = vrot.slane %v5038_v16, 6 }
  0x62   : > { %9066 = vst [vmem:[#allocation14_spill] sm:$0xff] %v5126_v61  ;;  %v737_v5 = vadd.f32 %v729_v60, %v720_v1  ;;  %v5149_v18 = vsel %vm656_vm0, %v640_v63, %v620_v62  ;;  %v816_v24 = vrot.slane %v5036_v15, 6  ;;  %v817_v26 = vrot.slane %v5040_v17, 6 }
  0x63   : > { %9067 = vst [vmem:[#allocation15_spill] sm:$0xff] %v5132_v0  ;;  %v780_v28 = vmul.f32 %v5137_v3, %v5149_v18  ;;  %v798_v30 = vrot.slane %v5045_v20, 6  ;;  %vm836_vm1 = vcmp.lt.s32.totalorder %v5066_v32, 2  ;;  %v5158_v31 = vperm.slane %v5034_v14, 1 }
  0x64   : > { %9068 = vst [vmem:[#allocation16_spill] sm:$0xff] %v5137_v3  ;;  %v754_v27 = vadd.f32 %v746_v2, %v737_v5  ;;  %v5161_v36 = vperm.slane %v5043_v19, 1  ;;  %v818_v40 = vrot.slane %v5047_v21, 6  ;;  %v837_v41 = vsel %vm836_vm1, %v816_v24, %v796_v7 }
  0x65   : > { %9069 = vst [vmem:[#allocation17_spill] sm:$0xff] %v5141_v4  ;;  %v5168_v44 = vsel %vm836_vm1, %v817_v26, %v797_v8  ;;  %v799_v45 = vrot.slane %v5019_v9, 6  ;;  %v819_v47 = vrot.slane %v5056_v25, 6  ;;  %v800_v50 = vrot.slane %v5021_v10, 6 }
  0x66   : > { %9070 = vst [vmem:[#allocation18_spill] sm:$0xff] %v5149_v18  ;;  %v771_v37 = vadd.f32 %v763_v6, %v754_v27  ;;  %v858_v51 = vmul.f32 %v5158_v31, %v837_v41  ;;  %v875_v54 = vmul.f32 %v5161_v36, %v5168_v44  ;;  %v801_v55 = vrot.slane %v5024_v11, 6 }
  0x67   : > { %9071 = vst [vmem:[#allocation19_spill] sm:$0xff] %v5158_v31  ;;  %v820_v57 = vrot.slane %v5068_v33, 6  ;;  %v5179_v58 = vperm.slane %v5050_v22, 1  ;;  %v5182_v60 = vperm.slane %v5053_v23, 1  ;;  %v821_v62 = vrot.slane %v5082_v39, 6 }
  0x68   : > { %9072 = vst [vmem:[#allocation20_spill] sm:$0xff] %v5161_v36  ;;  %v788_v49 = vadd.f32 %v780_v28, %v771_v37  ;;  %v5187_v63 = vsel %vm836_vm1, %v818_v40, %v798_v30  ;;  %v5190_v2 = vperm.slane %v5062_v29, 1  ;;  %v5194_v5 = vsel %vm836_vm1, %v819_v47, %v799_v45 }
  0x69   : > { %9073 = vst [vmem:[#allocation21_spill] sm:$0xff] %v5168_v44  ;;  %v892_v6 = vmul.f32 %v5179_v58, %v5187_v63  ;;  %v5199_v7 = vperm.slane %v5092_v43, 1  ;;  %v909_v24 = vmul.f32 %v5182_v60, %v5194_v5  ;;  %v802_v26 = vrot.slane %v5027_v12, 6  ;;  %v5351_v44 = vld [vmem:[#allocation2 + $0x38] sm:$0xff] }
  0x6a   : > { %9074 = vst [vmem:[#allocation22_spill] sm:$0xff] %v5179_v58  ;;  %v866_v1 = vadd.f32 %v858_v51, %v788_v49  ;;  %v822_v27 = vrot.slane %v5101_v48, 6  ;;  %v5207_v28 = vsel %vm836_vm1, %v820_v57, %v800_v50  ;;  %v5211_v30 = vsel %vm836_vm1, %v821_v62, %v801_v55 }
  0x6b   : > { %9075 = vst [vmem:[#allocation23_spill] sm:$0xff] %v5182_v60  ;;  %v926_v40 = vmul.f32 %v5190_v2, %v5207_v28  ;;  %v5216_v41 = vperm.slane %v5111_v53, 1  ;;  %v943_v45 = vmul.f32 %v5199_v7, %v5211_v30  ;;  %v976_v47 = vrot.slane %v5030_v13, 7 }
  0x6c   : > { %9076 = vst [vmem:[#allocation24_spill] sm:$0xff] %v5187_v63  ;;  %v883_v8 = vadd.f32 %v875_v54, %v866_v1  ;;  %v977_v50 = vrot.slane %v5038_v16, 7  ;;  %v996_v51 = vrot.slane %v5036_v15, 7  ;;  %v997_v54 = vrot.slane %v5040_v17, 7 }
  0x6d   : > { %9077 = vst [vmem:[#allocation25_spill] sm:$0xff] %v5190_v2  ;;  %v5226_v55 = vsel %vm836_vm1, %v822_v27, %v802_v26  ;;  %vm1016_vm2 = vcmp.lt.s32.totalorder %v5066_v32, 1  ;;  %v5232_v1 = vperm.slane %v5034_v14, 2  ;;  %v979_v26 = vrot.slane %v5019_v9, 7 }
  0x6e   : > { %9078 = vst [vmem:[#allocation26_spill] sm:$0xff] %v5194_v5  ;;  %v900_v37 = vadd.f32 %v892_v6, %v883_v8  ;;  %v960_v62 = vmul.f32 %v5216_v41, %v5226_v55  ;;  %v978_v6 = vrot.slane %v5045_v20, 7  ;;  %v998_v8 = vrot.slane %v5047_v21, 7 }
  0x6f   : > { %9079 = vst [vmem:[#allocation27_spill] sm:$0xff] %v5199_v7  ;;  %v5241_v27 = vsel %vm1016_vm2, %v997_v54, %v977_v50  ;;  %v1001_v5 = vrot.slane %v5082_v39, 7  ;;  %vm1315_vm3 = vcmp.lt.s32.totalorder %v5066_v32, 7  ;;  %v1297_v46 = vrot.slane %v5047_v21, 1 }
  0x70   : > { %9080 = vst [vmem:[#allocation28_spill] sm:$0xff] %v5207_v28  ;;  %v917_v49 = vadd.f32 %v909_v24, %v900_v37  ;;  %v1017_v24 = vsel %vm1016_vm2, %v996_v51, %v976_v47  ;;  %v5249_v28 = vperm.slane %v5050_v22, 2  ;;  %v5252_v47 = vperm.slane %v5053_v23, 2 }
  0x71   : > { %9081 = vst [vmem:[#allocation29_spill] sm:$0xff] %v5211_v30  ;;  %v1000_v51 = vrot.slane %v5068_v33, 7  ;;  %v5258_v50 = vsel %vm1016_vm2, %v998_v8, %v978_v6  ;;  %v1298_v7 = vrot.slane %v5056_v25, 1  ;;  %v1301_v2 = vrot.slane %v5101_v48, 1 }
  0x72   : > { %9082 = vst [vmem:[#allocation30_spill] sm:$0xff] %v5216_v41  ;;  %v934_v57 = vadd.f32 %v926_v40, %v917_v49  ;;  %v999_v40 = vrot.slane %v5056_v25, 7  ;;  %v1038_v49 = vmul.f32 %v5232_v1, %v1017_v24  ;;  %v1072_v24 = vmul.f32 %v5249_v28, %v5258_v50 }
  0x73   : > { %9083 = vst [vmem:[#allocation31_spill] sm:$0xff] %v5226_v55  ;;  %v5246_v55 = vperm.slane %v5043_v19, 2  ;;  %v1455_v58 = vrot.slane %v5030_v13, 2  ;;  %v1475_v31 = vrot.slane %v5036_v15, 2  ;;  %v5390_v3 = vperm.slane %v5050_v22, 4 }
  0x74   : > { %9084 = vst [vmem:[#allocation32_spill] sm:$0xff] %v5232_v1  ;;  %v951_v37 = vadd.f32 %v943_v45, %v934_v57  ;;  %v980_v45 = vrot.slane %v5021_v10, 7  ;;  %v5271_v63 = vsel %vm1016_vm2, %v999_v40, %v979_v26  ;;  %v5287_v40 = vperm.slane %v5111_v53, 2 }
  0x75   : > { %9085 = vst [vmem:[#allocation33_spill] sm:$0xff] %v5241_v27  ;;  %v1055_v54 = vmul.f32 %v5246_v55, %v5241_v27  ;;  %v1089_v8 = vmul.f32 %v5252_v47, %v5271_v63  ;;  %vm1495_vm4 = vcmp.lt.s32.totalorder %v5066_v32, 6  ;;  %vm1675_vm5 = vcmp.lt.s32.totalorder %v5066_v32, 5 }
  0x76   : > { %9086 = vst [vmem:[#allocation34_spill] sm:$0xff] %v5246_v55  ;;  %v968_v30 = vadd.f32 %v960_v62, %v951_v37  ;;  %v5265_v62 = vperm.slane %v5062_v29, 2  ;;  %v981_v37 = vrot.slane %v5024_v11, 7  ;;  %v5282_v27 = vsel %vm1016_vm2, %v1000_v51, %v980_v45  ;;  %v5302_v51 = vld [vmem:[#allocation2 + $0x8] sm:$0xff] }
  0x77   : > { %9087 = vst [vmem:[#allocation35_spill] sm:$0xff] %v5249_v28  ;;  %v1275_v55 = vrot.slane %v5030_v13, 1 }
  0x78   : > { %9088 = vst [vmem:[#allocation36_spill] sm:$0xff] %v5252_v47  ;;  %v1046_v57 = vadd.f32 %v1038_v49, %v968_v30  ;;  %v5276_v30 = vperm.slane %v5092_v43, 2  ;;  %v982_v49 = vrot.slane %v5027_v12, 7  ;;  %v1106_v26 = vmul.f32 %v5265_v62, %v5282_v27 }
  0x79   : > { %9089 = vst [vmem:[#allocation37_spill] sm:$0xff] %v5258_v50  ;;  %v1002_v50 = vrot.slane %v5101_v48, 7  ;;  %v5296_v47 = vperm.slane %v5034_v14, 3 }
  0x7a   : > { %9090 = vst [vmem:[#allocation38_spill] sm:$0xff] %v5265_v62  ;;  %v1063_v6 = vadd.f32 %v1055_v54, %v1046_v57  ;;  %v5291_v54 = vsel %vm1016_vm2, %v1001_v5, %v981_v37  ;;  %v5307_v5 = vperm.slane %v5043_v19, 3  ;;  %v5314_v37 = vperm.slane %v5053_v23, 3 }
  0x7b   : > { %9091 = vst [vmem:[#allocation39_spill] sm:$0xff] %v5271_v63  ;;  %v1123_v63 = vmul.f32 %v5276_v30, %v5291_v54  ;;  %v5300_v45 = vsel %vm1016_vm2, %v1002_v50, %v982_v49  ;;  %v1157_v49 = vmul.f32 %v5296_v47, %v5030_v13  ;;  %v5349_v62 = vperm.slane %v5111_v53, 3 }
  0x7c   : > { %9092 = vst [vmem:[#allocation40_spill] sm:$0xff] %v5276_v30  ;;  %v1080_v28 = vadd.f32 %v1072_v24, %v1063_v6  ;;  %v1140_v6 = vmul.f32 %v5287_v40, %v5300_v45  ;;  %v5342_v30 = vmul.f32 %v5126_v61, %v5149_v18  ;;  %v1278_v18 = vrot.slane %v5019_v9, 1 }
  0x7d   : > { %9093 = vst [vmem:[#allocation41_spill] sm:$0xff] %v5282_v27 }
  0x7e   : > { %9094 = vst [vmem:[#allocation42_spill] sm:$0xff] %v5287_v40  ;;  %v1097_v57 = vadd.f32 %v1089_v8, %v1080_v28  ;;  %v5311_v28 = vperm.slane %v5050_v22, 3  ;;  %v5316_v8 = vld [vmem:[#allocation2 + $0x20] sm:$0xff]  ;;  %v5327_v40 = vld [vmem:[#allocation2 + $0x28] sm:$0xff]  ;;  %v5411_v61 = vsel %vm1315_vm3, %v1278_v18, %v1298_v7 }
  0x7f   : > { %9095 = vst [vmem:[#allocation43_spill] sm:$0xff] %v5291_v54  ;;  %v1208_v54 = vmul.f32 %v5314_v37, %v5019_v9 }
  0x80   : > { %9096 = vst [vmem:[#allocation44_spill] sm:$0xff] %v5296_v47  ;;  %v1114_v24 = vadd.f32 %v1106_v26, %v1097_v57  ;;  %v5321_v26 = vperm.slane %v5062_v29, 3  ;;  %v5324_v57 = vperm.slane %v5092_v43, 3  ;;  %v1174_v47 = vmul.f32 %v5307_v5, %v5038_v16 }
  0x81   : > { %9097 = vst [vmem:[#allocation45_spill] sm:$0xff] %v5300_v45  ;;  %v5331_v45 = vmul.f32 %v5089_v42, %v5132_v0  ;;  %v1191_v27 = vmul.f32 %v5311_v28, %v5045_v20  ;;  %v1281_v0 = vrot.slane %v5027_v12, 1 }
  0x82   : > { %9098 = vst [vmem:[#allocation46_spill] sm:$0xff] %v5307_v5  ;;  %v1131_v50 = vadd.f32 %v1123_v63, %v1114_v24  ;;  %v5335_v63 = vmul.f32 %v5108_v52, %v5141_v4  ;;  %v1242_v5 = vmul.f32 %v5324_v57, %v5024_v11  ;;  %v1295_v4 = vrot.slane %v5036_v15, 1 }
  0x83   : > { %563 = vst [vmem:[#allocation3 + $0x30] sm:$0xff] %v5302_v51 }
  0x84   : > { %9099 = vst [vmem:[#allocation47_spill] sm:$0xff] %v5311_v28  ;;  %v1148_v24 = vadd.f32 %v1140_v6, %v1131_v50  ;;  %v1225_v50 = vmul.f32 %v5321_v26, %v5021_v10  ;;  %v1276_v28 = vrot.slane %v5038_v16, 1  ;;  %v1316_v60 = vsel %vm1315_vm3, %v1275_v55, %v1295_v4 }
  0x85   : > { %9100 = vst [vmem:[#allocation48_spill] sm:$0xff] %v5314_v37  ;;  %v1277_v37 = vrot.slane %v5045_v20, 1  ;;  %v5393_v4 = vperm.slane %v5053_v23, 4  ;;  %v5396_v55 = vperm.slane %v5062_v29, 4 }
  0x86   : > { %9101 = vst [vmem:[#allocation49_spill] sm:$0xff] %v5321_v26  ;;  %v1165_v6 = vadd.f32 %v1157_v49, %v1148_v24  ;;  %v1279_v49 = vrot.slane %v5021_v10, 1  ;;  %v1296_v24 = vrot.slane %v5040_v17, 1  ;;  %v1280_v26 = vrot.slane %v5024_v11, 1 }
  0x87   : > { %9102 = vst [vmem:[#allocation50_spill] sm:$0xff] %v5324_v57  ;;  %v1259_v57 = vmul.f32 %v5349_v62, %v5027_v12 }
  0x88   : > { %564 = vst [vmem:[#allocation3 + $0xc0] sm:$0xff] %v5316_v8  ;;  %v1182_v1 = vadd.f32 %v1174_v47, %v1165_v6  ;;  %v1299_v47 = vrot.slane %v5068_v33, 1  ;;  %v1300_v6 = vrot.slane %v5082_v39, 1 }
  0x89   : > { %565 = vst [vmem:[#allocation3 + $0x68] sm:$0xff] %v5327_v40 }
  0x8a   : > { %9103 = vst [vmem:[#allocation51_spill] sm:$0xff] %v5349_v62  ;;  %v1199_v41 = vadd.f32 %v1191_v27, %v1182_v1  ;;  %v5378_v62 = vperm.slane %v5034_v14, 4  ;;  %v5383_v1 = vsel %vm1315_vm3, %v1276_v28, %v1296_v24  ;;  %v5386_v27 = vperm.slane %v5043_v19, 4 }
  0x8b   : > { %566 = vst [vmem:[#allocation3 + $0x38] sm:$0xff] %v5351_v44  ;;  %v5403_v28 = vsel %vm1315_vm3, %v1277_v37, %v1297_v46  ;;  %v5406_v24 = vperm.slane %v5111_v53, 4  ;;  %v5415_v52 = vsel %vm1315_vm3, %v1279_v49, %v1299_v47  ;;  %v1496_v46 = vsel %vm1495_vm4, %v1455_v58, %v1475_v31 }
  0x8c   : > { %9104 = vst [vmem:[#allocation52_spill] sm:$0xff] %v5378_v62  ;;  %v1216_v36 = vadd.f32 %v1208_v54, %v1199_v41  ;;  %v5399_v41 = vperm.slane %v5092_v43, 4  ;;  %v1337_v42 = vmul.f32 %v5378_v62, %v1316_v60  ;;  %v1354_v18 = vmul.f32 %v5386_v27, %v5383_v1 }
  0x8d   : > { %9105 = vst [vmem:[#allocation53_spill] sm:$0xff] %v5383_v1  ;;  %v1371_v7 = vmul.f32 %v5390_v3, %v5403_v28  ;;  %v1405_v49 = vmul.f32 %v5396_v55, %v5415_v52  ;;  %v1456_v60 = vrot.slane %v5038_v16, 2  ;;  %v1458_v47 = vrot.slane %v5019_v9, 2 }
  0x8e   : > { %9106 = vst [vmem:[#allocation54_spill] sm:$0xff] %v5386_v27  ;;  %v1233_v54 = vadd.f32 %v1225_v50, %v1216_v36  ;;  %v5419_v36 = vsel %vm1315_vm3, %v1280_v26, %v1300_v6  ;;  %v5425_v50 = vsel %vm1315_vm3, %v1281_v0, %v1301_v2  ;;  %v1388_v26 = vmul.f32 %v5393_v4, %v5411_v61 }
  0x8f   : > { %9107 = vst [vmem:[#allocation55_spill] sm:$0xff] %v5390_v3  ;;  %v1422_v31 = vmul.f32 %v5399_v41, %v5419_v36  ;;  %v1439_v0 = vmul.f32 %v5406_v24, %v5425_v50  ;;  %v1476_v2 = vrot.slane %v5040_v17, 2  ;;  %v1459_v6 = vrot.slane %v5021_v10, 2 }
  0x90   : > { %9108 = vst [vmem:[#allocation56_spill] sm:$0xff] %v5393_v4  ;;  %v1250_v37 = vadd.f32 %v1242_v5, %v1233_v54  ;;  %v1457_v5 = vrot.slane %v5045_v20, 2  ;;  %v1460_v54 = vrot.slane %v5024_v11, 2  ;;  %v5462_v3 = vperm.slane %v5043_v19, 5 }
  0x91   : > { %9109 = vst [vmem:[#allocation57_spill] sm:$0xff] %v5396_v55  ;;  %v5455_v4 = vsel %vm1495_vm4, %v1456_v60, %v1476_v2  ;;  %v5465_v27 = vperm.slane %v5050_v22, 5  ;;  %v5477_v60 = vperm.slane %v5111_v53, 5 }
  0x92   : > { %9110 = vst [vmem:[#allocation58_spill] sm:$0xff] %v5399_v41  ;;  %v1267_v58 = vadd.f32 %v1259_v57, %v1250_v37  ;;  %v1477_v57 = vrot.slane %v5047_v21, 2  ;;  %v1478_v37 = vrot.slane %v5056_v25, 2  ;;  %v1635_v41 = vrot.slane %v5030_v13, 3 }
  0x93   : > { %9111 = vst [vmem:[#allocation59_spill] sm:$0xff] %v5403_v28  ;;  %v5468_v28 = vperm.slane %v5053_v23, 5  ;;  %v5471_v13 = vperm.slane %v5062_v29, 5 }
  0x94   : > { %9112 = vst [vmem:[#allocation60_spill] sm:$0xff] %v5406_v24  ;;  %v1481_v24 = vrot.slane %v5101_v48, 2  ;;  %v5486_v2 = vsel %vm1495_vm4, %v1458_v47, %v1478_v37  ;;  %v1659_v37 = vrot.slane %v5068_v33, 3 }
  0x95   : > { %9113 = vst [vmem:[#allocation61_spill] sm:$0xff] %v5411_v61  ;;  %v1461_v61 = vrot.slane %v5027_v12, 2 }
  0x96   : > { %9114 = vst [vmem:[#allocation62_spill] sm:$0xff] %v5415_v52  ;;  %v1345_v52 = vadd.f32 %v1337_v42, %v1267_v58  ;;  %v5458_v42 = vperm.slane %v5034_v14, 5  ;;  %v1655_v58 = vrot.slane %v5036_v15, 3  ;;  %v5482_v15 = vsel %vm1495_vm4, %v1457_v5, %v1477_v57 }
  0x97   : > { %9115 = vst [vmem:[#allocation63_spill] sm:$0xff] %v5419_v36  ;;  %v1480_v36 = vrot.slane %v5082_v39, 2  ;;  %v5502_v5 = vsel %vm1495_vm4, %v1461_v61, %v1481_v24  ;;  %v1534_v57 = vmul.f32 %v5462_v3, %v5455_v4 }
  0x98   : > { %9116 = vst [vmem:[#allocation64_spill] sm:$0xff] %v5425_v50  ;;  %v1479_v50 = vrot.slane %v5068_v33, 2  ;;  %v1362_v55 = vadd.f32 %v1354_v18, %v1345_v52  ;;  %v5474_v18 = vperm.slane %v5092_v43, 5  ;;  %v1517_v47 = vmul.f32 %v5458_v42, %v1496_v46 }
  0x99   : > { %9117 = vst [vmem:[#allocation65_spill] sm:$0xff] %v5455_v4  ;;  %v5498_v1 = vsel %vm1495_vm4, %v1460_v54, %v1480_v36  ;;  %v5521_v24 = vmul.f32 %v5477_v60, %v5502_v5  ;;  %v1636_v46 = vrot.slane %v5038_v16, 3  ;;  %v5535_v16 = vld [vmem:[#allocation3 + $0x58] sm:$0xff]  ;;  %v1658_v54 = vrot.slane %v5056_v25, 3  ;;  %v5554_v4 = vld [vmem:[#allocation3 + $0x80] sm:$0xff] }
  0x9a   : > { %9118 = vst [vmem:[#allocation66_spill] sm:$0xff] %v5458_v42  ;;  %v1379_v52 = vadd.f32 %v1371_v7, %v1362_v55  ;;  %v5490_v62 = vsel %vm1495_vm4, %v1459_v6, %v1479_v50  ;;  %v5494_v55 = vsel %vm1675_vm5, %v1635_v41, %v1655_v58  ;;  %v1551_v50 = vmul.f32 %v5465_v27, %v5482_v15 }
  0x9b   : > { %9119 = vst [vmem:[#allocation67_spill] sm:$0xff] %v5462_v3  ;;  %v1568_v41 = vmul.f32 %v5468_v28, %v5486_v2  ;;  %v5517_v61 = vmul.f32 %v5474_v18, %v5498_v1  ;;  %v1637_v6 = vrot.slane %v5045_v20, 3  ;;  %v5537_v20 = vld [vmem:[#allocation3 + $0xf8] sm:$0xff]  ;;  %v629_v3 = vrot.slane %v5327_v40, 5 }
  0x9c   : > { %9120 = vst [vmem:[#allocation68_spill] sm:$0xff] %v5465_v27  ;;  %v1396_v7 = vadd.f32 %v1388_v26, %v1379_v52  ;;  %v5513_v26 = vmul.f32 %v5471_v13, %v5490_v62  ;;  %v5528_v52 = vld [vmem:[#allocation3 + $0x130] sm:$0xff]  ;;  %v626_v58 = vrot.slane %v5537_v20, 5  ;;  %v628_v27 = vrot.slane %v5316_v8, 5 }
  0x9d   : > { %9121 = vst [vmem:[#allocation69_spill] sm:$0xff] %v5468_v28  ;;  %v5559_v28 = vld [vmem:[#allocation3 + $0x40] sm:$0xff] }
  0x9e   : > { %9122 = vst [vmem:[#allocation70_spill] sm:$0xff] %v5471_v13  ;;  %v1413_v36 = vadd.f32 %v1405_v49, %v1396_v7  ;;  %v5530_v49 = vld [vmem:[#allocation3 + $0x70] sm:$0xff] }
  0x9f   : > { %9123 = vst [vmem:[#allocation71_spill] sm:$0xff] %v5474_v18  ;;  %v625_v25 = vrot.slane %v5530_v49, 5  ;;  %v644_v18 = vrot.slane %v5535_v16, 5 }
  0xa0   : > { %9124 = vst [vmem:[#allocation72_spill] sm:$0xff] %v5477_v60  ;;  %v1430_v7 = vadd.f32 %v1422_v31, %v1413_v36  ;;  %v5544_v31 = vld [vmem:[#allocation3 + $0x90] sm:$0xff]  ;;  %v627_v60 = vrot.slane %v5302_v51, 5 }
  0xa1   : > { %9125 = vst [vmem:[#allocation73_spill] sm:$0xff] %v5482_v15  ;;  %v5546_v36 = vld [vmem:[#allocation3 + $0x110] sm:$0xff]  ;;  %v624_v15 = vrot.slane %v5528_v52, 5 }
  0xa2   : > { %9126 = vst [vmem:[#allocation74_spill] sm:$0xff] %v5486_v2  ;;  %v713_v2 = vmul.f32 %v5080_v38, %v5117_v56 }
  0xa3   : > { %9127 = vst [vmem:[#allocation75_spill] sm:$0xff] %v5490_v62  ;;  %v1657_v62 = vrot.slane %v5047_v21, 3  ;;  %v1447_v21 = vadd.f32 %v1439_v0, %v1430_v7  ;;  %v645_v0 = vrot.slane %v5544_v31, 5  ;;  %v646_v7 = vrot.slane %v5546_v36, 5 }
  0xa4   : > { %9128 = vst [vmem:[#allocation76_spill] sm:$0xff] %v5498_v1  ;;  %v721_v33 = vadd.f32 %v713_v2, %v5121_v59  ;;  %v667_v56 = vsel %vm656_vm0, %v644_v18, %v624_v15 }
  0xa5   : > { %9129 = vst [vmem:[#allocation77_spill] sm:$0xff] %v5502_v5  ;;  %v1656_v5 = vrot.slane %v5040_v17, 3  ;;  %v5548_v17 = vld [vmem:[#allocation3 + $0x98] sm:$0xff]  ;;  %v1525_v13 = vadd.f32 %v1517_v47, %v1447_v21  ;;  %v5571_v47 = vld [vmem:[#allocation3 + $0x128] sm:$0xff]  ;;  %v648_v21 = vrot.slane %v5554_v4, 5  ;;  %v668_v12 = vsel %vm656_vm0, %v645_v0, %v625_v25 }
  0xa6   : > { %v647_v1 = vrot.slane %v5548_v17, 5  ;;  %v738_v2 = vadd.f32 %v5331_v45, %v721_v33  ;;  %9131 = vst [vmem:[#allocation79_spill] sm:$0xff] %v5571_v47  ;;  %v649_v45 = vrot.slane %v5559_v28, 5  ;;  %v5583_v33 = vsel %vm656_vm0, %v646_v7, %v626_v58 }
  0xa7   : > { %v5566_v59 = vsel %vm1675_vm5, %v1636_v46, %v1656_v5  ;;  %v1542_v42 = vadd.f32 %v1534_v57, %v1525_v13  ;;  %v630_v46 = vrot.slane %v5351_v44, 5  ;;  %v682_v18 = vmul.f32 %v5071_v34, %v667_v56 }
  0xa8   : > { %9130 = vst [vmem:[#allocation78_spill] sm:$0xff] %v5566_v59  ;;  %v755_v5 = vadd.f32 %v5335_v63, %v738_v2  ;;  %v5587_v57 = vsel %vm656_vm0, %v647_v1, %v627_v60  ;;  %v683_v15 = vmul.f32 %v5071_v34, %v668_v12  ;;  %v650_v63 = vrot.slane %v5571_v47, 5 }
  0xa9   : > { %v1559_v13 = vadd.f32 %v1551_v50, %v1542_v42  ;;  %9132 = vst [vmem:[#allocation80_spill] sm:$0xff] %v5587_v57  ;;  %v699_v0 = vmul.f32 %v5074_v35, %v668_v12  ;;  %v700_v58 = vmul.f32 %v5074_v35, %v5583_v33  ;;  %v5599_v42 = vperm.slane %v5034_v14, 6  ;;  %v9137_v50 = vld [vmem:[#allocation10_spill] sm:$0xff] }
  0xaa   : > { %v5592_v25 = vadd.f32 %v5342_v30, %v755_v5  ;;  %v5603_v1 = vsel %vm656_vm0, %v648_v21, %v628_v27  ;;  %v716_v56 = vmul.f32 %v5080_v38, %v5583_v33  ;;  %v5609_v30 = vsel %vm1675_vm5, %v1637_v6, %v1657_v62 }
  0xab   : > { %v1576_v7 = vadd.f32 %v1568_v41, %v1559_v13  ;;  %9133 = vst [vmem:[#allocation81_spill] sm:$0xff] %v5599_v42  ;;  %v707_v60 = vadd.f32 %v699_v0, %v682_v18  ;;  %v5611_v12 = vadd.f32 %v700_v58, %v683_v15  ;;  %v733_v41 = vmul.f32 %v9137_v50, %v5587_v57  ;;  %v9149_v18 = vld [vmem:[#allocation14_spill] sm:$0xff] }
  0xac   : > { %9134 = vst [vmem:[#allocation82_spill] sm:$0xff] %v5603_v1  ;;  %v9138_v2 = vrot.slane %v5019_v9, 3  ;;  %v5623_v21 = vperm.slane %v5043_v19, 6  ;;  %v5627_v62 = vsel %vm656_vm0, %v649_v45, %v629_v3  ;;  %v9142_v6 = vrot.slane %v5021_v10, 3 }
  0xad   : > { %9135 = vst [vmem:[#allocation83_spill] sm:$0xff] %v5609_v30  ;;  %v1593_v14 = vadd.f32 %v5513_v26, %v1576_v7  ;;  %v5637_v9 = vsel %vm656_vm0, %v650_v63, %v630_v46  ;;  %v724_v26 = vadd.f32 %v716_v56, %v707_v60  ;;  %v1697_v3 = vmul.f32 %v5599_v42, %v5494_v55 }
  0xae   : > { %9136 = vst [vmem:[#allocation84_spill] sm:$0xff] %v5611_v12  ;;  %v5620_v27 = vsel %vm1675_vm5, %v9138_v2, %v1658_v54  ;;  %v5633_v5 = vsel %vm1675_vm5, %v9142_v6, %v1659_v37  ;;  %v9145_v54 = vld [vmem:[#allocation12_spill] sm:$0xff]  ;;  %v5645_v45 = vperm.slane %v5050_v22, 6  ;;  %v5648_v10 = vperm.slane %v5053_v23, 6  ;;  %v9191_v12 = vld [vmem:[#allocation26_spill] sm:$0xff] }
  0xaf   : > { %9139 = vst [vmem:[#allocation85_spill] sm:$0xff] %v5620_v27  ;;  %v750_v13 = vmul.f32 %v9145_v54, %v5603_v1  ;;  %v1610_v19 = vadd.f32 %v5517_v61, %v1593_v14  ;;  %v5651_v37 = vperm.slane %v5062_v29, 6  ;;  %v741_v46 = vadd.f32 %v733_v41, %v724_v26  ;;  %v9150_v22 = vld [vmem:[#allocation16_spill] sm:$0xff] }
  0xb0   : > { %9140 = vst [vmem:[#allocation86_spill] sm:$0xff] %v5623_v21  ;;  %v767_v15 = vmul.f32 %v9149_v18, %v5627_v62  ;;  %v806_v63 = vrot.slane %v5528_v52, 6  ;;  %v1714_v55 = vmul.f32 %v5623_v21, %v5566_v59  ;;  %v784_v0 = vmul.f32 %v9150_v22, %v5637_v9 }
  0xb1   : > { %9141 = vst [vmem:[#allocation87_spill] sm:$0xff] %v5627_v62  ;;  %v1627_v61 = vadd.f32 %v5521_v24, %v1610_v19  ;;  %v807_v23 = vrot.slane %v5530_v49, 6  ;;  %v758_v58 = vadd.f32 %v750_v13, %v741_v46  ;;  %v808_v29 = vrot.slane %v5537_v20, 6 }
  0xb2   : > { %9143 = vst [vmem:[#allocation88_spill] sm:$0xff] %v5633_v5  ;;  %v826_v7 = vrot.slane %v5535_v16, 6  ;;  %v827_v56 = vrot.slane %v5544_v31, 6  ;;  %v1731_v41 = vmul.f32 %v5645_v45, %v5609_v30  ;;  %v5668_v24 = vperm.slane %v5092_v43, 6 }
  0xb3   : > { %9144 = vst [vmem:[#allocation89_spill] sm:$0xff] %v5637_v9  ;;  %v1705_v60 = vadd.f32 %v1697_v3, %v1627_v61  ;;  %v828_v14 = vrot.slane %v5546_v36, 6  ;;  %v775_v2 = vadd.f32 %v767_v15, %v758_v58  ;;  %v809_v6 = vrot.slane %v5302_v51, 6 }
  0xb4   : > { %9146 = vst [vmem:[#allocation90_spill] sm:$0xff] %v5645_v45  ;;  %v829_v26 = vrot.slane %v5548_v17, 6  ;;  %v847_v13 = vsel %vm836_vm1, %v826_v7, %v806_v63  ;;  %v1748_v3 = vmul.f32 %v5648_v10, %v5620_v27  ;;  %v5678_v46 = vperm.slane %v5111_v53, 6  ;;  %v9155_v7 = vld [vmem:[#allocation19_spill] sm:$0xff] }
  0xb5   : > { %9147 = vst [vmem:[#allocation91_spill] sm:$0xff] %v5648_v10  ;;  %v1722_v19 = vadd.f32 %v1714_v55, %v1705_v60  ;;  %v5682_v43 = vsel %vm836_vm1, %v827_v56, %v807_v23  ;;  %v792_v61 = vadd.f32 %v784_v0, %v775_v2  ;;  %v810_v15 = vrot.slane %v5316_v8, 6  ;;  %v9156_v60 = vld [vmem:[#allocation20_spill] sm:$0xff] }
  0xb6   : > { %9148 = vst [vmem:[#allocation92_spill] sm:$0xff] %v5651_v37  ;;  %v830_v58 = vrot.slane %v5554_v4, 6  ;;  %v5688_v59 = vsel %vm836_vm1, %v828_v14, %v808_v29  ;;  %v1765_v55 = vmul.f32 %v5651_v37, %v5633_v5  ;;  %v862_v53 = vmul.f32 %v9155_v7, %v847_v13 }
  0xb7   : > { %9151 = vst [vmem:[#allocation93_spill] sm:$0xff] %v5668_v24  ;;  %v1739_v63 = vadd.f32 %v1731_v41, %v1722_v19  ;;  %v879_v27 = vmul.f32 %v9156_v60, %v5682_v43  ;;  %v9157_v23 = vrot.slane %v5082_v39, 3  ;;  %v9158_v0 = vrot.slane %v5024_v11, 3  ;;  %v9161_v11 = vld [vmem:[#allocation22_spill] sm:$0xff] }
  0xb8   : > { %9152 = vst [vmem:[#allocation94_spill] sm:$0xff] %v5678_v46  ;;  %v811_v29 = vrot.slane %v5327_v40, 6  ;;  %v831_v41 = vrot.slane %v5559_v28, 6  ;;  %v5707_v14 = vsel %vm836_vm1, %v829_v26, %v809_v6  ;;  %v870_v39 = vadd.f32 %v862_v53, %v792_v61 }
  0xb9   : > { %9153 = vst [vmem:[#allocation95_spill] sm:$0xff] %v5682_v43  ;;  %v5701_v56 = vsel %vm1675_vm5, %v9158_v0, %v9157_v23  ;;  %v1756_v2 = vadd.f32 %v1748_v3, %v1739_v63  ;;  %v896_v19 = vmul.f32 %v9161_v11, %v5688_v59  ;;  %v9162_v23 = vrot.slane %v5101_v48, 3  ;;  %v9163_v0 = vld [vmem:[#allocation5_spill] sm:$0xff]  ;;  %v9167_v48 = vld [vmem:[#allocation23_spill] sm:$0xff] }
  0xba   : > { %9154 = vst [vmem:[#allocation96_spill] sm:$0xff] %v5688_v59  ;;  %v1782_v13 = vmul.f32 %v5668_v24, %v5701_v56  ;;  %v9164_v5 = vrot.slane %v9163_v0, 3  ;;  %v812_v6 = vrot.slane %v5351_v44, 6  ;;  %v832_v26 = vrot.slane %v5571_v47, 6  ;;  %v5737_v59 = vld [vmem:[%s4958_s17] ss:$0 sm:$0xff] }
  0xbb   : > { %9159 = vst [vmem:[#allocation97_spill] sm:$0xff] %v5701_v56  ;;  %v5725_v3 = vsel %vm836_vm1, %v830_v58, %v810_v15  ;;  %v1773_v61 = vadd.f32 %v1765_v55, %v1756_v2  ;;  %v887_v53 = vadd.f32 %v879_v27, %v870_v39  ;;  %v913_v0 = vmul.f32 %v9167_v48, %v5707_v14  ;;  %v9170_v15 = vld [vmem:[#allocation25_spill] sm:$0xff]  ;;  %v9175_v43 = vld [vmem:[#allocation11_spill] sm:$0xff] }
  0xbc   : > { %9160 = vst [vmem:[#allocation98_spill] sm:$0xff] %v5707_v14  ;;  %v5719_v30 = vsel %vm1675_vm5, %v9164_v5, %v9162_v23  ;;  %v5733_v5 = vsel %vm836_vm1, %v831_v41, %v811_v29  ;;  %v986_v23 = vrot.slane %v5528_v52, 7  ;;  %v930_v58 = vmul.f32 %v9170_v15, %v5725_v3 }
  0xbd   : > { %9165 = vst [vmem:[#allocation5_spill] sm:$0xff] %v5719_v30  ;;  %v1799_v63 = vmul.f32 %v5678_v46, %v5719_v30  ;;  %v1790_v56 = vadd.f32 %v1782_v13, %v1773_v61  ;;  %v904_v24 = vadd.f32 %v896_v19, %v887_v53  ;;  %v5743_v55 = vsel %vm836_vm1, %v832_v26, %v812_v6  ;;  %v9172_v13 = vld [vmem:[#allocation27_spill] sm:$0xff]  ;;  %v9174_v46 = vld [vmem:[#allocation30_spill] sm:$0xff] }
  0xbe   : > { %9166 = vst [vmem:[#allocation99_spill] sm:$0xff] %v5725_v3  ;;  %v987_v27 = vrot.slane %v5530_v49, 7  ;;  %v1006_v2 = vrot.slane %v5535_v16, 7  ;;  %v1007_v29 = vrot.slane %v5544_v31, 7  ;;  %v947_v61 = vmul.f32 %v9172_v13, %v5733_v5 }
  0xbf   : > { %9168 = vst [vmem:[#allocation100_spill] sm:$0xff] %v5733_v5  ;;  %v1807_v41 = vadd.f32 %v1799_v63, %v1790_v56  ;;  %v921_v39 = vadd.f32 %v913_v0, %v904_v24  ;;  %v988_v19 = vrot.slane %v5537_v20, 7  ;;  %v1008_v53 = vrot.slane %v5546_v36, 7 }
  0xc0   : > { %9169 = vst [vmem:[#allocation101_spill] sm:$0xff] %v5737_v59  ;;  %v1027_v30 = vsel %vm1016_vm2, %v1006_v2, %v986_v23  ;;  %v964_v37 = vmul.f32 %v9174_v46, %v5743_v55  ;;  %v5761_v24 = vmul.f32 %v5071_v34, %v9175_v43  ;;  %v989_v56 = vrot.slane %v5302_v51, 7  ;;  %v9177_v23 = vld [vmem:[#allocation15_spill] sm:$0xff] }
  0xc1   : > { %9171 = vst [vmem:[#allocation102_spill] sm:$0xff] %v5743_v55  ;;  %v5755_v6 = vadd.f32 %v5737_v59, %v1807_v41  ;;  %v938_v26 = vadd.f32 %v930_v58, %v921_v39  ;;  %v1009_v63 = vrot.slane %v5548_v17, 7  ;;  %v5767_v0 = vsel %vm1016_vm2, %v1007_v29, %v987_v27  ;;  %v9179_v41 = vld [vmem:[#allocation32_spill] sm:$0xff]  ;;  %v9180_v59 = vld [vmem:[#allocation17_spill] sm:$0xff] }
  0xc2   : > { %9176 = vst [vmem:[#allocation11_spill] sm:$0xff] %v5767_v0  ;;  %v5771_v2 = vmul.f32 %v5074_v35, %v9177_v23  ;;  %v5775_v58 = vmul.f32 %v5080_v38, %v9177_v23  ;;  %v1042_v39 = vmul.f32 %v9179_v41, %v1027_v30  ;;  %v5781_v55 = vmul.f32 %v5080_v38, %v9180_v59 }
  0xc3   : > { %9173 = vst [vmem:[#allocation103_spill] sm:$0xff] %v5755_v6  ;;  %1827 = vadd.xlane.f32.xlu0 %v5755_v6  ;;  %v955_v43 = vadd.f32 %v947_v61, %v938_v26  ;;  %v990_v27 = vrot.slane %v5316_v8, 7  ;;  %v1010_v29 = vrot.slane %v5554_v4, 7  ;;  %v5787_v5 = vsel %vm1016_vm2, %v1008_v53, %v988_v19  ;;  %v9183_v6 = vld [vmem:[#allocation18_spill] sm:$0xff]  ;;  %v9187_v53 = vld [vmem:[#allocation21_spill] sm:$0xff] }
  0xc4   : > { %9178 = vst [vmem:[#allocation15_spill] sm:$0xff] %v5771_v2  ;;  %v5791_v23 = vmul.f32 %v9137_v50, %v9180_v59  ;;  %v5795_v61 = vmul.f32 %v9137_v50, %v9183_v6  ;;  %v9185_v26 = vld [vmem:[#allocation34_spill] sm:$0xff]  ;;  %v5801_v45 = vmul.f32 %v9145_v54, %v9183_v6  ;;  %v991_v21 = vrot.slane %v5327_v40, 7  ;;  %v9190_v6 = vld [vmem:[#allocation35_spill] sm:$0xff] }
  0xc5   : > { %9181 = vst [vmem:[#allocation17_spill] sm:$0xff] %v5781_v55  ;;  %v972_v30 = vadd.f32 %v964_v37, %v955_v43  ;;  %v1059_v10 = vmul.f32 %v9185_v26, %v5767_v0  ;;  %v1011_v19 = vrot.slane %v5559_v28, 7  ;;  %v5807_v59 = vsel %vm1016_vm2, %v1009_v63, %v989_v56  ;;  %v9188_v37 = vld [vmem:[#allocation24_spill] sm:$0xff] }
  0xc6   : > { %9182 = vst [vmem:[#allocation104_spill] sm:$0xff] %v5787_v5  ;;  %v5811_v55 = vmul.f32 %v9155_v7, %v9187_v53  ;;  %v5815_v43 = vmul.f32 %v9156_v60, %v9188_v37  ;;  %v5821_v2 = vmul.f32 %v9161_v11, %v9191_v12  ;;  %v992_v42 = vrot.slane %v5351_v44, 7  ;;  %v9194_v53 = vld [vmem:[#allocation29_spill] sm:$0xff]  ;;  %v9198_v60 = vld [vmem:[#allocation36_spill] sm:$0xff] }
  0xc7   : > { %9184 = vst [vmem:[#allocation18_spill] sm:$0xff] %v5795_v61  ;;  %v1050_v0 = vadd.f32 %v1042_v39, %v972_v30  ;;  %v1076_v61 = vmul.f32 %v9190_v6, %v5787_v5  ;;  %v1012_v56 = vrot.slane %v5571_v47, 7  ;;  %v5827_v63 = vsel %vm1016_vm2, %v1010_v29, %v990_v27  ;;  %v9196_v39 = vld [vmem:[#allocation28_spill] sm:$0xff] }
  0xc8   : > { %9186 = vst [vmem:[#allocation105_spill] sm:$0xff] %v5807_v59  ;;  %v5831_v46 = vmul.f32 %v9161_v11, %v9194_v53  ;;  %v5835_v30 = vmul.f32 %v9167_v48, %v9196_v39  ;;  %v5841_v12 = vmul.f32 %v9167_v48, %v9194_v53  ;;  %v5849_v29 = vmul.f32 %v9170_v15, %v9194_v53 }
  0xc9   : > { %9189 = vst [vmem:[#allocation21_spill] sm:$0xff] %v5815_v43  ;;  %v1067_v5 = vadd.f32 %v1059_v10, %v1050_v0  ;;  %v9200_v43 = vld [vmem:[#allocation31_spill] sm:$0xff] }
  0xca   : > { %9192 = vst [vmem:[#allocation24_spill] sm:$0xff] %v5821_v2  ;;  %v1093_v2 = vmul.f32 %v9198_v60, %v5807_v59  ;;  %v5845_v27 = vmul.f32 %v9167_v48, %v9200_v43  ;;  %v5857_v10 = vmul.f32 %v9170_v15, %v9200_v43  ;;  %v5861_v0 = vmul.f32 %v9172_v13, %v9200_v43 }
  0xcb   : > { %9193 = vst [vmem:[#allocation106_spill] sm:$0xff] %v5827_v63  ;;  %v1084_v59 = vadd.f32 %v1076_v61, %v1067_v5  ;;  %v5879_v43 = vsel %vm1016_vm2, %v1012_v56, %v992_v42  ;;  %v9214_v5 = vld [vmem:[#allocation43_spill] sm:$0xff] }
  0xcc   : > { %9195 = vst [vmem:[#allocation29_spill] sm:$0xff] %v5831_v46  ;;  %v5853_v46 = vsel %vm1016_vm2, %v1011_v19, %v991_v21  ;;  %v9211_v19 = vld [vmem:[#allocation39_spill] sm:$0xff]  ;;  %v5883_v61 = vmul.f32 %v9190_v6, %v9214_v5 }
  0xcd   : > { %9197 = vst [vmem:[#allocation107_spill] sm:$0xff] %v5835_v30  ;;  %v9207_v30 = vld [vmem:[#allocation33_spill] sm:$0xff]  ;;  %v5875_v15 = vmul.f32 %v9190_v6, %v9211_v19  ;;  %v5893_v19 = vmul.f32 %v9198_v60, %v9214_v5  ;;  %v9229_v6 = vld [vmem:[#allocation59_spill] sm:$0xff] }
  0xce   : > { %9199 = vst [vmem:[#allocation108_spill] sm:$0xff] %v5841_v12  ;;  %v9206_v12 = vld [vmem:[#allocation38_spill] sm:$0xff]  ;;  %v5867_v53 = vmul.f32 %v9179_v41, %v9207_v30  ;;  %v1101_v41 = vadd.f32 %v1093_v2, %v1084_v59  ;;  %v9225_v59 = vld [vmem:[#allocation53_spill] sm:$0xff] }
  0xcf   : > { %9201 = vst [vmem:[#allocation31_spill] sm:$0xff] %v5845_v27  ;;  %v1110_v27 = vmul.f32 %v9206_v12, %v5827_v63  ;;  %v9216_v63 = vld [vmem:[#allocation41_spill] sm:$0xff]  ;;  %v5901_v56 = vmul.f32 %v9206_v12, %v9214_v5 }
  0xd0   : > { %9202 = vst [vmem:[#allocation109_spill] sm:$0xff] %v5849_v29  ;;  %v9209_v29 = vld [vmem:[#allocation37_spill] sm:$0xff]  ;;  %v5887_v30 = vmul.f32 %v9198_v60, %v9216_v63  ;;  %v1311_v63 = vrot.slane %v5571_v47, 1 }
  0xd1   : > { %9203 = vst [vmem:[#allocation110_spill] sm:$0xff] %v5853_v46  ;;  %v5871_v21 = vmul.f32 %v9185_v26, %v9209_v29  ;;  %v9218_v26 = vld [vmem:[#allocation40_spill] sm:$0xff]  ;;  %v1490_v29 = vrot.slane %v5559_v28, 2 }
  0xd2   : > { %9204 = vst [vmem:[#allocation111_spill] sm:$0xff] %v5857_v10  ;;  %v9259_v10 = vld [vmem:[#allocation58_spill] sm:$0xff] }
  0xd3   : > { %9205 = vst [vmem:[#allocation112_spill] sm:$0xff] %v5861_v0 }
  0xd4   : > { %9208 = vst [vmem:[#allocation33_spill] sm:$0xff] %v5867_v53 }
  0xd5   : > { %9210 = vst [vmem:[#allocation113_spill] sm:$0xff] %v5871_v21  ;;  %v1127_v21 = vmul.f32 %v9218_v26, %v5853_v46  ;;  %v9226_v46 = vld [vmem:[#allocation52_spill] sm:$0xff] }
  0xd6   : > { %9212 = vst [vmem:[#allocation114_spill] sm:$0xff] %v5875_v15  ;;  %v9220_v15 = vld [vmem:[#allocation45_spill] sm:$0xff]  ;;  %v5919_v5 = vmul.f32 %v9226_v46, %v9229_v6  ;;  %v1465_v6 = vrot.slane %v5528_v52, 2 }
  0xd7   : > { %9213 = vst [vmem:[#allocation115_spill] sm:$0xff] %v5879_v43  ;;  %v5897_v42 = vmul.f32 %v9198_v60, %v9220_v15  ;;  %v5909_v2 = vmul.f32 %v9218_v26, %v9220_v15  ;;  %v9228_v60 = vld [vmem:[#allocation42_spill] sm:$0xff] }
  0xd8   : > { %9215 = vst [vmem:[#allocation43_spill] sm:$0xff] %v5883_v61  ;;  %v5905_v61 = vmul.f32 %v9206_v12, %v9220_v15  ;;  %v5927_v15 = vmul.f32 %v5071_v34, %v5583_v33  ;;  %v5946_v33 = vmul.f32 %v9145_v54, %v5627_v62  ;;  %v1286_v54 = vrot.slane %v5530_v49, 1 }
  0xd9   : > { %9217 = vst [vmem:[#allocation116_spill] sm:$0xff] %v5887_v30  ;;  %v5913_v30 = vmul.f32 %v9226_v46, %v9225_v59  ;;  %v5931_v59 = vmul.f32 %v5080_v38, %v5603_v1 }
  0xda   : > { %9219 = vst [vmem:[#allocation117_spill] sm:$0xff] %v5893_v19  ;;  %v1118_v19 = vadd.f32 %v1110_v27, %v1101_v41  ;;  %v5935_v41 = vmul.f32 %v9137_v50, %v5603_v1  ;;  %v9240_v1 = vld [vmem:[#allocation46_spill] sm:$0xff] }
  0xdb   : > { %9221 = vst [vmem:[#allocation45_spill] sm:$0xff] %v5897_v42  ;;  %v1144_v42 = vmul.f32 %v9228_v60, %v5879_v43  ;;  %v9241_v43 = vld [vmem:[#allocation47_spill] sm:$0xff] }
  0xdc   : > { %9222 = vst [vmem:[#allocation118_spill] sm:$0xff] %v5901_v56  ;;  %v9231_v56 = vld [vmem:[#allocation13_spill] sm:$0xff]  ;;  %v1135_v27 = vadd.f32 %v1127_v21, %v1118_v19  ;;  %v5954_v21 = vmul.f32 %v9161_v11, %v5707_v14  ;;  %v1306_v14 = vrot.slane %v5544_v31, 1 }
  0xdd   : > { %9223 = vst [vmem:[#allocation119_spill] sm:$0xff] %v5905_v61  ;;  %v5923_v12 = vmul.f32 %v5074_v35, %v9231_v56  ;;  %v5942_v35 = vmul.f32 %v9137_v50, %v5627_v62  ;;  %v1195_v50 = vmul.f32 %v9241_v43, %v5537_v20  ;;  %v1285_v62 = vrot.slane %v5528_v52, 1 }
  0xde   : > { %9224 = vst [vmem:[#allocation120_spill] sm:$0xff] %v5909_v2  ;;  %v1152_v19 = vadd.f32 %v1144_v42, %v1135_v27  ;;  %v1305_v61 = vrot.slane %v5535_v16, 1  ;;  %v1307_v42 = vrot.slane %v5546_v36, 1  ;;  %v1289_v43 = vrot.slane %v5316_v8, 1  ;;  %v9242_v2 = vld [vmem:[#allocation48_spill] sm:$0xff] }
  0xdf   : > { %9227 = vst [vmem:[#allocation53_spill] sm:$0xff] %v5913_v30  ;;  %v9235_v30 = vld [vmem:[#allocation44_spill] sm:$0xff]  ;;  %v1489_v56 = vrot.slane %v5554_v4, 2 }
  0xe0   : > { %9230 = vst [vmem:[#allocation121_spill] sm:$0xff] %v5919_v5  ;;  %v1161_v5 = vmul.f32 %v9235_v30, %v5528_v52 }
  0xe1   : > { %9232 = vst [vmem:[#allocation122_spill] sm:$0xff] %v5927_v15  ;;  %v1178_v15 = vmul.f32 %v9240_v1, %v5530_v49  ;;  %v1308_v1 = vrot.slane %v5548_v17, 1 }
  0xe2   : > { %9233 = vst [vmem:[#allocation123_spill] sm:$0xff] %v5931_v59  ;;  %v5950_v59 = vmul.f32 %v9149_v18, %v5637_v9  ;;  %v1287_v9 = vrot.slane %v5537_v20, 1  ;;  %v1169_v26 = vadd.f32 %v1161_v5, %v1152_v19  ;;  %v1212_v5 = vmul.f32 %v9242_v2, %v5302_v51 }
  0xe3   : > { %9234 = vst [vmem:[#allocation124_spill] sm:$0xff] %v5935_v41  ;;  %v1290_v19 = vrot.slane %v5327_v40, 1  ;;  %v1291_v41 = vrot.slane %v5351_v44, 1 }
  0xe4   : > { %9236 = vst [vmem:[#allocation125_spill] sm:$0xff] %v5942_v35  ;;  %v1485_v35 = vrot.slane %v5535_v16, 2  ;;  %v1186_v30 = vadd.f32 %v1178_v15, %v1169_v26  ;;  %v1326_v26 = vsel %vm1315_vm3, %v1285_v62, %v1305_v61  ;;  %v5991_v15 = vsel %vm1315_vm3, %v1286_v54, %v1306_v14  ;;  %v9249_v54 = vld [vmem:[#allocation50_spill] sm:$0xff] }
  0xe5   : > { %9237 = vst [vmem:[#allocation126_spill] sm:$0xff] %v5946_v33  ;;  %v1310_v33 = vrot.slane %v5559_v28, 1  ;;  %v5995_v2 = vsel %vm1315_vm3, %v1287_v9, %v1307_v42  ;;  %v1665_v62 = vrot.slane %v5535_v16, 3  ;;  %v1246_v14 = vmul.f32 %v9249_v54, %v5327_v40  ;;  %v9254_v16 = vld [vmem:[#allocation54_spill] sm:$0xff]  ;;  %v9258_v54 = vld [vmem:[#allocation57_spill] sm:$0xff] }
  0xe6   : > { %9238 = vst [vmem:[#allocation127_spill] sm:$0xff] %v5950_v59  ;;  %v5969_v27 = vsel %vm1495_vm4, %v1465_v6, %v1485_v35  ;;  %v1309_v59 = vrot.slane %v5554_v4, 1  ;;  %v5981_v35 = vmul.f32 %v9167_v48, %v5725_v3  ;;  %v9244_v6 = vld [vmem:[#allocation49_spill] sm:$0xff]  ;;  %v1203_v34 = vadd.f32 %v1195_v50, %v1186_v30  ;;  %v9250_v30 = vld [vmem:[#allocation51_spill] sm:$0xff] }
  0xe7   : > { %9239 = vst [vmem:[#allocation128_spill] sm:$0xff] %v5954_v21  ;;  %v1288_v21 = vrot.slane %v5302_v51, 1  ;;  %v1229_v60 = vmul.f32 %v9244_v6, %v5316_v8  ;;  %v1645_v50 = vrot.slane %v5528_v52, 3  ;;  %v1263_v9 = vmul.f32 %v9250_v30, %v5351_v44 }
  0xe8   : > { %9243 = vst [vmem:[#allocation129_spill] sm:$0xff] %v5981_v35  ;;  %v6003_v48 = vsel %vm1315_vm3, %v1289_v43, %v1309_v59  ;;  %v1220_v61 = vadd.f32 %v1212_v5, %v1203_v34  ;;  %v6013_v42 = vsel %vm1315_vm3, %v1290_v19, %v1310_v33  ;;  %v6021_v52 = vsel %vm1315_vm3, %v1291_v41, %v1311_v63  ;;  %v9256_v33 = vld [vmem:[#allocation55_spill] sm:$0xff]  ;;  %v9257_v35 = vld [vmem:[#allocation56_spill] sm:$0xff]  ;;  %v6036_v41 = vld [vmem:[#allocation3 + $0x88] sm:$0xff] }
  0xe9   : > { %9245 = vst [vmem:[#allocation130_spill] sm:$0xff] %v5991_v15  ;;  %v5999_v3 = vsel %vm1315_vm3, %v1288_v21, %v1308_v1  ;;  %v6015_v1 = vld [vmem:[#allocation3 + $0xb0] sm:$0xff]  ;;  %v6017_v21 = vld [vmem:[#allocation3 + $0x78] sm:$0xff]  ;;  %v1341_v34 = vmul.f32 %v9226_v46, %v1326_v26  ;;  %v1358_v43 = vmul.f32 %v9254_v16, %v5991_v15  ;;  %v6028_v59 = vsel %vm1675_vm5, %v1645_v50, %v1665_v62 }
  0xea   : > { %9246 = vst [vmem:[#allocation131_spill] sm:$0xff] %v5995_v2  ;;  %v1237_v5 = vadd.f32 %v1229_v60, %v1220_v61  ;;  %v1375_v19 = vmul.f32 %v9256_v33, %v5995_v2  ;;  %v1392_v30 = vmul.f32 %v9257_v35, %v5999_v3  ;;  %v1409_v63 = vmul.f32 %v9258_v54, %v6003_v48  ;;  %v6038_v26 = vld [vmem:[#allocation3 + $0x138] sm:$0xff] }
  0xeb   : > { %9247 = vst [vmem:[#allocation132_spill] sm:$0xff] %v5999_v3  ;;  %v1466_v16 = vrot.slane %v5530_v49, 2  ;;  %v1467_v46 = vrot.slane %v5537_v20, 2  ;;  %v621_v50 = vrot.slane %v6015_v1, 5  ;;  %v641_v60 = vrot.slane %v6017_v21, 5 }
  0xec   : > { %9248 = vst [vmem:[#allocation133_spill] sm:$0xff] %v6003_v48  ;;  %v1254_v62 = vadd.f32 %v1246_v14, %v1237_v5  ;;  %v1468_v61 = vrot.slane %v5302_v51, 2  ;;  %v1469_v3 = vrot.slane %v5316_v8, 2  ;;  %v705_v48 = vadd.f32 %v5923_v12, %v5761_v24 }
  0xed   : > { %9251 = vst [vmem:[#allocation134_spill] sm:$0xff] %v6013_v42  ;;  %v1486_v2 = vrot.slane %v5544_v31, 2  ;;  %v1487_v54 = vrot.slane %v5546_v36, 2  ;;  %v622_v35 = vrot.slane %v6036_v41, 5  ;;  %v642_v33 = vrot.slane %v6038_v26, 5 }
  0xee   : > { %9252 = vst [vmem:[#allocation135_spill] sm:$0xff] %v6015_v1  ;;  %v1271_v15 = vadd.f32 %v1263_v9, %v1254_v62  ;;  %v1470_v6 = vrot.slane %v5327_v40, 2  ;;  %v1471_v14 = vrot.slane %v5351_v44, 2  ;;  %v1488_v5 = vrot.slane %v5548_v17, 2  ;;  %v9260_v62 = vld [vmem:[#allocation60_spill] sm:$0xff] }
  0xef   : > { %9253 = vst [vmem:[#allocation136_spill] sm:$0xff] %v6021_v52  ;;  %v1491_v12 = vrot.slane %v5571_v47, 2  ;;  %v6060_v24 = vsel %vm656_vm0, %v641_v60, %v621_v50  ;;  %v1426_v9 = vmul.f32 %v9259_v10, %v6013_v42  ;;  %v722_v13 = vadd.f32 %v5775_v58, %v705_v48 }
  0xf0   : > { %9255 = vst [vmem:[#allocation137_spill] sm:$0xff] %v6028_v59  ;;  %v1349_v53 = vadd.f32 %v1341_v34, %v1271_v15  ;;  %v1443_v59 = vmul.f32 %v9260_v62, %v6021_v52  ;;  %v6069_v0 = vsel %vm1495_vm4, %v1466_v16, %v1486_v2  ;;  %v6073_v47 = vsel %vm1495_vm4, %v1467_v46, %v1487_v54 }
  0xf1   : > { %9261 = vst [vmem:[#allocation138_spill] sm:$0xff] %v6069_v0  ;;  %v6077_v50 = vsel %vm656_vm0, %v642_v33, %v622_v35  ;;  %v781_v15 = vmul.f32 %v9150_v22, %v6060_v24  ;;  %v6083_v60 = vsel %vm1495_vm4, %v1468_v61, %v1488_v5  ;;  %v739_v48 = vadd.f32 %v5791_v23, %v722_v13  ;;  %v9267_v13 = vld [vmem:[#allocation66_spill] sm:$0xff]  ;;  %v9270_v33 = vld [vmem:[#allocation69_spill] sm:$0xff] }
  0xf2   : > { %9262 = vst [vmem:[#allocation139_spill] sm:$0xff] %v6073_v47  ;;  %v1366_v34 = vadd.f32 %v1358_v43, %v1349_v53  ;;  %v765_v58 = vmul.f32 %v9149_v18, %v6060_v24  ;;  %v6090_v46 = vsel %vm1495_vm4, %v1469_v3, %v1489_v56  ;;  %v6094_v2 = vsel %vm1495_vm4, %v1470_v6, %v1490_v29  ;;  %v9268_v56 = vld [vmem:[#allocation67_spill] sm:$0xff]  ;;  %v9269_v29 = vld [vmem:[#allocation68_spill] sm:$0xff] }
  0xf3   : > { %9263 = vst [vmem:[#allocation140_spill] sm:$0xff] %v6083_v60  ;;  %v6098_v53 = vsel %vm1495_vm4, %v1471_v14, %v1491_v12  ;;  %v789_v35 = vadd.f32 %v781_v15, %v5592_v25  ;;  %v1521_v23 = vmul.f32 %v9267_v13, %v5969_v27  ;;  %v756_v16 = vadd.f32 %v5801_v45, %v739_v48  ;;  %v9271_v14 = vld [vmem:[#allocation70_spill] sm:$0xff]  ;;  %v9272_v12 = vld [vmem:[#allocation71_spill] sm:$0xff] }
  0xf4   : > { %9264 = vst [vmem:[#allocation141_spill] sm:$0xff] %v6090_v46  ;;  %v1383_v54 = vadd.f32 %v1375_v19, %v1366_v34  ;;  %v782_v3 = vmul.f32 %v9150_v22, %v6077_v50  ;;  %v1538_v43 = vmul.f32 %v9268_v56, %v6069_v0  ;;  %v1555_v6 = vmul.f32 %v9269_v29, %v6073_v47  ;;  %v9277_v0 = vld [vmem:[#allocation24_spill] sm:$0xff] }
  0xf5   : > { %9265 = vst [vmem:[#allocation142_spill] sm:$0xff] %v6094_v2  ;;  %v1572_v61 = vmul.f32 %v9270_v33, %v6083_v60  ;;  %v867_v25 = vadd.f32 %v5811_v55, %v789_v35  ;;  %v6115_v27 = vmul.f32 %v9271_v14, %v6090_v46  ;;  %v773_v45 = vadd.f32 %v765_v58, %v756_v16  ;;  %v9273_v55 = vld [vmem:[#allocation21_spill] sm:$0xff]  ;;  %v9274_v58 = vld [vmem:[#allocation26_spill] sm:$0xff]  ;;  %v9275_v16 = vld [vmem:[#allocation20_spill] sm:$0xff] }
  0xf6   : > { %9266 = vst [vmem:[#allocation143_spill] sm:$0xff] %v6098_v53  ;;  %v1400_v19 = vadd.f32 %v1392_v30, %v1383_v54  ;;  %v860_v5 = vmul.f32 %v9155_v7, %v9188_v37  ;;  %v6121_v15 = vmul.f32 %v9272_v12, %v6094_v2  ;;  %v6125_v34 = vmul.f32 %v5080_v38, %v5587_v57  ;;  %v9276_v37 = vld [vmem:[#allocation72_spill] sm:$0xff] }
  0xf7   : > { %v803_v48 = vrot.slane %v6015_v1, 6  ;;  %v884_v30 = vadd.f32 %v9273_v55, %v867_v25  ;;  %v790_v54 = vadd.f32 %v782_v3, %v773_v45  ;;  %v823_v46 = vrot.slane %v6017_v21, 6 }
  0xf8   : > { %v1417_v35 = vadd.f32 %v1409_v63, %v1400_v19  ;;  %v877_v60 = vmul.f32 %v9275_v16, %v9274_v58  ;;  %v6134_v47 = vmul.f32 %v9276_v37, %v6098_v53  ;;  %v1646_v2 = vrot.slane %v5530_v49, 3  ;;  %v9278_v53 = vld [vmem:[#allocation107_spill] sm:$0xff] }
  0xf9   : > { %v1666_v38 = vrot.slane %v5544_v31, 3  ;;  %v901_v52 = vadd.f32 %v9277_v0, %v884_v30  ;;  %v1647_v25 = vrot.slane %v5537_v20, 3  ;;  %v868_v63 = vadd.f32 %v860_v5, %v790_v54  ;;  %v9279_v30 = vld [vmem:[#allocation109_spill] sm:$0xff] }
  0xfa   : > { %v1434_v42 = vadd.f32 %v1426_v9, %v1417_v35  ;;  %v894_v3 = vmul.f32 %v9161_v11, %v9196_v39  ;;  %v1648_v19 = vrot.slane %v5302_v51, 3  ;;  %v804_v45 = vrot.slane %v6036_v41, 6  ;;  %v9280_v35 = vld [vmem:[#allocation30_spill] sm:$0xff] }
  0xfb   : > { %v824_v55 = vrot.slane %v6038_v26, 6  ;;  %v918_v58 = vadd.f32 %v9278_v53, %v901_v52  ;;  %v1649_v31 = vrot.slane %v5316_v8, 3  ;;  %v6149_v0 = vsel %vm836_vm1, %v823_v46, %v803_v48  ;;  %v9282_v48 = vld [vmem:[#allocation79_spill] sm:$0xff] }
  0xfc   : > { %v1451_v49 = vadd.f32 %v1443_v59, %v1434_v42  ;;  %v885_v20 = vadd.f32 %v877_v60, %v868_v63  ;;  %v1667_v9 = vrot.slane %v5546_v36, 3  ;;  %v1668_v5 = vrot.slane %v5548_v17, 3  ;;  %v9281_v17 = vld [vmem:[#allocation112_spill] sm:$0xff] }
  0xfd   : > { %v935_v51 = vadd.f32 %v9279_v30, %v918_v58  ;;  %v961_v54 = vmul.f32 %v9280_v35, %v6149_v0  ;;  %v1650_v52 = vrot.slane %v5327_v40, 3  ;;  %v1669_v59 = vrot.slane %v5554_v4, 3  ;;  %v9283_v63 = vld [vmem:[#allocation108_spill] sm:$0xff]  ;;  %v9284_v40 = vld [vmem:[#allocation27_spill] sm:$0xff] }
  0xfe   : > { %v1529_v11 = vadd.f32 %v1521_v23, %v1451_v49  ;;  %v902_v8 = vadd.f32 %v894_v3, %v885_v20  ;;  %v1670_v46 = vrot.slane %v5559_v28, 3  ;;  %v6162_v36 = vsel %vm836_vm1, %v824_v55, %v804_v45  ;;  %v9288_v45 = vld [vmem:[#allocation137_spill] sm:$0xff]  ;;  %v9290_v30 = vld [vmem:[#allocation111_spill] sm:$0xff] }
  0xff   : > { %v952_v60 = vadd.f32 %v9281_v17, %v935_v51  ;;  %v945_v49 = vmul.f32 %v9284_v40, %v6149_v0  ;;  %v6171_v3 = vsel %vm1675_vm5, %v1646_v2, %v1666_v38  ;;  %v6175_v4 = vsel %vm1675_vm5, %v1647_v25, %v1667_v9  ;;  %v9289_v55 = vld [vmem:[#allocation81_spill] sm:$0xff]  ;;  %v6186_v38 = vld [vmem:[#allocation3 + $0x8] sm:$0xff] }
 0x100   : > { %v1546_v53 = vadd.f32 %v1538_v43, %v1529_v11  ;;  %v919_v23 = vadd.f32 %v9283_v63, %v902_v8  ;;  %9285 = vst [vmem:[#allocation21_spill] sm:$0xff] %v6171_v3  ;;  %v6179_v28 = vsel %vm1675_vm5, %v1648_v19, %v1668_v5  ;;  %v1701_v20 = vmul.f32 %v9289_v55, %v9288_v45  ;;  %v9293_v19 = vld [vmem:[#allocation33_spill] sm:$0xff]  ;;  %v9302_v55 = vld [vmem:[#allocation15_spill] sm:$0xff] }
 0x101   : > { %9286 = vst [vmem:[#allocation24_spill] sm:$0xff] %v6175_v4  ;;  %v969_v11 = vadd.f32 %v961_v54, %v952_v60  ;;  %v962_v8 = vmul.f32 %v9280_v35, %v6162_v36  ;;  %v6190_v2 = vsel %vm1675_vm5, %v1649_v31, %v1669_v59  ;;  %v6194_v25 = vsel %vm1675_vm5, %v1650_v52, %v1670_v46  ;;  %v9294_v60 = vld [vmem:[#allocation37_spill] sm:$0xff]  ;;  %v9298_v52 = vld [vmem:[#allocation7_spill] sm:$0xff] }
 0x102   : > { %9287 = vst [vmem:[#allocation107_spill] sm:$0xff] %v6179_v28  ;;  %v1563_v43 = vadd.f32 %v1555_v6, %v1546_v53  ;;  %v936_v51 = vadd.f32 %v9290_v30, %v919_v23  ;;  %v983_v6 = vrot.slane %v6015_v1, 7  ;;  %v1003_v17 = vrot.slane %v6017_v21, 7  ;;  %v9295_v53 = vld [vmem:[#allocation32_spill] sm:$0xff]  ;;  %v6201_v23 = vld [vmem:[#allocation3 + $0x20] sm:$0xff] }
 0x103   : > { %9291 = vst [vmem:[#allocation109_spill] sm:$0xff] %v6190_v2  ;;  %v1047_v9 = vadd.f32 %v9293_v19, %v969_v11  ;;  %v1040_v63 = vmul.f32 %v9295_v53, %v9294_v60  ;;  %v984_v31 = vrot.slane %v6036_v41, 7  ;;  %v9296_v59 = vld [vmem:[#allocation113_spill] sm:$0xff]  ;;  %v631_v42 = vrot.slane %v6186_v38, 5  ;;  %v9301_v60 = vld [vmem:[#allocation114_spill] sm:$0xff] }
 0x104   : > { %9292 = vst [vmem:[#allocation112_spill] sm:$0xff] %v6194_v25  ;;  %v1580_v5 = vadd.f32 %v1572_v61, %v1563_v43  ;;  %v953_v54 = vadd.f32 %v945_v49, %v936_v51  ;;  %v9297_v30 = vld [vmem:[#allocation13_spill] sm:$0xff]  ;;  %v1004_v49 = vrot.slane %v6038_v26, 7  ;;  %v9299_v43 = vld [vmem:[#allocation39_spill] sm:$0xff]  ;;  %v9300_v51 = vld [vmem:[#allocation34_spill] sm:$0xff]  ;;  %v651_v37 = vrot.slane %v6201_v23, 5 }
 0x105   : > { %v1064_v45 = vadd.f32 %v9296_v59, %v1047_v9  ;;  %v681_v46 = vmul.f32 %v9298_v52, %v9297_v30  ;;  %v1057_v19 = vmul.f32 %v9300_v51, %v9299_v43  ;;  %v9303_v9 = vld [vmem:[#allocation84_spill] sm:$0xff] }
 0x106   : > { %v1597_v11 = vadd.f32 %v6115_v27, %v1580_v5  ;;  %v970_v61 = vadd.f32 %v962_v8, %v953_v54  ;;  %v725_v59 = vadd.f32 %v6125_v34, %v9303_v9  ;;  %v6220_v27 = vsel %vm1016_vm2, %v1003_v17, %v983_v6  ;;  %v9305_v5 = vld [vmem:[#allocation41_spill] sm:$0xff]  ;;  %v9306_v54 = vld [vmem:[#allocation35_spill] sm:$0xff]  ;;  %v9307_v43 = vld [vmem:[#allocation116_spill] sm:$0xff] }
 0x107   : > { %v1081_v58 = vadd.f32 %v9301_v60, %v1064_v45  ;;  %v706_v39 = vadd.f32 %v9302_v55, %v681_v46  ;;  %9304 = vst [vmem:[#allocation79_spill] sm:$0xff] %v6220_v27  ;;  %v1074_v52 = vmul.f32 %v9306_v54, %v9305_v5  ;;  %v9308_v45 = vld [vmem:[#allocation17_spill] sm:$0xff]  ;;  %v6228_v55 = vsel %vm656_vm0, %v651_v37, %v631_v42  ;;  %v9310_v46 = vld [vmem:[#allocation124_spill] sm:$0xff]  ;;  %v9313_v9 = vld [vmem:[#allocation118_spill] sm:$0xff] }
 0x108   : > { %v1614_v30 = vadd.f32 %v6121_v15, %v1597_v11  ;;  %v1048_v8 = vadd.f32 %v1040_v63, %v970_v61  ;;  %9309 = vst [vmem:[#allocation108_spill] sm:$0xff] %v6228_v55  ;;  %v742_v34 = vadd.f32 %v9310_v46, %v725_v59  ;;  %v9311_v11 = vld [vmem:[#allocation86_spill] sm:$0xff]  ;;  %v785_v37 = vmul.f32 %v9150_v22, %v6228_v55 }
 0x109   : > { %v1098_v12 = vadd.f32 %v9307_v43, %v1081_v58  ;;  %v723_v60 = vadd.f32 %v9308_v45, %v706_v39  ;;  %v1718_v6 = vmul.f32 %v9311_v11, %v6171_v3  ;;  %v9312_v63 = vld [vmem:[#allocation42_spill] sm:$0xff]  ;;  %v6249_v46 = vsel %vm1016_vm2, %v1004_v49, %v984_v31  ;;  %v9324_v11 = vld [vmem:[#allocation95_spill] sm:$0xff] }
 0x10a   : > { %v1631_v15 = vadd.f32 %v6134_v47, %v1614_v30  ;;  %v1065_v17 = vadd.f32 %v1057_v19, %v1048_v8  ;;  %v1141_v61 = vmul.f32 %v9312_v63, %v6220_v27  ;;  %v9314_v58 = vld [vmem:[#allocation18_spill] sm:$0xff]  ;;  %v9317_v30 = vld [vmem:[#allocation91_spill] sm:$0xff]  ;;  %9318 = vst [vmem:[#allocation137_spill] sm:$0xff] %v6249_v46  ;;  %v9326_v31 = vrot.slane %v5351_v44, 3  ;;  %v9332_v44 = vld [vmem:[#allocation25_spill] sm:$0xff] }
 0x10b   : > { %v1115_v5 = vadd.f32 %v9313_v9, %v1098_v12  ;;  %v6238_v43 = vadd.f32 %v9314_v58, %v723_v60  ;;  %v9315_v39 = vld [vmem:[#allocation126_spill] sm:$0xff]  ;;  %v1752_v19 = vmul.f32 %v9317_v30, %v6179_v28  ;;  %v9319_v12 = vld [vmem:[#allocation120_spill] sm:$0xff]  ;;  %v9335_v30 = vld [vmem:[#allocation47_spill] sm:$0xff] }
 0x10c   : > { %v759_v45 = vadd.f32 %v9315_v39, %v742_v34  ;;  %v1709_v42 = vadd.f32 %v1701_v20, %v1631_v15  ;;  %v9316_v47 = vld [vmem:[#allocation90_spill] sm:$0xff]  ;;  %v1082_v8 = vadd.f32 %v1074_v52, %v1065_v17  ;;  %v4838_v9 = vld [vmem:[#allocation3 + $0xd8] sm:$0xff]  ;;  %v9321_v39 = vld [vmem:[#allocation127_spill] sm:$0xff]  ;;  %v863_v52 = vmul.f32 %v9155_v7, %v9324_v11 }
 0x10d   : > { %v1735_v59 = vmul.f32 %v9316_v47, %v6175_v4  ;;  %v1132_v60 = vadd.f32 %v9319_v12, %v1115_v5  ;;  %v9320_v58 = vld [vmem:[#allocation44_spill] sm:$0xff]  ;;  %v9322_v20 = vld [vmem:[#allocation117_spill] sm:$0xff]  ;;  %v9325_v17 = vrot.slane %v9282_v48, 3  ;;  %v1142_v48 = vmul.f32 %v9312_v63, %v6249_v46 }
 0x10e   : > { %v1158_v34 = vmul.f32 %v4838_v9, %v9320_v58  ;;  %v776_v3 = vadd.f32 %v9321_v39, %v759_v45  ;;  %v1726_v55 = vadd.f32 %v1718_v6, %v1709_v42  ;;  %v1099_v15 = vadd.f32 %v9322_v20, %v1082_v8  ;;  %v9323_v4 = vld [vmem:[#allocation40_spill] sm:$0xff]  ;;  %v4839_v12 = vld [vmem:[#allocation3 + $0x60] sm:$0xff]  ;;  %v9328_v45 = vld [vmem:[#allocation46_spill] sm:$0xff] }
 0x10f   : > { %v1125_v47 = vmul.f32 %v9323_v4, %v6220_v27  ;;  %v6265_v49 = vsel %vm1675_vm5, %v9326_v31, %v9325_v17  ;;  %v1149_v5 = vadd.f32 %v1141_v61, %v1132_v60  ;;  %v1175_v6 = vmul.f32 %v4839_v12, %v9328_v45  ;;  %v9329_v9 = vld [vmem:[#allocation92_spill] sm:$0xff]  ;;  %v9330_v20 = vld [vmem:[#allocation119_spill] sm:$0xff]  ;;  %v9333_v17 = vld [vmem:[#allocation93_spill] sm:$0xff] }
 0x110   : > { %9327 = vst [vmem:[#allocation111_spill] sm:$0xff] %v6265_v49  ;;  %v793_v42 = vadd.f32 %v785_v37, %v776_v3  ;;  %v1743_v8 = vadd.f32 %v1735_v59, %v1726_v55  ;;  %v1769_v39 = vmul.f32 %v9329_v9, %v6190_v2  ;;  %v1116_v28 = vadd.f32 %v9330_v20, %v1099_v15  ;;  %v9331_v11 = vld [vmem:[#allocation100_spill] sm:$0xff]  ;;  %v9336_v20 = vld [vmem:[#allocation94_spill] sm:$0xff] }
 0x111   : > { %v931_v27 = vmul.f32 %v9332_v44, %v9331_v11  ;;  %v1786_v31 = vmul.f32 %v9333_v17, %v6194_v25  ;;  %v1166_v61 = vadd.f32 %v1158_v34, %v1149_v5  ;;  %v6277_v60 = vld [vmem:[#allocation3 + $0x118] sm:$0xff]  ;;  %v1159_v59 = vmul.f32 %v4839_v12, %v9320_v58  ;;  %v6284_v9 = vld [vmem:[#allocation3 + $0x28] sm:$0xff]  ;;  %v9341_v12 = vld [vmem:[#allocation49_spill] sm:$0xff] }
 0x112   : > { %9334 = vst [vmem:[#allocation33_spill] sm:$0xff] %v6277_v60  ;;  %v1192_v3 = vmul.f32 %v6277_v60, %v9335_v30  ;;  %v1760_v55 = vadd.f32 %v1752_v19, %v1743_v8  ;;  %v1133_v37 = vadd.f32 %v1125_v47, %v1116_v28  ;;  %v871_v15 = vadd.f32 %v863_v52, %v793_v42  ;;  %v9338_v11 = vld [vmem:[#allocation48_spill] sm:$0xff]  ;;  %v6293_v52 = vld [vmem:[#allocation3 + $0x50] sm:$0xff] }
 0x113   : > { %v1803_v2 = vmul.f32 %v9336_v20, %v6265_v49  ;;  %v1183_v46 = vadd.f32 %v1175_v6, %v1166_v61  ;;  %9337 = vst [vmem:[#allocation37_spill] sm:$0xff] %v6284_v9  ;;  %v1209_v25 = vmul.f32 %v6284_v9, %v9338_v11  ;;  %v9339_v34 = vld [vmem:[#allocation96_spill] sm:$0xff]  ;;  %v1176_v28 = vmul.f32 %v6277_v60, %v9328_v45  ;;  %v9342_v61 = vld [vmem:[#allocation102_spill] sm:$0xff] }
 0x114   : > { %v880_v5 = vmul.f32 %v9275_v16, %v9339_v34  ;;  %v1777_v17 = vadd.f32 %v1769_v39, %v1760_v55  ;;  %v1150_v7 = vadd.f32 %v1142_v48, %v1133_v37  ;;  %v813_v47 = vrot.slane %v6186_v38, 6  ;;  %9340 = vst [vmem:[#allocation113_spill] sm:$0xff] %v6293_v52  ;;  %v9343_v55 = vld [vmem:[#allocation105_spill] sm:$0xff]  ;;  %v9345_v60 = vld [vmem:[#allocation50_spill] sm:$0xff]  ;;  %v9346_v16 = vld [vmem:[#allocation128_spill] sm:$0xff] }
 0x115   : > { %v1200_v19 = vadd.f32 %v1192_v3, %v1183_v46  ;;  %v1226_v6 = vmul.f32 %v6293_v52, %v9341_v12  ;;  %v833_v42 = vrot.slane %v6201_v23, 6  ;;  %v948_v49 = vmul.f32 %v9284_v40, %v9342_v61  ;;  %v6306_v3 = vld [vmem:[#allocation3 + $0x108] sm:$0xff]  ;;  %v9348_v45 = vld [vmem:[#allocation36_spill] sm:$0xff] }
 0x116   : > { %v888_v8 = vadd.f32 %v880_v5, %v871_v15  ;;  %v1794_v34 = vadd.f32 %v1786_v31, %v1777_v17  ;;  %v1167_v39 = vadd.f32 %v1159_v59, %v1150_v7  ;;  %v1193_v48 = vmul.f32 %v6284_v9, %v9335_v30  ;;  %9344 = vst [vmem:[#allocation13_spill] sm:$0xff] %v6306_v3  ;;  %v9347_v5 = vld [vmem:[#allocation106_spill] sm:$0xff] }
 0x117   : > { %v6304_v37 = vmul.f32 %v9306_v54, %v9343_v55  ;;  %v1217_v46 = vadd.f32 %v1209_v25, %v1200_v19  ;;  %v1243_v20 = vmul.f32 %v6306_v3, %v9345_v60  ;;  %v6313_v61 = vmul.f32 %v9348_v45, %v9347_v5  ;;  %v9349_v54 = vld [vmem:[#allocation51_spill] sm:$0xff]  ;;  %v9351_v55 = vld [vmem:[#allocation129_spill] sm:$0xff] }
 0x118   : > { %v905_v15 = vadd.f32 %v9346_v16, %v888_v8  ;;  %v1811_v7 = vadd.f32 %v1803_v2, %v1794_v34  ;;  %v1184_v17 = vadd.f32 %v1176_v28, %v1167_v39  ;;  %v1210_v31 = vmul.f32 %v6293_v52, %v9338_v11  ;;  %v9352_v16 = vld [vmem:[#allocation110_spill] sm:$0xff]  ;;  %v9354_v45 = vld [vmem:[#allocation101_spill] sm:$0xff]  ;;  %v9362_v5 = vld [vmem:[#allocation59_spill] sm:$0xff] }
 0x119   : > { %v1234_v59 = vadd.f32 %v1226_v6, %v1217_v46  ;;  %v1260_v25 = vmul.f32 %v9349_v54, %v6015_v1  ;;  %v6321_v19 = vsel %vm836_vm1, %v833_v42, %v813_v47  ;;  %v9353_v8 = vld [vmem:[#allocation38_spill] sm:$0xff]  ;;  %v1227_v28 = vmul.f32 %v6306_v3, %v9341_v12  ;;  %v9356_v6 = vld [vmem:[#allocation115_spill] sm:$0xff]  ;;  %v9358_v47 = vld [vmem:[#allocation52_spill] sm:$0xff] }
 0x11a   : > { %9350 = vst [vmem:[#allocation114_spill] sm:$0xff] %v6321_v19  ;;  %v922_v9 = vadd.f32 %v9351_v55, %v905_v15  ;;  %v6326_v30 = vmul.f32 %v9353_v8, %v9352_v16  ;;  %v6329_v2 = vadd.f32 %v9354_v45, %v1811_v7  ;;  %v1201_v34 = vadd.f32 %v1193_v48, %v1184_v17  ;;  %v9357_v46 = vld [vmem:[#allocation130_spill] sm:$0xff]  ;;  %v9360_v16 = vld [vmem:[#allocation8_spill] sm:$0xff]  ;;  %v9366_v52 = vld [vmem:[#allocation61_spill] sm:$0xff] }
 0x11b   : > { %v6335_v39 = vmul.f32 %v9323_v4, %v9356_v6  ;;  %v6339_v42 = vmul.f32 %v9358_v47, %v9357_v46  ;;  %v1251_v55 = vadd.f32 %v1243_v20, %v1234_v59  ;;  %v6344_v45 = vmul.f32 %v9360_v16, %v5587_v57  ;;  %v9363_v20 = vld [vmem:[#allocation54_spill] sm:$0xff]  ;;  %v9365_v47 = vld [vmem:[#allocation53_spill] sm:$0xff] }
 0x11c   : > { %9355 = vst [vmem:[#allocation15_spill] sm:$0xff] %v6329_v2  ;;  %v939_v15 = vadd.f32 %v931_v27, %v922_v9  ;;  %1835 = vadd.xlane.f32.xlu2 %v6329_v2  ;;  %v1218_v48 = vadd.f32 %v1210_v31, %v1201_v34  ;;  %v1244_v7 = vmul.f32 %v9345_v60, %v6015_v1  ;;  %v1282_v2 = vrot.slane %v6015_v1, 1  ;;  %v9364_v31 = vld [vmem:[#allocation11_spill] sm:$0xff] }
 0x11d   : > { %9359 = vst [vmem:[#allocation84_spill] sm:$0xff] %v6339_v42  ;;  %v965_v17 = vmul.f32 %v9280_v35, %v6321_v19  ;;  %v1261_v6 = vmul.f32 %v9349_v54, %v6036_v41  ;;  %v1268_v46 = vadd.f32 %v1260_v25, %v1251_v55  ;;  %v1355_v27 = vmul.f32 %v9363_v20, %v9362_v5  ;;  %v9367_v25 = vld [vmem:[#allocation55_spill] sm:$0xff]  ;;  %v9368_v5 = vld [vmem:[#allocation12_spill] sm:$0xff] }
 0x11e   : > { %9361 = vst [vmem:[#allocation116_spill] sm:$0xff] %v6344_v45  ;;  %v956_v9 = vadd.f32 %v948_v49, %v939_v15  ;;  %v1235_v59 = vadd.f32 %v1227_v28, %v1218_v48  ;;  %v1283_v57 = vrot.slane %v6036_v41, 1  ;;  %v1043_v34 = vmul.f32 %v9295_v53, %v9364_v31  ;;  %v9369_v48 = vld [vmem:[#allocation104_spill] sm:$0xff] }
 0x11f   : > { %v1302_v16 = vrot.slane %v6017_v21, 1  ;;  %v1303_v19 = vrot.slane %v6038_v26, 1  ;;  %v1346_v3 = vadd.f32 %v9365_v47, %v1268_v46  ;;  %v1372_v55 = vmul.f32 %v9367_v25, %v9366_v52  ;;  %v9370_v47 = vld [vmem:[#allocation62_spill] sm:$0xff]  ;;  %v9371_v46 = vld [vmem:[#allocation56_spill] sm:$0xff] }
 0x120   : > { %v749_v49 = vmul.f32 %v9368_v5, %v6060_v24  ;;  %v1252_v28 = vadd.f32 %v1244_v7, %v1235_v59  ;;  %v973_v15 = vadd.f32 %v965_v17, %v956_v9  ;;  %v1060_v4 = vmul.f32 %v9300_v51, %v9369_v48  ;;  %v9375_v9 = vld [vmem:[#allocation57_spill] sm:$0xff] }
 0x121   : > { %v766_v31 = vmul.f32 %v9149_v18, %v6077_v50  ;;  %v6371_v45 = vmul.f32 %v9332_v44, %v6149_v0  ;;  %v1363_v8 = vadd.f32 %v1355_v27, %v1346_v3  ;;  %v1389_v42 = vmul.f32 %v9371_v46, %v9370_v47  ;;  %v9374_v27 = vld [vmem:[#allocation63_spill] sm:$0xff]  ;;  %v9376_v48 = vld [vmem:[#allocation121_spill] sm:$0xff] }
 0x122   : > { %v6377_v53 = vmul.f32 %v9284_v40, %v6162_v36  ;;  %v1269_v24 = vadd.f32 %v1261_v6, %v1252_v28  ;;  %v1356_v7 = vmul.f32 %v9363_v20, %v9366_v52  ;;  %v1051_v17 = vadd.f32 %v1043_v34, %v973_v15  ;;  %v9378_v18 = vld [vmem:[#allocation65_spill] sm:$0xff] }
 0x123   : > { %v6383_v50 = vsel %vm1315_vm3, %v1282_v2, %v1302_v16  ;;  %v6387_v0 = vsel %vm1315_vm3, %v1283_v57, %v1303_v19  ;;  %v1380_v3 = vadd.f32 %v1372_v55, %v1363_v8  ;;  %v1406_v59 = vmul.f32 %v9375_v9, %v9374_v27  ;;  %v9377_v16 = vld [vmem:[#allocation64_spill] sm:$0xff]  ;;  %v6402_v55 = vld [vmem:[#allocation3 + $0xc8] sm:$0xff] }
 0x124   : > { %9372 = vst [vmem:[#allocation17_spill] sm:$0xff] %v6383_v50  ;;  %v1347_v36 = vadd.f32 %v9376_v48, %v1269_v24  ;;  %v1373_v6 = vmul.f32 %v9367_v25, %v9370_v47  ;;  %v1390_v34 = vmul.f32 %v9371_v46, %v9374_v27  ;;  %v1068_v28 = vadd.f32 %v1060_v4, %v1051_v17  ;;  %v6400_v8 = vld [vmem:[#allocation3 + $0xb8] sm:$0xff] }
 0x125   : > { %9373 = vst [vmem:[#allocation124_spill] sm:$0xff] %v6387_v0  ;;  %v1397_v15 = vadd.f32 %v1389_v42, %v1380_v3  ;;  %v1423_v2 = vmul.f32 %v9259_v10, %v9377_v16  ;;  %v993_v57 = vrot.slane %v6186_v38, 7  ;;  %v1013_v19 = vrot.slane %v6201_v23, 7 }
 0x126   : > { %v1364_v48 = vadd.f32 %v1356_v7, %v1347_v36  ;;  %v1407_v24 = vmul.f32 %v9375_v9, %v9377_v16  ;;  %v1424_v27 = vmul.f32 %v9259_v10, %v6383_v50  ;;  %v1085_v4 = vadd.f32 %v6304_v37, %v1068_v28 }
 0x127   : > { %v1462_v42 = vrot.slane %v6015_v1, 2  ;;  %v757_v17 = vadd.f32 %v749_v49, %v6238_v43  ;;  %v1414_v3 = vadd.f32 %v1406_v59, %v1397_v15  ;;  %v1440_v47 = vmul.f32 %v9260_v62, %v6383_v50 }
 0x128   : > { %v1381_v40 = vadd.f32 %v1373_v6, %v1364_v48  ;;  %v1102_v52 = vadd.f32 %v6313_v61, %v1085_v4  ;;  %v623_v7 = vrot.slane %v6400_v8, 5  ;;  %v643_v36 = vrot.slane %v6402_v55, 5 }
 0x129   : > { %v1463_v16 = vrot.slane %v6036_v41, 2  ;;  %v1431_v44 = vadd.f32 %v1423_v2, %v1414_v3  ;;  %v1518_v37 = vmul.f32 %v9267_v13, %v9378_v18  ;;  %v6421_v43 = vsel %vm1016_vm2, %v1013_v19, %v993_v57  ;;  %v9380_v2 = vld [vmem:[#allocation73_spill] sm:$0xff] }
 0x12a   : > { %9379 = vst [vmem:[#allocation42_spill] sm:$0xff] %v6421_v43  ;;  %v1398_v49 = vadd.f32 %v1390_v34, %v1381_v40  ;;  %v1482_v59 = vrot.slane %v6017_v21, 2  ;;  %v1483_v6 = vrot.slane %v6038_v26, 2  ;;  %v1119_v61 = vadd.f32 %v6326_v30, %v1102_v52  ;;  %v9381_v52 = vld [vmem:[#allocation74_spill] sm:$0xff] }
 0x12b   : > { %v1441_v28 = vmul.f32 %v9260_v62, %v6387_v0  ;;  %v774_v15 = vadd.f32 %v766_v31, %v757_v17  ;;  %v1448_v48 = vadd.f32 %v1440_v47, %v1431_v44  ;;  %v1535_v4 = vmul.f32 %v9268_v56, %v9380_v2 }
 0x12c   : > { %v1415_v18 = vadd.f32 %v1407_v24, %v1398_v49  ;;  %v1136_v3 = vadd.f32 %v6335_v39, %v1119_v61  ;;  %v1145_v40 = vmul.f32 %v9312_v63, %v6421_v43  ;;  %v666_v34 = vsel %vm656_vm0, %v643_v36, %v623_v7  ;;  %v9384_v24 = vld [vmem:[#allocation75_spill] sm:$0xff]  ;;  %v9385_v7 = vld [vmem:[#allocation76_spill] sm:$0xff] }
 0x12d   : > { %v1519_v30 = vmul.f32 %v9267_v13, %v9380_v2  ;;  %v1536_v57 = vmul.f32 %v9268_v56, %v9381_v52  ;;  %v1526_v31 = vadd.f32 %v1518_v37, %v1448_v48  ;;  %v1552_v44 = vmul.f32 %v9269_v29, %v9381_v52  ;;  %v9386_v48 = vld [vmem:[#allocation77_spill] sm:$0xff]  ;;  %v4844_v2 = vld [vmem:[#allocation3 + $0x70] sm:$0xff]  ;;  %v9388_v43 = vld [vmem:[#allocation72_spill] sm:$0xff] }
 0x12e   : > { %v1432_v47 = vadd.f32 %v1424_v27, %v1415_v18  ;;  %v6443_v39 = vsel %vm1495_vm4, %v1462_v42, %v1482_v59  ;;  %v6447_v19 = vsel %vm1495_vm4, %v1463_v16, %v1483_v6  ;;  %v1553_v17 = vmul.f32 %v9269_v29, %v9384_v24  ;;  %v9387_v6 = vld [vmem:[#allocation71_spill] sm:$0xff] }
 0x12f   : > { %9382 = vst [vmem:[#allocation118_spill] sm:$0xff] %v6443_v39  ;;  %v1570_v36 = vmul.f32 %v9270_v33, %v9385_v7  ;;  %v1543_v49 = vadd.f32 %v1535_v4, %v1526_v31  ;;  %v1569_v37 = vmul.f32 %v9270_v33, %v9384_v24  ;;  %v783_v27 = vmul.f32 %v9150_v22, %v666_v34  ;;  %v6466_v34 = vld [vmem:[#allocation3 + $0xf8] sm:$0xff] }
 0x130   : > { %9383 = vst [vmem:[#allocation18_spill] sm:$0xff] %v6447_v19  ;;  %v1449_v61 = vadd.f32 %v1441_v28, %v1432_v47  ;;  %v1587_v42 = vmul.f32 %v9271_v14, %v9386_v48  ;;  %v1153_v59 = vadd.f32 %v1145_v40, %v1136_v3  ;;  %v1162_v16 = vmul.f32 %v4844_v2, %v9320_v58  ;;  %v9390_v47 = vld [vmem:[#allocation46_spill] sm:$0xff]  ;;  %v6470_v40 = vld [vmem:[#allocation3 + $0x30] sm:$0xff] }
 0x131   : > { %v1604_v18 = vmul.f32 %v9387_v6, %v6443_v39  ;;  %v1621_v52 = vmul.f32 %v9388_v43, %v6447_v19  ;;  %v1560_v4 = vadd.f32 %v1552_v44, %v1543_v49  ;;  %v1586_v31 = vmul.f32 %v9271_v14, %v9385_v7  ;;  %9389 = vst [vmem:[#allocation126_spill] sm:$0xff] %v6466_v34  ;;  %v9392_v2 = vld [vmem:[#allocation47_spill] sm:$0xff]  ;;  %v9393_v19 = vld [vmem:[#allocation26_spill] sm:$0xff] }
 0x132   : > { %v1527_v24 = vadd.f32 %v1519_v30, %v1449_v61  ;;  %v1642_v28 = vrot.slane %v6015_v1, 3  ;;  %v1179_v3 = vmul.f32 %v6466_v34, %v9390_v47  ;;  %9391 = vst [vmem:[#allocation120_spill] sm:$0xff] %v6470_v40  ;;  %v1196_v0 = vmul.f32 %v6470_v40, %v9392_v2  ;;  %v9394_v7 = vld [vmem:[#allocation19_spill] sm:$0xff] }
 0x133   : > { %v1577_v50 = vadd.f32 %v1569_v37, %v1560_v4  ;;  %v1603_v44 = vmul.f32 %v9387_v6, %v9386_v48  ;;  %v791_v49 = vadd.f32 %v783_v27, %v774_v15  ;;  %v861_v30 = vmul.f32 %v9394_v7, %v9393_v19  ;;  %v9395_v37 = vld [vmem:[#allocation28_spill] sm:$0xff]  ;;  %v9397_v15 = vld [vmem:[#allocation83_spill] sm:$0xff]  ;;  %v9398_v27 = vld [vmem:[#allocation81_spill] sm:$0xff] }
 0x134   : > { %v1544_v61 = vadd.f32 %v1536_v57, %v1527_v24  ;;  %v1643_v1 = vrot.slane %v6036_v41, 3  ;;  %v1662_v14 = vrot.slane %v6017_v21, 3  ;;  %v1170_v33 = vadd.f32 %v1162_v16, %v1153_v59  ;;  %v9396_v4 = vld [vmem:[#allocation20_spill] sm:$0xff]  ;;  %v6487_v57 = vld [vmem:[#allocation3 + $0xc0] sm:$0xff]  ;;  %v9400_v59 = vld [vmem:[#allocation78_spill] sm:$0xff] }
 0x135   : > { %v1663_v34 = vrot.slane %v6038_v26, 3  ;;  %v1594_v22 = vadd.f32 %v1586_v31, %v1577_v50  ;;  %v1620_v40 = vmul.f32 %v9388_v43, %v6443_v39  ;;  %v878_v2 = vmul.f32 %v9396_v4, %v9395_v37  ;;  %9399 = vst [vmem:[#allocation127_spill] sm:$0xff] %v6487_v57  ;;  %v6493_v50 = vld [vmem:[#allocation3 + $0x68] sm:$0xff] }
 0x136   : > { %v1561_v48 = vadd.f32 %v1553_v17, %v1544_v61  ;;  %v1699_v6 = vmul.f32 %v9398_v27, %v9397_v15  ;;  %v1187_v19 = vadd.f32 %v1179_v3, %v1170_v33  ;;  %v1213_v21 = vmul.f32 %v6487_v57, %v9338_v11  ;;  %9401 = vst [vmem:[#allocation117_spill] sm:$0xff] %v6493_v50 }
 0x137   : > { %v1611_v24 = vadd.f32 %v1603_v44, %v1594_v22  ;;  %v1698_v26 = vmul.f32 %v9398_v27, %v9400_v59  ;;  %v1230_v16 = vmul.f32 %v6493_v50, %v9341_v12  ;;  %v869_v31 = vadd.f32 %v861_v30, %v791_v49  ;;  %v9403_v44 = vld [vmem:[#allocation86_spill] sm:$0xff]  ;;  %v9404_v27 = vld [vmem:[#allocation85_spill] sm:$0xff] }
 0x138   : > { %v1578_v17 = vadd.f32 %v1570_v36, %v1561_v48  ;;  %v1204_v61 = vadd.f32 %v1196_v0, %v1187_v19  ;;  %v805_v37 = vrot.slane %v6400_v8, 6  ;;  %v825_v33 = vrot.slane %v6402_v55, 6  ;;  %v6507_v36 = vld [vmem:[#allocation3 + $0x38] sm:$0xff]  ;;  %v9408_v30 = vld [vmem:[#allocation29_spill] sm:$0xff] }
 0x139   : > { %v6501_v3 = vsel %vm1675_vm5, %v1642_v28, %v1662_v14  ;;  %v1628_v22 = vadd.f32 %v1620_v40, %v1611_v24  ;;  %v1715_v59 = vmul.f32 %v9403_v44, %v9397_v15  ;;  %v886_v57 = vadd.f32 %v878_v2, %v869_v31  ;;  %9405 = vst [vmem:[#allocation119_spill] sm:$0xff] %v6507_v36  ;;  %v9407_v28 = vld [vmem:[#allocation90_spill] sm:$0xff]  ;;  %v9409_v24 = vld [vmem:[#allocation88_spill] sm:$0xff] }
 0x13a   : > { %9402 = vst [vmem:[#allocation95_spill] sm:$0xff] %v6501_v3  ;;  %v1595_v39 = vadd.f32 %v1587_v42, %v1578_v17  ;;  %v1716_v50 = vmul.f32 %v9403_v44, %v9404_v27  ;;  %v1221_v49 = vadd.f32 %v1213_v21, %v1204_v61  ;;  %v1247_v0 = vmul.f32 %v6507_v36, %v9345_v60 }
 0x13b   : > { %v6513_v48 = vsel %vm1675_vm5, %v1643_v1, %v1663_v34  ;;  %v1706_v14 = vadd.f32 %v1698_v26, %v1628_v22  ;;  %v1732_v40 = vmul.f32 %v9407_v28, %v9404_v27  ;;  %v903_v2 = vadd.f32 %v9408_v30, %v886_v57  ;;  %v9410_v1 = vld [vmem:[#allocation91_spill] sm:$0xff]  ;;  %v9412_v27 = vld [vmem:[#allocation97_spill] sm:$0xff] }
 0x13c   : > { %9406 = vst [vmem:[#allocation48_spill] sm:$0xff] %v6513_v48  ;;  %v1612_v42 = vadd.f32 %v1604_v18, %v1595_v39  ;;  %v1238_v15 = vadd.f32 %v1230_v16, %v1221_v49  ;;  %v1264_v19 = vmul.f32 %v9349_v54, %v6186_v38  ;;  %v846_v21 = vsel %vm836_vm1, %v825_v33, %v805_v37  ;;  %v9411_v26 = vld [vmem:[#allocation31_spill] sm:$0xff]  ;;  %v9414_v37 = vld [vmem:[#allocation92_spill] sm:$0xff] }
 0x13d   : > { %v1733_v31 = vmul.f32 %v9407_v28, %v9409_v24  ;;  %v1723_v17 = vadd.f32 %v1715_v59, %v1706_v14  ;;  %v1749_v34 = vmul.f32 %v9410_v1, %v9409_v24  ;;  %v920_v61 = vadd.f32 %v9411_v26, %v903_v2  ;;  %v9413_v57 = vld [vmem:[#allocation131_spill] sm:$0xff]  ;;  %v9415_v26 = vld [vmem:[#allocation5_spill] sm:$0xff] }
 0x13e   : > { %v1629_v22 = vadd.f32 %v1621_v52, %v1612_v42  ;;  %v1750_v39 = vmul.f32 %v9410_v1, %v9412_v27  ;;  %v1255_v18 = vadd.f32 %v1247_v0, %v1238_v15  ;;  %v1359_v16 = vmul.f32 %v9363_v20, %v9413_v57  ;;  %v9416_v0 = vld [vmem:[#allocation93_spill] sm:$0xff] }
 0x13f   : > { %v1740_v49 = vadd.f32 %v1732_v40, %v1723_v17  ;;  %v1766_v33 = vmul.f32 %v9414_v37, %v9412_v27  ;;  %v937_v30 = vadd.f32 %v6371_v45, %v920_v61  ;;  %v963_v59 = vmul.f32 %v9280_v35, %v846_v21  ;;  %v9417_v40 = vld [vmem:[#allocation39_spill] sm:$0xff]  ;;  %v9418_v17 = vld [vmem:[#allocation32_spill] sm:$0xff]  ;;  %v9422_v35 = vld [vmem:[#allocation41_spill] sm:$0xff] }
 0x140   : > { %v1707_v14 = vadd.f32 %v1699_v6, %v1629_v22  ;;  %v1272_v24 = vadd.f32 %v1264_v19, %v1255_v18  ;;  %v1292_v2 = vrot.slane %v6186_v38, 1  ;;  %v1312_v52 = vrot.slane %v6201_v23, 1  ;;  %v9419_v21 = vld [vmem:[#allocation84_spill] sm:$0xff] }
 0x141   : > { %v1757_v42 = vadd.f32 %v1749_v34, %v1740_v49  ;;  %v1783_v15 = vmul.f32 %v9416_v0, %v9415_v26  ;;  %v954_v57 = vadd.f32 %v6377_v53, %v937_v30  ;;  %v1041_v36 = vmul.f32 %v9418_v17, %v9417_v40  ;;  %v9420_v19 = vld [vmem:[#allocation132_spill] sm:$0xff]  ;;  %v9421_v34 = vld [vmem:[#allocation94_spill] sm:$0xff]  ;;  %v9423_v40 = vld [vmem:[#allocation133_spill] sm:$0xff] }
 0x142   : > { %v1724_v27 = vadd.f32 %v1716_v50, %v1707_v14  ;;  %v1767_v45 = vmul.f32 %v9414_v37, %v9415_v26  ;;  %v1350_v6 = vadd.f32 %v9419_v21, %v1272_v24  ;;  %v1376_v61 = vmul.f32 %v9367_v25, %v9420_v19  ;;  %v9430_v19 = vld [vmem:[#allocation43_spill] sm:$0xff] }
 0x143   : > { %v1774_v22 = vadd.f32 %v1766_v33, %v1757_v42  ;;  %v1800_v18 = vmul.f32 %v9421_v34, %v6501_v3  ;;  %v971_v49 = vadd.f32 %v963_v59, %v954_v57  ;;  %v1058_v53 = vmul.f32 %v9300_v51, %v9422_v35  ;;  %v9425_v33 = vld [vmem:[#allocation134_spill] sm:$0xff] }
 0x144   : > { %v1741_v30 = vadd.f32 %v1733_v31, %v1724_v27  ;;  %v1784_v50 = vmul.f32 %v9416_v0, %v6501_v3  ;;  %v1367_v14 = vadd.f32 %v1359_v16, %v1350_v6  ;;  %v1393_v26 = vmul.f32 %v9371_v46, %v9423_v40  ;;  %v6563_v16 = vld [vmem:[#allocation3 + $0x48] sm:$0xff]  ;;  %v6565_v6 = vld [vmem:[#allocation3 + $0x120] sm:$0xff] }
 0x145   : > { %v1791_v24 = vadd.f32 %v1783_v15, %v1774_v22  ;;  %v6557_v21 = vsel %vm1315_vm3, %v1292_v2, %v1312_v52  ;;  %v1410_v42 = vmul.f32 %v9375_v9, %v9425_v33  ;;  %v1049_v57 = vadd.f32 %v1041_v36, %v971_v49  ;;  %v9426_v15 = vld [vmem:[#allocation79_spill] sm:$0xff]  ;;  %v9427_v22 = vld [vmem:[#allocation38_spill] sm:$0xff] }
 0x146   : > { %9424 = vst [vmem:[#allocation128_spill] sm:$0xff] %v6557_v21  ;;  %v1758_v59 = vadd.f32 %v1750_v39, %v1741_v30  ;;  %v1384_v35 = vadd.f32 %v1376_v61, %v1367_v14  ;;  %v985_v27 = vrot.slane %v6400_v8, 7  ;;  %v1005_v31 = vrot.slane %v6402_v55, 7  ;;  %v9428_v39 = vld [vmem:[#allocation136_spill] sm:$0xff]  ;;  %v6576_v30 = vld [vmem:[%s4958_s17] ss:$0 sm:$0xff] }
 0x147   : > { %v1109_v40 = vmul.f32 %v9427_v22, %v9426_v15  ;;  %v1801_v2 = vmul.f32 %v9421_v34, %v6513_v48  ;;  %v1808_v52 = vadd.f32 %v1800_v18, %v1791_v24  ;;  %v1066_v33 = vadd.f32 %v1058_v53, %v1049_v57  ;;  %v9431_v24 = vld [vmem:[#allocation122_spill] sm:$0xff]  ;;  %v9432_v57 = vld [vmem:[#allocation116_spill] sm:$0xff] }
 0x148   : > { %v1775_v3 = vadd.f32 %v1767_v45, %v1758_v59  ;;  %v1401_v36 = vadd.f32 %v1393_v26, %v1384_v35  ;;  %v1427_v61 = vmul.f32 %v9259_v10, %v9428_v39  ;;  %v1444_v49 = vmul.f32 %v9260_v62, %v6557_v21  ;;  %v9433_v35 = vld [vmem:[#allocation89_spill] sm:$0xff] }
 0x149   : > { %v6579_v14 = vadd.f32 %v6576_v30, %v1808_v52  ;;  %v1083_v15 = vadd.f32 %v9430_v19, %v1066_v33  ;;  %v632_v22 = vrot.slane %v6563_v16, 5  ;;  %v652_v18 = vrot.slane %v6565_v6, 5  ;;  %v9434_v39 = vld [vmem:[#allocation137_spill] sm:$0xff]  ;;  %v9435_v52 = vld [vmem:[#allocation40_spill] sm:$0xff]  ;;  %v9437_v33 = vld [vmem:[#allocation14_spill] sm:$0xff] }
 0x14a   : > { %v1792_v53 = vadd.f32 %v1784_v50, %v1775_v3  ;;  %v1418_v45 = vadd.f32 %v1410_v42, %v1401_v36  ;;  %v1026_v26 = vsel %vm1016_vm2, %v1005_v31, %v985_v27  ;;  %v709_v59 = vadd.f32 %v9432_v57, %v9431_v24  ;;  %v9436_v19 = vld [vmem:[#allocation108_spill] sm:$0xff]  ;;  %v9438_v10 = vld [vmem:[#allocation45_spill] sm:$0xff]  ;;  %v9439_v36 = vld [vmem:[#allocation138_spill] sm:$0xff] }
 0x14b   : > { %9429 = vst [vmem:[#allocation129_spill] sm:$0xff] %v6579_v14  ;;  %v752_v21 = vmul.f32 %v9368_v5, %v9433_v35  ;;  %v1126_v48 = vmul.f32 %v9435_v52, %v9434_v39  ;;  %1829 = vadd.xlane.f32.xlu0 %v6579_v14  ;;  %v769_v62 = vmul.f32 %v9437_v33, %v9436_v19  ;;  %v9440_v31 = vld [vmem:[#allocation123_spill] sm:$0xff] }
 0x14c   : > { %v1100_v3 = vadd.f32 %v9438_v10, %v1083_v15  ;;  %v1809_v50 = vadd.f32 %v1801_v2, %v1792_v53  ;;  %v1435_v42 = vadd.f32 %v1427_v61, %v1418_v45  ;;  %v1522_v27 = vmul.f32 %v9267_v13, %v9439_v36  ;;  %v9441_v57 = vld [vmem:[#allocation139_spill] sm:$0xff]  ;;  %v9444_v45 = vld [vmem:[#allocation33_spill] sm:$0xff] }
 0x14d   : > { %v726_v24 = vadd.f32 %v9440_v31, %v709_v59  ;;  %v1539_v5 = vmul.f32 %v9268_v56, %v9441_v57  ;;  %v1143_v39 = vmul.f32 %v9312_v63, %v1026_v26  ;;  %v6604_v14 = vsel %vm656_vm0, %v652_v18, %v632_v22  ;;  %v9445_v59 = vld [vmem:[#allocation125_spill] sm:$0xff]  ;;  %v9448_v31 = vld [vmem:[#allocation16_spill] sm:$0xff] }
 0x14e   : > { %v1117_v35 = vadd.f32 %v1109_v40, %v1100_v3  ;;  %9442 = vst [vmem:[#allocation101_spill] sm:$0xff] %v6604_v14  ;;  %v6607_v33 = vadd.f32 %v6576_v30, %v1809_v50  ;;  %v1452_v10 = vadd.f32 %v1444_v49, %v1435_v42  ;;  %v1464_v2 = vrot.slane %v6400_v8, 2  ;;  %v9446_v3 = vld [vmem:[#allocation140_spill] sm:$0xff]  ;;  %v9452_v57 = vld [vmem:[#allocation113_spill] sm:$0xff] }
 0x14f   : > { %v1484_v61 = vrot.slane %v6402_v55, 2  ;;  %v1472_v15 = vrot.slane %v6186_v38, 2  ;;  %v1160_v40 = vmul.f32 %v9444_v45, %v9320_v58  ;;  %v743_v26 = vadd.f32 %v9445_v59, %v726_v24  ;;  %v9449_v59 = vld [vmem:[#allocation141_spill] sm:$0xff] }
 0x150   : > { %9443 = vst [vmem:[#allocation130_spill] sm:$0xff] %v6607_v33  ;;  %v1134_v53 = vadd.f32 %v1126_v48, %v1117_v35  ;;  %1831 = vadd.xlane.f32.xlu1 %v6607_v33  ;;  %v1492_v22 = vrot.slane %v6201_v23, 2  ;;  %v1530_v18 = vadd.f32 %v1522_v27, %v1452_v10  ;;  %v1556_v49 = vmul.f32 %v9269_v29, %v9446_v3  ;;  %v9447_v48 = vld [vmem:[#allocation37_spill] sm:$0xff]  ;;  %v9451_v10 = vld [vmem:[#allocation47_spill] sm:$0xff]  ;;  %v9453_v29 = vld [vmem:[#allocation96_spill] sm:$0xff] }
 0x151   : > { %v6621_v50 = vsel %vm1495_vm4, %v1464_v2, %v1484_v61  ;;  %v1177_v35 = vmul.f32 %v9447_v48, %v9390_v47  ;;  %v760_v36 = vadd.f32 %v752_v21, %v743_v26  ;;  %v786_v24 = vmul.f32 %v9448_v31, %v6604_v14  ;;  %v9450_v33 = vld [vmem:[#allocation69_spill] sm:$0xff]  ;;  %v9455_v61 = vld [vmem:[#allocation142_spill] sm:$0xff]  ;;  %v9460_v31 = vld [vmem:[#allocation71_spill] sm:$0xff] }
 0x152   : > { %v1151_v42 = vadd.f32 %v1143_v39, %v1134_v53  ;;  %v1547_v45 = vadd.f32 %v1539_v5, %v1530_v18  ;;  %v1573_v19 = vmul.f32 %v9450_v33, %v9449_v59  ;;  %v1194_v3 = vmul.f32 %v9452_v57, %v9451_v10  ;;  %v9456_v53 = vld [vmem:[#allocation70_spill] sm:$0xff]  ;;  %v9457_v18 = vld [vmem:[#allocation13_spill] sm:$0xff]  ;;  %v9462_v14 = vld [vmem:[#allocation23_spill] sm:$0xff] }
 0x153   : > { %v777_v58 = vadd.f32 %v769_v62, %v760_v36  ;;  %v864_v2 = vmul.f32 %v9394_v7, %v9453_v29  ;;  %v6635_v39 = vsel %vm1495_vm4, %v1472_v15, %v1492_v22  ;;  %v1590_v26 = vmul.f32 %v9456_v53, %v9455_v61  ;;  %v9459_v36 = vld [vmem:[#allocation143_spill] sm:$0xff]  ;;  %v9461_v7 = vld [vmem:[#allocation100_spill] sm:$0xff]  ;;  %v9474_v59 = vld [vmem:[#allocation114_spill] sm:$0xff] }
 0x154   : > { %v1168_v27 = vadd.f32 %v1160_v40, %v1151_v42  ;;  %9454 = vst [vmem:[#allocation59_spill] sm:$0xff] %v6635_v39  ;;  %v1564_v21 = vadd.f32 %v1556_v49, %v1547_v45  ;;  %v1211_v48 = vmul.f32 %v9457_v18, %v9338_v11  ;;  %v9458_v42 = vld [vmem:[#allocation98_spill] sm:$0xff]  ;;  %v1607_v29 = vmul.f32 %v9460_v31, %v9459_v36  ;;  %v9463_v49 = vld [vmem:[#allocation135_spill] sm:$0xff]  ;;  %v9472_v36 = vld [vmem:[#allocation52_spill] sm:$0xff] }
 0x155   : > { %v794_v40 = vadd.f32 %v786_v24, %v777_v58  ;;  %v881_v57 = vmul.f32 %v9396_v4, %v9458_v42  ;;  %v915_v15 = vmul.f32 %v9462_v14, %v9461_v7  ;;  %v1228_v45 = vmul.f32 %v9341_v12, %v9463_v49  ;;  %v9464_v24 = vld [vmem:[#allocation99_spill] sm:$0xff] }
 0x156   : > { %v1185_v5 = vadd.f32 %v1177_v35, %v1168_v27  ;;  %v1581_v62 = vadd.f32 %v1573_v19, %v1564_v21  ;;  %v1624_v27 = vmul.f32 %v9388_v43, %v6635_v39  ;;  %v1245_v58 = vmul.f32 %v9345_v60, %v6036_v41  ;;  %v9465_v19 = vld [vmem:[#allocation22_spill] sm:$0xff]  ;;  %v9471_v39 = vld [vmem:[#allocation61_spill] sm:$0xff] }
 0x157   : > { %v872_v61 = vadd.f32 %v864_v2, %v794_v40  ;;  %v898_v21 = vmul.f32 %v9465_v19, %v9464_v24  ;;  %v814_v4 = vrot.slane %v6563_v16, 6  ;;  %v834_v14 = vrot.slane %v6565_v6, 6  ;;  %v9467_v40 = vld [vmem:[#allocation81_spill] sm:$0xff] }
 0x158   : > { %v1202_v22 = vadd.f32 %v1194_v3, %v1185_v5  ;;  %v1598_v35 = vadd.f32 %v1590_v26, %v1581_v62  ;;  %v1652_v49 = vrot.slane %v6186_v38, 3  ;;  %v1672_v2 = vrot.slane %v6201_v23, 3  ;;  %v9466_v26 = vld [vmem:[#allocation21_spill] sm:$0xff] }
 0x159   : > { %v889_v3 = vadd.f32 %v881_v57, %v872_v61  ;;  %v1702_v62 = vmul.f32 %v9467_v40, %v9466_v26  ;;  %v1262_v41 = vmul.f32 %v9349_v54, %v6400_v8  ;;  %v1644_v24 = vrot.slane %v6400_v8, 3  ;;  %v9469_v19 = vld [vmem:[#allocation25_spill] sm:$0xff]  ;;  %v9470_v57 = vld [vmem:[#allocation24_spill] sm:$0xff]  ;;  %v9475_v54 = vld [vmem:[#allocation27_spill] sm:$0xff] }
 0x15a   : > { %v1219_v18 = vadd.f32 %v1211_v48, %v1202_v22  ;;  %v1615_v5 = vadd.f32 %v1607_v29, %v1598_v35  ;;  %v1664_v48 = vrot.slane %v6402_v55, 3  ;;  %v9468_v22 = vld [vmem:[#allocation102_spill] sm:$0xff]  ;;  %v1719_v29 = vmul.f32 %v9403_v44, %v9470_v57 }
 0x15b   : > { %v932_v42 = vmul.f32 %v9469_v19, %v9468_v22  ;;  %v906_v35 = vadd.f32 %v898_v21, %v889_v3  ;;  %v1340_v26 = vmul.f32 %v9472_v36, %v9471_v39  ;;  %v949_v19 = vmul.f32 %v9475_v54, %v9474_v59  ;;  %v9480_v54 = vld [vmem:[#allocation30_spill] sm:$0xff] }
 0x15c   : > { %v1236_v7 = vadd.f32 %v1228_v45, %v1219_v18  ;;  %v1632_v61 = vadd.f32 %v1624_v27, %v1615_v5  ;;  %v6673_v45 = vsel %vm1675_vm5, %v1644_v24, %v1664_v48  ;;  %v6677_v18 = vsel %vm836_vm1, %v834_v14, %v814_v4  ;;  %v9476_v5 = vld [vmem:[#allocation107_spill] sm:$0xff]  ;;  %v9479_v48 = vld [vmem:[#allocation109_spill] sm:$0xff] }
 0x15d   : > { %9473 = vst [vmem:[#allocation54_spill] sm:$0xff] %v6677_v18  ;;  %v1736_v22 = vmul.f32 %v9407_v28, %v9476_v5  ;;  %v923_v21 = vadd.f32 %v915_v15, %v906_v35  ;;  %v1753_v4 = vmul.f32 %v9410_v1, %v9479_v48  ;;  %v1284_v15 = vrot.slane %v6400_v8, 1  ;;  %v9485_v48 = vld [vmem:[#allocation111_spill] sm:$0xff]  ;;  %v9498_v5 = vld [vmem:[#allocation42_spill] sm:$0xff] }
 0x15e   : > { %v1253_v23 = vadd.f32 %v1245_v58, %v1236_v7  ;;  %v1710_v27 = vadd.f32 %v1702_v62, %v1632_v61  ;;  %v6685_v7 = vsel %vm1675_vm5, %v1652_v49, %v1672_v2  ;;  %v9478_v58 = vld [vmem:[#allocation62_spill] sm:$0xff]  ;;  %v966_v62 = vmul.f32 %v9480_v54, %v6677_v18  ;;  %v9481_v61 = vld [vmem:[#allocation112_spill] sm:$0xff]  ;;  %v9482_v49 = vld [vmem:[#allocation63_spill] sm:$0xff] }
 0x15f   : > { %9477 = vst [vmem:[#allocation11_spill] sm:$0xff] %v6685_v7  ;;  %v1357_v24 = vmul.f32 %v9363_v20, %v9478_v58  ;;  %v940_v14 = vadd.f32 %v932_v42, %v923_v21  ;;  %v1770_v59 = vmul.f32 %v9414_v37, %v9481_v61  ;;  %v1374_v2 = vmul.f32 %v9367_v25, %v9482_v49  ;;  %v9484_v21 = vld [vmem:[#allocation64_spill] sm:$0xff]  ;;  %v9489_v49 = vld [vmem:[#allocation35_spill] sm:$0xff] }
 0x160   : > { %v1270_v39 = vadd.f32 %v1262_v41, %v1253_v23  ;;  %v1727_v3 = vadd.f32 %v1719_v29, %v1710_v27  ;;  %v1304_v23 = vrot.slane %v6402_v55, 1  ;;  %v9483_v27 = vld [vmem:[#allocation104_spill] sm:$0xff]  ;;  %v1391_v54 = vmul.f32 %v9371_v46, %v9484_v21 }
 0x161   : > { %v957_v29 = vadd.f32 %v949_v19, %v940_v14  ;;  %v1044_v58 = vmul.f32 %v9418_v17, %v9483_v27  ;;  %v1787_v61 = vmul.f32 %v9416_v0, %v9485_v48  ;;  %v9487_v19 = vld [vmem:[#allocation17_spill] sm:$0xff]  ;;  %v9490_v27 = vld [vmem:[#allocation124_spill] sm:$0xff]  ;;  %v1014_v17 = vrot.slane %v6565_v6, 7 }
 0x162   : > { %v1348_v35 = vadd.f32 %v1340_v26, %v1270_v39  ;;  %v1744_v41 = vadd.f32 %v1736_v22, %v1727_v3  ;;  %v9486_v26 = vld [vmem:[#allocation105_spill] sm:$0xff]  ;;  %v1804_v22 = vmul.f32 %v9421_v34, %v6685_v7  ;;  %v1408_v3 = vmul.f32 %v9375_v9, %v9487_v19  ;;  %v9494_v7 = vld [vmem:[#allocation60_spill] sm:$0xff] }
 0x163   : > { %v974_v8 = vadd.f32 %v966_v62, %v957_v29  ;;  %v1061_v39 = vmul.f32 %v9300_v51, %v9486_v26  ;;  %v9491_v62 = vld [vmem:[#allocation58_spill] sm:$0xff]  ;;  %v994_v51 = vrot.slane %v6563_v16, 7 }
 0x164   : > { %v1365_v42 = vadd.f32 %v1357_v24, %v1348_v35  ;;  %v1761_v18 = vadd.f32 %v1753_v4, %v1744_v41  ;;  %v1325_v24 = vsel %vm1315_vm3, %v1284_v15, %v1304_v23  ;;  %v9488_v4 = vld [vmem:[#allocation106_spill] sm:$0xff]  ;;  %v1425_v29 = vmul.f32 %v9491_v62, %v9490_v27  ;;  %v9495_v23 = vld [vmem:[#allocation115_spill] sm:$0xff] }
 0x165   : > { %v1052_v35 = vadd.f32 %v1044_v58, %v974_v8  ;;  %v1078_v41 = vmul.f32 %v9489_v49, %v9488_v4  ;;  %v1442_v15 = vmul.f32 %v9494_v7, %v1325_v24  ;;  %v9496_v58 = vld [vmem:[#allocation38_spill] sm:$0xff]  ;;  %v9500_v24 = vld [vmem:[#allocation75_spill] sm:$0xff] }
 0x166   : > { %v1382_v55 = vadd.f32 %v1374_v2, %v1365_v42  ;;  %v1778_v14 = vadd.f32 %v1770_v59, %v1761_v18  ;;  %v9492_v2 = vld [vmem:[#allocation110_spill] sm:$0xff]  ;;  %v9493_v42 = vld [vmem:[#allocation36_spill] sm:$0xff]  ;;  %v1112_v8 = vmul.f32 %v9496_v58, %v9495_v23 }
 0x167   : > { %v1095_v26 = vmul.f32 %v9493_v42, %v9492_v2  ;;  %v1069_v59 = vadd.f32 %v1061_v39, %v1052_v35  ;;  %v9497_v27 = vld [vmem:[#allocation74_spill] sm:$0xff] }
 0x168   : > { %v1399_v21 = vadd.f32 %v1391_v54, %v1382_v55  ;;  %v1795_v19 = vadd.f32 %v1787_v61, %v1778_v14  ;;  %v1520_v54 = vmul.f32 %v9267_v13, %v9497_v27  ;;  %v6728_v55 = vsel %vm1016_vm2, %v1014_v17, %v994_v51  ;;  %v9501_v51 = vld [vmem:[#allocation76_spill] sm:$0xff] }
 0x169   : > { %v1086_v49 = vadd.f32 %v1078_v41, %v1069_v59  ;;  %v1129_v61 = vmul.f32 %v9435_v52, %v9498_v5  ;;  %v1146_v41 = vmul.f32 %v9312_v63, %v6728_v55  ;;  %v9502_v17 = vld [vmem:[#allocation68_spill] sm:$0xff] }
 0x16a   : > { %v1416_v18 = vadd.f32 %v1408_v3, %v1399_v21  ;;  %v1812_v4 = vadd.f32 %v1804_v22, %v1795_v19  ;;  %v1537_v22 = vmul.f32 %v9268_v56, %v9500_v24  ;;  %v1554_v21 = vmul.f32 %v9502_v17, %v9501_v51  ;;  %v9503_v59 = vld [vmem:[#allocation44_spill] sm:$0xff] }
 0x16b   : > { %v1103_v3 = vadd.f32 %v1095_v26, %v1086_v49  ;;  %v9505_v26 = vld [vmem:[#allocation77_spill] sm:$0xff] }
 0x16c   : > { %v1433_v48 = vadd.f32 %v1425_v29, %v1416_v18  ;;  %v6733_v39 = vadd.f32 %v6576_v30, %v1812_v4  ;;  %v9504_v18 = vld [vmem:[#allocation126_spill] sm:$0xff] }
 0x16d   : > { %v1120_v35 = vadd.f32 %v1112_v8, %v1103_v3  ;;  %v1163_v4 = vmul.f32 %v9504_v18, %v9503_v59  ;;  %v9507_v3 = vld [vmem:[#allocation118_spill] sm:$0xff] }
 0x16e   : > { %9499 = vst [vmem:[#allocation53_spill] sm:$0xff] %v6733_v39  ;;  %v1450_v14 = vadd.f32 %v1442_v15, %v1433_v48  ;;  %1837 = vadd.xlane.f32.xlu2 %v6733_v39  ;;  %v1571_v48 = vmul.f32 %v9450_v33, %v9505_v26  ;;  %v9506_v15 = vld [vmem:[#allocation120_spill] sm:$0xff]  ;;  %v1588_v39 = vmul.f32 %v9456_v53, %v9507_v3 }
 0x16f   : > { %v1137_v19 = vadd.f32 %v1129_v61, %v1120_v35  ;;  %v1180_v24 = vmul.f32 %v9506_v15, %v9390_v47  ;;  %v9509_v35 = vld [vmem:[#allocation18_spill] sm:$0xff] }
 0x170   : > { %v1528_v29 = vadd.f32 %v1520_v54, %v1450_v14  ;;  %v9508_v14 = vld [vmem:[#allocation127_spill] sm:$0xff]  ;;  %v1605_v18 = vmul.f32 %v9460_v31, %v9509_v35 }
 0x171   : > { %v1154_v49 = vadd.f32 %v1146_v41, %v1137_v19  ;;  %v1197_v51 = vmul.f32 %v9508_v14, %v9451_v10  ;;  %v1622_v19 = vmul.f32 %v9388_v43, %v6621_v50 }
 0x172   : > { %v1545_v27 = vadd.f32 %v1537_v22, %v1528_v29  ;;  %v9510_v29 = vld [vmem:[#allocation117_spill] sm:$0xff] }
 0x173   : > { %v1171_v54 = vadd.f32 %v1163_v4, %v1154_v49  ;;  %v1214_v26 = vmul.f32 %v9510_v29, %v9338_v11  ;;  %v9512_v49 = vld [vmem:[#allocation85_spill] sm:$0xff] }
 0x174   : > { %v1562_v8 = vadd.f32 %v1554_v21, %v1545_v27  ;;  %v9511_v27 = vld [vmem:[#allocation119_spill] sm:$0xff]  ;;  %v1700_v10 = vmul.f32 %v9467_v40, %v9512_v49 }
 0x175   : > { %v1188_v22 = vadd.f32 %v1180_v24, %v1171_v54  ;;  %v1231_v3 = vmul.f32 %v9511_v27, %v9341_v12  ;;  %v9513_v54 = vld [vmem:[#allocation88_spill] sm:$0xff] }
 0x176   : > { %v1579_v61 = vadd.f32 %v1571_v48, %v1562_v8  ;;  %v1248_v8 = vmul.f32 %v9345_v60, %v6186_v38  ;;  %v1717_v35 = vmul.f32 %v9403_v44, %v9513_v54  ;;  %v9521_v27 = vld [vmem:[#allocation48_spill] sm:$0xff] }
 0x177   : > { %v1205_v21 = vadd.f32 %v1197_v51, %v1188_v22  ;;  %v9515_v22 = vld [vmem:[#allocation97_spill] sm:$0xff] }
 0x178   : > { %v1596_v41 = vadd.f32 %v1588_v39, %v1579_v61  ;;  %v9514_v61 = vld [vmem:[#allocation51_spill] sm:$0xff]  ;;  %v1734_v12 = vmul.f32 %v9407_v28, %v9515_v22 }
 0x179   : > { %v1222_v48 = vadd.f32 %v1214_v26, %v1205_v21  ;;  %v1265_v50 = vmul.f32 %v9514_v61, %v6563_v16  ;;  %v9517_v21 = vld [vmem:[#allocation5_spill] sm:$0xff] }
 0x17a   : > { %v1613_v4 = vadd.f32 %v1605_v18, %v1596_v41  ;;  %v9516_v18 = vld [vmem:[#allocation131_spill] sm:$0xff]  ;;  %v1751_v38 = vmul.f32 %v9410_v1, %v9517_v21 }
 0x17b   : > { %v1239_v39 = vadd.f32 %v1231_v3, %v1222_v48  ;;  %v1343_v41 = vmul.f32 %v9472_v36, %v9516_v18  ;;  %v9519_v48 = vld [vmem:[#allocation95_spill] sm:$0xff] }
 0x17c   : > { %v1630_v24 = vadd.f32 %v1622_v19, %v1613_v4  ;;  %v9518_v4 = vld [vmem:[#allocation132_spill] sm:$0xff]  ;;  %v1768_v61 = vmul.f32 %v9414_v37, %v9519_v48 }
 0x17d   : > { %v1256_v49 = vadd.f32 %v1248_v8, %v1239_v39  ;;  %v1360_v54 = vmul.f32 %v9363_v20, %v9518_v4  ;;  %v1785_v8 = vmul.f32 %v9416_v0, %v9521_v27  ;;  %v1313_v39 = vrot.slane %v6565_v6, 1 }
 0x17e   : > { %v1708_v51 = vadd.f32 %v1700_v10, %v1630_v24  ;;  %v9520_v24 = vld [vmem:[#allocation133_spill] sm:$0xff] }
 0x17f   : > { %v1273_v19 = vadd.f32 %v1265_v50, %v1256_v49  ;;  %v1377_v22 = vmul.f32 %v9367_v25, %v9520_v24  ;;  %v1802_v49 = vmul.f32 %v9421_v34, %v6673_v45 }
 0x180   : > { %v1725_v26 = vadd.f32 %v1717_v35, %v1708_v51  ;;  %v1293_v35 = vrot.slane %v6563_v16, 1  ;;  %v9522_v51 = vld [vmem:[#allocation134_spill] sm:$0xff] }
 0x181   : > { %v1351_v10 = vadd.f32 %v1343_v41, %v1273_v19  ;;  %v1394_v18 = vmul.f32 %v9371_v46, %v9522_v51  ;;  %v9542_v46 = vld [vmem:[#allocation14_spill] sm:$0xff] }
 0x182   : > { %v1742_v3 = vadd.f32 %v1734_v12, %v1725_v26  ;;  %v9523_v26 = vld [vmem:[#allocation136_spill] sm:$0xff]  ;;  %v6792_v27 = vsel %vm1315_vm3, %v1293_v35, %v1313_v39  ;;  %v9530_v39 = vld [vmem:[#allocation87_spill] sm:$0xff] }
 0x183   : > { %v1368_v50 = vadd.f32 %v1360_v54, %v1351_v10  ;;  %v1411_v21 = vmul.f32 %v9375_v9, %v9523_v26  ;;  %9524 = vst [vmem:[#allocation55_spill] sm:$0xff] %v6792_v27 }
 0x184   : > { %v1759_v60 = vadd.f32 %v1751_v38, %v1742_v3  ;;  %v9525_v3 = vld [vmem:[#allocation128_spill] sm:$0xff] }
 0x185   : > { %v1385_v41 = vadd.f32 %v1377_v22, %v1368_v50  ;;  %v1428_v54 = vmul.f32 %v9491_v62, %v9525_v3  ;;  %v9528_v22 = vld [vmem:[#allocation8_spill] sm:$0xff]  ;;  %v4877_v62 = vmov 128.0  }
 0x186   : > { %v1776_v12 = vadd.f32 %v1768_v61, %v1759_v60  ;;  %v1445_v60 = vmul.f32 %v9494_v7, %v6792_v27  ;;  %v9527_v61 = vld [vmem:[#allocation82_spill] sm:$0xff]  ;;  %v9534_v7 = vld [vmem:[#allocation7_spill] sm:$0xff]  ;;  %4756 = vrcp.f32 %v4877_v62  ;;  %v9535_v27 = vld [vmem:[#allocation89_spill] sm:$0xff] }
 0x187   : > { %v1402_v19 = vadd.f32 %v1394_v18, %v1385_v41  ;;  %v702_v50 = vmul.f32 %v9528_v22, %v9527_v61  ;;  %v9531_v18 = vld [vmem:[#allocation9_spill] sm:$0xff]  ;;  %v9536_v61 = vld [vmem:[#allocation10_spill] sm:$0xff] }
 0x188   : > { %v1793_v38 = vadd.f32 %v1785_v8, %v1776_v12  ;;  %v9529_v12 = vld [vmem:[#allocation139_spill] sm:$0xff]  ;;  %v719_v41 = vmul.f32 %v9531_v18, %v9530_v39  ;;  %v9537_v22 = vld [vmem:[#allocation141_spill] sm:$0xff]  ;;  %v1473_v39 = vrot.slane %v6563_v16, 2  ;;  %v9539_v18 = vld [vmem:[#allocation12_spill] sm:$0xff] }
 0x189   : > { %v1419_v10 = vadd.f32 %v1411_v21, %v1402_v19  ;;  %v1523_v35 = vmul.f32 %v9267_v13, %v9529_v12  ;;  %v9532_v21 = vld [vmem:[#allocation140_spill] sm:$0xff]  ;;  %v1557_v12 = vmul.f32 %v9502_v17, %v9537_v22 }
 0x18a   : > { %v1810_v48 = vadd.f32 %v1802_v49, %v1793_v38  ;;  %v1540_v38 = vmul.f32 %v9268_v56, %v9532_v21  ;;  %v9533_v19 = vld [vmem:[#allocation80_spill] sm:$0xff]  ;;  %v9540_v21 = vld [vmem:[#allocation142_spill] sm:$0xff] }
 0x18b   : > { %v1436_v8 = vadd.f32 %v1428_v54, %v1419_v10  ;;  %v736_v54 = vmul.f32 %v9536_v61, %v9535_v27 }
 0x18c   : > { %v6799_v45 = vadd.f32 %v6576_v30, %v1810_v48  ;;  %v685_v48 = vmul.f32 %v9534_v7, %v9533_v19  ;;  %v1574_v7 = vmul.f32 %v9450_v33, %v9540_v21  ;;  %v9541_v19 = vld [vmem:[#allocation101_spill] sm:$0xff] }
 0x18d   : > { %v1453_v49 = vadd.f32 %v1445_v60, %v1436_v8  ;;  %v1493_v60 = vrot.slane %v6565_v6, 2  ;;  %v9538_v8 = vld [vmem:[#allocation108_spill] sm:$0xff]  ;;  %v770_v27 = vmul.f32 %v9542_v46, %v9541_v19 }
 0x18e   : > { %9526 = vst [vmem:[#allocation57_spill] sm:$0xff] %v6799_v45  ;;  %1833 = vadd.xlane.f32.xlu1 %v6799_v45  ;;  %v710_v13 = vadd.f32 %v702_v50, %v685_v48  ;;  %v753_v45 = vmul.f32 %v9539_v18, %v9538_v8  ;;  %v4757_v48 = vpop.eup %4756  ;;  %v9544_v8 = vld [vmem:[#allocation59_spill] sm:$0xff] }
 0x18f   : > { %v1531_v10 = vadd.f32 %v1523_v35, %v1453_v49  ;;  %v9543_v49 = vld [vmem:[#allocation143_spill] sm:$0xff]  ;;  %v6828_v17 = vsel %vm1495_vm4, %v1473_v39, %v1493_v60  ;;  %v1844_v18 = vmul.f32 128.0, %v4757_v48  ;;  %vm1848_vm6 = vweird.f32 %v4757_v48 }
 0x190   : > { %v727_v62 = vadd.f32 %v719_v41, %v710_v13  ;;  %v1591_v61 = vmul.f32 %v9456_v53, %v9543_v49  ;;  %v1625_v46 = vmul.f32 %v9388_v43, %v6828_v17  ;;  %v9545_v60 = vld [vmem:[#allocation107_spill] sm:$0xff] }
 0x191   : > { %v1548_v56 = vadd.f32 %v1540_v38, %v1531_v10  ;;  %v1608_v38 = vmul.f32 %v9460_v31, %v9544_v8  ;;  %v1845_v41 = vsub.f32 1.0, %v1844_v18  ;;  %v9547_v18 = vld [vmem:[#allocation112_spill] sm:$0xff] }
 0x192   : > { %v744_v50 = vadd.f32 %v736_v54, %v727_v62  ;;  %v1703_v54 = vmul.f32 %v9467_v40, %v9470_v57 }
 0x193   : > { %v1565_v35 = vadd.f32 %v1557_v12, %v1548_v56  ;;  %v1846_v62 = vmul.f32 %v4757_v48, %v1845_v41  ;;  %v9548_v41 = vld [vmem:[#allocation111_spill] sm:$0xff] }
 0x194   : > { %v761_v10 = vadd.f32 %v753_v45, %v744_v50  ;;  %v9546_v50 = vld [vmem:[#allocation109_spill] sm:$0xff] }
 0x195   : > { %v1582_v22 = vadd.f32 %v1574_v7, %v1565_v35  ;;  %v1720_v7 = vmul.f32 %v9403_v44, %v9545_v60  ;;  %v1847_v19 = vadd.f32 %v4757_v48, %v1846_v62  ;;  %v1828_v35 = vpop.xlane.xlu0 %1827 }
 0x196   : > { %v778_v56 = vadd.f32 %v770_v27, %v761_v10  ;;  %v1653_v27 = vrot.slane %v6563_v16, 3 }
 0x197   : > { %v1599_v13 = vadd.f32 %v1591_v61, %v1582_v22  ;;  %v1737_v22 = vmul.f32 %v9407_v28, %v9546_v50  ;;  %v6840_v61 = vsel %vm1848_vm6, %v4757_v48, %v1847_v19  ;;  %v6854_v48 = vld [vmem:[#allocation3 + $0x10] sm:$0xff]  ;;  %v9554_v28 = vld [vmem:[#allocation98_spill] sm:$0xff] }
 0x198   : > { %v1850_v57 = vmul.f32 %v6840_v61, %v1828_v35  ;;  %v653_v19 = vrot.slane %v6854_v48, 5 }
 0x199   : > { %v1616_v12 = vadd.f32 %v1608_v38, %v1599_v13  ;;  %v1673_v38 = vrot.slane %v6565_v6, 3  ;;  %v1754_v13 = vmul.f32 %v9410_v1, %v9547_v18  ;;  %v9556_v18 = vld [vmem:[#allocation100_spill] sm:$0xff] }
 0x19b   : > { %v1633_v39 = vadd.f32 %v1625_v46, %v1616_v12  ;;  %v1771_v12 = vmul.f32 %v9414_v37, %v9548_v41  ;;  %v6858_v6 = vsel %vm1675_vm5, %v1653_v27, %v1673_v38  ;;  %v9553_v27 = vld [vmem:[#allocation16_spill] sm:$0xff] }
 0x19c   : > { %9551 = vst [vmem:[#allocation65_spill] sm:$0xff] %v6858_v6 }
 0x19d   : > { %v1711_v45 = vadd.f32 %v1703_v54, %v1633_v39  ;;  %v9549_v54 = vld [vmem:[#allocation103_spill] sm:$0xff]  ;;  %v6852_v39 = vld [vmem:[#allocation3 + $0xa0] sm:$0xff] }
 0x19e   : > { %v6850_v62 = vsub.f32 %v9549_v54, %v1850_v57  ;;  %v1805_v54 = vmul.f32 %v9421_v34, %v6858_v6  ;;  %v9560_v34 = vld [vmem:[#allocation102_spill] sm:$0xff]  ;;  %v9561_v6 = vld [vmem:[#allocation23_spill] sm:$0xff] }
 0x19f   : > { %v1728_v10 = vadd.f32 %v1720_v7, %v1711_v45  ;;  %v633_v7 = vrot.slane %v6852_v39, 5  ;;  %v9552_v45 = vld [vmem:[#allocation11_spill] sm:$0xff]  ;;  %v916_v50 = vmul.f32 %v9561_v6, %v9560_v34  ;;  %v9566_v6 = vld [vmem:[#allocation30_spill] sm:$0xff] }
 0x1a0   : > { %9550 = vst [vmem:[#allocation121_spill] sm:$0xff] %v6850_v62  ;;  %v1866_v37 = vmul.f32 %v6850_v62, %v6850_v62 }
 0x1a1   : > { %v1745_v46 = vadd.f32 %v1737_v22, %v1728_v10  ;;  %v1788_v22 = vmul.f32 %v9416_v0, %v9552_v45  ;;  %v676_v57 = vsel %vm656_vm0, %v653_v19, %v633_v7  ;;  %v9557_v0 = vld [vmem:[#allocation22_spill] sm:$0xff]  ;;  %v9559_v19 = vld [vmem:[#allocation20_spill] sm:$0xff] }
 0x1a2   : > { %v787_v38 = vmul.f32 %v9553_v27, %v676_v57  ;;  %1874 = vadd.xlane.f32.xlu0 %v1866_v37  ;;  %v899_v45 = vmul.f32 %v9557_v0, %v9556_v18  ;;  %v9562_v37 = vld [vmem:[#allocation114_spill] sm:$0xff]  ;;  %v9565_v0 = vld [vmem:[#allocation27_spill] sm:$0xff] }
 0x1a3   : > { %v1762_v35 = vadd.f32 %v1754_v13, %v1745_v46  ;;  %v9555_v13 = vld [vmem:[#allocation19_spill] sm:$0xff] }
 0x1a4   : > { %v795_v41 = vadd.f32 %v787_v38, %v778_v56  ;;  %v865_v46 = vmul.f32 %v9555_v13, %v9554_v28  ;;  %v9563_v56 = vld [vmem:[#allocation25_spill] sm:$0xff] }
 0x1a5   : > { %v1779_v10 = vadd.f32 %v1771_v12, %v1762_v35  ;;  %v9558_v12 = vld [vmem:[#allocation99_spill] sm:$0xff]  ;;  %v933_v57 = vmul.f32 %v9563_v56, %v9562_v37  ;;  %v1096_v56 = vmul.f32 %v9493_v42, %v9495_v23 }
 0x1a6   : > { %v873_v7 = vadd.f32 %v865_v46, %v795_v41  ;;  %v882_v35 = vmul.f32 %v9559_v19, %v9558_v12  ;;  %v815_v41 = vrot.slane %v6852_v39, 6  ;;  %v9567_v46 = vld [vmem:[#allocation105_spill] sm:$0xff] }
 0x1a7   : > { %v1796_v1 = vadd.f32 %v1788_v22, %v1779_v10  ;;  %v9564_v10 = vld [vmem:[#allocation54_spill] sm:$0xff] }
 0x1a8   : > { %v890_v22 = vadd.f32 %v882_v35, %v873_v7  ;;  %v9568_v7 = vld [vmem:[#allocation32_spill] sm:$0xff] }
 0x1a9   : > { %v1813_v44 = vadd.f32 %v1805_v54, %v1796_v1  ;;  %v950_v1 = vmul.f32 %v9565_v0, %v9564_v10  ;;  %v835_v54 = vrot.slane %v6854_v48, 6  ;;  %v1045_v12 = vmul.f32 %v9568_v7, %v9567_v46  ;;  %v4851_v7 = vld [vmem:[#allocation3 + $0x8] sm:$0xff] }
 0x1aa   : > { %v907_v28 = vadd.f32 %v899_v45, %v890_v22  ;;  %v9569_v45 = vld [vmem:[#allocation35_spill] sm:$0xff]  ;;  %v9571_v22 = vld [vmem:[#allocation34_spill] sm:$0xff]  ;;  %v1130_v0 = vmul.f32 %v9435_v52, %v6728_v55  ;;  %v1181_v52 = vmul.f32 %v9508_v14, %v9390_v47 }
 0x1ab   : > { %v6880_v62 = vadd.f32 %v6576_v30, %v1813_v44  ;;  %v856_v44 = vsel %vm836_vm1, %v835_v54, %v815_v41  ;;  %v1079_v19 = vmul.f32 %v9569_v45, %v9492_v2  ;;  %v1015_v2 = vrot.slane %v6854_v48, 7 }
 0x1ac   : > { %v924_v18 = vadd.f32 %v916_v50, %v907_v28  ;;  %v967_v38 = vmul.f32 %v9566_v6, %v856_v44  ;;  %v9570_v50 = vld [vmem:[#allocation106_spill] sm:$0xff]  ;;  %v1113_v28 = vmul.f32 %v9496_v58, %v9498_v5  ;;  %v1164_v5 = vmul.f32 %v9506_v15, %v9503_v59  ;;  %v9572_v44 = vld [vmem:[#allocation47_spill] sm:$0xff] }
 0x1ad   : > { %1839 = vadd.xlane.f32.xlu2 %v6880_v62  ;;  %v1062_v37 = vmul.f32 %v9571_v22, %v9570_v50 }
 0x1ae   : > { %v941_v27 = vadd.f32 %v933_v57, %v924_v18  ;;  %v995_v18 = vrot.slane %v6852_v39, 7 }
 0x1b0   : > { %v958_v34 = vadd.f32 %v950_v1, %v941_v27  ;;  %v1036_v54 = vsel %vm1016_vm2, %v1015_v2, %v995_v18  ;;  %v9580_v2 = vld [vmem:[#allocation60_spill] sm:$0xff] }
 0x1b1   : > { %v1147_v42 = vmul.f32 %v9312_v63, %v1036_v54  ;;  %v9582_v54 = vld [vmem:[#allocation66_spill] sm:$0xff] }
 0x1b2   : > { %v975_v13 = vadd.f32 %v967_v38, %v958_v34  ;;  %v1198_v34 = vmul.f32 %v9510_v29, %v9572_v44  ;;  %v9573_v38 = vld [vmem:[#allocation119_spill] sm:$0xff]  ;;  %v1344_v29 = vmul.f32 %v9472_v36, %v9518_v4  ;;  %v1294_v36 = vrot.slane %v6852_v39, 1  ;;  %v9585_v44 = vld [vmem:[#allocation68_spill] sm:$0xff] }
 0x1b3   : > { %v1314_v4 = vrot.slane %v6854_v48, 1 }
 0x1b4   : > { %v1053_v35 = vadd.f32 %v1045_v12, %v975_v13  ;;  %v1215_v13 = vmul.f32 %v9573_v38, %v9338_v11  ;;  %v9574_v12 = vld [vmem:[#allocation49_spill] sm:$0xff]  ;;  %v1361_v11 = vmul.f32 %v9363_v20, %v9520_v24 }
 0x1b5   : > { %v1232_v63 = vmul.f32 %v4851_v7, %v9574_v12  ;;  %v1592_v12 = vmul.f32 %v9456_v53, %v9544_v8  ;;  %v9587_v53 = vld [vmem:[#allocation109_spill] sm:$0xff]  ;;  %v9588_v8 = vld [vmem:[#allocation86_spill] sm:$0xff] }
 0x1b6   : > { %v1070_v57 = vadd.f32 %v1062_v37, %v1053_v35  ;;  %v9576_v35 = vld [vmem:[#allocation51_spill] sm:$0xff]  ;;  %v1378_v37 = vmul.f32 %v9367_v25, %v9522_v51  ;;  %v1335_v25 = vsel %vm1315_vm3, %v1294_v36, %v1314_v4  ;;  %v1836_v4 = vpop.xlane.xlu2 %1835 }
 0x1b7   : > { %v1266_v47 = vmul.f32 %v9576_v35, %v6852_v39 }
 0x1b8   : > { %v1087_v10 = vadd.f32 %v1079_v19, %v1070_v57  ;;  %v9575_v19 = vld [vmem:[#allocation50_spill] sm:$0xff]  ;;  %v9577_v57 = vld [vmem:[#allocation56_spill] sm:$0xff] }
 0x1b9   : > { %v1249_v59 = vmul.f32 %v9575_v19, %v6563_v16  ;;  %v1609_v19 = vmul.f32 %v9460_v31, %v6828_v17  ;;  %v1654_v31 = vrot.slane %v6852_v39, 3  ;;  %v1674_v17 = vrot.slane %v6854_v48, 3 }
 0x1ba   : > { %v1104_v1 = vadd.f32 %v1096_v56, %v1087_v10  ;;  %v1412_v56 = vmul.f32 %v9375_v9, %v9525_v3  ;;  %v9578_v10 = vld [vmem:[#allocation55_spill] sm:$0xff]  ;;  %v1446_v9 = vmul.f32 %v9580_v2, %v1335_v25  ;;  %v1854_v25 = vmul.f32 %v6840_v61, %v1836_v4 }
 0x1bc   : > { %v1121_v41 = vadd.f32 %v1113_v28, %v1104_v1  ;;  %v1395_v28 = vmul.f32 %v9577_v57, %v9523_v26  ;;  %v9581_v26 = vld [vmem:[#allocation140_spill] sm:$0xff]  ;;  %v9593_v57 = vld [vmem:[#allocation11_spill] sm:$0xff] }
 0x1be   : > { %v1138_v27 = vadd.f32 %v1130_v0, %v1121_v41  ;;  %v9579_v0 = vld [vmem:[#allocation58_spill] sm:$0xff]  ;;  %v1830_v24 = vpop.xlane.xlu0 %1829 }
 0x1bf   : > { %v1429_v1 = vmul.f32 %v9579_v0, %v9578_v10  ;;  %v1851_v3 = vmul.f32 %v6840_v61, %v1830_v24 }
 0x1c0   : > { %v1155_v23 = vadd.f32 %v1147_v42, %v1138_v27  ;;  %v1524_v27 = vmul.f32 %v9582_v54, %v9581_v26  ;;  %v9599_v26 = vld [vmem:[#allocation130_spill] sm:$0xff] }
 0x1c2   : > { %v1172_v58 = vadd.f32 %v1164_v5, %v1155_v23  ;;  %v9583_v23 = vld [vmem:[#allocation141_spill] sm:$0xff]  ;;  %v9584_v5 = vld [vmem:[#allocation67_spill] sm:$0xff] }
 0x1c3   : > { %v1832_v10 = vpop.xlane.xlu1 %1831 }
 0x1c4   : > { %v1189_v55 = vadd.f32 %v1181_v52, %v1172_v58  ;;  %v1541_v58 = vmul.f32 %v9584_v5, %v9583_v23  ;;  %v1474_v52 = vrot.slane %v6852_v39, 2 }
 0x1c6   : > { %v1206_v6 = vadd.f32 %v1198_v34, %v1189_v55  ;;  %v1494_v55 = vrot.slane %v6854_v48, 2  ;;  %v1558_v34 = vmul.f32 %v9585_v44, %v9540_v21 }
 0x1c8   : > { %v1223_v46 = vadd.f32 %v1215_v13, %v1206_v6  ;;  %v9586_v6 = vld [vmem:[#allocation129_spill] sm:$0xff] }
 0x1c9   : > { %v6949_v38 = vsub.f32 %v9586_v6, %v1851_v3  ;;  %v9598_v3 = vld [vmem:[#allocation15_spill] sm:$0xff] }
 0x1ca   : > { %v1240_v45 = vadd.f32 %v1232_v63, %v1223_v46  ;;  %v1575_v46 = vmul.f32 %v9450_v33, %v9543_v49  ;;  %v1515_v63 = vsel %vm1495_vm4, %v1474_v52, %v1494_v55  ;;  %v1704_v33 = vmul.f32 %v9467_v40, %v9545_v60 }
 0x1cb   : > { %v1867_v21 = vmul.f32 %v6949_v38, %v6949_v38  ;;  %v1695_v60 = vsel %vm1675_vm5, %v1654_v31, %v1674_v17  ;;  %v4464_v17 = vld [vmem:[%s4977_s15 + $0xd0] sm:$0xf0] }
 0x1cc   : > { %v1257_v15 = vadd.f32 %v1249_v59, %v1240_v45 }
 0x1cd   : > { %1876 = vadd.xlane.f32.xlu1 %v1867_v21  ;;  %v4691_v21 = vld [vmem:[%s4977_s15 + $0xf4] sm:$0xf0] }
 0x1ce   : > { %v1274_v14 = vadd.f32 %v1266_v47, %v1257_v15  ;;  %v1626_v15 = vmul.f32 %v9388_v43, %v1515_v63  ;;  %v1721_v47 = vmul.f32 %v9588_v8, %v9587_v53  ;;  %v9592_v43 = vld [vmem:[#allocation91_spill] sm:$0xff] }
 0x1d0   : > { %v1352_v50 = vadd.f32 %v1344_v29, %v1274_v14  ;;  %v9589_v29 = vld [vmem:[#allocation112_spill] sm:$0xff] }
 0x1d2   : > { %v1369_v22 = vadd.f32 %v1361_v11, %v1352_v50  ;;  %v9590_v50 = vld [vmem:[#allocation90_spill] sm:$0xff] }
 0x1d3   : > { %v1738_v11 = vmul.f32 %v9590_v50, %v9589_v29  ;;  %v4462_v29 = vld [vmem:[%s4977_s15 + $0xc0] sm:$0xf]  ;;  %v4686_v50 = vld [vmem:[%s4977_s15 + $0xcc] sm:$0xf0] }
 0x1d4   : > { %v1386_v16 = vadd.f32 %v1378_v37, %v1369_v22  ;;  %v9591_v37 = vld [vmem:[#allocation111_spill] sm:$0xff]  ;;  %v4463_v31 = vor.u32 %v4686_v50, %v4462_v29 }
 0x1d6   : > { %v1403_v18 = vadd.f32 %v1395_v28, %v1386_v16  ;;  %v9594_v28 = vld [vmem:[#allocation92_spill] sm:$0xff] }
 0x1d7   : > { %v1772_v40 = vmul.f32 %v9594_v28, %v9593_v57  ;;  %v4472_v57 = vld [vmem:[%s4977_s15 + $0xd8] sm:$0xf0] }
 0x1d8   : > { %v1420_v20 = vadd.f32 %v1412_v56, %v1403_v18  ;;  %v1755_v56 = vmul.f32 %v9592_v43, %v9591_v37  ;;  %v9596_v18 = vld [vmem:[#allocation93_spill] sm:$0xff]  ;;  %v4687_v37 = vld [vmem:[%s4977_s15 + $0xd4] sm:$0xf0] }
 0x1da   : > { %v1437_v51 = vadd.f32 %v1429_v1, %v1420_v20  ;;  %v9595_v1 = vld [vmem:[#allocation65_spill] sm:$0xff]  ;;  %v9597_v20 = vld [vmem:[#allocation94_spill] sm:$0xff] }
 0x1db   : > { %v1789_v36 = vmul.f32 %v9596_v18, %v9595_v1  ;;  %v1806_v48 = vmul.f32 %v9597_v20, %v1695_v60  ;;  %v4446_v20 = vld [vmem:[%s4977_s15 + $0xa0] sm:$0xf] }
 0x1dc   : > { %v1454_v41 = vadd.f32 %v1446_v9, %v1437_v51  ;;  %v1852_v51 = vmul.f32 %v6840_v61, %v1832_v10 }
 0x1de   : > { %v1532_v42 = vadd.f32 %v1524_v27, %v1454_v41  ;;  %v6985_v41 = vsub.f32 %v9598_v3, %v1854_v25  ;;  %v6988_v54 = vsub.f32 %v9599_v26, %v1852_v51  ;;  %v4454_v3 = vld [vmem:[%s4977_s15 + $0xa8] sm:$0xf]  ;;  %v4683_v26 = vld [vmem:[%s4977_s15 + $0xb4] sm:$0xf0] }
 0x1e0   : > { %v1549_v13 = vadd.f32 %v1541_v58, %v1532_v42  ;;  %v1870_v52 = vmul.f32 %v6985_v41, %v6985_v41  ;;  %v1868_v55 = vmul.f32 %v6988_v54, %v6988_v54 }
 0x1e1   : > { %v1838_v42 = vpop.xlane.xlu2 %1837 }
 0x1e2   : > { %v1566_v7 = vadd.f32 %v1558_v34, %v1549_v13  ;;  %v1855_v5 = vmul.f32 %v6840_v61, %v1838_v42  ;;  %v9601_v34 = vld [vmem:[#allocation53_spill] sm:$0xff]  ;;  %1878 = vadd.xlane.f32.xlu1 %v1868_v55 }
 0x1e4   : > { %v1583_v45 = vadd.f32 %v1575_v46, %v1566_v7  ;;  %v7003_v6 = vsub.f32 %v9601_v34, %v1855_v5  ;;  %v4478_v46 = vld [vmem:[%s4977_s15 + $0xe0] sm:$0xf]  ;;  %v4690_v7 = vld [vmem:[%s4977_s15 + $0xec] sm:$0xf0]  ;;  %v4681_v5 = vld [vmem:[%s4977_s15 + $0xac] sm:$0xf] }
 0x1e5   : > { %v4479_v63 = vor.u32 %v4690_v7, %v4478_v46  ;;  %v4678_v34 = vld [vmem:[%s4977_s15 + $0x8c] sm:$0xf0]  ;;  %v4432_v46 = vld [vmem:[%s4977_s15 + $0x90] sm:$0xf0] }
 0x1e6   : > { %v1600_v59 = vadd.f32 %v1592_v12, %v1583_v45  ;;  %v1871_v13 = vmul.f32 %v7003_v6, %v7003_v6  ;;  %v4688_v12 = vld [vmem:[%s4977_s15 + $0xe4] sm:$0xf]  ;;  %v4480_v45 = vld [vmem:[%s4977_s15 + $0xf0] sm:$0xf0] }
 0x1e7   : > { %2224 = vmatpush.bf16.msra.mxu0 %v4479_v63 }
 0x1e8   : > { %v1617_v35 = vadd.f32 %v1609_v19, %v1600_v59  ;;  %v4486_v19 = vld [vmem:[%s4977_s15 + $0xe8] sm:$0xf]  ;;  %v4483_v59 = vor.u32 %v4688_v12, %v4480_v45 }
 0x1e9   : > { %v4438_v45 = vld [vmem:[%s4977_s15 + $0x88] sm:$0xf] }
 0x1ea   : > { %v1634_v49 = vadd.f32 %v1626_v15, %v1617_v35  ;;  %1884 = vadd.xlane.f32.xlu1 %v1871_v13  ;;  %v4487_v15 = vor.u32 %v4691_v21, %v4486_v19  ;;  %v4689_v35 = vld [vmem:[%s4977_s15 + $0xec] sm:$0xf]  ;;  %2253 = vmatpush.bf16.msra.mxu1 %v4483_v59  ;;  %v4676_v13 = vld [vmem:[%s4977_s15 + $0x84] sm:$0xf]  ;;  %v4679_v19 = vld [vmem:[%s4977_s15 + $0x94] sm:$0xf0] }
 0x1eb   : > { %2225 = vmatpush.bf16.msra.mxu0 %v4463_v31  ;;  %v4435_v63 = vor.u32 %v4676_v13, %v4432_v46  ;;  %v4677_v21 = vld [vmem:[%s4977_s15 + $0x8c] sm:$0xf]  ;;  %v4400_v46 = vld [vmem:[%s4977_s15 + $0x50] sm:$0xf0] }
 0x1ec   : > { %v1712_v14 = vadd.f32 %v1704_v33, %v1634_v49  ;;  %v4488_v33 = vld [vmem:[%s4977_s15 + $0xf8] sm:$0xf0]  ;;  %2282 = vmatpush.bf16.msra.mxu2 %v4487_v15 }
 0x1ed   : > { %v4491_v49 = vor.u32 %v4689_v35, %v4488_v33  ;;  %v4439_v35 = vor.u32 %v4679_v19, %v4438_v45  ;;  %v4440_v33 = vld [vmem:[%s4977_s15 + $0x98] sm:$0xf0] }
 0x1ee   : > { %v1729_v22 = vadd.f32 %v1721_v47, %v1712_v14 }
 0x1ef   : > { %2311 = vmatpush.bf16.msra.mxu3 %v4491_v49  ;;  %v4443_v49 = vor.u32 %v4677_v21, %v4440_v33  ;;  %v4408_v21 = vld [vmem:[%s4977_s15 + $0x58] sm:$0xf0] }
 0x1f0   : > { %v1746_v16 = vadd.f32 %v1738_v11, %v1729_v22  ;;  %v4684_v11 = vld [vmem:[%s4977_s15 + $0xc4] sm:$0xf]  ;;  %v4470_v22 = vld [vmem:[%s4977_s15 + $0xc8] sm:$0xf] }
 0x1f1   : > { %v4467_v43 = vor.u32 %v4684_v11, %v4464_v17 }
 0x1f2   : > { %v1763_v0 = vadd.f32 %v1755_v56, %v1746_v16  ;;  %v4471_v56 = vor.u32 %v4687_v37, %v4470_v22  ;;  %v4685_v16 = vld [vmem:[%s4977_s15 + $0xcc] sm:$0xf] }
 0x1f3   : > { %v4475_v28 = vor.u32 %v4685_v16, %v4472_v57  ;;  %2254 = vmatpush.bf16.msra.mxu1 %v4467_v43  ;;  %v4414_v57 = vld [vmem:[%s4977_s15 + $0x60] sm:$0xf] }
 0x1f4   : > { %v1780_v39 = vadd.f32 %v1772_v40, %v1763_v0  ;;  %2283 = vmatpush.bf16.msra.mxu2 %v4471_v56 }
 0x1f5   : > { %2312 = vmatpush.bf16.msra.mxu3 %v4475_v28  ;;  %v4674_v28 = vld [vmem:[%s4977_s15 + $0x6c] sm:$0xf0] }
 0x1f6   : > { %v1797_v24 = vadd.f32 %v1789_v36, %v1780_v39 }
 0x1f8   : > { %v1814_v2 = vadd.f32 %v1806_v48, %v1797_v24  ;;  %v4682_v48 = vld [vmem:[%s4977_s15 + $0xac] sm:$0xf0]  ;;  %v4680_v24 = vld [vmem:[%s4977_s15 + $0xa4] sm:$0xf] }
 0x1f9   : > { %v4447_v51 = vor.u32 %v4682_v48, %v4446_v20 }
 0x1fa   : > { %v6982_v9 = vadd.f32 %v6576_v30, %v1814_v2  ;;  %v9600_v30 = vld [vmem:[#allocation57_spill] sm:$0xff]  ;;  %v4448_v2 = vld [vmem:[%s4977_s15 + $0xb0] sm:$0xf0] }
 0x1fb   : > { %v4451_v42 = vor.u32 %v4680_v24, %v4448_v2  ;;  %2226 = vmatpush.bf16.msra.mxu0 %v4447_v51  ;;  %v4424_v51 = vld [vmem:[%s4977_s15 + $0x78] sm:$0xf0] }
 0x1fc   : > { %1841 = vadd.xlane.f32.xlu0 %v6982_v9 }
 0x1fd   : > { %2255 = vmatpush.bf16.msra.mxu1 %v4451_v42  ;;  %v4670_v42 = vld [vmem:[%s4977_s15 + $0x4c] sm:$0xf0] }
 0x201   : > { %v1834_v27 = vpop.xlane.xlu1 %1833  ;;  %2256 = vmatpush.bf16.msra.mxu1 %v4435_v63 }
 0x202   : > { %v1853_v23 = vmul.f32 %v6840_v61, %v1834_v27 }
 0x204   : > { %v6994_v58 = vsub.f32 %v9600_v30, %v1853_v23  ;;  %1882 = vadd.xlane.f32.xlu0 %v1870_v52  ;;  %v4455_v23 = vor.u32 %v4683_v26, %v4454_v3  ;;  %v4456_v30 = vld [vmem:[%s4977_s15 + $0xb8] sm:$0xf0]  ;;  %v4430_v52 = vld [vmem:[%s4977_s15 + $0x80] sm:$0xf] }
 0x205   : > { %v4431_v12 = vor.u32 %v4678_v34, %v4430_v52  ;;  %v9606_v52 = vld [vmem:[#allocation121_spill] sm:$0xff] }
 0x206   : > { %v1869_v44 = vmul.f32 %v6994_v58, %v6994_v58  ;;  %2284 = vmatpush.bf16.msra.mxu2 %v4455_v23  ;;  %v4668_v23 = vld [vmem:[%s4977_s15 + $0x44] sm:$0xf] }
 0x207   : > { %2227 = vmatpush.bf16.msra.mxu0 %v4431_v12  ;;  %v4671_v12 = vld [vmem:[%s4977_s15 + $0x54] sm:$0xf0]  ;;  %v4403_v19 = vor.u32 %v4668_v23, %v4400_v46  ;;  %v4661_v23 = vld [vmem:[%s4977_s15 + $0xc] sm:$0xf]  ;;  %v4376_v46 = vld [vmem:[%s4977_s15 + $0x18] sm:$0xf0] }
 0x208   : > { %1880 = vadd.xlane.f32.xlu2 %v1869_v44  ;;  %v4459_v44 = vor.u32 %v4681_v5, %v4456_v30  ;;  %v7116_v5 = vld [vmem:[%s456_s20] ss:$0 sm:$0xff] }
 0x20a   : > { %2313 = vmatpush.bf16.msra.mxu3 %v4459_v44  ;;  %2285 = vmatpush.bf16.msra.mxu2 %v4439_v35 }
 0x20e   : > { %2314 = vmatpush.bf16.msra.mxu3 %v4443_v49 }
 0x220   : > { %v1840_v53 = vpop.xlane.xlu2 %1839 }
 0x221   : > { %v1856_v8 = vmul.f32 %v6840_v61, %v1840_v53 }
 0x223   : > { %v7017_v47 = vsub.f32 %v6880_v62, %v1856_v8  ;;  %v1875_v62 = vpop.xlane.xlu0 %1874 }
 0x224   : > { %v1890_v40 = vmul.f32 %v1875_v62, %v6840_v61  ;;  %v4672_v62 = vld [vmem:[%s4977_s15 + $0x64] sm:$0xf] }
 0x225   : > { %v1872_v14 = vmul.f32 %v7017_v47, %v7017_v47 }
 0x226   : > { %v7031_v0 = vadd.f32 1e-06, %v1890_v40 }
 0x227   : > { %1886 = vadd.xlane.f32.xlu2 %v1872_v14 }
 0x228   : > { %4758 = vrsqrt.f32 %v7031_v0  ;;  %vm1912_vm8 = vweird.f32 %v7031_v0 }
 0x22e   : > { %v7037_v18 = vpop.eup %4758 }
 0x22f   : > { %v1907_v4 = vmul.f32 %v7037_v18, %v7031_v0  ;;  %vm1913_vm7 = vweird.f32 %v7037_v18  ;;  %v4422_v0 = vld [vmem:[%s4977_s15 + $0x68] sm:$0xf] }
 0x230   : > { %vm7080_vm9 = vmor %vm1912_vm8, %vm1913_vm7 }
 0x231   : > { %v1908_v25 = vmul.f32 %v7037_v18, %v1907_v4  ;;  %v4675_v4 = vld [vmem:[%s4977_s15 + $0x74] sm:$0xf0] }
 0x232   : > { %v4423_v24 = vor.u32 %v4675_v4, %v4422_v0  ;;  %v4366_v4 = vld [vmem:[%s4977_s15] sm:$0xf] }
 0x233   : > { %v1909_v59 = vmul.f32 0.5, %v1908_v25  ;;  %v4673_v25 = vld [vmem:[%s4977_s15 + $0x6c] sm:$0xf] }
 0x234   : > { %v4427_v2 = vor.u32 %v4673_v25, %v4424_v51  ;;  %2286 = vmatpush.bf16.msra.mxu2 %v4423_v24  ;;  %v4660_v51 = vld [vmem:[%s4977_s15 + $0x4] sm:$0xf] }
 0x235   : > { %v1910_v29 = vsub.f32 1.5, %v1909_v59 }
 0x236   : > { %2315 = vmatpush.bf16.msra.mxu3 %v4427_v2  ;;  %v4368_v2 = vld [vmem:[%s4977_s15 + $0x10] sm:$0xf0] }
 0x237   : > { %v1911_v43 = vmul.f32 %v7037_v18, %v1910_v29  ;;  %v7147_v29 = vld [vmem:[%s459_s23] ss:$0 sm:$0xff] }
 0x240   : > { %v1877_v60 = vpop.xlane.xlu1 %1876 }
 0x241   : > { %v1891_v10 = vmul.f32 %v1877_v60, %v6840_v61  ;;  %v4415_v60 = vor.u32 %v4674_v28, %v4414_v57 }
 0x243   : > { %v7033_v1 = vadd.f32 1e-06, %v1891_v10  ;;  %v4416_v10 = vld [vmem:[%s4977_s15 + $0x70] sm:$0xf0]  ;;  %2228 = vmatpush.bf16.msra.mxu0 %v4415_v60 }
 0x244   : > { %v4419_v48 = vor.u32 %v4672_v62, %v4416_v10  ;;  %v4665_v62 = vld [vmem:[%s4977_s15 + $0x2c] sm:$0xf] }
 0x245   : > { %4760 = vrsqrt.f32 %v7033_v1  ;;  %vm1922_vm10 = vweird.f32 %v7033_v1 }
 0x246   : > { %2257 = vmatpush.bf16.msra.mxu1 %v4419_v48 }
 0x24a   : > { %2258 = vmatpush.bf16.msra.mxu1 %v4403_v19 }
 0x24b   : > { %v7039_v36 = vpop.eup %4760 }
 0x24c   : > { %v1917_v39 = vmul.f32 %v7039_v36, %v7033_v1  ;;  %vm1923_vm11 = vweird.f32 %v7039_v36  ;;  %v1915_v1 = vsel %vm7080_vm9, %v7037_v18, %v1911_v43  ;;  %v4390_v43 = vld [vmem:[%s4977_s15 + $0x28] sm:$0xf] }
 0x24d   : > { %vm7097_vm12 = vmor %vm1922_vm10, %vm1923_vm11 }
 0x24e   : > { %v1918_v7 = vmul.f32 %v7039_v36, %v1917_v39 }
 0x250   : > { %v1919_v8 = vmul.f32 0.5, %v1918_v7  ;;  %v4406_v7 = vld [vmem:[%s4977_s15 + $0x48] sm:$0xf] }
 0x251   : > { %v4407_v35 = vor.u32 %v4671_v12, %v4406_v7  ;;  %v4379_v12 = vor.u32 %v4661_v23, %v4376_v46 }
 0x252   : > { %v1920_v22 = vsub.f32 1.5, %v1919_v8  ;;  %v4382_v8 = vld [vmem:[%s4977_s15 + $0x20] sm:$0xf] }
 0x253   : > { %2287 = vmatpush.bf16.msra.mxu2 %v4407_v35 }
 0x254   : > { %v1921_v40 = vmul.f32 %v7039_v36, %v1920_v22 }
 0x255   : > { %v1879_v14 = vpop.xlane.xlu1 %1878 }
 0x256   : > { %v1892_v11 = vmul.f32 %v1879_v14, %v6840_v61  ;;  %v1925_v44 = vsel %vm7097_vm12, %v7039_v36, %v1921_v40  ;;  %v4669_v36 = vld [vmem:[%s4977_s15 + $0x4c] sm:$0xf]  ;;  %v4666_v14 = vld [vmem:[%s4977_s15 + $0x2c] sm:$0xf0]  ;;  %v4392_v40 = vld [vmem:[%s4977_s15 + $0x38] sm:$0xf0] }
 0x257   : > { %v1987_v33 = vmul.f32 %v1925_v44, %v6949_v38  ;;  %v4383_v38 = vor.u32 %v4666_v14, %v4382_v8  ;;  %v4395_v0 = vor.u32 %v4665_v62, %v4392_v40 }
 0x258   : > { %v7072_v17 = vadd.f32 1e-06, %v1892_v11  ;;  %v4664_v11 = vld [vmem:[%s4977_s15 + $0x24] sm:$0xf] }
 0x259   : > { %v1999_v39 = vmul.f32 %v7116_v5, %v1987_v33 }
 0x25a   : > { %4762 = vrsqrt.f32 %v7072_v17  ;;  %vm1932_vm13 = vweird.f32 %v7072_v17 }
 0x25d   : > { %v1885_v3 = vpop.xlane.xlu1 %1884 }
 0x25e   : > { %v1895_v18 = vmul.f32 %v1885_v3, %v6840_v61 }
 0x260   : > { %v7105_v26 = vpop.eup %4762  ;;  %v7132_v45 = vadd.f32 1e-06, %v1895_v18  ;;  %v4371_v18 = vor.u32 %v4660_v51, %v4368_v2 }
 0x261   : > { %v1927_v34 = vmul.f32 %v7105_v26, %v7072_v17  ;;  %vm1933_vm14 = vweird.f32 %v7105_v26 }
 0x262   : > { %vm7170_vm1 = vmor %vm1932_vm13, %vm1933_vm14  ;;  %vm1962_vm3 = vweird.f32 %v7132_v45 }
 0x263   : > { %v1928_v59 = vmul.f32 %v7105_v26, %v1927_v34 }
 0x26f   : > { %v1842_v27 = vpop.xlane.xlu0 %1841 }
 0x270   : > { %v1857_v55 = vmul.f32 %v6840_v61, %v1842_v27  ;;  %v4398_v27 = vld [vmem:[%s4977_s15 + $0x40] sm:$0xf] }
 0x271   : > { %v4399_v13 = vor.u32 %v4670_v42, %v4398_v27  ;;  %v4374_v27 = vld [vmem:[%s4977_s15 + $0x8] sm:$0xf]  ;;  %v4663_v42 = vld [vmem:[%s4977_s15 + $0x14] sm:$0xf0] }
 0x272   : > { %v7064_v15 = vsub.f32 %v6982_v9, %v1857_v55  ;;  %v1986_v55 = vmul.f32 %v1915_v1, %v9606_v52  ;;  %v4662_v1 = vld [vmem:[%s4977_s15 + $0xc] sm:$0xf0] }
 0x273   : > { %2229 = vmatpush.bf16.msra.mxu0 %v4399_v13  ;;  %v4367_v25 = vor.u32 %v4662_v1, %v4366_v4  ;;  %v4375_v13 = vor.u32 %v4663_v42, %v4374_v27 }
 0x274   : > { %v1873_v53 = vmul.f32 %v7064_v15, %v7064_v15  ;;  %v1998_v16 = vmul.f32 %v7116_v5, %v1986_v55  ;;  %v2011_v55 = vadd.f32 %v7147_v29, %v1999_v39 }
 0x276   : > { %1888 = vadd.xlane.f32.xlu0 %v1873_v53  ;;  %v4411_v53 = vor.u32 %v4669_v36, %v4408_v21  ;;  %v2010_v52 = vadd.f32 %v7147_v29, %v1998_v16 }
 0x277   : > { %v1883_v31 = vpop.xlane.xlu0 %1882  ;;  %2230 = vmatpush.bf16.msra.mxu0 %v4383_v38 }
 0x278   : > { %v1894_v56 = vmul.f32 %v1883_v31, %v6840_v61  ;;  %2316 = vmatpush.bf16.msra.mxu3 %v4411_v53 }
 0x27a   : > { %v7101_v20 = vadd.f32 1e-06, %v1894_v56  ;;  %v4667_v56 = vld [vmem:[%s4977_s15 + $0x34] sm:$0xf0] }
 0x27b   : > { %v1881_v50 = vpop.xlane.xlu2 %1880  ;;  %v4391_v28 = vor.u32 %v4667_v56, %v4390_v43  ;;  %2231 = vmatpush.bf16.msra.mxu0 %v4367_v25 }
 0x27c   : > { %v1893_v9 = vmul.f32 %v1881_v50, %v6840_v61  ;;  %v1929_v50 = vmul.f32 0.5, %v1928_v59  ;;  %2317 = vmatpush.bf16.msra.mxu3 %v4395_v0  ;;  %vm1952_vm5 = vweird.f32 %v7101_v20 }
 0x27d   : > { %2288 = vmatpush.bf16.msra.mxu2 %v4391_v28 }
 0x27e   : > { %v7074_v37 = vadd.f32 1e-06, %v1893_v9  ;;  %v4384_v9 = vld [vmem:[%s4977_s15 + $0x30] sm:$0xf0]  ;;  %v1930_v57 = vsub.f32 1.5, %v1929_v50 }
 0x27f   : > { %v4387_v22 = vor.u32 %v4664_v11, %v4384_v9 }
 0x280   : > { %4764 = vrsqrt.f32 %v7074_v37  ;;  %vm1942_vm15 = vweird.f32 %v7074_v37  ;;  %v1931_v48 = vmul.f32 %v7105_v26, %v1930_v57  ;;  %2318 = vmatpush.bf16.msra.mxu3 %v4379_v12 }
 0x281   : > { %4766 = vrsqrt.f32 %v7101_v20  ;;  %2259 = vmatpush.bf16.msra.mxu1 %v4387_v22  ;;  %2289 = vmatpush.bf16.msra.mxu2 %v4375_v13 }
 0x282   : > { %4768 = vrsqrt.f32 %v7132_v45  ;;  %v1935_v19 = vsel %vm7170_vm1, %v7105_v26, %v1931_v48 }
 0x283   : > { %v1988_v59 = vmul.f32 %v1935_v19, %v6988_v54 }
 0x285   : > { %2260 = vmatpush.bf16.msra.mxu1 %v4371_v18  ;;  %v2000_v26 = vmul.f32 %v7116_v5, %v1988_v59 }
 0x286   : > { %v7118_v30 = vpop.eup %4764 }
 0x287   : > { %v1937_v63 = vmul.f32 %v7118_v30, %v7074_v37  ;;  %v7158_v60 = vpop.eup %4766  ;;  %vm1943_vm0 = vweird.f32 %v7118_v30 }
 0x288   : > { %v4769_v3 = vpop.eup %4768  ;;  %v1947_v44 = vmul.f32 %v7158_v60, %v7101_v20  ;;  %vm7190_vm2 = vmor %vm1942_vm15, %vm1943_vm0  ;;  %vm1953_vm6 = vweird.f32 %v7158_v60 }
 0x289   : > { %v1938_v49 = vmul.f32 %v7118_v30, %v1937_v63  ;;  %v1957_v34 = vmul.f32 %v4769_v3, %v7132_v45  ;;  %v2018_v63 = vpack.c.bf16 %v2011_v55, %v2010_v52  ;;  %vm1963_vm4 = vweird.f32 %v4769_v3  ;;  %vm1954_vm8 = vmor %vm1952_vm5, %vm1953_vm6 }
 0x28a   : > { %v1948_v37 = vmul.f32 %v7158_v60, %v1947_v44  ;;  %vm1964_vm7 = vmor %vm1962_vm3, %vm1963_vm4  ;;  %v2054_v44 = vld [vmem:[%s4983_s18] sm:$0xf] }
 0x28b   : > { %v1939_v31 = vmul.f32 0.5, %v1938_v49  ;;  %v1958_v36 = vmul.f32 %v4769_v3, %v1957_v34  ;;  %2232 = vmatmul.bf16.vlgmr.msra.gmra.mxu0 %v2018_v63  ;;  %2261 = vmatmul.bf16.vlgmr.msra.gmra.mxu1 %v2018_v63  ;;  %v7227_v13 = vperm.slane %v2054_v44, 0  ;;  %v7245_v19 = vperm.slane %v2054_v44, 2 }
 0x28c   : > { %2290 = vmatmul.bf16.vlgmr.msra.gmra.mxu2 %v2018_v63  ;;  %2319 = vmatmul.bf16.vlgmr.msra.gmra.mxu3 %v2018_v63  ;;  %v1949_v49 = vmul.f32 0.5, %v1948_v37 }
 0x28d   : > { %v1940_v10 = vsub.f32 1.5, %v1939_v31  ;;  %v1959_v35 = vmul.f32 0.5, %v1958_v36  ;;  %9611 = vst [vmem:[#allocation73_spill] sm:$0xff] %v7227_v13 }
 0x28e   : > { %v1950_v14 = vsub.f32 1.5, %v1949_v49  ;;  %9613 = vst [vmem:[#allocation46_spill] sm:$0xff] %v7245_v19 }
 0x28f   : > { %v1941_v17 = vmul.f32 %v7118_v30, %v1940_v10  ;;  %v1960_v53 = vsub.f32 1.5, %v1959_v35 }
 0x290   : > { %v1951_v50 = vmul.f32 %v7158_v60, %v1950_v14 }
 0x291   : > { %v1945_v21 = vsel %vm7190_vm2, %v7118_v30, %v1941_v17  ;;  %v2012_v30 = vadd.f32 %v7147_v29, %v2000_v26  ;;  %v1961_v54 = vmul.f32 %v4769_v3, %v1960_v53 }
 0x292   : > { %v1989_v33 = vmul.f32 %v1945_v21, %v6994_v58  ;;  %v1955_v9 = vsel %vm1954_vm8, %v7158_v60, %v1951_v50  ;;  %v7249_v21 = vperm.slane %v2054_v44, 3 }
 0x293   : > { %v1965_v11 = vsel %vm1964_vm7, %v4769_v3, %v1961_v54  ;;  %v1990_v20 = vmul.f32 %v1955_v9, %v6985_v41 }
 0x294   : > { %v2001_v8 = vmul.f32 %v7116_v5, %v1989_v33  ;;  %v1991_v45 = vmul.f32 %v1965_v11, %v7003_v6  ;;  %9614 = vst [vmem:[#allocation26_spill] sm:$0xff] %v7249_v21 }
 0x295   : > { %v2002_v22 = vmul.f32 %v7116_v5, %v1990_v20 }
 0x296   : > { %v2013_v58 = vadd.f32 %v7147_v29, %v2001_v8  ;;  %v2003_v31 = vmul.f32 %v7116_v5, %v1991_v45 }
 0x297   : > { %v2014_v56 = vadd.f32 %v7147_v29, %v2002_v22 }
 0x298   : > { %v2019_v38 = vpack.c.bf16 %v2013_v58, %v2012_v30  ;;  %v2015_v43 = vadd.f32 %v7147_v29, %v2003_v31 }
 0x29a   : > { %v2020_v16 = vpack.c.bf16 %v2015_v43, %v2014_v56  ;;  %v1887_v57 = vpop.xlane.xlu2 %1886 }
 0x29b   : > { %2237 = vmatmul.bf16.gmra.mxu0 %v2019_v38  ;;  %2266 = vmatmul.bf16.gmra.mxu1 %v2019_v38  ;;  %v1896_v6 = vmul.f32 %v1887_v57, %v6840_v61 }
 0x29c   : > { %2295 = vmatmul.bf16.gmra.mxu2 %v2019_v38  ;;  %2324 = vmatmul.bf16.gmra.mxu3 %v2019_v38 }
 0x29d   : > { %v1904_v28 = vadd.f32 1e-06, %v1896_v6 }
 0x29f   : > { %4770 = vrsqrt.f32 %v1904_v28  ;;  %vm1972_vm9 = vweird.f32 %v1904_v28 }
 0x2a5   : > { %v4771_v62 = vpop.eup %4770 }
 0x2a6   : > { %v1967_v41 = vmul.f32 %v4771_v62, %v1904_v28  ;;  %vm1973_vm10 = vweird.f32 %v4771_v62 }
 0x2a7   : > { %vm1974_vm11 = vmor %vm1972_vm9, %vm1973_vm10 }
 0x2a8   : > { %v1968_v40 = vmul.f32 %v4771_v62, %v1967_v41 }
 0x2aa   : > { %v1969_v4 = vmul.f32 0.5, %v1968_v40 }
 0x2ab   : > { %2242 = vmatmul.bf16.gmra.mxu0 %v2020_v16  ;;  %2271 = vmatmul.bf16.gmra.mxu1 %v2020_v16 }
 0x2ac   : > { %2300 = vmatmul.bf16.gmra.mxu2 %v2020_v16  ;;  %2329 = vmatmul.bf16.gmra.mxu3 %v2020_v16  ;;  %v1970_v1 = vsub.f32 1.5, %v1969_v4 }
 0x2ae   : > { %v1971_v48 = vmul.f32 %v4771_v62, %v1970_v1 }
 0x2b0   : > { %v1975_v51 = vsel %vm1974_vm11, %v4771_v62, %v1971_v48 }
 0x2b1   : > { %v1992_v18 = vmul.f32 %v1975_v51, %v7017_v47  ;;  %v7229_v47 = vperm.slane %v2054_v44, 1 }
 0x2b3   : > { %v2004_v23 = vmul.f32 %v7116_v5, %v1992_v18  ;;  %9612 = vst [vmem:[#allocation72_spill] sm:$0xff] %v7229_v47 }
 0x2b5   : > { %v2016_v55 = vadd.f32 %v7147_v29, %v2004_v23 }
 0x2e9   : > { %v1889_v60 = vpop.xlane.xlu0 %1888 }
 0x2ea   : > { %v1897_v10 = vmul.f32 %v1889_v60, %v6840_v61 }
 0x2ec   : > { %v1905_v0 = vadd.f32 1e-06, %v1897_v10 }
 0x2ee   : > { %4772 = vrsqrt.f32 %v1905_v0  ;;  %vm1982_vm13 = vweird.f32 %v1905_v0 }
 0x2f4   : > { %v4773_v39 = vpop.eup %4772 }
 0x2f5   : > { %v1977_v24 = vmul.f32 %v4773_v39, %v1905_v0  ;;  %vm1983_vm12 = vweird.f32 %v4773_v39 }
 0x2f6   : > { %vm1984_vm14 = vmor %vm1982_vm13, %vm1983_vm12 }
 0x2f7   : > { %v1978_v25 = vmul.f32 %v4773_v39, %v1977_v24 }
 0x2f9   : > { %v1979_v2 = vmul.f32 0.5, %v1978_v25 }
 0x2fb   : > { %v1980_v3 = vsub.f32 1.5, %v1979_v2 }
 0x2fd   : > { %v1981_v27 = vmul.f32 %v4773_v39, %v1980_v3 }
 0x2ff   : > { %v1985_v61 = vsel %vm1984_vm14, %v4773_v39, %v1981_v27 }
 0x300   : > { %v1993_v42 = vmul.f32 %v1985_v61, %v7064_v15 }
 0x302   : > { %v2005_v52 = vmul.f32 %v7116_v5, %v1993_v42 }
 0x304   : > { %v2017_v17 = vadd.f32 %v7147_v29, %v2005_v52 }
 0x306   : > { %v2021_v34 = vpack.c.bf16 %v2017_v17, %v2016_v55 }
 0x308   : > { %2247 = vmatmul.bf16.gmra.mxu0 %v2021_v34  ;;  %2276 = vmatmul.bf16.gmra.mxu1 %v2021_v34  ;;  %v2233_v46 = vpop.f32.mrf.mxu0  ;;  %v2262_v7 = vpop.f32.mrf.mxu1 }
 0x309   : > { %2305 = vmatmul.bf16.gmra.mxu2 %v2021_v34  ;;  %2334 = vmatmul.bf16.gmra.mxu3 %v2021_v34  ;;  %v7232_v15 = vadd.f32 %v2233_v46, %v7227_v13  ;;  %v7235_v5 = vadd.f32 %v2262_v7, %v7229_v47 }
 0x30b   : > { %v7238_v29 = vmul.f32 0.70710677, %v7232_v15  ;;  %v7241_v12 = vmul.f32 0.70710677, %v7235_v5 }
 0x30d   : > { %v2404_v63 = vmul.f32 %v7238_v29, %v7238_v29  ;;  %v2444_v36 = vmul.f32 %v7241_v12, %v7241_v12 }
 0x30f   : > { %v7251_v37 = vmin.f32 %v2404_v63, 16.0  ;;  %v7253_v59 = vmin.f32 %v2444_v36, 16.0  ;;  %v2291_v35 = vpop.f32.mrf.mxu2  ;;  %v2320_v53 = vpop.f32.mrf.mxu3 }
 0x310   : > { %v7258_v26 = vadd.f32 %v2291_v35, %v7245_v19  ;;  %v7263_v30 = vadd.f32 %v2320_v53, %v7249_v21  ;;  %v2235_v62 = vpop.f32.mrf.mxu0 }
 0x311   : > { %v2406_v33 = vmul.f32 2.1237322e-06, %v7251_v37  ;;  %v2417_v49 = vmul.f32 3.8918573e-05, %v7251_v37  ;;  %v2446_v8 = vmul.f32 2.1237322e-06, %v7253_v59  ;;  %v2236_v48 = vadd.f32 %v2235_v62, %v7227_v13 }
 0x312   : > { %v2457_v14 = vmul.f32 3.8918573e-05, %v7253_v59  ;;  %v7266_v38 = vmul.f32 0.70710677, %v7258_v26  ;;  %v7270_v9 = vmul.f32 0.70710677, %v7263_v30 }
 0x313   : > { %v2407_v54 = vadd.f32 0.00028619796, %v2406_v33  ;;  %v2418_v58 = vadd.f32 0.001143296, %v2417_v49  ;;  %v2447_v20 = vadd.f32 0.00028619796, %v2446_v8 }
 0x314   : > { %v2458_v50 = vadd.f32 0.001143296, %v2457_v14  ;;  %v2484_v22 = vmul.f32 %v7266_v38, %v7266_v38  ;;  %v2524_v56 = vmul.f32 %v7270_v9, %v7270_v9  ;;  %v7294_v55 = vmul.f32 0.70710677, %v2236_v48 }
 0x315   : > { %v2419_v11 = vmul.f32 %v2418_v58, %v7251_v37  ;;  %v2408_v45 = vmul.f32 %v2407_v54, %v7251_v37  ;;  %v2448_v40 = vmul.f32 %v2447_v20, %v7253_v59 }
 0x316   : > { %v2459_v31 = vmul.f32 %v2458_v50, %v7253_v59  ;;  %v7278_v57 = vmin.f32 %v2484_v22, 16.0  ;;  %v7281_v28 = vmin.f32 %v2524_v56, 16.0  ;;  %v2564_v8 = vmul.f32 %v7294_v55, %v7294_v55 }
 0x317   : > { %v2420_v43 = vadd.f32 0.014752088, %v2419_v11  ;;  %v2409_v41 = vadd.f32 0.0036580483, %v2408_v45  ;;  %v2449_v2 = vadd.f32 0.0036580483, %v2448_v40  ;;  %v2264_v11 = vpop.f32.mrf.mxu1 }
 0x318   : > { %v2460_v16 = vadd.f32 0.014752088, %v2459_v31  ;;  %v2497_v10 = vmul.f32 3.8918573e-05, %v7278_v57  ;;  %v2486_v4 = vmul.f32 2.1237322e-06, %v7278_v57 }
 0x319   : > { %v2421_v6 = vmul.f32 %v2420_v43, %v7251_v37  ;;  %v2526_v39 = vmul.f32 2.1237322e-06, %v7281_v28  ;;  %v2410_v51 = vmul.f32 %v2409_v41, %v7251_v37  ;;  %v2537_v18 = vmul.f32 3.8918573e-05, %v7281_v28 }
 0x31a   : > { %v2461_v60 = vmul.f32 %v2460_v16, %v7253_v59  ;;  %v2498_v25 = vadd.f32 0.001143296, %v2497_v10  ;;  %v2487_v61 = vadd.f32 0.00028619796, %v2486_v4  ;;  %v2450_v46 = vmul.f32 %v2449_v2, %v7253_v59 }
 0x31b   : > { %v2422_v0 = vadd.f32 0.112945676, %v2421_v6  ;;  %v2527_v52 = vadd.f32 0.00028619796, %v2526_v39  ;;  %v2411_v34 = vadd.f32 0.05243302, %v2410_v51  ;;  %v2265_v6 = vadd.f32 %v2264_v11, %v7229_v47 }
 0x31c   : > { %v2462_v1 = vadd.f32 0.112945676, %v2461_v60  ;;  %v2499_v42 = vmul.f32 %v2498_v25, %v7278_v57  ;;  %v2538_v63 = vadd.f32 0.001143296, %v2537_v18  ;;  %v2488_v35 = vmul.f32 %v2487_v61, %v7278_v57 }
 0x31d   : > { %v2423_v24 = vmul.f32 %v2422_v0, %v7251_v37  ;;  %v2528_v53 = vmul.f32 %v2527_v52, %v7281_v28  ;;  %v2412_v54 = vmul.f32 %v2411_v34, %v7251_v37  ;;  %v2451_v58 = vadd.f32 0.05243302, %v2450_v46  ;;  %v2293_v46 = vpop.f32.mrf.mxu2 }
 0x31e   : > { %v2463_v3 = vmul.f32 %v2462_v1, %v7253_v59  ;;  %v2500_v44 = vadd.f32 0.014752088, %v2499_v42  ;;  %v2539_v14 = vmul.f32 %v2538_v63, %v7281_v28  ;;  %v2489_v50 = vadd.f32 0.0036580483, %v2488_v35 }
 0x31f   : > { %v2424_v27 = vadd.f32 0.4994258, %v2423_v24  ;;  %v2529_v20 = vadd.f32 0.0036580483, %v2528_v53  ;;  %v7312_v31 = vmin.f32 %v2564_v8, 16.0  ;;  %v2452_v56 = vmul.f32 %v2451_v58, %v7253_v59 }
 0x320   : > { %v2464_v23 = vadd.f32 0.4994258, %v2463_v3  ;;  %v2501_v49 = vmul.f32 %v2500_v44, %v7278_v57  ;;  %v2540_v22 = vadd.f32 0.014752088, %v2539_v14  ;;  %v2413_v43 = vadd.f32 0.18741608, %v2412_v54  ;;  %v2322_v14 = vpop.f32.mrf.mxu3 }
 0x321   : > { %v2425_v17 = vmul.f32 %v2424_v27, %v7251_v37  ;;  %v2490_v62 = vmul.f32 %v2489_v50, %v7278_v57  ;;  %v2577_v40 = vmul.f32 3.8918573e-05, %v7312_v31  ;;  %v2530_v0 = vmul.f32 %v2529_v20, %v7281_v28 }
 0x322   : > { %v2465_v7 = vmul.f32 %v2464_v23, %v7253_v59  ;;  %v2502_v45 = vadd.f32 0.112945676, %v2501_v49  ;;  %v2541_v41 = vmul.f32 %v2540_v22, %v7281_v28  ;;  %v7324_v4 = vmul.f32 0.5, %v7232_v15 }
 0x323   : > { %v7299_v36 = vadd.f32 1.0, %v2425_v17  ;;  %v7327_v1 = vmul.f32 0.5, %v7235_v5  ;;  %v2414_v25 = vmul.f32 %v2413_v43, %v7251_v37  ;;  %v2453_v51 = vadd.f32 0.18741608, %v2452_v56 }
 0x324   : > { %v7302_v33 = vadd.f32 1.0, %v2465_v7  ;;  %v2503_v16 = vmul.f32 %v2502_v45, %v7278_v57  ;;  %v2542_v39 = vadd.f32 0.112945676, %v2541_v41  ;;  %v7333_v3 = vmul.f32 0.70710677, %v2265_v6 }
 0x325   : > { %4774 = vrcp.f32 %v7299_v36  ;;  %v2491_v27 = vadd.f32 0.05243302, %v2490_v62  ;;  %v2578_v61 = vadd.f32 0.001143296, %v2577_v40  ;;  %v7339_v5 = vmul.f32 0.5, %v7258_v26 }
 0x326   : > { %4776 = vrcp.f32 %v7302_v33  ;;  %v2504_v10 = vadd.f32 0.4994258, %v2503_v16  ;;  %v2543_v15 = vmul.f32 %v2542_v39, %v7281_v28  ;;  %v2531_v42 = vadd.f32 0.05243302, %v2530_v0 }
 0x327   : > { %v7341_v23 = vmul.f32 0.5, %v2236_v48  ;;  %v2566_v37 = vmul.f32 2.1237322e-06, %v7312_v31  ;;  %v2579_v34 = vmul.f32 %v2578_v61, %v7312_v31  ;;  %v2454_v7 = vmul.f32 %v2453_v51, %v7253_v59 }
 0x328   : > { %v2505_v2 = vmul.f32 %v2504_v10, %v7278_v57  ;;  %v2544_v44 = vadd.f32 0.4994258, %v2543_v15  ;;  %v7351_v63 = vmul.f32 0.5, %v7263_v30  ;;  %v7353_v26 = vmul.f32 0.5, %v2265_v6 }
 0x329   : > { %v2604_v48 = vmul.f32 %v7333_v3, %v7333_v3  ;;  %v2415_v35 = vadd.f32 1.1283791, %v2414_v25  ;;  %v2492_v53 = vmul.f32 %v2491_v27, %v7278_v57  ;;  %v2436_v54 = vand.u32 2147483647, %v7299_v36 }
 0x32a   : > { %v7346_v17 = vadd.f32 1.0, %v2505_v2  ;;  %v2545_v8 = vmul.f32 %v2544_v44, %v7281_v28  ;;  %v2532_v58 = vmul.f32 %v2531_v42, %v7281_v28  ;;  %v2580_v59 = vadd.f32 0.014752088, %v2579_v34 }
 0x32b   : > { %v7320_v60 = vpop.eup %4774  ;;  %v7362_v30 = vadd.f32 %v2293_v46, %v7245_v19  ;;  %v2567_v45 = vadd.f32 0.00028619796, %v2566_v37  ;;  %v2455_v20 = vadd.f32 1.1283791, %v2454_v7  ;;  %v7368_v43 = vmin.f32 %v2604_v48, 16.0 }
 0x32c   : > { %v7329_v24 = vpop.eup %4776  ;;  %v2428_v18 = vmul.f32 %v7320_v60, %v7299_v36  ;;  %4778 = vrcp.f32 %v7346_v17  ;;  %v7365_v11 = vadd.f32 1.0, %v2545_v8  ;;  %v2581_v22 = vmul.f32 %v2580_v59, %v7312_v31 }
 0x32d   : > { %v2468_v52 = vmul.f32 %v7329_v24, %v7302_v33  ;;  %v7371_v56 = vadd.f32 %v2322_v14, %v7249_v21  ;;  %v2416_v16 = vmul.f32 %v2415_v35, %v7238_v29  ;;  %v2493_v62 = vadd.f32 0.18741608, %v2492_v53 }
 0x32e   : > { %v2429_v49 = vsub.f32 1.0, %v2428_v18  ;;  %4780 = vrcp.f32 %v7365_v11  ;;  %vm2432_vm15 = vweird.f32 %v7299_v36  ;;  %v2438_v41 = vand.u32 2147483648, %v7299_v36 }
 0x32f   : > { %v2469_v50 = vsub.f32 1.0, %v2468_v52  ;;  %v2533_v40 = vadd.f32 0.18741608, %v2532_v58  ;;  %v2582_v10 = vadd.f32 0.112945676, %v2581_v22  ;;  %vm7378_vm0 = vcmp.eq.f32.partialorder %v2436_v54, 8.507059e+37 }
 0x330   : > { %v2430_v6 = vmul.f32 %v7320_v60, %v2429_v49  ;;  %vm2472_vm1 = vweird.f32 %v7302_v33  ;;  %v2568_v29 = vmul.f32 %v2567_v45, %v7312_v31  ;;  %v2476_v25 = vand.u32 2147483647, %v7302_v33 }
 0x331   : > { %v2470_v39 = vmul.f32 %v7329_v24, %v2469_v50  ;;  %v2478_v51 = vand.u32 2147483648, %v7302_v33  ;;  %v2583_v2 = vmul.f32 %v2582_v10, %v7312_v31  ;;  %v2606_v18 = vmul.f32 2.1237322e-06, %v7368_v43 }
 0x332   : > { %v7389_v27 = vpop.eup %4778  ;;  %v2431_v15 = vadd.f32 %v7320_v60, %v2430_v6  ;;  %vm2433_vm2 = vweird.f32 %v7320_v60  ;;  %v2494_v61 = vmul.f32 %v2493_v62, %v7278_v57  ;;  %v2617_v42 = vmul.f32 3.8918573e-05, %v7368_v43 }
 0x333   : > { %v2439_v37 = vor.u32 1.1754944e-38, %v2438_v41  ;;  %v2534_v52 = vmul.f32 %v2533_v40, %v7281_v28  ;;  %v2584_v44 = vadd.f32 0.4994258, %v2583_v2  ;;  %v7397_v34 = vmul.f32 0.70710677, %v7362_v30  ;;  %vm7405_vm4 = vmor %vm2432_vm15, %vm2433_vm2 }
 0x334   : > { %v7399_v46 = vpop.eup %4780  ;;  %v2471_v7 = vadd.f32 %v7329_v24, %v2470_v39  ;;  %vm2473_vm3 = vweird.f32 %v7329_v24  ;;  %v2569_v48 = vadd.f32 0.0036580483, %v2568_v29  ;;  %v2618_v35 = vadd.f32 0.001143296, %v2617_v42 }
 0x335   : > { %v2479_v49 = vor.u32 1.1754944e-38, %v2478_v51  ;;  %v2508_v28 = vmul.f32 %v7389_v27, %v7346_v17  ;;  %v2585_v53 = vmul.f32 %v2584_v44, %v7312_v31  ;;  %v2607_v8 = vadd.f32 0.00028619796, %v2606_v18  ;;  %vm7420_vm5 = vmor %vm2472_vm1, %vm2473_vm3 }
 0x336   : > { %v2435_v14 = vsel %vm7405_vm4, %v7320_v60, %v2431_v15  ;;  %v2495_v54 = vadd.f32 1.1283791, %v2494_v61  ;;  %v2619_v58 = vmul.f32 %v2618_v35, %v7368_v43  ;;  %v2644_v36 = vmul.f32 %v7397_v34, %v7397_v34 }
 0x337   : > { %v2518_v50 = vand.u32 2147483648, %v7346_v17  ;;  %v2535_v45 = vadd.f32 1.1283791, %v2534_v52  ;;  %v2548_v22 = vmul.f32 %v7399_v46, %v7365_v11  ;;  %v7427_v6 = vadd.f32 1.0, %v2585_v53 }
 0x338   : > { %v2475_v60 = vsel %vm7420_vm5, %v7329_v24, %v2471_v7  ;;  %v2570_v62 = vmul.f32 %v2569_v48, %v7312_v31  ;;  %v2620_v41 = vadd.f32 0.014752088, %v2619_v58  ;;  %v7433_v33 = vmin.f32 %v2644_v36, 16.0 }
 0x339   : > { %v2440_v40 = vsel %vm7378_vm0, %v2439_v37, %v2435_v14  ;;  %v2509_v10 = vsub.f32 1.0, %v2508_v28  ;;  %4782 = vrcp.f32 %v7427_v6  ;;  %v2608_v39 = vmul.f32 %v2607_v8, %v7368_v43 }
 0x33a   : > { %v2456_v29 = vmul.f32 %v2455_v20, %v7241_v12  ;;  %vm2477_vm6 = vcmp.eq.f32.partialorder %v2476_v25, 8.507059e+37  ;;  %v7441_v51 = vmul.f32 %v2495_v54, %v7266_v38  ;;  %v7444_v24 = vmul.f32 0.5, %v7362_v30 }
 0x33b   : > { %v2480_v2 = vsel %vm2477_vm6, %v2479_v49, %v2475_v60  ;;  %vm2512_vm7 = vweird.f32 %v7346_v17  ;;  %v2516_v0 = vand.u32 2147483647, %v7346_v17  ;;  %v2549_v18 = vsub.f32 1.0, %v2548_v22 }
 0x33c   : > { %v2621_v15 = vmul.f32 %v2620_v41, %v7368_v43  ;;  %v2441_v61 = vmul.f32 %v2440_v40, %v2416_v16  ;;  %v7450_v42 = vmul.f32 %v2535_v45, %v7270_v9  ;;  %v2571_v12 = vadd.f32 0.05243302, %v2570_v62 }
 0x33d   : > { %v2657_v20 = vmul.f32 3.8918573e-05, %v7433_v33  ;;  %v2510_v38 = vmul.f32 %v7389_v27, %v2509_v10  ;;  %v2519_v25 = vor.u32 1.1754944e-38, %v2518_v50  ;;  %v2609_v30 = vadd.f32 0.0036580483, %v2608_v39 }
 0x33e   : > { %v2622_v37 = vadd.f32 0.112945676, %v2621_v15  ;;  %v2481_v52 = vmul.f32 %v2480_v2, %v2456_v29  ;;  %v2646_v44 = vmul.f32 2.1237322e-06, %v7433_v33  ;;  %v7456_v48 = vmul.f32 0.70710677, %v7371_v56 }
 0x33f   : > { %v2658_v7 = vadd.f32 0.001143296, %v2657_v20  ;;  %v7458_v35 = vpop.eup %4782  ;;  %v2550_v9 = vmul.f32 %v7399_v46, %v2549_v18  ;;  %vm2552_vm8 = vweird.f32 %v7365_v11  ;;  %v2556_v16 = vand.u32 2147483647, %v7365_v11 }
 0x340   : > { %v2623_v57 = vmul.f32 %v2622_v37, %v7368_v43  ;;  %v4492_v49 = vclamps-f32 %v2441_v61, 1.0  ;;  %vm7464_vm9 = vcmp.eq.f32.partialorder %v2516_v0, 8.507059e+37  ;;  %v2558_v53 = vand.u32 2147483648, %v7365_v11  ;;  %v2238_v0 = vpop.f32.mrf.mxu0 }
 0x341   : > { %v2572_v8 = vmul.f32 %v2571_v12, %v7312_v31  ;;  %v2659_v14 = vmul.f32 %v2658_v7, %v7433_v33  ;;  %v2511_v54 = vadd.f32 %v7389_v27, %v2510_v38  ;;  %vm2513_vm10 = vweird.f32 %v7389_v27 }
 0x342   : > { %v2610_v58 = vmul.f32 %v2609_v30, %v7368_v43  ;;  %v2624_v36 = vadd.f32 0.4994258, %v2623_v57  ;;  %v2588_v59 = vmul.f32 %v7458_v35, %v7427_v6  ;;  %v2647_v50 = vadd.f32 0.00028619796, %v2646_v44  ;;  %vm7483_vm12 = vmor %vm2512_vm7, %vm2513_vm10  ;;  %v2267_v57 = vpop.f32.mrf.mxu1 }
 0x343   : > { %v2660_v45 = vadd.f32 0.014752088, %v2659_v14  ;;  %v2684_v22 = vmul.f32 %v7456_v48, %v7456_v48  ;;  %v4493_v60 = vclamps-f32 %v2481_v52, 1.0  ;;  %v2551_v62 = vadd.f32 %v7399_v46, %v2550_v9 }
 0x344   : > { %vm2553_vm11 = vweird.f32 %v7399_v46  ;;  %v2625_v41 = vmul.f32 %v2624_v36, %v7368_v43  ;;  %vm7487_vm13 = vcmp.eq.f32.partialorder %v2556_v16, 8.507059e+37  ;;  %v2573_v39 = vadd.f32 0.18741608, %v2572_v8 }
 0x345   : > { %v2661_v29 = vmul.f32 %v2660_v45, %v7433_v33  ;;  %v7492_v2 = vmin.f32 %v2684_v22, 16.0  ;;  %v3684_v18 = vadd.f32 1.0, %v4492_v49  ;;  %v2515_v15 = vsel %vm7483_vm12, %v7389_v27, %v2511_v54  ;;  %vm7501_vm14 = vmor %vm2552_vm8, %vm2553_vm11 }
 0x346   : > { %v2611_v17 = vadd.f32 0.05243302, %v2610_v58  ;;  %v7497_v61 = vadd.f32 1.0, %v2625_v41  ;;  %v2589_v20 = vsub.f32 1.0, %v2588_v59  ;;  %v2648_v38 = vmul.f32 %v2647_v50, %v7433_v33 }
 0x347   : > { %v2662_v30 = vadd.f32 0.112945676, %v2661_v29  ;;  %v2697_v37 = vmul.f32 3.8918573e-05, %v7492_v2  ;;  %v2555_v52 = vsel %vm7501_vm14, %v7399_v46, %v2551_v62  ;;  %v2686_v27 = vmul.f32 2.1237322e-06, %v7492_v2  ;;  %v2296_v29 = vpop.f32.mrf.mxu2 }
 0x348   : > { %4784 = vrcp.f32 %v7497_v61  ;;  %v7513_v11 = vadd.f32 %v2238_v0, %v7227_v13  ;;  %v3685_v44 = vadd.f32 1.0, %v4493_v60  ;;  %v2559_v7 = vor.u32 1.1754944e-38, %v2558_v53 }
 0x349   : > { %v2574_v9 = vmul.f32 %v2573_v39, %v7312_v31  ;;  %v2663_v16 = vmul.f32 %v2662_v30, %v7433_v33  ;;  %v7518_v49 = vmul.f32 %v3684_v18, %v7324_v4  ;;  %v2520_v46 = vsel %vm7464_vm9, %v2519_v25, %v2515_v15 }
 0x34a   : > { %v2612_v8 = vmul.f32 %v2611_v17, %v7368_v43  ;;  %v2698_v14 = vadd.f32 0.001143296, %v2697_v37  ;;  %v2560_v54 = vsel %vm7487_vm13, %v2559_v7, %v2555_v52  ;;  %v2590_v58 = vmul.f32 %v7458_v35, %v2589_v20 }
 0x34b   : > { %v2649_v53 = vadd.f32 0.0036580483, %v2648_v38  ;;  %v2664_v36 = vadd.f32 0.4994258, %v2663_v16  ;;  %v2687_v31 = vadd.f32 0.00028619796, %v2686_v27  ;;  %v7531_v4 = vadd.f32 %v2267_v57, %v7229_v47 }
 0x34c   : > { %v2699_v59 = vmul.f32 %v2698_v14, %v7492_v2  ;;  %v7528_v50 = vmul.f32 0.70710677, %v7513_v11  ;;  %v7534_v25 = vmul.f32 %v3685_v44, %v7327_v1  ;;  %v2521_v28 = vmul.f32 %v2520_v46, %v7441_v51  ;;  %v4699_v14 = vld [vmem:[%s4988_s22 + $0x38] sm:$0xff] }
 0x34d   : > { %v2575_v45 = vadd.f32 1.1283791, %v2574_v9  ;;  %v2665_v22 = vmul.f32 %v2664_v36, %v7433_v33  ;;  %v2598_v62 = vand.u32 2147483648, %v7427_v6  ;;  %v7544_v10 = vmul.f32 0.70710677, %v7531_v4  ;;  %4024 = vmatpush.bf16.msrb.mxu0 %v4699_v14 }
 0x34e   : > { %v7538_v60 = vpop.eup %4784  ;;  %v2700_v41 = vadd.f32 0.014752088, %v2699_v59  ;;  %v2724_v40 = vmul.f32 %v7528_v50, %v7528_v50  ;;  %v2561_v39 = vmul.f32 %v2560_v54, %v7450_v42  ;;  %v2591_v1 = vadd.f32 %v7458_v35, %v2590_v58  ;;  %v4707_v54 = vld [vmem:[%s4988_s22 + $0x78] sm:$0xff] }
 0x34f   : > { %vm2593_vm15 = vweird.f32 %v7458_v35  ;;  %v2650_v51 = vmul.f32 %v2649_v53, %v7433_v33  ;;  %v2613_v0 = vadd.f32 0.18741608, %v2612_v8  ;;  %v7550_v18 = vadd.f32 1.0, %v2665_v22  ;;  %v2325_v8 = vpop.f32.mrf.mxu3  ;;  %4053 = vmatpush.bf16.msrb.mxu1 %v4707_v54 }
 0x350   : > { %v2688_v15 = vmul.f32 %v2687_v31, %v7492_v2  ;;  %v2701_v17 = vmul.f32 %v2700_v41, %v7492_v2  ;;  %vm2592_vm0 = vweird.f32 %v7427_v6  ;;  %v2596_v12 = vand.u32 2147483647, %v7427_v6  ;;  %v4698_v41 = vld [vmem:[%s4988_s22 + $0x30] sm:$0xff] }
 0x351   : > { %v2628_v42 = vmul.f32 %v7538_v60, %v7497_v61  ;;  %v7558_v20 = vmin.f32 %v2724_v40, 16.0  ;;  %v4494_v38 = vclamps-f32 %v2521_v28, 1.0  ;;  %vm7560_vm1 = vmor %vm2592_vm0, %vm2593_vm15  ;;  %4786 = vrcp.f32 %v7550_v18  ;;  %v4706_v40 = vld [vmem:[%s4988_s22 + $0x70] sm:$0xff]  ;;  %4025 = vmatpush.bf16.msrb.mxu0 %v4698_v41 }
 0x352   : > { %v2764_v37 = vmul.f32 %v7544_v10, %v7544_v10  ;;  %v7568_v52 = vadd.f32 %v2296_v29, %v7245_v19  ;;  %v2595_v6 = vsel %vm7560_vm1, %v7458_v35, %v2591_v1  ;;  %v2651_v27 = vadd.f32 0.05243302, %v2650_v51 }
 0x353   : > { %v7574_v44 = vmul.f32 0.5, %v7371_v56  ;;  %v2702_v7 = vadd.f32 0.112945676, %v2701_v17  ;;  %v4495_v9 = vclamps-f32 %v2561_v39, 1.0  ;;  %v2599_v16 = vor.u32 1.1754944e-38, %v2598_v62  ;;  %4054 = vmatpush.bf16.msrb.mxu1 %v4706_v40 }
 0x354   : > { %v2614_v57 = vmul.f32 %v2613_v0, %v7368_v43  ;;  %v2689_v46 = vadd.f32 0.0036580483, %v2688_v15  ;;  %vm2597_vm2 = vcmp.eq.f32.partialorder %v2596_v12, 8.507059e+37  ;;  %v2629_v58 = vsub.f32 1.0, %v2628_v42 }
 0x355   : > { %v2703_v53 = vmul.f32 %v2702_v7, %v7492_v2  ;;  %v2726_v35 = vmul.f32 2.1237322e-06, %v7558_v20  ;;  %v3686_v36 = vadd.f32 1.0, %v4494_v38  ;;  %v2600_v56 = vsel %vm2597_vm2, %v2599_v16, %v2595_v6  ;;  %v4723_v6 = vld [vmem:[%s4988_s22 + $0xf8] sm:$0xff] }
 0x356   : > { %v7581_v31 = vmin.f32 %v2764_v37, 16.0  ;;  %v7584_v59 = vmul.f32 0.70710677, %v7568_v52  ;;  %v2576_v43 = vmul.f32 %v2575_v45, %v7294_v55  ;;  %v2652_v28 = vmul.f32 %v2651_v27, %v7433_v33  ;;  %v4715_v37 = vld [vmem:[%s4988_s22 + $0xb8] sm:$0xff]  ;;  %4111 = vmatpush.bf16.msrb.mxu3 %v4723_v6 }
 0x357   : > { %v2704_v22 = vadd.f32 0.4994258, %v2703_v53  ;;  %v7589_v62 = vadd.f32 %v2325_v8, %v7249_v21  ;;  %v7593_v39 = vpop.eup %4786  ;;  %v3687_v1 = vadd.f32 1.0, %v4495_v9  ;;  %v2615_v51 = vadd.f32 1.1283791, %v2614_v57  ;;  %4082 = vmatpush.bf16.msrb.mxu2 %v4715_v37 }
 0x358   : > { %v2690_v29 = vmul.f32 %v2689_v46, %v7492_v2  ;;  %v2804_v0 = vmul.f32 %v7584_v59, %v7584_v59  ;;  %v2601_v55 = vmul.f32 %v2600_v56, %v2576_v43  ;;  %v2630_v45 = vmul.f32 %v7538_v60, %v2629_v58 }
 0x359   : > { %v2668_v15 = vmul.f32 %v7593_v39, %v7550_v18  ;;  %v2727_v17 = vadd.f32 0.00028619796, %v2726_v35  ;;  %v7602_v12 = vmul.f32 %v3686_v36, %v7339_v5  ;;  %v7605_v42 = vmul.f32 0.5, %v7513_v11  ;;  %v2240_v5 = vpop.f32.mrf.mxu0 }
 0x35a   : > { %v2766_v38 = vmul.f32 2.1237322e-06, %v7581_v31  ;;  %v7608_v30 = vmin.f32 %v2804_v0, 16.0  ;;  %v2636_v27 = vand.u32 2147483647, %v7497_v61  ;;  %v2705_v9 = vmul.f32 %v2704_v22, %v7492_v2  ;;  %v4714_v22 = vld [vmem:[%s4988_s22 + $0xb0] sm:$0xff] }
 0x35b   : > { %9631 = vst [vmem:[#allocation28_spill] sm:$0xff] %v7605_v42  ;;  %v2653_v7 = vadd.f32 0.18741608, %v2652_v28  ;;  %v7615_v16 = vmul.f32 0.70710677, %v7589_v62  ;;  %v7618_v11 = vmul.f32 %v3687_v1, %v7351_v63  ;;  %v2638_v57 = vand.u32 2147483648, %v7497_v61  ;;  %4083 = vmatpush.bf16.msrb.mxu2 %v4714_v22 }
 0x35c   : > { %v2691_v46 = vadd.f32 0.05243302, %v2690_v29  ;;  %v2806_v8 = vmul.f32 2.1237322e-06, %v7608_v30  ;;  %v4496_v14 = vclamps-f32 %v2601_v55, 1.0  ;;  %v2631_v54 = vadd.f32 %v7538_v60, %v2630_v45 }
 0x35d   : > { %vm2633_vm3 = vweird.f32 %v7538_v60  ;;  %v2669_v58 = vsub.f32 1.0, %v2668_v15  ;;  %v2728_v53 = vmul.f32 %v2727_v17, %v7558_v20  ;;  %v2767_v35 = vadd.f32 0.00028619796, %v2766_v38  ;;  %v2269_v17 = vpop.f32.mrf.mxu1 }
 0x35e   : > { %v2844_v63 = vmul.f32 %v7615_v16, %v7615_v16  ;;  %v7628_v36 = vadd.f32 %v2240_v5, %v7227_v13  ;;  %v2616_v56 = vmul.f32 %v2615_v51, %v7333_v3  ;;  %vm2632_vm4 = vweird.f32 %v7497_v61 }
 0x35f   : > { %v2654_v43 = vmul.f32 %v2653_v7, %v7433_v33  ;;  %v7633_v28 = vadd.f32 1.0, %v2705_v9  ;;  %vm7635_vm5 = vmor %vm2632_vm4, %vm2633_vm3  ;;  %vm7639_vm6 = vcmp.eq.f32.partialorder %v2636_v27, 8.507059e+37  ;;  %v2639_v40 = vor.u32 1.1754944e-38, %v2638_v57  ;;  %v2298_v9 = vpop.f32.mrf.mxu2 }
 0x360   : > { %v2692_v1 = vmul.f32 %v2691_v46, %v7492_v2  ;;  %v2807_v29 = vadd.f32 0.00028619796, %v2806_v8  ;;  %v3688_v0 = vadd.f32 1.0, %v4496_v14  ;;  %v2635_v3 = vsel %vm7635_vm5, %v7538_v60, %v2631_v54  ;;  %v4697_v8 = vld [vmem:[%s4988_s22 + $0x28] sm:$0xff] }
 0x361   : > { %v2670_v33 = vmul.f32 %v7593_v39, %v2669_v58  ;;  %v7649_v61 = vmul.f32 0.5, %v7531_v4  ;;  %v2729_v51 = vadd.f32 0.0036580483, %v2728_v53  ;;  %v2768_v55 = vmul.f32 %v2767_v35, %v7581_v31  ;;  %v4705_v14 = vld [vmem:[%s4988_s22 + $0x68] sm:$0xff]  ;;  %4026 = vmatpush.bf16.msrb.mxu0 %v4697_v8 }
 0x362   : > { %v7652_v45 = vmin.f32 %v2844_v63, 16.0  ;;  %v7655_v15 = vmul.f32 0.70710677, %v7628_v36  ;;  %v2655_v38 = vadd.f32 1.1283791, %v2654_v43  ;;  %v2678_v60 = vand.u32 2147483648, %v7550_v18  ;;  %4055 = vmatpush.bf16.msrb.mxu1 %v4705_v14 }
 0x363   : > { %9636 = vst [vmem:[#allocation83_spill] sm:$0xff] %v7649_v61  ;;  %v2676_v37 = vand.u32 2147483647, %v7550_v18  ;;  %4788 = vrcp.f32 %v7633_v28  ;;  %v2640_v4 = vsel %vm7639_vm6, %v2639_v40, %v2635_v3  ;;  %v2693_v6 = vadd.f32 0.18741608, %v2692_v1  ;;  %v4713_v8 = vld [vmem:[%s4988_s22 + $0xa8] sm:$0xff] }
 0x364   : > { %v2808_v27 = vmul.f32 %v2807_v29, %v7608_v30  ;;  %v2884_v7 = vmul.f32 %v7655_v15, %v7655_v15  ;;  %v7666_v5 = vmul.f32 %v3688_v0, %v7341_v23  ;;  %v2671_v57 = vadd.f32 %v7593_v39, %v2670_v33  ;;  %v4721_v14 = vld [vmem:[%s4988_s22 + $0xe8] sm:$0xff]  ;;  %4084 = vmatpush.bf16.msrb.mxu2 %v4713_v8 }
 0x365   : > { %vm2673_vm7 = vweird.f32 %v7593_v39  ;;  %v7671_v46 = vadd.f32 %v2269_v17, %v7229_v47  ;;  %v2730_v54 = vmul.f32 %v2729_v51, %v7558_v20  ;;  %v2769_v58 = vadd.f32 0.0036580483, %v2768_v55  ;;  %v4722_v55 = vld [vmem:[%s4988_s22 + $0xf0] sm:$0xff]  ;;  %v4704_v17 = vld [vmem:[%s4988_s22 + $0x60] sm:$0xff] }
 0x366   : > { %v2846_v53 = vmul.f32 2.1237322e-06, %v7652_v45  ;;  %v7677_v35 = vmin.f32 %v2884_v7, 16.0  ;;  %v2641_v63 = vmul.f32 %v2640_v4, %v2616_v56  ;;  %vm2672_vm8 = vweird.f32 %v7550_v18  ;;  %4112 = vmatpush.bf16.msrb.mxu3 %v4722_v55  ;;  %4056 = vmatpush.bf16.msrb.mxu1 %v4704_v17 }
 0x367   : > { %vm7680_vm9 = vcmp.eq.f32.partialorder %v2676_v37, 8.507059e+37  ;;  %v7685_v43 = vadd.f32 %v2298_v9, %v7245_v19  ;;  %vm7690_vm10 = vmor %vm2672_vm8, %vm2673_vm7  ;;  %v2679_v18 = vor.u32 1.1754944e-38, %v2678_v60  ;;  %v2694_v56 = vmul.f32 %v2693_v6, %v7492_v2  ;;  %v4696_v2 = vld [vmem:[%s4988_s22 + $0x20] sm:$0xff] }
 0x368   : > { %v2809_v40 = vadd.f32 0.0036580483, %v2808_v27  ;;  %v2886_v1 = vmul.f32 2.1237322e-06, %v7677_v35  ;;  %v2656_v0 = vmul.f32 %v2655_v38, %v7397_v34  ;;  %v2675_v3 = vsel %vm7690_vm10, %v7593_v39, %v2671_v57  ;;  %v2327_v39 = vpop.f32.mrf.mxu3  ;;  %4027 = vmatpush.bf16.msrb.mxu0 %v4696_v2 }
 0x369   : > { %v7696_v29 = vpop.eup %4788  ;;  %v7703_v33 = vmul.f32 0.5, %v7568_v52  ;;  %v7706_v51 = vmul.f32 0.70710677, %v7671_v46  ;;  %v2731_v37 = vadd.f32 0.05243302, %v2730_v54  ;;  %v2770_v60 = vmul.f32 %v2769_v58, %v7581_v31 }
 0x36a   : > { %v7713_v34 = vmul.f32 0.5, %v7589_v62  ;;  %v2847_v38 = vadd.f32 0.00028619796, %v2846_v53  ;;  %v4497_v4 = vclamps-f32 %v2641_v63, 1.0  ;;  %v2887_v52 = vadd.f32 0.00028619796, %v2886_v1  ;;  %4113 = vmatpush.bf16.msrb.mxu3 %v4721_v14 }
 0x36b   : > { %9641 = vst [vmem:[#allocation78_spill] sm:$0xff] %v7703_v33  ;;  %v2924_v6 = vmul.f32 %v7706_v51, %v7706_v51  ;;  %v7718_v27 = vmul.f32 0.70710677, %v7685_v43  ;;  %v2680_v7 = vsel %vm7680_vm9, %v2679_v18, %v2675_v3  ;;  %v2695_v9 = vadd.f32 1.1283791, %v2694_v56  ;;  %v2243_v56 = vpop.f32.mrf.mxu0  ;;  %v4703_v1 = vld [vmem:[%s4988_s22 + $0x58] sm:$0xff] }
 0x36c   : > { %9642 = vst [vmem:[#allocation29_spill] sm:$0xff] %v7713_v34  ;;  %v2708_v62 = vmul.f32 %v7696_v29, %v7633_v28  ;;  %v2810_v57 = vmul.f32 %v2809_v40, %v7608_v30  ;;  %v2716_v54 = vand.u32 2147483647, %v7633_v28  ;;  %v7733_v63 = vadd.f32 %v2327_v39, %v7249_v21  ;;  %v4695_v40 = vld [vmem:[%s4988_s22 + $0x18] sm:$0xff]  ;;  %4057 = vmatpush.bf16.msrb.mxu1 %v4703_v1  ;;  %v4708_v34 = vld [vmem:[%s4988_s22 + $0x80] sm:$0xff] }
 0x36d   : > { %v7728_v58 = vmin.f32 %v2924_v6, 16.0  ;;  %v2964_v53 = vmul.f32 %v7718_v27, %v7718_v27  ;;  %v2718_v23 = vand.u32 2147483648, %v7633_v28  ;;  %v2732_v22 = vmul.f32 %v2731_v37, %v7558_v20  ;;  %4028 = vmatpush.bf16.msrb.mxu0 %v4695_v40  ;;  %v4702_v40 = vld [vmem:[%s4988_s22 + $0x50] sm:$0xff] }
 0x36e   : > { %v2771_v41 = vadd.f32 0.05243302, %v2770_v60  ;;  %v2848_v18 = vmul.f32 %v2847_v38, %v7652_v45  ;;  %v2681_v3 = vmul.f32 %v2680_v7, %v2656_v0  ;;  %v2888_v55 = vmul.f32 %v2887_v52, %v7677_v35 }
 0x36f   : > { %v2926_v2 = vmul.f32 2.1237322e-06, %v7728_v58  ;;  %v7742_v17 = vmin.f32 %v2964_v53, 16.0  ;;  %v7744_v39 = vadd.f32 1.0, %v4497_v4  ;;  %v2709_v6 = vsub.f32 1.0, %v2708_v62  ;;  %v4712_v4 = vld [vmem:[%s4988_s22 + $0xa0] sm:$0xff] }
 0x370   : > { %v2811_v37 = vadd.f32 0.05243302, %v2810_v57  ;;  %v7747_v60 = vmul.f32 0.70710677, %v7733_v63  ;;  %v7750_v0 = vmul.f32 %v2695_v9, %v7456_v48  ;;  %v7754_v7 = vadd.f32 %v2243_v56, %v7227_v13  ;;  %v2272_v48 = vpop.f32.mrf.mxu1  ;;  %v4720_v9 = vld [vmem:[%s4988_s22 + $0xe0] sm:$0xff]  ;;  %v4694_v53 = vld [vmem:[%s4988_s22 + $0x10] sm:$0xff]  ;;  %4085 = vmatpush.bf16.msrb.mxu2 %v4712_v4  ;;  %4058 = vmatpush.bf16.msrb.mxu1 %v4702_v40 }
 0x371   : > { %v2927_v38 = vadd.f32 0.00028619796, %v2926_v2  ;;  %v2966_v52 = vmul.f32 2.1237322e-06, %v7742_v17  ;;  %vm2712_vm11 = vweird.f32 %v7633_v28  ;;  %v7758_v62 = vor.u32 1.1754944e-38, %v2718_v23  ;;  %4114 = vmatpush.bf16.msrb.mxu3 %v4720_v9  ;;  %4029 = vmatpush.bf16.msrb.mxu0 %v4694_v53 }
 0x372   : > { %9643 = vst [vmem:[#allocation31_spill] sm:$0xff] %v7747_v60  ;;  %v2772_v57 = vmul.f32 %v2771_v41, %v7581_v31  ;;  %v2849_v8 = vadd.f32 0.0036580483, %v2848_v18  ;;  %v3004_v14 = vmul.f32 %v7747_v60, %v7747_v60  ;;  %v4498_v1 = vclamps-f32 %v2681_v3, 1.0 }
 0x373   : > { %v2733_v2 = vadd.f32 0.18741608, %v2732_v22  ;;  %v7767_v56 = vmul.f32 0.5, %v7628_v36  ;;  %v2889_v32 = vadd.f32 0.0036580483, %v2888_v55  ;;  %v2710_v23 = vmul.f32 %v7696_v29, %v2709_v6  ;;  %v4711_v22 = vld [vmem:[%s4988_s22 + $0x98] sm:$0xff]  ;;  %v2301_v6 = vpop.f32.mrf.mxu2 }
 0x374   : > { %vm2713_vm12 = vweird.f32 %v7696_v29  ;;  %v7771_v41 = vmin.f32 %v3004_v14, 16.0  ;;  %v7774_v18 = vmul.f32 0.70710677, %v7754_v7  ;;  %v2812_v36 = vmul.f32 %v2811_v37, %v7608_v30  ;;  %v4719_v14 = vld [vmem:[%s4988_s22 + $0xd8] sm:$0xff]  ;;  %4086 = vmatpush.bf16.msrb.mxu2 %v4711_v22 }
 0x375   : > { %9644 = vst [vmem:[#allocation39_spill] sm:$0xff] %v7767_v56  ;;  %v2928_v3 = vmul.f32 %v2927_v38, %v7728_v58  ;;  %v2967_v55 = vadd.f32 0.00028619796, %v2966_v52  ;;  %v7780_v4 = vadd.f32 %v2272_v48, %v7229_v47  ;;  %vm7783_vm13 = vcmp.eq.f32.partialorder %v2716_v54, 8.507059e+37  ;;  %v4693_v38 = vld [vmem:[%s4988_s22 + $0x8] sm:$0xff]  ;;  %4115 = vmatpush.bf16.msrb.mxu3 %v4719_v14  ;;  %vm7821_vm14 = vmor %vm2712_vm11, %vm2713_vm12 }
 0x376   : > { %9645 = vst [vmem:[#allocation84_spill] sm:$0xff] %v7774_v18  ;;  %v2773_v33 = vadd.f32 0.18741608, %v2772_v57  ;;  %v2850_v9 = vmul.f32 %v2849_v8, %v7652_v45  ;;  %v3006_v53 = vmul.f32 2.1237322e-06, %v7771_v41  ;;  %v3044_v37 = vmul.f32 %v7774_v18, %v7774_v18  ;;  %v4701_v52 = vld [vmem:[%s4988_s22 + $0x48] sm:$0xff]  ;;  %4030 = vmatpush.bf16.msrb.mxu0 %v4693_v38 }
 0x377   : > { %9646 = vst [vmem:[#allocation41_spill] sm:$0xff] %v7780_v4  ;;  %v3690_v48 = vadd.f32 1.0, %v4498_v1  ;;  %v2734_v40 = vmul.f32 %v2733_v2, %v7558_v20  ;;  %v2890_v54 = vmul.f32 %v2889_v32, %v7677_v35  ;;  %v7796_v61 = vmul.f32 0.70710677, %v7780_v4  ;;  %v4710_v1 = vld [vmem:[%s4988_s22 + $0x90] sm:$0xff]  ;;  %4059 = vmatpush.bf16.msrb.mxu1 %v4701_v52  ;;  %v4692_v38 = vld [vmem:[%s4988_s22] sm:$0xff]  ;;  %v2245_v52 = vpop.f32.mrf.mxu0 }
 0x378   : > { %v2711_v57 = vadd.f32 %v7696_v29, %v2710_v23  ;;  %v3007_v8 = vadd.f32 0.00028619796, %v3006_v53  ;;  %v7799_v56 = vmin.f32 %v3044_v37, 16.0  ;;  %v7802_v42 = vadd.f32 %v2301_v6, %v7245_v19  ;;  %v4718_v18 = vld [vmem:[%s4988_s22 + $0xd0] sm:$0xff]  ;;  %v2330_v23 = vpop.f32.mrf.mxu3  ;;  %4087 = vmatpush.bf16.msrb.mxu2 %v4710_v1 }
 0x379   : > { %9649 = vst [vmem:[#allocation79_spill] sm:$0xff] %v7796_v61  ;;  %v2813_v2 = vadd.f32 0.18741608, %v2812_v36  ;;  %v2929_v60 = vadd.f32 0.0036580483, %v2928_v3  ;;  %v2968_v32 = vmul.f32 %v2967_v55, %v7742_v17  ;;  %v3084_v22 = vmul.f32 %v7796_v61, %v7796_v61  ;;  %4116 = vmatpush.bf16.msrb.mxu3 %v4718_v18  ;;  %v4717_v3 = vld [vmem:[%s4988_s22 + $0xc8] sm:$0xff] }
 0x37a   : > { %9650 = vst [vmem:[#allocation43_spill] sm:$0xff] %v7802_v42  ;;  %v2774_v53 = vmul.f32 %v2773_v33, %v7581_v31  ;;  %v2851_v37 = vadd.f32 0.05243302, %v2850_v9  ;;  %v3008_v6 = vmul.f32 %v3007_v8, %v7771_v41  ;;  %v3046_v14 = vmul.f32 2.1237322e-06, %v7799_v56  ;;  %v4700_v8 = vld [vmem:[%s4988_s22 + $0x40] sm:$0xff]  ;;  %4031 = vmatpush.bf16.msrb.mxu0 %v4692_v38 }
 0x37b   : > { %v7815_v36 = vmul.f32 %v7744_v39, %v7353_v26  ;;  %v2891_v33 = vadd.f32 0.05243302, %v2890_v54  ;;  %v7825_v55 = vmin.f32 %v3084_v22, 16.0  ;;  %v7828_v9 = vmul.f32 0.70710677, %v7802_v42  ;;  %v4709_v54 = vld [vmem:[%s4988_s22 + $0x88] sm:$0xff]  ;;  %4060 = vmatpush.bf16.msrb.mxu1 %v4700_v8 }
 0x37c   : > { %v2715_v26 = vsel %vm7821_vm14, %v7696_v29, %v2711_v57  ;;  %v2735_v39 = vadd.f32 1.1283791, %v2734_v40  ;;  %v3047_v28 = vadd.f32 0.00028619796, %v3046_v14  ;;  %v7835_v4 = vadd.f32 %v2330_v23, %v7249_v21  ;;  %4088 = vmatpush.bf16.msrb.mxu2 %v4709_v54 }
 0x37d   : > { %9653 = vst [vmem:[#allocation122_spill] sm:$0xff] %v7828_v9  ;;  %v2930_v22 = vmul.f32 %v2929_v60, %v7728_v58  ;;  %v2969_v42 = vadd.f32 0.0036580483, %v2968_v32  ;;  %v3086_v61 = vmul.f32 2.1237322e-06, %v7825_v55  ;;  %v3124_v1 = vmul.f32 %v7828_v9, %v7828_v9  ;;  %4117 = vmatpush.bf16.msrb.mxu3 %v4717_v3 }
 0x37e   : > { %9654 = vst [vmem:[#allocation116_spill] sm:$0xff] %v7835_v4  ;;  %v2775_v29 = vadd.f32 1.1283791, %v2774_v53  ;;  %v7844_v40 = vmul.f32 0.5, %v7671_v46  ;;  %v3009_v57 = vadd.f32 0.0036580483, %v3008_v6  ;;  %v7847_v18 = vadd.f32 %v2245_v52, %v7227_v13 }
 0x37f   : > { %v2720_v60 = vsel %vm7783_vm13, %v7758_v62, %v2715_v26  ;;  %v2814_v32 = vmul.f32 %v2813_v2, %v7608_v30  ;;  %v2852_v23 = vmul.f32 %v2851_v37, %v7652_v45  ;;  %v2892_v14 = vmul.f32 %v2891_v33, %v7677_v35  ;;  %v4716_v33 = vld [vmem:[%s4988_s22 + $0xc0] sm:$0xff]  ;;  %v2274_v26 = vpop.f32.mrf.mxu1 }
 0x380   : > { %v7856_v53 = vmul.f32 %v3690_v48, %v7444_v24  ;;  %v3048_v46 = vmul.f32 %v3047_v28, %v7799_v56  ;;  %v3087_v6 = vadd.f32 0.00028619796, %v3086_v61  ;;  %v7860_v38 = vmul.f32 0.70710677, %v7835_v4  ;;  %4089 = vmatpush.bf16.msrb.mxu2 %v4708_v34 }
 0x381   : > { %v7864_v62 = vmul.f32 %v2735_v39, %v7528_v50  ;;  %v2931_v2 = vadd.f32 0.05243302, %v2930_v22  ;;  %v2970_v37 = vmul.f32 %v2969_v42, %v7742_v17  ;;  %v7867_v52 = vmin.f32 %v3124_v1, 16.0  ;;  %v2303_v1 = vpop.f32.mrf.mxu2  ;;  %4118 = vmatpush.bf16.msrb.mxu3 %v4716_v33 }
 0x382   : > { %9655 = vst [vmem:[#allocation137_spill] sm:$0xff] %v7860_v38  ;;  %v2721_v24 = vmul.f32 %v2720_v60, %v7750_v0  ;;  %v7872_v48 = vmul.f32 0.5, %v7685_v43  ;;  %v3010_v61 = vmul.f32 %v3009_v57, %v7771_v41  ;;  %v7876_v8 = vmul.f32 0.70710677, %v7847_v18 }
 0x383   : > { %v7879_v50 = vmul.f32 %v2775_v29, %v7544_v10  ;;  %v2815_v39 = vadd.f32 1.1283791, %v2814_v32  ;;  %v2853_v28 = vadd.f32 0.18741608, %v2852_v23  ;;  %v2893_v42 = vadd.f32 0.18741608, %v2892_v14 }
 0x384   : > { %v3049_v54 = vadd.f32 0.0036580483, %v3048_v46  ;;  %v3088_v22 = vmul.f32 %v3087_v6, %v7825_v55  ;;  %v3164_v43 = vmul.f32 %v7860_v38, %v7860_v38  ;;  %v3204_v0 = vmul.f32 %v7876_v8, %v7876_v8 }
 0x385   : > { %v2932_v3 = vmul.f32 %v2931_v2, %v7728_v58  ;;  %v2971_v57 = vadd.f32 0.05243302, %v2970_v37  ;;  %v3126_v10 = vmul.f32 2.1237322e-06, %v7867_v52  ;;  %v7889_v29 = vadd.f32 %v2274_v26, %v7229_v47 }
 0x386   : > { %v4499_v60 = vclamps-f32 %v2721_v24, 1.0  ;;  %v7892_v32 = vmul.f32 0.5, %v7733_v63  ;;  %v3011_v23 = vadd.f32 0.05243302, %v3010_v61  ;;  %v7894_v14 = vmin.f32 %v3204_v0, 16.0 }
 0x387   : > { %9656 = vst [vmem:[#allocation40_spill] sm:$0xff] %v7889_v29  ;;  %v7897_v46 = vmul.f32 %v2815_v39, %v7584_v59  ;;  %v2854_v6 = vmul.f32 %v2853_v28, %v7652_v45  ;;  %v2894_v34 = vmul.f32 %v2893_v42, %v7677_v35  ;;  %v7902_v2 = vadd.f32 %v2303_v1, %v7245_v19 }
 0x388   : > { %v3050_v37 = vmul.f32 %v3049_v54, %v7799_v56  ;;  %v3089_v33 = vadd.f32 0.0036580483, %v3088_v22  ;;  %v7905_v24 = vmin.f32 %v3164_v43, 16.0  ;;  %v3206_v63 = vmul.f32 2.1237322e-06, %v7894_v14 }
 0x389   : > { %9657 = vst [vmem:[#allocation45_spill] sm:$0xff] %v7902_v2  ;;  %v2933_v61 = vadd.f32 0.18741608, %v2932_v3  ;;  %v2972_v26 = vmul.f32 %v2971_v57, %v7742_v17  ;;  %v3127_v0 = vadd.f32 0.00028619796, %v3126_v10  ;;  %v3691_v39 = vadd.f32 1.0, %v4499_v60  ;;  %v2332_v57 = vpop.f32.mrf.mxu3 }
 0x38a   : > { %v7910_v59 = vmul.f32 0.70710677, %v7889_v29  ;;  %v3012_v28 = vmul.f32 %v3011_v23, %v7771_v41  ;;  %v7914_v42 = vmul.f32 0.5, %v7754_v7  ;;  %v3207_v1 = vadd.f32 0.00028619796, %v3206_v63 }
 0x38b   : > { %v2855_v54 = vadd.f32 1.1283791, %v2854_v6  ;;  %v2895_v22 = vadd.f32 1.1283791, %v2894_v34  ;;  %v7919_v3 = vmul.f32 0.70710677, %v7902_v2  ;;  %v3090_v4 = vmul.f32 %v3089_v33, %v7825_v55 }
 0x38c   : > { %v3244_v43 = vmul.f32 %v7910_v59, %v7910_v59  ;;  %v3051_v10 = vadd.f32 0.05243302, %v3050_v37  ;;  %v3166_v60 = vmul.f32 2.1237322e-06, %v7905_v24  ;;  %v3208_v23 = vmul.f32 %v3207_v1, %v7894_v14 }
 0x38d   : > { %9658 = vst [vmem:[#allocation138_spill] sm:$0xff] %v7919_v3  ;;  %v2934_v7 = vmul.f32 %v2933_v61, %v7728_v58  ;;  %v2973_v38 = vadd.f32 0.18741608, %v2972_v26  ;;  %v3128_v6 = vmul.f32 %v3127_v0, %v7867_v52  ;;  %v3013_v63 = vadd.f32 0.18741608, %v3012_v28 }
 0x38e   : > { %v7926_v34 = vmin.f32 %v3244_v43, 16.0  ;;  %v3209_v19 = vadd.f32 0.0036580483, %v3208_v23  ;;  %v3284_v2 = vmul.f32 %v7919_v3, %v7919_v3  ;;  %v7931_v37 = vadd.f32 %v2332_v57, %v7249_v21 }
 0x38f   : > { %v3723_v33 = vmul.f32 %v3691_v39, %v7574_v44  ;;  %v7935_v47 = vmul.f32 %v2855_v54, %v7615_v16  ;;  %v3748_v26 = vpack.c.bf16 %v7666_v5, %v7518_v49  ;;  %v3052_v0 = vmul.f32 %v3051_v10, %v7799_v56 }
 0x390   : > { %9659 = vst [vmem:[#allocation123_spill] sm:$0xff] %v7931_v37  ;;  %v3246_v61 = vmul.f32 2.1237322e-06, %v7926_v34  ;;  %v3091_v28 = vadd.f32 0.05243302, %v3090_v4  ;;  %v3210_v43 = vmul.f32 %v3209_v19, %v7894_v14  ;;  %v7943_v23 = vmul.f32 %v2895_v22, %v7655_v15 }
 0x391   : > { %v3167_v1 = vadd.f32 0.00028619796, %v3166_v60  ;;  %v2935_v57 = vadd.f32 1.1283791, %v2934_v7  ;;  %v3129_v21 = vadd.f32 0.0036580483, %v3128_v6  ;;  %4032 = vmatmul.bf16.vlgmr.msrb.gmra.mxu0 %v3748_v26  ;;  %v3749_v44 = vpack.c.bf16 %v7815_v36, %v7534_v25 }
 0x392   : > { %v2974_v16 = vmul.f32 %v2973_v38, %v7742_v17  ;;  %v3014_v39 = vmul.f32 %v3013_v63, %v7771_v41  ;;  %v7949_v49 = vmin.f32 %v3284_v2, 16.0  ;;  %v7952_v5 = vmul.f32 0.70710677, %v7931_v37 }
 0x393   : > { %v7955_v19 = vmul.f32 0.5, %v7847_v18  ;;  %v3247_v15 = vadd.f32 0.00028619796, %v3246_v61  ;;  %4061 = vmatmul.bf16.vlgmr.msrb.gmra.mxu1 %v3749_v44  ;;  %v3750_v4 = vpack.c.bf16 %v7856_v53, %v7602_v12  ;;  %v3751_v54 = vpack.c.bf16 %v3723_v33, %v7618_v11 }
 0x394   : > { %9660 = vst [vmem:[#allocation33_spill] sm:$0xff] %v7952_v5  ;;  %v3053_v25 = vadd.f32 0.18741608, %v3052_v0  ;;  %v3092_v36 = vmul.f32 %v3091_v28, %v7825_v55  ;;  %v3168_v38 = vmul.f32 %v3167_v1, %v7905_v24  ;;  %v3211_v2 = vadd.f32 0.05243302, %v3210_v43 }
 0x395   : > { %v7963_v22 = vmul.f32 %v2935_v57, %v7706_v51  ;;  %v3130_v10 = vmul.f32 %v3129_v21, %v7867_v52  ;;  %4090 = vmatmul.bf16.vlgmr.msrb.gmra.mxu2 %v3750_v4  ;;  %4119 = vmatmul.bf16.vlgmr.msrb.gmra.mxu3 %v3751_v54  ;;  %v2737_v18 = vmul.f32 3.8918573e-05, %v7558_v20  ;;  %v2897_v60 = vmul.f32 3.8918573e-05, %v7677_v35 }
 0x396   : > { %v2975_v12 = vadd.f32 1.1283791, %v2974_v16  ;;  %v7968_v53 = vadd.f32 1.1283791, %v3014_v39  ;;  %v3286_v11 = vmul.f32 2.1237322e-06, %v7949_v49  ;;  %v3324_v7 = vmul.f32 %v7952_v5, %v7952_v5 }
 0x397   : > { %v3248_v6 = vmul.f32 %v3247_v15, %v7926_v34  ;;  %v2738_v51 = vadd.f32 0.001143296, %v2737_v18  ;;  %v2898_v63 = vadd.f32 0.001143296, %v2897_v60  ;;  %v2777_v21 = vmul.f32 3.8918573e-05, %v7581_v31 }
 0x398   : > { %v3054_v33 = vmul.f32 %v3053_v25, %v7799_v56  ;;  %v3093_v61 = vadd.f32 0.18741608, %v3092_v36  ;;  %v3169_v26 = vadd.f32 0.0036580483, %v3168_v38  ;;  %v3212_v0 = vmul.f32 %v3211_v2, %v7894_v14 }
 0x399   : > { %v3131_v28 = vadd.f32 0.05243302, %v3130_v10  ;;  %v2739_v1 = vmul.f32 %v2738_v51, %v7558_v20  ;;  %v2899_v43 = vmul.f32 %v2898_v63, %v7677_v35  ;;  %v2778_v57 = vadd.f32 0.001143296, %v2777_v21 }
 0x39a   : > { %v7980_v44 = vmul.f32 %v2975_v12, %v7718_v27  ;;  %v3287_v16 = vadd.f32 0.00028619796, %v3286_v11  ;;  %v7982_v39 = vmin.f32 %v3324_v7, 16.0  ;;  %v2937_v15 = vmul.f32 3.8918573e-05, %v7728_v58 }
 0x39b   : > { %v3249_v4 = vadd.f32 0.0036580483, %v3248_v6  ;;  %v2740_v54 = vadd.f32 0.014752088, %v2739_v1  ;;  %v2900_v25 = vadd.f32 0.014752088, %v2899_v43  ;;  %v2779_v36 = vmul.f32 %v2778_v57, %v7581_v31 }
 0x39c   : > { %v3055_v38 = vadd.f32 1.1283791, %v3054_v33  ;;  %v3170_v2 = vmul.f32 %v3169_v26, %v7905_v24  ;;  %v3213_v10 = vadd.f32 0.18741608, %v3212_v0  ;;  %v2938_v18 = vadd.f32 0.001143296, %v2937_v15 }
 0x39d   : > { %v3094_v60 = vmul.f32 %v3093_v61, %v7825_v55  ;;  %v2741_v27 = vmul.f32 %v2740_v54, %v7558_v20  ;;  %v2901_v12 = vmul.f32 %v2900_v25, %v7677_v35  ;;  %v2780_v11 = vadd.f32 0.014752088, %v2779_v36 }
 0x39e   : > { %v3288_v7 = vmul.f32 %v3287_v16, %v7949_v49  ;;  %v3326_v6 = vmul.f32 2.1237322e-06, %v7982_v39  ;;  %v2939_v51 = vmul.f32 %v2938_v18, %v7728_v58  ;;  %v2817_v63 = vmul.f32 3.8918573e-05, %v7608_v30 }
 0x39f   : > { %v3250_v21 = vmul.f32 %v3249_v4, %v7926_v34  ;;  %v2742_v33 = vadd.f32 0.112945676, %v2741_v27  ;;  %v2902_v26 = vadd.f32 0.112945676, %v2901_v12  ;;  %v2781_v0 = vmul.f32 %v2780_v11, %v7581_v31 }
 0x3a0   : > { %v3132_v61 = vmul.f32 %v3131_v28, %v7867_v52  ;;  %v3171_v1 = vadd.f32 0.05243302, %v3170_v2  ;;  %v3214_v43 = vmul.f32 %v3213_v10, %v7894_v14  ;;  %v2940_v57 = vadd.f32 0.014752088, %v2939_v51 }
 0x3a1   : > { %v3095_v15 = vadd.f32 1.1283791, %v3094_v60  ;;  %v2743_v16 = vmul.f32 %v2742_v33, %v7558_v20  ;;  %v2903_v54 = vmul.f32 %v2902_v26, %v7677_v35  ;;  %v2782_v25 = vadd.f32 0.112945676, %v2781_v0 }
 0x3a2   : > { %v3289_v36 = vadd.f32 0.0036580483, %v3288_v7  ;;  %v3327_v18 = vadd.f32 0.00028619796, %v3326_v6  ;;  %v2941_v4 = vmul.f32 %v2940_v57, %v7728_v58  ;;  %v2818_v27 = vadd.f32 0.001143296, %v2817_v63 }
 0x3a3   : > { %v3251_v12 = vadd.f32 0.05243302, %v3250_v21  ;;  %v2744_v37 = vadd.f32 0.4994258, %v2743_v16  ;;  %v2904_v11 = vadd.f32 0.4994258, %v2903_v54  ;;  %v2783_v28 = vmul.f32 %v2782_v25, %v7581_v31 }
 0x3a4   : > { %v3133_v2 = vadd.f32 0.18741608, %v3132_v61  ;;  %v3215_v5 = vadd.f32 1.1283791, %v3214_v43  ;;  %v2942_v10 = vadd.f32 0.112945676, %v2941_v4  ;;  %v2819_v60 = vmul.f32 %v2818_v27, %v7608_v30 }
 0x3a5   : > { %v2745_v51 = vmul.f32 %v2744_v37, %v7558_v20  ;;  %v2905_v33 = vmul.f32 %v2904_v11, %v7677_v35  ;;  %v2784_v26 = vadd.f32 0.4994258, %v2783_v28  ;;  %v2977_v7 = vmul.f32 3.8918573e-05, %v7742_v17  ;;  %v9661_v37 = vld [vmem:[#allocation31_spill] sm:$0xff] }
 0x3a6   : > { %v3290_v6 = vmul.f32 %v3289_v36, %v7949_v49  ;;  %v3328_v63 = vmul.f32 %v3327_v18, %v7982_v39  ;;  %v2943_v21 = vmul.f32 %v2942_v10, %v7728_v58  ;;  %v2820_v0 = vadd.f32 0.014752088, %v2819_v60  ;;  %v9662_v36 = vld [vmem:[#allocation84_spill] sm:$0xff]  ;;  %v9663_v4 = vld [vmem:[#allocation79_spill] sm:$0xff] }
 0x3a7   : > { %v3252_v61 = vmul.f32 %v3251_v12, %v7926_v34  ;;  %v8010_v43 = vadd.f32 1.0, %v2745_v51  ;;  %v8012_v57 = vadd.f32 1.0, %v2905_v33  ;;  %v2785_v20 = vmul.f32 %v2784_v26, %v7581_v31 }
 0x3a8   : > { %v8017_v35 = vmul.f32 %v7968_v53, %v9661_v37  ;;  %v2944_v16 = vadd.f32 0.4994258, %v2943_v21  ;;  %v2821_v54 = vmul.f32 %v2820_v0, %v7608_v30  ;;  %v2978_v25 = vadd.f32 0.001143296, %v2977_v7 }
 0x3a9   : > { %v8021_v18 = vmul.f32 %v3055_v38, %v9662_v36  ;;  %v8024_v27 = vmul.f32 %v3095_v15, %v9663_v4  ;;  %v8027_v12 = vmul.f32 %v3171_v1, %v7905_v24  ;;  %4790 = vrcp.f32 %v8010_v43 }
 0x3aa   : > { %v8031_v31 = vmul.f32 %v3133_v2, %v7867_v52  ;;  %v3291_v53 = vadd.f32 0.05243302, %v3290_v6  ;;  %v8033_v11 = vadd.f32 0.0036580483, %v3328_v63  ;;  %4792 = vrcp.f32 %v8012_v57 }
 0x3ab   : > { %9664 = vst [vmem:[#allocation125_spill] sm:$0xff] %v8027_v12  ;;  %v8037_v28 = vmul.f32 %v3215_v5, %v7876_v8  ;;  %v8039_v38 = vadd.f32 0.18741608, %v3252_v61  ;;  %v8041_v15 = vadd.f32 1.0, %v2785_v20  ;;  %v2857_v1 = vmul.f32 3.8918573e-05, %v7652_v45 }
 0x3ac   : > { %9665 = vst [vmem:[#allocation37_spill] sm:$0xff] %v8031_v31  ;;  %v2756_v10 = vand.u32 2147483647, %v8010_v43  ;;  %v2945_v60 = vmul.f32 %v2944_v16, %v7728_v58  ;;  %v2822_v2 = vadd.f32 0.112945676, %v2821_v54  ;;  %v2979_v51 = vmul.f32 %v2978_v25, %v7742_v17 }
 0x3ad   : > { %v2758_v33 = vand.u32 2147483648, %v8010_v43  ;;  %v2916_v26 = vand.u32 2147483647, %v8012_v57  ;;  %v2918_v8 = vand.u32 2147483648, %v8012_v57  ;;  %4794 = vrcp.f32 %v8041_v15 }
 0x3ae   : > { %v8052_v5 = vmul.f32 %v3291_v53, %v7949_v49  ;;  %v8054_v7 = vadd.f32 1.0, %v2945_v60  ;;  %v2823_v6 = vmul.f32 %v2822_v2, %v7608_v30  ;;  %v2980_v63 = vadd.f32 0.014752088, %v2979_v51 }
 0x3af   : > { %v4791_v58 = vpop.eup %4790  ;;  %vm2752_vm15 = vweird.f32 %v8010_v43  ;;  %vm2912_vm0 = vweird.f32 %v8012_v57  ;;  %v2798_v21 = vand.u32 2147483648, %v8041_v15  ;;  %v2858_v0 = vadd.f32 0.001143296, %v2857_v1 }
 0x3b0   : > { %9666 = vst [vmem:[#allocation69_spill] sm:$0xff] %v8052_v5  ;;  %v4793_v61 = vpop.eup %4792  ;;  %v2748_v20 = vmul.f32 %v4791_v58, %v8010_v43  ;;  %vm8061_vm1 = vcmp.eq.f32.partialorder %v2756_v10, 8.507059e+37  ;;  %v2796_v16 = vand.u32 2147483647, %v8041_v15  ;;  %4796 = vrcp.f32 %v8054_v7 }
 0x3b1   : > { %v2759_v54 = vor.u32 1.1754944e-38, %v2758_v33  ;;  %v2908_v25 = vmul.f32 %v4793_v61, %v8012_v57  ;;  %vm8068_vm2 = vcmp.eq.f32.partialorder %v2916_v26, 8.507059e+37  ;;  %v2919_v4 = vor.u32 1.1754944e-38, %v2918_v8 }
 0x3b2   : > { %v2749_v53 = vsub.f32 1.0, %v2748_v20  ;;  %vm2792_vm3 = vweird.f32 %v8041_v15  ;;  %v2824_v1 = vadd.f32 0.4994258, %v2823_v6  ;;  %v2981_v10 = vmul.f32 %v2980_v63, %v7742_v17 }
 0x3b3   : > { %v3017_v60 = vmul.f32 3.8918573e-05, %v7771_v41  ;;  %v4795_v2 = vpop.eup %4794  ;;  %vm2753_vm4 = vweird.f32 %v4791_v58  ;;  %v2909_v51 = vsub.f32 1.0, %v2908_v25  ;;  %v2799_v3 = vor.u32 1.1754944e-38, %v2798_v21 }
 0x3b4   : > { %v2859_v33 = vmul.f32 %v2858_v0, %v7652_v45  ;;  %v2750_v13 = vmul.f32 %v4791_v58, %v2749_v53  ;;  %vm2913_vm5 = vweird.f32 %v4793_v61  ;;  %v2788_v26 = vmul.f32 %v4795_v2, %v8041_v15  ;;  %vm2754_vm8 = vmor %vm2752_vm15, %vm2753_vm4 }
 0x3b5   : > { %vm8077_vm6 = vcmp.eq.f32.partialorder %v2796_v16, 8.507059e+37  ;;  %v2956_v6 = vand.u32 2147483647, %v8054_v7  ;;  %v2910_v20 = vmul.f32 %v4793_v61, %v2909_v51  ;;  %vm2952_vm7 = vweird.f32 %v8054_v7  ;;  %vm2914_vm10 = vmor %vm2912_vm0, %vm2913_vm5 }
 0x3b6   : > { %v2825_v63 = vmul.f32 %v2824_v1, %v7608_v30  ;;  %v2982_v9 = vadd.f32 0.112945676, %v2981_v10  ;;  %v2860_v25 = vadd.f32 0.014752088, %v2859_v33  ;;  %v4797_v21 = vpop.eup %4796  ;;  %v2751_v29 = vadd.f32 %v4791_v58, %v2750_v13 }
 0x3b7   : > { %v2789_v0 = vsub.f32 1.0, %v2788_v26  ;;  %v2958_v53 = vand.u32 2147483648, %v8054_v7  ;;  %v3018_v5 = vadd.f32 0.001143296, %v3017_v60  ;;  %v2911_v16 = vadd.f32 %v4793_v61, %v2910_v20 }
 0x3b8   : > { %vm2793_vm9 = vweird.f32 %v4795_v2  ;;  %v2948_v51 = vmul.f32 %v4797_v21, %v8054_v7  ;;  %v8089_v31 = vadd.f32 1.0, %v2825_v63  ;;  %v2755_v12 = vsel %vm2754_vm8, %v4791_v58, %v2751_v29  ;;  %v9675_v7 = vld [vmem:[#allocation28_spill] sm:$0xff] }
 0x3b9   : > { %v2790_v13 = vmul.f32 %v4795_v2, %v2789_v0  ;;  %v2983_v30 = vmul.f32 %v2982_v9, %v7742_v17  ;;  %v2861_v1 = vmul.f32 %v2860_v25, %v7652_v45  ;;  %v2760_v43 = vsel %vm8061_vm1, %v2759_v54, %v2755_v12  ;;  %vm2794_vm12 = vmor %vm2792_vm3, %vm2793_vm9 }
 0x3ba   : > { %v2915_v10 = vsel %vm2914_vm10, %v4793_v61, %v2911_v16  ;;  %v2949_v60 = vsub.f32 1.0, %v2948_v51  ;;  %4798 = vrcp.f32 %v8089_v31  ;;  %v2761_v33 = vmul.f32 %v2760_v43, %v7864_v62 }
 0x3bb   : > { %v2920_v29 = vsel %vm8068_vm2, %v2919_v4, %v2915_v10  ;;  %v2791_v58 = vadd.f32 %v4795_v2, %v2790_v13  ;;  %vm8102_vm11 = vcmp.eq.f32.partialorder %v2956_v6, 8.507059e+37  ;;  %vm2953_vm13 = vweird.f32 %v4797_v21 }
 0x3bc   : > { %v2921_v9 = vmul.f32 %v2920_v29, %v7943_v23  ;;  %v2950_v12 = vmul.f32 %v4797_v21, %v2949_v60  ;;  %v3019_v61 = vmul.f32 %v3018_v5, %v7771_v41  ;;  %v4500_v37 = vclamps-f32 %v2761_v33, 1.0  ;;  %vm2954_vm14 = vmor %vm2952_vm7, %vm2953_vm13 }
 0x3bd   : > { %v2795_v62 = vsel %vm2794_vm12, %v4795_v2, %v2791_v58  ;;  %v2984_v54 = vadd.f32 0.4994258, %v2983_v30  ;;  %v2862_v36 = vadd.f32 0.112945676, %v2861_v1  ;;  %v2959_v20 = vor.u32 1.1754944e-38, %v2958_v53  ;;  %v9676_v30 = vld [vmem:[#allocation39_spill] sm:$0xff] }
 0x3be   : > { %v4504_v4 = vclamps-f32 %v2921_v9, 1.0  ;;  %v2800_v26 = vsel %vm8077_vm6, %v2799_v3, %v2795_v62  ;;  %v2951_v6 = vadd.f32 %v4797_v21, %v2950_v12  ;;  %v3692_v63 = vadd.f32 1.0, %v4500_v37 }
 0x3bf   : > { %v2801_v23 = vmul.f32 %v2800_v26, %v7879_v50  ;;  %v2985_v15 = vmul.f32 %v2984_v54, %v7742_v17  ;;  %v3057_v5 = vmul.f32 3.8918573e-05, %v7799_v56  ;;  %v2863_v16 = vmul.f32 %v2862_v36, %v7652_v45  ;;  %v9677_v54 = vld [vmem:[#allocation83_spill] sm:$0xff] }
 0x3c0   : > { %v4799_v25 = vpop.eup %4798  ;;  %v3696_v2 = vadd.f32 1.0, %v4504_v4  ;;  %v2955_v0 = vsel %vm2954_vm14, %v4797_v21, %v2951_v6  ;;  %v3020_v51 = vadd.f32 0.014752088, %v3019_v61  ;;  %v2838_v50 = vand.u32 2147483648, %v8089_v31 }
 0x3c1   : > { %v4501_v8 = vclamps-f32 %v2801_v23, 1.0  ;;  %v2960_v3 = vsel %vm8102_vm11, %v2959_v20, %v2955_v0  ;;  %v2828_v53 = vmul.f32 %v4799_v25, %v8089_v31  ;;  %v3724_v13 = vmul.f32 %v3692_v63, %v9675_v7 }
 0x3c2   : > { %v3728_v17 = vmul.f32 %v3696_v2, %v9676_v30  ;;  %v2961_v1 = vmul.f32 %v2960_v3, %v7963_v22  ;;  %v8126_v43 = vadd.f32 1.0, %v2985_v15  ;;  %v2864_v60 = vadd.f32 0.4994258, %v2863_v16 }
 0x3c3   : > { %v3693_v21 = vadd.f32 1.0, %v4501_v8  ;;  %v2829_v10 = vsub.f32 1.0, %v2828_v53  ;;  %v3021_v33 = vmul.f32 %v3020_v51, %v7771_v41  ;;  %v3254_v29 = vmul.f32 %v8039_v38, %v7926_v34 }
 0x3c4   : > { %v3752_v58 = vpack.c.bf16 %v3728_v17, %v3724_v13  ;;  %v4505_v57 = vclamps-f32 %v2961_v1, 1.0  ;;  %4800 = vrcp.f32 %v8126_v43  ;;  %vm2832_vm15 = vweird.f32 %v8089_v31 }
 0x3c5   : > { %v2830_v9 = vmul.f32 %v4799_v25, %v2829_v10  ;;  %vm2833_vm0 = vweird.f32 %v4799_v25  ;;  %v2836_v22 = vand.u32 2147483647, %v8089_v31  ;;  %v2865_v61 = vmul.f32 %v2864_v60, %v7652_v45 }
 0x3c6   : > { %4037 = vmatmul.bf16.gmra.mxu0 %v3752_v58  ;;  %v3697_v12 = vadd.f32 1.0, %v4505_v57  ;;  %v3022_v37 = vadd.f32 0.112945676, %v3021_v33  ;;  %v3058_v62 = vadd.f32 0.001143296, %v3057_v5  ;;  %v3725_v36 = vmul.f32 %v3693_v21, %v9677_v54  ;;  %vm2834_vm1 = vmor %vm2832_vm15, %vm2833_vm0 }
 0x3c7   : > { %v2831_v4 = vadd.f32 %v4799_v25, %v2830_v9  ;;  %v2839_v38 = vor.u32 1.1754944e-38, %v2838_v50  ;;  %v3217_v26 = vmul.f32 3.8918573e-05, %v7894_v14  ;;  %v8138_v20 = vadd.f32 1.0, %v2865_v61 }
 0x3c8   : > { %v3729_v6 = vmul.f32 %v3697_v12, %v7844_v40  ;;  %v3023_v63 = vmul.f32 %v3022_v37, %v7771_v41  ;;  %v3059_v31 = vmul.f32 %v3058_v62, %v7799_v56  ;;  %vm2837_vm2 = vcmp.eq.f32.partialorder %v2836_v22, 8.507059e+37 }
 0x3c9   : > { %v2835_v23 = vsel %vm2834_vm1, %v4799_v25, %v2831_v4  ;;  %v3218_v45 = vadd.f32 0.001143296, %v3217_v26  ;;  %v3097_v15 = vmul.f32 3.8918573e-05, %v7825_v55  ;;  %v8145_v2 = vmul.f32 %v8033_v11, %v7982_v39 }
 0x3ca   : > { %v4801_v5 = vpop.eup %4800  ;;  %v3753_v0 = vpack.c.bf16 %v3729_v6, %v3725_v36  ;;  %v2840_v16 = vsel %vm2837_vm2, %v2839_v38, %v2835_v23  ;;  %4802 = vrcp.f32 %v8138_v20  ;;  %v2996_v8 = vand.u32 2147483647, %v8126_v43 }
 0x3cb   : > { %v2841_v40 = vmul.f32 %v2840_v16, %v7897_v46  ;;  %v2988_v51 = vmul.f32 %v4801_v5, %v8126_v43  ;;  %v2998_v25 = vand.u32 2147483648, %v8126_v43  ;;  %v8152_v3 = vadd.f32 1.1283791, %v3254_v29 }
 0x3cc   : > { %4066 = vmatmul.bf16.gmra.mxu1 %v3753_v0  ;;  %v3024_v53 = vadd.f32 0.4994258, %v3023_v63  ;;  %v3060_v50 = vadd.f32 0.014752088, %v3059_v31  ;;  %v3219_v11 = vmul.f32 %v3218_v45, %v7894_v14  ;;  %vm2992_vm3 = vweird.f32 %v8126_v43 }
 0x3cd   : > { %v2989_v7 = vsub.f32 1.0, %v2988_v51  ;;  %v3098_v13 = vadd.f32 0.001143296, %v3097_v15  ;;  %v3257_v30 = vmul.f32 3.8918573e-05, %v7926_v34  ;;  %v4502_v46 = vclamps-f32 %v2841_v40, 1.0 }
 0x3ce   : > { %v3025_v17 = vmul.f32 %v3024_v53, %v7771_v41  ;;  %v3061_v1 = vmul.f32 %v3060_v50, %v7799_v56  ;;  %v3220_v21 = vadd.f32 0.014752088, %v3219_v11  ;;  %vm2993_vm4 = vweird.f32 %v4801_v5 }
 0x3cf   : > { %v2990_v10 = vmul.f32 %v4801_v5, %v2989_v7  ;;  %vm8159_vm5 = vcmp.eq.f32.partialorder %v2996_v8, 8.507059e+37  ;;  %v2999_v33 = vor.u32 1.1754944e-38, %v2998_v25  ;;  %v3099_v22 = vmul.f32 %v3098_v13, %v7825_v55  ;;  %vm2994_vm7 = vmor %vm2992_vm3, %vm2993_vm4 }
 0x3d0   : > { %v4803_v29 = vpop.eup %4802  ;;  %v8163_v58 = vadd.f32 1.0, %v3025_v17  ;;  %v3062_v57 = vadd.f32 0.112945676, %v3061_v1  ;;  %v3221_v9 = vmul.f32 %v3220_v21, %v7894_v14  ;;  %vm2872_vm6 = vweird.f32 %v8138_v20 }
 0x3d1   : > { %v2991_v12 = vadd.f32 %v4801_v5, %v2990_v10  ;;  %v2868_v41 = vmul.f32 %v4803_v29, %v8138_v20  ;;  %v2876_v61 = vand.u32 2147483647, %v8138_v20  ;;  %v3694_v37 = vadd.f32 1.0, %v4502_v46 }
 0x3d2   : > { %v2878_v62 = vand.u32 2147483648, %v8138_v20  ;;  %4804 = vrcp.f32 %v8163_v58  ;;  %v3258_v54 = vadd.f32 0.001143296, %v3257_v30  ;;  %v3063_v38 = vmul.f32 %v3062_v57, %v7799_v56 }
 0x3d3   : > { %v2995_v36 = vsel %vm2994_vm7, %v4801_v5, %v2991_v12  ;;  %v2869_v4 = vsub.f32 1.0, %v2868_v41  ;;  %v3222_v26 = vadd.f32 0.112945676, %v3221_v9  ;;  %vm2873_vm8 = vweird.f32 %v4803_v29 }
 0x3d4   : > { %v3000_v6 = vsel %vm8159_vm5, %v2999_v33, %v2995_v36  ;;  %v3100_v63 = vadd.f32 0.014752088, %v3099_v22  ;;  %v3137_v31 = vmul.f32 3.8918573e-05, %v7867_v52  ;;  %v3064_v45 = vadd.f32 0.4994258, %v3063_v38  ;;  %vm2874_vm10 = vmor %vm2872_vm6, %vm2873_vm8 }
 0x3d5   : > { %v3001_v43 = vmul.f32 %v3000_v6, %v7980_v44  ;;  %v2870_v23 = vmul.f32 %v4803_v29, %v2869_v4  ;;  %v3223_v15 = vmul.f32 %v3222_v26, %v7894_v14  ;;  %vm8180_vm9 = vcmp.eq.f32.partialorder %v2876_v61, 8.507059e+37  ;;  %v9682_v44 = vld [vmem:[#allocation78_spill] sm:$0xff] }
 0x3d6   : > { %v2879_v5 = vor.u32 1.1754944e-38, %v2878_v62  ;;  %v3101_v16 = vmul.f32 %v3100_v63, %v7825_v55  ;;  %v3259_v40 = vmul.f32 %v3258_v54, %v7926_v34  ;;  %v3065_v25 = vmul.f32 %v3064_v45, %v7799_v56 }
 0x3d7   : > { %v4506_v51 = vclamps-f32 %v3001_v43, 1.0  ;;  %v2871_v8 = vadd.f32 %v4803_v29, %v2870_v23  ;;  %v3224_v53 = vadd.f32 0.4994258, %v3223_v15  ;;  %v3726_v11 = vmul.f32 %v3694_v37, %v9682_v44 }
 0x3d8   : > { %v4805_v50 = vpop.eup %4804  ;;  %v3102_v7 = vadd.f32 0.112945676, %v3101_v16  ;;  %v3260_v13 = vadd.f32 0.014752088, %v3259_v40  ;;  %v3138_v30 = vadd.f32 0.001143296, %v3137_v31  ;;  %vm3032_vm12 = vweird.f32 %v8163_v58 }
 0x3d9   : > { %v3698_v46 = vadd.f32 1.0, %v4506_v51  ;;  %v2875_v17 = vsel %vm2874_vm10, %v4803_v29, %v2871_v8  ;;  %v3028_v1 = vmul.f32 %v4805_v50, %v8163_v58  ;;  %v3036_v21 = vand.u32 2147483647, %v8163_v58 }
 0x3da   : > { %v2880_v56 = vsel %vm8180_vm9, %v2879_v5, %v2875_v17  ;;  %v8195_v10 = vadd.f32 1.0, %v3065_v25  ;;  %v3225_v60 = vmul.f32 %v3224_v53, %v7894_v14  ;;  %v3103_v33 = vmul.f32 %v3102_v7, %v7825_v55 }
 0x3db   : > { %v3730_v20 = vmul.f32 %v3698_v46, %v7872_v48  ;;  %v2881_v57 = vmul.f32 %v2880_v56, %v7935_v47  ;;  %v3029_v9 = vsub.f32 1.0, %v3028_v1  ;;  %v3261_v29 = vmul.f32 %v3260_v13, %v7926_v34 }
 0x3dc   : > { %v3038_v22 = vand.u32 2147483648, %v8163_v58  ;;  %4806 = vrcp.f32 %v8195_v10  ;;  %v3139_v12 = vmul.f32 %v3138_v30, %v7867_v52  ;;  %v3297_v41 = vmul.f32 3.8918573e-05, %v7949_v49 }
 0x3dd   : > { %v3754_v61 = vpack.c.bf16 %v3730_v20, %v3726_v11  ;;  %v3030_v37 = vmul.f32 %v4805_v50, %v3029_v9  ;;  %vm3033_vm11 = vweird.f32 %v4805_v50  ;;  %v8206_v14 = vadd.f32 1.0, %v3225_v60  ;;  %v9685_v11 = vld [vmem:[#allocation29_spill] sm:$0xff] }
 0x3de   : > { %v4503_v62 = vclamps-f32 %v2881_v57, 1.0  ;;  %v3104_v47 = vadd.f32 0.4994258, %v3103_v33  ;;  %v3262_v48 = vadd.f32 0.112945676, %v3261_v29  ;;  %v3078_v4 = vand.u32 2147483648, %v8195_v10  ;;  %vm3034_vm13 = vmor %vm3032_vm12, %vm3033_vm11 }
 0x3df   : > { %4095 = vmatmul.bf16.gmra.mxu2 %v3754_v61  ;;  %v3031_v54 = vadd.f32 %v4805_v50, %v3030_v37  ;;  %v3076_v36 = vand.u32 2147483647, %v8195_v10  ;;  %4808 = vrcp.f32 %v8206_v14  ;;  %v3039_v38 = vor.u32 1.1754944e-38, %v3038_v22 }
 0x3e0   : > { %v3105_v26 = vmul.f32 %v3104_v47, %v7825_v55  ;;  %v3263_v6 = vmul.f32 %v3262_v48, %v7926_v34  ;;  %v3298_v63 = vadd.f32 0.001143296, %v3297_v41  ;;  %v8216_v58 = vmul.f32 %v8152_v3, %v7910_v59  ;;  %v9693_v47 = vld [vmem:[#allocation69_spill] sm:$0xff] }
 0x3e1   : > { %v3035_v31 = vsel %vm3034_vm13, %v4805_v50, %v3031_v54  ;;  %vm3037_vm14 = vcmp.eq.f32.partialorder %v3036_v21, 8.507059e+37  ;;  %v3140_v43 = vadd.f32 0.014752088, %v3139_v12  ;;  %v3695_v15 = vadd.f32 1.0, %v4503_v62 }
 0x3e2   : > { %v4807_v23 = vpop.eup %4806  ;;  %v3040_v45 = vsel %vm3037_vm14, %v3039_v38, %v3035_v31  ;;  %vm3072_vm15 = vweird.f32 %v8195_v10  ;;  %v8219_v0 = vadd.f32 1.0, %v3105_v26  ;;  %vm8223_vm0 = vcmp.eq.f32.partialorder %v3076_v36, 8.507059e+37 }
 0x3e3   : > { %v3041_v5 = vmul.f32 %v3040_v45, %v8017_v35  ;;  %v3068_v55 = vmul.f32 %v4807_v23, %v8195_v10  ;;  %v3079_v59 = vor.u32 1.1754944e-38, %v3078_v4  ;;  %v3264_v3 = vadd.f32 0.4994258, %v3263_v6 }
 0x3e4   : > { %v3236_v40 = vand.u32 2147483647, %v8206_v14  ;;  %v3238_v51 = vand.u32 2147483648, %v8206_v14  ;;  %4810 = vrcp.f32 %v8219_v0  ;;  %v3299_v8 = vmul.f32 %v3298_v63, %v7949_v49 }
 0x3e5   : > { %v4809_v25 = vpop.eup %4808  ;;  %v4507_v53 = vclamps-f32 %v3041_v5, 1.0  ;;  %v3069_v50 = vsub.f32 1.0, %v3068_v55  ;;  %v3265_v35 = vmul.f32 %v3264_v3, %v7926_v34  ;;  %v3141_v44 = vmul.f32 %v3140_v43, %v7867_v52 }
 0x3e6   : > { %v3727_v7 = vmul.f32 %v3695_v15, %v9685_v11  ;;  %vm3073_vm1 = vweird.f32 %v4807_v23  ;;  %v3228_v13 = vmul.f32 %v4809_v25, %v8206_v14  ;;  %vm3232_vm2 = vweird.f32 %v8206_v14 }
 0x3e7   : > { %v3699_v30 = vadd.f32 1.0, %v4507_v53  ;;  %v3070_v46 = vmul.f32 %v4807_v23, %v3069_v50  ;;  %v8236_v17 = vadd.f32 1.0, %v3265_v35  ;;  %v3142_v1 = vadd.f32 0.112945676, %v3141_v44  ;;  %vm3074_vm4 = vmor %vm3072_vm15, %vm3073_vm1 }
 0x3e8   : > { %v3229_v21 = vsub.f32 1.0, %v3228_v13  ;;  %vm8238_vm3 = vcmp.eq.f32.partialorder %v3236_v40, 8.507059e+37  ;;  %v3239_v34 = vor.u32 1.1754944e-38, %v3238_v51  ;;  %v3116_v60 = vand.u32 2147483647, %v8219_v0 }
 0x3e9   : > { %v3731_v33 = vmul.f32 %v3699_v30, %v7892_v32  ;;  %v3071_v20 = vadd.f32 %v4807_v23, %v3070_v46  ;;  %4812 = vrcp.f32 %v8236_v17  ;;  %v3300_v57 = vadd.f32 0.014752088, %v3299_v8 }
 0x3ea   : > { %v4811_v9 = vpop.eup %4810  ;;  %v3230_v29 = vmul.f32 %v4809_v25, %v3229_v21  ;;  %vm3233_vm5 = vweird.f32 %v4809_v25  ;;  %v3143_v22 = vmul.f32 %v3142_v1, %v7867_v52  ;;  %v3177_v12 = vmul.f32 3.8918573e-05, %v7905_v24 }
 0x3eb   : > { %v3755_v41 = vpack.c.bf16 %v3731_v33, %v3727_v7  ;;  %v3075_v61 = vsel %vm3074_vm4, %v4807_v23, %v3071_v20  ;;  %v3108_v37 = vmul.f32 %v4811_v9, %v8219_v0  ;;  %vm3112_vm6 = vweird.f32 %v8219_v0  ;;  %vm3234_vm8 = vmor %vm3232_vm2, %vm3233_vm5 }
 0x3ec   : > { %v3080_v32 = vsel %vm8223_vm0, %v3079_v59, %v3075_v61  ;;  %v3231_v62 = vadd.f32 %v4809_v25, %v3230_v29  ;;  %vm8254_vm7 = vcmp.eq.f32.partialorder %v3116_v60, 8.507059e+37  ;;  %v3118_v10 = vand.u32 2147483648, %v8219_v0 }
 0x3ed   : > { %4124 = vmatmul.bf16.gmra.mxu3 %v3755_v41  ;;  %v3081_v48 = vmul.f32 %v3080_v32, %v8021_v18  ;;  %v3109_v54 = vsub.f32 1.0, %v3108_v37  ;;  %v3144_v36 = vadd.f32 0.4994258, %v3143_v22  ;;  %v3301_v4 = vmul.f32 %v3300_v57, %v7949_v49  ;;  %v9690_v57 = vld [vmem:[#allocation41_spill] sm:$0xff] }
 0x3ee   : > { %v3235_v38 = vsel %vm3234_vm8, %v4809_v25, %v3231_v62  ;;  %vm3113_vm9 = vweird.f32 %v4811_v9  ;;  %v3178_v26 = vadd.f32 0.001143296, %v3177_v12  ;;  %v3337_v6 = vmul.f32 3.8918573e-05, %v7982_v39  ;;  %v9691_v22 = vld [vmem:[#allocation125_spill] sm:$0xff] }
 0x3ef   : > { %v4813_v63 = vpop.eup %4812  ;;  %v4508_v31 = vclamps-f32 %v3081_v48, 1.0  ;;  %v3240_v43 = vsel %vm8238_vm3, %v3239_v34, %v3235_v38  ;;  %v3110_v23 = vmul.f32 %v4811_v9, %v3109_v54  ;;  %v3145_v18 = vmul.f32 %v3144_v36, %v7867_v52  ;;  %vm3114_vm10 = vmor %vm3112_vm6, %vm3113_vm9  ;;  %v9692_v32 = vld [vmem:[#allocation37_spill] sm:$0xff] }
 0x3f0   : > { %v3241_v14 = vmul.f32 %v3240_v43, %v8037_v28  ;;  %v3119_v45 = vor.u32 1.1754944e-38, %v3118_v10  ;;  %v3268_v15 = vmul.f32 %v4813_v63, %v8236_v17  ;;  %v3302_v5 = vadd.f32 0.112945676, %v3301_v4 }
 0x3f1   : > { %v3700_v55 = vadd.f32 1.0, %v4508_v31  ;;  %v3111_v16 = vadd.f32 %v4811_v9, %v3110_v23  ;;  %v8269_v59 = vadd.f32 1.0, %v3145_v18  ;;  %v3179_v3 = vmul.f32 %v3178_v26, %v7905_v24  ;;  %v9694_v26 = vld [vmem:[#allocation40_spill] sm:$0xff] }
 0x3f2   : > { %v4512_v40 = vclamps-f32 %v3241_v14, 1.0  ;;  %v3269_v51 = vsub.f32 1.0, %v3268_v15  ;;  %v3303_v52 = vmul.f32 %v3302_v5, %v7949_v49  ;;  %v3338_v8 = vadd.f32 0.001143296, %v3337_v6 }
 0x3f3   : > { %v3115_v28 = vsel %vm3114_vm10, %v4811_v9, %v3111_v16  ;;  %v3276_v25 = vand.u32 2147483647, %v8236_v17  ;;  %v3278_v53 = vand.u32 2147483648, %v8236_v17  ;;  %4814 = vrcp.f32 %v8269_v59 }
 0x3f4   : > { %v3704_v50 = vadd.f32 1.0, %v4512_v40  ;;  %v3120_v35 = vsel %vm8254_vm7, %v3119_v45, %v3115_v28  ;;  %v3270_v44 = vmul.f32 %v4813_v63, %v3269_v51  ;;  %vm3273_vm11 = vweird.f32 %v4813_v63 }
 0x3f5   : > { %v3121_v0 = vmul.f32 %v3120_v35, %v8024_v27  ;;  %vm3272_vm12 = vweird.f32 %v8236_v17  ;;  %v3304_v11 = vadd.f32 0.4994258, %v3303_v52  ;;  %v3180_v7 = vadd.f32 0.014752088, %v3179_v3 }
 0x3f6   : > { %v3732_v13 = vmul.f32 %v3700_v55, %v7914_v42  ;;  %v3736_v30 = vmul.f32 %v3704_v50, %v7955_v19  ;;  %v3271_v46 = vadd.f32 %v4813_v63, %v3270_v44  ;;  %v3339_v1 = vmul.f32 %v3338_v8, %v7982_v39  ;;  %vm3274_vm13 = vmor %vm3272_vm12, %vm3273_vm11  ;;  %v2248_v44 = vpop.f32.mrf.mxu0 }
 0x3f7   : > { %vm3277_vm14 = vcmp.eq.f32.partialorder %v3276_v25, 8.507059e+37  ;;  %v3279_v21 = vor.u32 1.1754944e-38, %v3278_v53  ;;  %v3305_v56 = vmul.f32 %v3304_v11, %v7949_v49  ;;  %v3181_v34 = vmul.f32 %v3180_v7, %v7905_v24  ;;  %v9695_v25 = vld [vmem:[#allocation122_spill] sm:$0xff] }
 0x3f8   : > { %v3756_v60 = vpack.c.bf16 %v3736_v30, %v3732_v13  ;;  %v4509_v27 = vclamps-f32 %v3121_v0, 1.0  ;;  %v3275_v33 = vsel %vm3274_vm13, %v4813_v63, %v3271_v46  ;;  %v3340_v17 = vadd.f32 0.014752088, %v3339_v1  ;;  %v2277_v0 = vpop.f32.mrf.mxu1  ;;  %v9696_v13 = vld [vmem:[#allocation73_spill] sm:$0xff] }
 0x3f9   : > { %v4815_v20 = vpop.eup %4814  ;;  %v2357_v9 = vmul.f32 0.5, %v9690_v57  ;;  %v3280_v42 = vsel %vm3277_vm14, %v3279_v21, %v3275_v33  ;;  %v8289_v29 = vadd.f32 1.0, %v3305_v56  ;;  %v3182_v19 = vadd.f32 0.112945676, %v3181_v34  ;;  %v9697_v21 = vld [vmem:[#allocation72_spill] sm:$0xff] }
 0x3fa   : > { %v3173_v12 = vadd.f32 0.18741608, %v9691_v22  ;;  %4042 = vmatmul.bf16.gmra.mxu0 %v3756_v60  ;;  %v3281_v41 = vmul.f32 %v3280_v42, %v8216_v58  ;;  %v3148_v61 = vmul.f32 %v4815_v20, %v8269_v59  ;;  %v3341_v37 = vmul.f32 %v3340_v17, %v7982_v39 }
 0x3fb   : > { %v3135_v62 = vadd.f32 1.1283791, %v9692_v32  ;;  %v3293_v10 = vadd.f32 0.18741608, %v9693_v47  ;;  %v3331_v48 = vadd.f32 0.05243302, %v8145_v2  ;;  %4816 = vrcp.f32 %v8289_v29 }
 0x3fc   : > { %v4513_v54 = vclamps-f32 %v3281_v41, 1.0  ;;  %v3701_v36 = vadd.f32 1.0, %v4509_v27  ;;  %v3149_v4 = vsub.f32 1.0, %v3148_v61  ;;  %v3183_v38 = vmul.f32 %v3182_v19, %v7905_v24  ;;  %v9698_v41 = vld [vmem:[#allocation138_spill] sm:$0xff]  ;;  %v9700_v47 = vld [vmem:[#allocation43_spill] sm:$0xff] }
 0x3fd   : > { %v2361_v6 = vmul.f32 0.5, %v9694_v26  ;;  %v3156_v58 = vand.u32 2147483647, %v8269_v59  ;;  %v3158_v63 = vand.u32 2147483648, %v8269_v59  ;;  %v3342_v31 = vadd.f32 0.112945676, %v3341_v37 }
 0x3fe   : > { %v3705_v43 = vadd.f32 1.0, %v4513_v54  ;;  %v3150_v23 = vmul.f32 %v4815_v20, %v3149_v4  ;;  %vm3153_vm15 = vweird.f32 %v4815_v20  ;;  %v3184_v18 = vadd.f32 0.4994258, %v3183_v38  ;;  %v9699_v32 = vld [vmem:[#allocation46_spill] sm:$0xff]  ;;  %v9702_v38 = vld [vmem:[#allocation137_spill] sm:$0xff] }
 0x3ff   : > { %v3294_v2 = vmul.f32 %v3293_v10, %v7949_v49  ;;  %v3332_v14 = vmul.f32 %v3331_v48, %v7982_v39  ;;  %vm3152_vm0 = vweird.f32 %v8269_v59  ;;  %v3343_v45 = vmul.f32 %v3342_v31, %v7982_v39  ;;  %v9701_v48 = vld [vmem:[#allocation45_spill] sm:$0xff] }
 0x400   : > { %v3733_v15 = vmul.f32 %v3701_v36, %v2357_v9  ;;  %v3737_v5 = vmul.f32 %v3705_v43, %v2361_v6  ;;  %v3151_v55 = vadd.f32 %v4815_v20, %v3150_v23  ;;  %v3185_v16 = vmul.f32 %v3184_v18, %v7905_v24  ;;  %vm3154_vm1 = vmor %vm3152_vm0, %vm3153_vm15  ;;  %v9703_v18 = vld [vmem:[#allocation26_spill] sm:$0xff] }
 0x401   : > { %v4817_v3 = vpop.eup %4816  ;;  %v3174_v40 = vmul.f32 %v3173_v12, %v7905_v24  ;;  %v3159_v51 = vor.u32 1.1754944e-38, %v3158_v63  ;;  %v3344_v52 = vadd.f32 0.4994258, %v3343_v45  ;;  %vm3157_vm2 = vcmp.eq.f32.partialorder %v3156_v58, 8.507059e+37 }
 0x402   : > { %v3757_v8 = vpack.c.bf16 %v3737_v5, %v3733_v15  ;;  %v3155_v28 = vsel %vm3154_vm1, %v4815_v20, %v3151_v55  ;;  %v3308_v49 = vmul.f32 %v4817_v3, %v8289_v29  ;;  %v3136_v59 = vmul.f32 %v3135_v62, %v9695_v25  ;;  %v2306_v20 = vpop.f32.mrf.mxu2  ;;  %v2335_v62 = vpop.f32.mrf.mxu3 }
 0x403   : > { %v3160_v53 = vsel %vm3157_vm2, %v3159_v51, %v3155_v28  ;;  %v8311_v50 = vadd.f32 1.0, %v3185_v16  ;;  %v3345_v35 = vmul.f32 %v3344_v52, %v7982_v39  ;;  %v3295_v11 = vadd.f32 1.1283791, %v3294_v2  ;;  %v2250_v51 = vpop.f32.mrf.mxu0 }
 0x404   : > { %v3333_v7 = vadd.f32 0.18741608, %v3332_v14  ;;  %4071 = vmatmul.bf16.gmra.mxu1 %v3757_v8  ;;  %v3309_v24 = vsub.f32 1.0, %v3308_v49  ;;  %v8315_v30 = vadd.f32 %v2248_v44, %v9696_v13  ;;  %v3161_v46 = vmul.f32 %v3160_v53, %v3136_v59 }
 0x405   : > { %v3318_v1 = vand.u32 2147483648, %v8289_v29  ;;  %4818 = vrcp.f32 %v8311_v50  ;;  %v8320_v56 = vadd.f32 %v2277_v0, %v9697_v21  ;;  %vm3313_vm3 = vweird.f32 %v4817_v3 }
 0x406   : > { %v3310_v34 = vmul.f32 %v4817_v3, %v3309_v24  ;;  %v3316_v60 = vand.u32 2147483647, %v8289_v29  ;;  %v8323_v27 = vadd.f32 1.0, %v3345_v35  ;;  %v3175_v33 = vadd.f32 1.1283791, %v3174_v40 }
 0x407   : > { %v8326_v17 = vmul.f32 0.70710677, %v8315_v30  ;;  %v3334_v57 = vmul.f32 %v3333_v7, %v7982_v39  ;;  %vm3312_vm4 = vweird.f32 %v8289_v29  ;;  %v4510_v42 = vclamps-f32 %v3161_v46, 1.0 }
 0x408   : > { %v3311_v9 = vadd.f32 %v4817_v3, %v3310_v34  ;;  %4820 = vrcp.f32 %v8323_v27  ;;  %vm3314_vm5 = vmor %vm3312_vm4, %vm3313_vm3  ;;  %v3319_v19 = vor.u32 1.1754944e-38, %v3318_v1  ;;  %v8334_v12 = vmul.f32 0.70710677, %v8320_v56 }
 0x409   : > { %v3364_v22 = vmul.f32 %v8326_v17, %v8326_v17  ;;  %v3296_v61 = vmul.f32 %v3295_v11, %v9698_v41  ;;  %vm3317_vm6 = vcmp.eq.f32.partialorder %v3316_v60, 8.507059e+37  ;;  %v8338_v39 = vadd.f32 %v2306_v20, %v9699_v32 }
 0x40a   : > { %v3315_v37 = vsel %vm3314_vm5, %v4817_v3, %v3311_v9  ;;  %v2358_v10 = vmul.f32 0.5, %v9700_v47  ;;  %v2362_v54 = vmul.f32 0.5, %v9701_v48  ;;  %v3196_v4 = vand.u32 2147483647, %v8311_v50  ;;  %v2279_v9 = vpop.f32.mrf.mxu1 }
 0x40b   : > { %v4819_v29 = vpop.eup %4818  ;;  %v3320_v36 = vsel %vm3317_vm6, %v3319_v19, %v3315_v37  ;;  %v3176_v26 = vmul.f32 %v3175_v33, %v9702_v38  ;;  %v3404_v63 = vmul.f32 %v8334_v12, %v8334_v12  ;;  %v3335_v31 = vadd.f32 1.1283791, %v3334_v57 }
 0x40c   : > { %v3321_v6 = vmul.f32 %v3320_v36, %v3296_v61  ;;  %v3188_v58 = vmul.f32 %v4819_v29, %v8311_v50  ;;  %v3702_v43 = vadd.f32 1.0, %v4510_v42  ;;  %v8347_v23 = vmin.f32 %v3364_v22, 16.0 }
 0x40d   : > { %v8350_v2 = vadd.f32 %v2335_v62, %v9703_v18  ;;  %vm3192_vm7 = vweird.f32 %v8311_v50  ;;  %v8354_v5 = vmul.f32 0.70710677, %v8338_v39  ;;  %vm8356_vm8 = vcmp.eq.f32.partialorder %v3196_v4, 8.507059e+37 }
 0x40e   : > { %v4821_v14 = vpop.eup %4820  ;;  %v4514_v45 = vclamps-f32 %v3321_v6, 1.0  ;;  %v3189_v15 = vsub.f32 1.0, %v3188_v58  ;;  %v3198_v16 = vand.u32 2147483648, %v8311_v50  ;;  %v3358_v40 = vand.u32 2147483648, %v8323_v27  ;;  %v9707_v58 = vld [vmem:[#allocation116_spill] sm:$0xff] }
 0x40f   : > { %v3348_v3 = vmul.f32 %v4821_v14, %v8323_v27  ;;  %vm3193_vm9 = vweird.f32 %v4819_v29  ;;  %v8363_v28 = vmin.f32 %v3404_v63, 16.0  ;;  %v3734_v49 = vmul.f32 %v3702_v43, %v2358_v10  ;;  %v2308_v43 = vpop.f32.mrf.mxu2 }
 0x410   : > { %v3706_v52 = vadd.f32 1.0, %v4514_v45  ;;  %v3190_v8 = vmul.f32 %v4819_v29, %v3189_v15  ;;  %v3366_v59 = vmul.f32 2.1237322e-06, %v8347_v23  ;;  %v8367_v53 = vmul.f32 0.70710677, %v8350_v2  ;;  %vm3194_vm10 = vmor %vm3192_vm7, %vm3193_vm9 }
 0x411   : > { %v3349_v25 = vsub.f32 1.0, %v3348_v3  ;;  %v3444_v0 = vmul.f32 %v8354_v5, %v8354_v5  ;;  %v8372_v11 = vadd.f32 %v2250_v51, %v9696_v13  ;;  %v3199_v7 = vor.u32 1.1754944e-38, %v3198_v16 }
 0x412   : > { %v3738_v35 = vmul.f32 %v3706_v52, %v2362_v54  ;;  %v3191_v44 = vadd.f32 %v4819_v29, %v3190_v8  ;;  %vm3353_vm11 = vweird.f32 %v4821_v14  ;;  %v3356_v46 = vand.u32 2147483647, %v8323_v27 }
 0x413   : > { %v3350_v24 = vmul.f32 %v4821_v14, %v3349_v25  ;;  %vm3352_vm12 = vweird.f32 %v8323_v27  ;;  %v3406_v60 = vmul.f32 2.1237322e-06, %v8363_v28  ;;  %v3359_v13 = vor.u32 1.1754944e-38, %v3358_v40  ;;  %v9706_v27 = vld [vmem:[#allocation33_spill] sm:$0xff] }
 0x414   : > { %v3758_v1 = vpack.c.bf16 %v3738_v35, %v3734_v49  ;;  %v3195_v34 = vsel %vm3194_vm10, %v4819_v29, %v3191_v44  ;;  %v3367_v57 = vadd.f32 0.00028619796, %v3366_v59  ;;  %vm3354_vm13 = vmor %vm3352_vm12, %vm3353_vm11  ;;  %v8381_v42 = vmin.f32 %v3444_v0, 16.0  ;;  %v2337_v44 = vpop.f32.mrf.mxu3 }
 0x415   : > { %v3200_v33 = vsel %vm8356_vm8, %v3199_v7, %v3195_v34  ;;  %v3351_v20 = vadd.f32 %v4821_v14, %v3350_v24  ;;  %v3484_v19 = vmul.f32 %v8367_v53, %v8367_v53  ;;  %v8386_v22 = vmul.f32 0.70710677, %v8372_v11 }
 0x416   : > { %4100 = vmatmul.bf16.gmra.mxu2 %v3758_v1  ;;  %v3201_v50 = vmul.f32 %v3200_v33, %v3176_v26  ;;  %v3336_v41 = vmul.f32 %v3335_v31, %v9706_v27  ;;  %vm3357_vm14 = vcmp.eq.f32.partialorder %v3356_v46, 8.507059e+37  ;;  %v3407_v29 = vadd.f32 0.00028619796, %v3406_v60 }
 0x417   : > { %v3355_v61 = vsel %vm3354_vm13, %v4821_v14, %v3351_v20  ;;  %v8390_v47 = vadd.f32 %v2279_v9, %v9697_v21  ;;  %v3368_v48 = vmul.f32 %v3367_v57, %v8347_v23  ;;  %v3524_v54 = vmul.f32 %v8386_v22, %v8386_v22  ;;  %v9708_v14 = vld [vmem:[#allocation123_spill] sm:$0xff] }
 0x418   : > { %v4511_v37 = vclamps-f32 %v3201_v50, 1.0  ;;  %v3360_v62 = vsel %vm3357_vm14, %v3359_v13, %v3355_v61  ;;  %v3446_v36 = vmul.f32 2.1237322e-06, %v8381_v42  ;;  %v8396_v4 = vmin.f32 %v3484_v19, 16.0 }
 0x419   : > { %v3361_v10 = vmul.f32 %v3360_v62, %v3336_v41  ;;  %v8398_v6 = vmin.f32 %v3524_v54, 16.0  ;;  %v2359_v63 = vmul.f32 0.5, %v9707_v58  ;;  %v3408_v31 = vmul.f32 %v3407_v29, %v8363_v28 }
 0x41a   : > { %v3703_v26 = vadd.f32 1.0, %v4511_v37  ;;  %v8403_v21 = vmul.f32 0.70710677, %v8390_v47  ;;  %v2363_v45 = vmul.f32 0.5, %v9708_v14  ;;  %v3369_v55 = vadd.f32 0.0036580483, %v3368_v48 }
 0x41b   : > { %v4515_v38 = vclamps-f32 %v3361_v10, 1.0  ;;  %v3526_v16 = vmul.f32 2.1237322e-06, %v8398_v6  ;;  %v3447_v3 = vadd.f32 0.00028619796, %v3446_v36  ;;  %v8411_v25 = vadd.f32 %v2308_v43, %v9699_v32 }
 0x41c   : > { %v3486_v40 = vmul.f32 2.1237322e-06, %v8396_v4  ;;  %v3564_v51 = vmul.f32 %v8403_v21, %v8403_v21  ;;  %v3735_v52 = vmul.f32 %v3703_v26, %v2359_v63  ;;  %v3409_v59 = vadd.f32 0.0036580483, %v3408_v31 }
 0x41d   : > { %v3707_v15 = vadd.f32 1.0, %v4515_v38  ;;  %v3527_v49 = vadd.f32 0.00028619796, %v3526_v16  ;;  %v3370_v7 = vmul.f32 %v3369_v55, %v8347_v23  ;;  %v3448_v46 = vmul.f32 %v3447_v3, %v8381_v42 }
 0x41e   : > { %v8413_v35 = vmin.f32 %v3564_v51, 16.0  ;;  %v3487_v1 = vadd.f32 0.00028619796, %v3486_v40  ;;  %v8420_v33 = vmul.f32 0.70710677, %v8411_v25  ;;  %v8423_v32 = vadd.f32 %v2337_v44, %v9703_v18 }
 0x41f   : > { %v3739_v8 = vmul.f32 %v3707_v15, %v2363_v45  ;;  %v3528_v24 = vmul.f32 %v3527_v49, %v8398_v6  ;;  %v3377_v20 = vmul.f32 3.8918573e-05, %v8347_v23  ;;  %v3410_v13 = vmul.f32 %v3409_v59, %v8363_v28 }
 0x420   : > { %v3566_v34 = vmul.f32 2.1237322e-06, %v8413_v35  ;;  %v3371_v9 = vadd.f32 0.05243302, %v3370_v7  ;;  %v3604_v19 = vmul.f32 %v8420_v33, %v8420_v33  ;;  %v3417_v61 = vmul.f32 3.8918573e-05, %v8363_v28 }
 0x421   : > { %v3759_v0 = vpack.c.bf16 %v3739_v8, %v3735_v52  ;;  %v3529_v60 = vadd.f32 0.0036580483, %v3528_v24  ;;  %v3378_v41 = vadd.f32 0.001143296, %v3377_v20  ;;  %v3449_v37 = vadd.f32 0.0036580483, %v3448_v46 }
 0x422   : > { %v3567_v57 = vadd.f32 0.00028619796, %v3566_v34  ;;  %v3488_v18 = vmul.f32 %v3487_v1, %v8396_v4  ;;  %v8434_v62 = vmul.f32 0.70710677, %v8423_v32  ;;  %v3411_v29 = vadd.f32 0.05243302, %v3410_v13 }
 0x423   : > { %4129 = vmatmul.bf16.gmra.mxu3 %v3759_v0  ;;  %v3530_v50 = vmul.f32 %v3529_v60, %v8398_v6  ;;  %v3379_v48 = vmul.f32 %v3378_v41, %v8347_v23  ;;  %v3418_v54 = vadd.f32 0.001143296, %v3417_v61  ;;  %v3372_v36 = vmul.f32 %v3371_v9, %v8347_v23 }
 0x424   : > { %v3568_v27 = vmul.f32 %v3567_v57, %v8413_v35  ;;  %v8438_v26 = vmin.f32 %v3604_v19, 16.0  ;;  %v8441_v58 = vmul.f32 0.5, %v8315_v30  ;;  %v8446_v14 = vmul.f32 0.5, %v8320_v56 }
 0x425   : > { %v3531_v38 = vadd.f32 0.05243302, %v3530_v50  ;;  %v3380_v31 = vadd.f32 0.014752088, %v3379_v48  ;;  %v3419_v43 = vmul.f32 %v3418_v54, %v8363_v28  ;;  %v3450_v45 = vmul.f32 %v3449_v37, %v8381_v42 }
 0x426   : > { %v3569_v10 = vadd.f32 0.0036580483, %v3568_v27  ;;  %v3489_v15 = vadd.f32 0.0036580483, %v3488_v18  ;;  %v3644_v55 = vmul.f32 %v8434_v62, %v8434_v62  ;;  %v3412_v16 = vmul.f32 %v3411_v29, %v8363_v28 }
 0x427   : > { %v3381_v3 = vmul.f32 %v3380_v31, %v8347_v23  ;;  %v3537_v30 = vmul.f32 3.8918573e-05, %v8398_v6  ;;  %v3420_v40 = vadd.f32 0.014752088, %v3419_v43  ;;  %v3373_v51 = vadd.f32 0.18741608, %v3372_v36 }
 0x428   : > { %v3570_v63 = vmul.f32 %v3569_v10, %v8413_v35  ;;  %v3532_v52 = vmul.f32 %v3531_v38, %v8398_v6  ;;  %v3606_v8 = vmul.f32 2.1237322e-06, %v8438_v26  ;;  %v3577_v56 = vmul.f32 3.8918573e-05, %v8413_v35 }
 0x429   : > { %v3382_v59 = vadd.f32 0.112945676, %v3381_v3  ;;  %v3538_v44 = vadd.f32 0.001143296, %v3537_v30  ;;  %v3421_v0 = vmul.f32 %v3420_v40, %v8363_v28  ;;  %v3451_v7 = vadd.f32 0.05243302, %v3450_v45 }
 0x42a   : > { %v3571_v49 = vadd.f32 0.05243302, %v3570_v63  ;;  %v3490_v24 = vmul.f32 %v3489_v15, %v8396_v4  ;;  %v8459_v46 = vmin.f32 %v3644_v55, 16.0  ;;  %v3578_v1 = vadd.f32 0.001143296, %v3577_v56 }
 0x42b   : > { %v3413_v34 = vadd.f32 0.18741608, %v3412_v16  ;;  %v3383_v60 = vmul.f32 %v3382_v59, %v8347_v23  ;;  %v3539_v20 = vmul.f32 %v3538_v44, %v8398_v6  ;;  %v3422_v13 = vadd.f32 0.112945676, %v3421_v0 }
 0x42c   : > { %v3374_v57 = vmul.f32 %v3373_v51, %v8347_v23  ;;  %v3533_v9 = vadd.f32 0.18741608, %v3532_v52  ;;  %v3607_v50 = vadd.f32 0.00028619796, %v3606_v8  ;;  %v3579_v19 = vmul.f32 %v3578_v1, %v8413_v35 }
 0x42d   : > { %v3572_v27 = vmul.f32 %v3571_v49, %v8413_v35  ;;  %v3384_v41 = vadd.f32 0.4994258, %v3383_v60  ;;  %v3540_v61 = vadd.f32 0.014752088, %v3539_v20  ;;  %v3423_v37 = vmul.f32 %v3422_v13, %v8363_v28 }
 0x42e   : > { %v3452_v18 = vmul.f32 %v3451_v7, %v8381_v42  ;;  %v3646_v29 = vmul.f32 2.1237322e-06, %v8459_v46  ;;  %v3580_v10 = vadd.f32 0.014752088, %v3579_v19  ;;  %v3457_v48 = vmul.f32 3.8918573e-05, %v8381_v42 }
 0x42f   : > { %v3414_v54 = vmul.f32 %v3413_v34, %v8363_v28  ;;  %v3385_v36 = vmul.f32 %v3384_v41, %v8347_v23  ;;  %v3541_v38 = vmul.f32 %v3540_v61, %v8398_v6  ;;  %v3424_v63 = vadd.f32 0.4994258, %v3423_v37 }
 0x430   : > { %v3534_v31 = vmul.f32 %v3533_v9, %v8398_v6  ;;  %v3608_v43 = vmul.f32 %v3607_v50, %v8438_v26  ;;  %v3581_v45 = vmul.f32 %v3580_v10, %v8413_v35  ;;  %v3458_v15 = vadd.f32 0.001143296, %v3457_v48 }
 0x431   : > { %v3573_v55 = vadd.f32 0.18741608, %v3572_v27  ;;  %v8476_v16 = vadd.f32 1.0, %v3385_v36  ;;  %v3542_v3 = vadd.f32 0.112945676, %v3541_v38  ;;  %v3425_v30 = vmul.f32 %v3424_v63, %v8363_v28 }
 0x432   : > { %v8480_v40 = vmul.f32 0.5, %v8372_v11  ;;  %v3647_v23 = vadd.f32 0.00028619796, %v3646_v29  ;;  %v3582_v51 = vadd.f32 0.112945676, %v3581_v45  ;;  %v3459_v52 = vmul.f32 %v3458_v15, %v8381_v42 }
 0x433   : > { %v3375_v8 = vadd.f32 1.1283791, %v3374_v57  ;;  %v3453_v56 = vadd.f32 0.18741608, %v3452_v18  ;;  %v3491_v49 = vadd.f32 0.05243302, %v3490_v24  ;;  %4822 = vrcp.f32 %v8476_v16 }
 0x434   : > { %v3415_v59 = vadd.f32 1.1283791, %v3414_v54  ;;  %v3535_v44 = vadd.f32 1.1283791, %v3534_v31  ;;  %v3543_v0 = vmul.f32 %v3542_v3, %v8398_v6  ;;  %v8485_v7 = vadd.f32 1.0, %v3425_v30 }
 0x435   : > { %v3574_v28 = vmul.f32 %v3573_v55, %v8413_v35  ;;  %v3609_v1 = vadd.f32 0.0036580483, %v3608_v43  ;;  %v3583_v11 = vmul.f32 %v3582_v51, %v8413_v35  ;;  %v3460_v34 = vadd.f32 0.014752088, %v3459_v52 }
 0x436   : > { %v8490_v60 = vmul.f32 0.5, %v8390_v47  ;;  %v3648_v20 = vmul.f32 %v3647_v23, %v8459_v46  ;;  %v3544_v24 = vadd.f32 0.4994258, %v3543_v0  ;;  %4824 = vrcp.f32 %v8485_v7 }
 0x437   : > { %v8495_v13 = vmul.f32 %v3375_v8, %v8326_v17  ;;  %v8498_v57 = vmul.f32 %v3453_v56, %v8381_v42  ;;  %v8501_v9 = vmul.f32 %v3491_v49, %v8396_v4  ;;  %v3584_v50 = vadd.f32 0.4994258, %v3583_v11 }
 0x438   : > { %v8504_v19 = vmul.f32 %v3415_v59, %v8334_v12  ;;  %v8507_v47 = vmul.f32 %v3535_v44, %v8386_v22  ;;  %v3545_v27 = vmul.f32 %v3544_v24, %v8398_v6  ;;  %v3461_v41 = vmul.f32 %v3460_v34, %v8381_v42 }
 0x439   : > { %v4823_v61 = vpop.eup %4822  ;;  %v3575_v17 = vadd.f32 1.1283791, %v3574_v28  ;;  %v3610_v37 = vmul.f32 %v3609_v1, %v8438_v26  ;;  %v3585_v18 = vmul.f32 %v3584_v50, %v8413_v35  ;;  %v3617_v29 = vmul.f32 3.8918573e-05, %v8438_v26 }
 0x43a   : > { %v8514_v10 = vadd.f32 0.0036580483, %v3648_v20  ;;  %v3388_v12 = vmul.f32 %v4823_v61, %v8476_v16  ;;  %v3396_v48 = vand.u32 2147483647, %v8476_v16  ;;  %v8518_v22 = vadd.f32 1.0, %v3545_v27 }
 0x43b   : > { %v3398_v6 = vand.u32 2147483648, %v8476_v16  ;;  %v3436_v54 = vand.u32 2147483647, %v8485_v7  ;;  %v3438_v36 = vand.u32 2147483648, %v8485_v7  ;;  %v8523_v38 = vadd.f32 1.0, %v3585_v18 }
 0x43c   : > { %v4825_v63 = vpop.eup %4824  ;;  %v3389_v35 = vsub.f32 1.0, %v3388_v12  ;;  %4826 = vrcp.f32 %v8518_v22  ;;  %v3462_v31 = vadd.f32 0.112945676, %v3461_v41  ;;  %v3618_v43 = vadd.f32 0.001143296, %v3617_v29 }
 0x43d   : > { %v8527_v45 = vmul.f32 %v3575_v17, %v8403_v21  ;;  %v8529_v15 = vadd.f32 0.05243302, %v3610_v37  ;;  %v3428_v55 = vmul.f32 %v4825_v63, %v8485_v7  ;;  %4828 = vrcp.f32 %v8523_v38 }
 0x43e   : > { %v3390_v3 = vmul.f32 %v4823_v61, %v3389_v35  ;;  %vm3392_vm15 = vweird.f32 %v8476_v16  ;;  %vm3393_vm0 = vweird.f32 %v4823_v61  ;;  %vm8534_vm1 = vcmp.eq.f32.partialorder %v3396_v48, 8.507059e+37 }
 0x43f   : > { %v3399_v23 = vor.u32 1.1754944e-38, %v3398_v6  ;;  %v3429_v51 = vsub.f32 1.0, %v3428_v55  ;;  %vm3432_vm2 = vweird.f32 %v8485_v7  ;;  %vm8539_vm3 = vcmp.eq.f32.partialorder %v3436_v54, 8.507059e+37  ;;  %vm3394_vm4 = vmor %vm3392_vm15, %vm3393_vm0 }
 0x440   : > { %v3391_v52 = vadd.f32 %v4823_v61, %v3390_v3  ;;  %v3439_v8 = vor.u32 1.1754944e-38, %v3438_v36  ;;  %v3463_v56 = vmul.f32 %v3462_v31, %v8381_v42  ;;  %v3619_v49 = vmul.f32 %v3618_v43, %v8438_v26 }
 0x441   : > { %vm3552_vm5 = vweird.f32 %v8518_v22  ;;  %v3556_v16 = vand.u32 2147483647, %v8518_v22  ;;  %v3430_v59 = vmul.f32 %v4825_v63, %v3429_v51  ;;  %vm3433_vm6 = vweird.f32 %v4825_v63 }
 0x442   : > { %v3497_v44 = vmul.f32 3.8918573e-05, %v8396_v4  ;;  %v4827_v0 = vpop.eup %4826  ;;  %v3395_v28 = vsel %vm3394_vm4, %v4823_v61, %v3391_v52  ;;  %v3558_v1 = vand.u32 2147483648, %v8518_v22  ;;  %v3464_v11 = vadd.f32 0.4994258, %v3463_v56  ;;  %vm3434_vm8 = vmor %vm3432_vm2, %vm3433_vm6 }
 0x443   : > { %v3620_v34 = vadd.f32 0.014752088, %v3619_v49  ;;  %v4829_v20 = vpop.eup %4828  ;;  %v3400_v24 = vsel %vm8534_vm1, %v3399_v23, %v3395_v28  ;;  %v3548_v50 = vmul.f32 %v4827_v0, %v8518_v22  ;;  %v3431_v27 = vadd.f32 %v4825_v63, %v3430_v59 }
 0x444   : > { %v3596_v41 = vand.u32 2147483647, %v8523_v38  ;;  %vm3553_vm7 = vweird.f32 %v4827_v0  ;;  %v3588_v17 = vmul.f32 %v4829_v20, %v8523_v38  ;;  %v3598_v61 = vand.u32 2147483648, %v8523_v38 }
 0x445   : > { %v3465_v37 = vmul.f32 %v3464_v11, %v8381_v42  ;;  %v3549_v18 = vsub.f32 1.0, %v3548_v50  ;;  %v3435_v29 = vsel %vm3434_vm8, %v4825_v63, %v3431_v27  ;;  %v3621_v12 = vmul.f32 %v3620_v34, %v8438_v26  ;;  %vm3554_vm12 = vmor %vm3552_vm5, %vm3553_vm7  ;;  %v4062_v42 = vpop.f32.mrf.mxu1 }
 0x446   : > { %v3498_v48 = vadd.f32 0.001143296, %v3497_v44  ;;  %v3401_v6 = vmul.f32 %v3400_v24, %v8495_v13  ;;  %v3440_v54 = vsel %vm8539_vm3, %v3439_v8, %v3435_v29  ;;  %v3589_v36 = vsub.f32 1.0, %v3588_v17  ;;  %v4033_v29 = vpop.f32.mrf.mxu0 }
 0x447   : > { %v8562_v35 = vadd.f32 1.0, %v3465_v37  ;;  %v3550_v7 = vmul.f32 %v4827_v0, %v3549_v18  ;;  %v3441_v31 = vmul.f32 %v3440_v54, %v8504_v19  ;;  %v3622_v43 = vadd.f32 0.112945676, %v3621_v12 }
 0x448   : > { %v3499_v55 = vmul.f32 %v3498_v48, %v8396_v4  ;;  %vm8566_vm9 = vcmp.eq.f32.partialorder %v3556_v16, 8.507059e+37  ;;  %v3590_v63 = vmul.f32 %v4829_v20, %v3589_v36  ;;  %vm3593_vm10 = vweird.f32 %v4829_v20 }
 0x449   : > { %4830 = vrcp.f32 %v8562_v35  ;;  %v3551_v13 = vadd.f32 %v4827_v0, %v3550_v7  ;;  %v3559_v3 = vor.u32 1.1754944e-38, %v3558_v1  ;;  %vm3592_vm11 = vweird.f32 %v8523_v38  ;;  %v8601_v7 = vld [vmem:[%s476_s25] ss:$0 sm:$0xff] }
 0x44a   : > { %v3657_v30 = vmul.f32 3.8918573e-05, %v8459_v46  ;;  %v4516_v23 = vclamps-f32 %v3401_v6, 1.0  ;;  %v3591_v19 = vadd.f32 %v4829_v20, %v3590_v63  ;;  %v3623_v51 = vmul.f32 %v3622_v43, %v8438_v26  ;;  %vm3594_vm13 = vmor %vm3592_vm11, %vm3593_vm10 }
 0x44b   : > { %v3500_v21 = vadd.f32 0.014752088, %v3499_v55  ;;  %v3555_v52 = vsel %vm3554_vm12, %v4827_v0, %v3551_v13  ;;  %v4517_v8 = vclamps-f32 %v3441_v31, 1.0  ;;  %vm3597_vm14 = vcmp.eq.f32.partialorder %v3596_v41, 8.507059e+37 }
 0x44c   : > { %v3599_v56 = vor.u32 1.1754944e-38, %v3598_v61  ;;  %v3560_v49 = vsel %vm8566_vm9, %v3559_v3, %v3555_v52  ;;  %v3595_v38 = vsel %vm3594_vm13, %v4829_v20, %v3591_v19  ;;  %v3624_v16 = vadd.f32 0.4994258, %v3623_v51 }
 0x44d   : > { %v3501_v59 = vmul.f32 %v3500_v21, %v8396_v4  ;;  %v3612_v22 = vmul.f32 %v8529_v15, %v8438_v26  ;;  %v3561_v44 = vmul.f32 %v3560_v49, %v8507_v47  ;;  %v3658_v1 = vadd.f32 0.001143296, %v3657_v30 }
 0x44e   : > { %v3600_v28 = vsel %vm3597_vm14, %v3599_v56, %v3595_v38  ;;  %v3708_v0 = vadd.f32 1.0, %v4516_v23  ;;  %v3625_v24 = vmul.f32 %v3624_v16, %v8438_v26  ;;  %v3650_v20 = vmul.f32 %v8514_v10, %v8459_v46 }
 0x44f   : > { %v4831_v11 = vpop.eup %4830  ;;  %v3601_v34 = vmul.f32 %v3600_v28, %v8527_v45  ;;  %v3502_v50 = vadd.f32 0.112945676, %v3501_v59  ;;  %v4520_v27 = vclamps-f32 %v3561_v44, 1.0  ;;  %v3659_v15 = vmul.f32 %v3658_v1, %v8459_v46 }
 0x450   : > { %v3468_v41 = vmul.f32 %v4831_v11, %v8562_v35  ;;  %v3709_v47 = vadd.f32 1.0, %v4517_v8  ;;  %v8589_v61 = vadd.f32 1.0, %v3625_v24  ;;  %v3613_v18 = vadd.f32 0.18741608, %v3612_v22 }
 0x451   : > { %v4521_v17 = vclamps-f32 %v3601_v34, 1.0  ;;  %v3503_v37 = vmul.f32 %v3502_v50, %v8396_v4  ;;  %v3712_v45 = vadd.f32 1.0, %v4520_v27  ;;  %v3660_v48 = vadd.f32 0.014752088, %v3659_v15  ;;  %v4120_v27 = vpop.f32.mrf.mxu3 }
 0x452   : > { %v3469_v12 = vsub.f32 1.0, %v3468_v41  ;;  %v3740_v6 = vmul.f32 %v3708_v0, %v8441_v58  ;;  %v3478_v54 = vand.u32 2147483648, %v8562_v35  ;;  %4832 = vrcp.f32 %v8589_v61 }
 0x453   : > { %v3713_v10 = vadd.f32 1.0, %v4521_v17  ;;  %v3744_v36 = vmul.f32 %v3712_v45, %v8480_v40  ;;  %vm3473_vm15 = vweird.f32 %v4831_v11  ;;  %v3504_v43 = vadd.f32 0.4994258, %v3503_v37  ;;  %v4064_v37 = vpop.f32.mrf.mxu1 }
 0x454   : > { %v3470_v31 = vmul.f32 %v4831_v11, %v3469_v12  ;;  %v3741_v55 = vmul.f32 %v3709_v47, %v8446_v14  ;;  %v3476_v63 = vand.u32 2147483647, %v8562_v35  ;;  %v3661_v13 = vmul.f32 %v3660_v48, %v8459_v46 }
 0x455   : > { %v3745_v58 = vmul.f32 %v3713_v10, %v8490_v60  ;;  %v3760_v3 = vpack.c.bf16 %v3744_v36, %v3740_v6  ;;  %vm3472_vm0 = vweird.f32 %v8562_v35  ;;  %v3505_v30 = vmul.f32 %v3504_v43, %v8396_v4  ;;  %v4151_v36 = vld [vmem:[#allocation2 + $0x30] sm:$0xff] }
 0x456   : > { %v3471_v40 = vadd.f32 %v4831_v11, %v3470_v31  ;;  %v3455_v23 = vadd.f32 1.1283791, %v8498_v57  ;;  %v3651_v19 = vadd.f32 0.05243302, %v3650_v20  ;;  %vm3474_vm1 = vmor %vm3472_vm0, %vm3473_vm15  ;;  %v3662_v21 = vadd.f32 0.112945676, %v3661_v13  ;;  %v4091_v20 = vpop.f32.mrf.mxu2 }
 0x457   : > { %v3761_v51 = vpack.c.bf16 %v3745_v58, %v3741_v55  ;;  %4047 = vmatmul.bf16.gmra.mxu0 %v3760_v3  ;;  %v4034_v14 = vadd.f32 %v8601_v7, %v4033_v29  ;;  %v3479_v52 = vor.u32 1.1754944e-38, %v3478_v54  ;;  %v8611_v8 = vadd.f32 1.0, %v3505_v30 }
 0x458   : > { %v3475_v60 = vsel %vm3474_vm1, %v4831_v11, %v3471_v40  ;;  %v4833_v56 = vpop.eup %4832  ;;  %v3614_v49 = vmul.f32 %v3613_v18, %v8438_v26  ;;  %vm3477_vm2 = vcmp.eq.f32.partialorder %v3476_v63, 8.507059e+37  ;;  %v3663_v35 = vmul.f32 %v3662_v21, %v8459_v46  ;;  %v4035_v11 = vpop.f32.mrf.mxu0  ;;  %v9715_v26 = vld [vmem:[#allocation6_spill] sm:$0xff] }
 0x459   : > { %4076 = vmatmul.bf16.gmra.mxu1 %v3761_v51  ;;  %v3480_v38 = vsel %vm3477_vm2, %v3479_v52, %v3475_v60  ;;  %v3628_v57 = vmul.f32 %v4833_v56, %v8589_v61  ;;  %4834 = vrcp.f32 %v8611_v8  ;;  %v3456_v16 = vmul.f32 %v3455_v23, %v8354_v5 }
 0x45a   : > { %v3493_v59 = vadd.f32 0.18741608, %v8501_v9  ;;  %v3652_v22 = vmul.f32 %v3651_v19, %v8459_v46  ;;  %v3664_v44 = vadd.f32 0.4994258, %v3663_v35  ;;  %v4063_v28 = vadd.f32 %v4062_v42, %v4034_v14  ;;  %v4122_v14 = vpop.f32.mrf.mxu3 }
 0x45b   : > { %v3629_v1 = vsub.f32 1.0, %v3628_v57  ;;  %vm4140_vm3 = vcmp.lt.s32.totalorder %v9715_v26, 4  ;;  %v3615_v0 = vadd.f32 1.1283791, %v3614_v49  ;;  %v3481_v34 = vmul.f32 %v3480_v38, %v3456_v16 }
 0x45c   : > { %v3638_v24 = vand.u32 2147483648, %v8589_v61  ;;  %v3665_v50 = vmul.f32 %v3664_v44, %v8459_v46  ;;  %vm3633_vm4 = vweird.f32 %v4833_v56  ;;  %v3636_v5 = vand.u32 2147483647, %v8589_v61 }
 0x45d   : > { %v3630_v41 = vmul.f32 %v4833_v56, %v3629_v1  ;;  %v4092_v9 = vadd.f32 %v4091_v20, %v4063_v28  ;;  %v3494_v15 = vmul.f32 %v3493_v59, %v8396_v4  ;;  %v3653_v17 = vadd.f32 0.18741608, %v3652_v22  ;;  %v4067_v1 = vpop.f32.mrf.mxu1 }
 0x45e   : > { %v8625_v47 = vadd.f32 1.0, %v3665_v50  ;;  %v4878_v18 = vmov 0.0   ;;  %vm3632_vm5 = vweird.f32 %v8589_v61  ;;  %v4036_v48 = vadd.f32 %v8601_v7, %v4035_v11  ;;  %v4093_v21 = vpop.f32.mrf.mxu2  ;;  %v4152_v11 = vld [vmem:[#allocation2] sm:$0xff] }
 0x45f   : > { %v8629_v45 = vsel %vm4140_vm3, 1.0, %v4878_v18  ;;  %v4835_v29 = vpop.eup %4834  ;;  %v3631_v12 = vadd.f32 %v4833_v56, %v3630_v41  ;;  %v4121_v6 = vadd.f32 %v4120_v27, %v4092_v9  ;;  %v4518_v10 = vclamps-f32 %v3481_v34, 1.0  ;;  %vm3634_vm6 = vmor %vm3632_vm5, %vm3633_vm4 }
 0x460   : > { %v3639_v4 = vor.u32 1.1754944e-38, %v3638_v24  ;;  %v3508_v54 = vmul.f32 %v4835_v29, %v8611_v8  ;;  %4836 = vrcp.f32 %v8625_v47  ;;  %v3616_v31 = vmul.f32 %v3615_v0, %v8420_v33  ;;  %v4038_v23 = vpop.f32.mrf.mxu0 }
 0x461   : > { %v3635_v43 = vsel %vm3634_vm6, %v4833_v56, %v3631_v12  ;;  %vm3637_vm7 = vcmp.eq.f32.partialorder %v3636_v5, 8.507059e+37  ;;  %v4143_v55 = vmul.f32 %v8629_v45, %v4121_v6  ;;  %v3495_v58 = vadd.f32 1.1283791, %v3494_v15 }
 0x462   : > { %v3654_v61 = vmul.f32 %v3653_v17, %v8459_v46  ;;  %v3640_v42 = vsel %vm3637_vm7, %v3639_v4, %v3635_v43  ;;  %v3509_v63 = vsub.f32 1.0, %v3508_v54  ;;  %v3518_v3 = vand.u32 2147483648, %v8611_v8 }
 0x463   : > { %v3641_v13 = vmul.f32 %v3640_v42, %v3616_v31  ;;  %v4065_v40 = vadd.f32 %v4064_v37, %v4036_v48  ;;  %v4159_v30 = vadd.f32 %v4151_v36, %v4143_v55  ;;  %v3710_v19 = vadd.f32 1.0, %v4518_v10  ;;  %v4153_v36 = vld [vmem:[#allocation2 + $0x18] sm:$0xff] }
 0x464   : > { %v3510_v51 = vmul.f32 %v4835_v29, %v3509_v63  ;;  %vm3513_vm8 = vweird.f32 %v4835_v29  ;;  %v3516_v33 = vand.u32 2147483647, %v8611_v8  ;;  %v2366_v60 = vmul.f32 0.5, %v8338_v39 }
 0x465   : > { %v2370_v52 = vmul.f32 0.5, %v8411_v25  ;;  %v4522_v46 = vclamps-f32 %v3641_v13, 1.0  ;;  %4167 = vst [vmem:[#allocation2 + $0x30] sm:$0xff] %v4159_v30  ;;  %v4094_v56 = vadd.f32 %v4093_v21, %v4065_v40  ;;  %v3496_v35 = vmul.f32 %v3495_v58, %v8367_v53  ;;  %v4069_v55 = vpop.f32.mrf.mxu1 }
 0x466   : > { %v4837_v49 = vpop.eup %4836  ;;  %v3511_v38 = vadd.f32 %v4835_v29, %v3510_v51  ;;  %vm3512_vm9 = vweird.f32 %v8611_v8  ;;  %v4039_v57 = vadd.f32 %v8601_v7, %v4038_v23  ;;  %v3519_v59 = vor.u32 1.1754944e-38, %v3518_v3  ;;  %v4096_v15 = vpop.f32.mrf.mxu2 }
 0x467   : > { %v3714_v16 = vadd.f32 1.0, %v4522_v46  ;;  %vm3514_vm10 = vmor %vm3512_vm9, %vm3513_vm8  ;;  %v3668_v22 = vmul.f32 %v4837_v49, %v8625_v47  ;;  %v4123_v39 = vadd.f32 %v4122_v14, %v4094_v56  ;;  %v3655_v44 = vadd.f32 1.1283791, %v3654_v61 }
 0x468   : > { %v3742_v25 = vmul.f32 %v3710_v19, %v2366_v60  ;;  %v3515_v28 = vsel %vm3514_vm10, %v4835_v29, %v3511_v38  ;;  %vm3517_vm11 = vcmp.eq.f32.partialorder %v3516_v33, 8.507059e+37  ;;  %vm3673_vm12 = vweird.f32 %v4837_v49  ;;  %v4040_v9 = vpop.f32.mrf.mxu0  ;;  %v4154_v33 = vld [vmem:[#allocation2 + $0x10] sm:$0xff] }
 0x469   : > { %v3746_v26 = vmul.f32 %v3714_v16, %v2370_v52  ;;  %v3520_v53 = vsel %vm3517_vm11, %v3519_v59, %v3515_v28  ;;  %v3669_v0 = vsub.f32 1.0, %v3668_v22  ;;  %v4144_v8 = vmul.f32 %v8629_v45, %v4123_v39  ;;  %v4155_v22 = vld [vmem:[#allocation2 + $0x8] sm:$0xff] }
 0x46a   : > { %v3676_v34 = vand.u32 2147483647, %v8625_v47  ;;  %v3678_v24 = vand.u32 2147483648, %v8625_v47  ;;  %v4068_v50 = vadd.f32 %v4067_v1, %v4039_v57  ;;  %v3521_v27 = vmul.f32 %v3520_v53, %v3496_v35  ;;  %v4156_v53 = vld [vmem:[#allocation2 + $0x20] sm:$0xff] }
 0x46b   : > { %v3762_v20 = vpack.c.bf16 %v3746_v26, %v3742_v25  ;;  %v3670_v41 = vmul.f32 %v4837_v49, %v3669_v0  ;;  %v4160_v5 = vadd.f32 %v4152_v11, %v4144_v8  ;;  %vm3672_vm13 = vweird.f32 %v8625_v47 }
 0x46c   : > { %v4097_v18 = vadd.f32 %v4096_v15, %v4068_v50  ;;  %v3656_v29 = vmul.f32 %v3655_v44, %v8434_v62  ;;  %vm3674_vm14 = vmor %vm3672_vm13, %vm3673_vm12  ;;  %vm3677_vm15 = vcmp.eq.f32.partialorder %v3676_v34, 8.507059e+37  ;;  %v3679_v12 = vor.u32 1.1754944e-38, %v3678_v24 }
 0x46d   : > { %4105 = vmatmul.bf16.gmra.mxu2 %v3762_v20  ;;  %v3671_v37 = vadd.f32 %v4837_v49, %v3670_v41  ;;  %4168 = vst [vmem:[#allocation2] sm:$0xff] %v4160_v5  ;;  %v4519_v48 = vclamps-f32 %v3521_v27, 1.0  ;;  %v4041_v10 = vadd.f32 %v8601_v7, %v4040_v9  ;;  %v2367_v63 = vmul.f32 0.5, %v8350_v2 }
 0x46e   : > { %v4098_v62 = vpop.f32.mrf.mxu2  ;;  %v2371_v13 = vmul.f32 0.5, %v8423_v32 }
 0x46f   : > { %v3675_v6 = vsel %vm3674_vm14, %v4837_v49, %v3671_v37  ;;  %v3711_v58 = vadd.f32 1.0, %v4519_v48  ;;  %v4070_v61 = vadd.f32 %v4069_v55, %v4041_v10 }
 0x470   : > { %v4125_v17 = vpop.f32.mrf.mxu3  ;;  %v3680_v54 = vsel %vm3677_vm15, %v3679_v12, %v3675_v6 }
 0x471   : > { %v4126_v4 = vadd.f32 %v4125_v17, %v4097_v18  ;;  %v3681_v31 = vmul.f32 %v3680_v54, %v3656_v29  ;;  %v4099_v40 = vadd.f32 %v4098_v62, %v4070_v61  ;;  %v3743_v23 = vmul.f32 %v3711_v58, %v2367_v63  ;;  %v4157_v18 = vld [vmem:[#allocation2 + $0x28] sm:$0xff] }
 0x473   : > { %v4145_v43 = vmul.f32 %v8629_v45, %v4126_v4  ;;  %v4523_v47 = vclamps-f32 %v3681_v31, 1.0 }
 0x475   : > { %v4161_v42 = vadd.f32 %v4153_v36, %v4145_v43  ;;  %v3715_v3 = vadd.f32 1.0, %v4523_v47  ;;  %v4158_v36 = vld [vmem:[#allocation2 + $0x38] sm:$0xff] }
 0x477   : > { %4169 = vst [vmem:[#allocation2 + $0x18] sm:$0xff] %v4161_v42  ;;  %v3747_v19 = vmul.f32 %v3715_v3, %v2371_v13  ;;  %v4043_v52 = vpop.f32.mrf.mxu0 }
 0x478   : > { %v4127_v30 = vpop.f32.mrf.mxu3  ;;  %v4044_v46 = vadd.f32 %v8601_v7, %v4043_v52 }
 0x479   : > { %v4128_v51 = vadd.f32 %v4127_v30, %v4099_v40  ;;  %v3763_v21 = vpack.c.bf16 %v3747_v19, %v3743_v23 }
 0x47b   : > { %v4146_v14 = vmul.f32 %v8629_v45, %v4128_v51  ;;  %4134 = vmatmul.bf16.gmra.mxu3 %v3763_v21 }
 0x47d   : > { %v4162_v60 = vadd.f32 %v4154_v33, %v4146_v14 }
 0x47f   : > { %4170 = vst [vmem:[#allocation2 + $0x10] sm:$0xff] %v4162_v60  ;;  %v4045_v49 = vpop.f32.mrf.mxu0 }
 0x480   : > { %v4046_v38 = vadd.f32 %v8601_v7, %v4045_v49 }
 0x481   : > { %v4072_v2 = vpop.f32.mrf.mxu1 }
 0x482   : > { %v4073_v32 = vadd.f32 %v4072_v2, %v4044_v46 }
 0x489   : > { %v4074_v59 = vpop.f32.mrf.mxu1 }
 0x48a   : > { %v4075_v44 = vadd.f32 %v4074_v59, %v4046_v38 }
 0x499   : > { %v4101_v56 = vpop.f32.mrf.mxu2 }
 0x49a   : > { %v4102_v35 = vadd.f32 %v4101_v56, %v4073_v32 }
 0x4a1   : > { %v4103_v39 = vpop.f32.mrf.mxu2 }
 0x4a2   : > { %v4104_v1 = vadd.f32 %v4103_v39, %v4075_v44 }
 0x4a6   : > { %v4130_v57 = vpop.f32.mrf.mxu3 }
 0x4a7   : > { %v4131_v16 = vadd.f32 %v4130_v57, %v4102_v35 }
 0x4a9   : > { %v4147_v25 = vmul.f32 %v8629_v45, %v4131_v16 }
 0x4ab   : > { %v4163_v28 = vadd.f32 %v4155_v22, %v4147_v25 }
 0x4ad   : > { %4171 = vst [vmem:[#allocation2 + $0x8] sm:$0xff] %v4163_v28 }
 0x4ae   : > { %v4132_v11 = vpop.f32.mrf.mxu3 }
 0x4af   : > { %v4133_v26 = vadd.f32 %v4132_v11, %v4104_v1 }
 0x4b1   : > { %v4148_v0 = vmul.f32 %v8629_v45, %v4133_v26 }
 0x4b3   : > { %v4164_v8 = vadd.f32 %v4156_v53, %v4148_v0 }
 0x4b5   : > { %4172 = vst [vmem:[#allocation2 + $0x20] sm:$0xff] %v4164_v8 }
 0x4d4   : > { %v4048_v34 = vpop.f32.mrf.mxu0 }
 0x4d5   : > { %v4049_v24 = vadd.f32 %v8601_v7, %v4048_v34 }
 0x4d6   : > { %v4077_v50 = vpop.f32.mrf.mxu1 }
 0x4d7   : > { %v4078_v27 = vadd.f32 %v4077_v50, %v4049_v24 }
 0x4dc   : > { %v4050_v41 = vpop.f32.mrf.mxu0 }
 0x4dd   : > { %v4051_v9 = vadd.f32 %v8601_v7, %v4050_v41 }
 0x4de   : > { %v4079_v37 = vpop.f32.mrf.mxu1 }
 0x4df   : > { %v4080_v12 = vadd.f32 %v4079_v37, %v4051_v9 }
 0x4f0   : > { %v4106_v20 = vpop.f32.mrf.mxu2 }
 0x4f1   : > { %v4107_v5 = vadd.f32 %v4106_v20, %v4078_v27 }
 0x4f8   : > { %v4108_v29 = vpop.f32.mrf.mxu2 }
 0x4f9   : > { %v4109_v10 = vadd.f32 %v4108_v29, %v4080_v12 }
 0x4fe   : > { %v4135_v15 = vpop.f32.mrf.mxu3 }
 0x4ff   : > { %v4136_v17 = vadd.f32 %v4135_v15, %v4107_v5 }
 0x501   : > { %v4149_v48 = vmul.f32 %v8629_v45, %v4136_v17 }
 0x503   : > { %v4165_v6 = vadd.f32 %v4157_v18, %v4149_v48 }
 0x505   : > { %4173 = vst [vmem:[#allocation2 + $0x28] sm:$0xff] %v4165_v6 }
 0x506   : > { %v4137_v4 = vpop.f32.mrf.mxu3 }
 0x507   : > { %v4138_v54 = vadd.f32 %v4137_v4, %v4109_v10 }
 0x509   : > { %v4150_v31 = vmul.f32 %v8629_v45, %v4138_v54  ;;  %4178 = sbr.rel (%p4653_p6) target bundleno = 1318 (0x526), region = 64 }
 0x50b   : > { %v4166_v43 = vadd.f32 %v4158_v36, %v4150_v31 }
 0x50d   : > { %4174 = vst [vmem:[#allocation2 + $0x38] sm:$0xff] %v4166_v43 }
 0x50e   : > { %v4179_v7 = vld [vmem:[#allocation2 + $0x30] sm:$0xff]  ;;  %v4180_v55 = vld [vmem:[#allocation2] sm:$0xff]  ;;  %v4181_v47 = vld [vmem:[#allocation2 + $0x18] sm:$0xff] }
 0x50f   : > { %v4187_v58 = vadd.f32 %v4180_v55, %v4179_v7  ;;  %v4183_v61 = vld [vmem:[#allocation2 + $0x8] sm:$0xff]  ;;  %v4184_v42 = vld [vmem:[#allocation2 + $0x20] sm:$0xff]  ;;  %v4182_v62 = vld [vmem:[#allocation2 + $0x10] sm:$0xff] }
 0x510   : > { %v4185_v63 = vld [vmem:[#allocation2 + $0x28] sm:$0xff]  ;;  %v4196_v13 = vadd.f32 %v4184_v42, %v4183_v61 }
 0x511   : > { %v4188_v3 = vadd.f32 %v4187_v58, %v4181_v47 }
 0x512   : > { %v4197_v30 = vadd.f32 %v4196_v13, %v4185_v63 }
 0x513   : > { %v4189_v23 = vadd.f32 %v4188_v3, %v4182_v62 }
 0x514   : > { %v4186_v40 = vld [vmem:[#allocation2 + $0x38] sm:$0xff] }
 0x515   : > { %v4198_v19 = vadd.f32 %v4197_v30, %v4186_v40  ;;  %v4190_v45 = vrot.slane %v4189_v23, 4 }
 0x517   : > { %v4199_v51 = vrot.slane %v4198_v19, 4  ;;  %v4191_v33 = vadd.f32 %v4190_v45, %v4189_v23 }
 0x519   : > { %v4200_v21 = vadd.f32 %v4199_v51, %v4198_v19  ;;  %v4192_v14 = vrot.slane %v4191_v33, 2 }
 0x51b   : > { %v4201_v60 = vrot.slane %v4200_v21, 2  ;;  %v4193_v52 = vadd.f32 %v4192_v14, %v4191_v33 }
 0x51d   : > { %v4202_v46 = vadd.f32 %v4201_v60, %v4200_v21  ;;  %v4194_v2 = vrot.slane %v4193_v52, 1 }
 0x51f   : > { %v4203_v56 = vrot.slane %v4202_v46, 1  ;;  %v4195_v32 = vadd.f32 %v4194_v2, %v4193_v52 }
 0x521   : > { %v4204_v49 = vadd.f32 %v4203_v56, %v4202_v46  ;;  %v4205_v35 = vmul.f32 0.0625, %v4195_v32 }
 0x523   : > { %v4206_v38 = vmul.f32 0.0625, %v4204_v49  ;;  %4207 = vst [vmem:[%s8692_s9] sm:$0x1] %v4205_v35 }
 0x525   : > { %4208 = vst [vmem:[%s8692_s9 + $0x1] sm:$0x1] %v4206_v38 }
 0x526 PF: > { %s19_s11 = sadd.s32 1, %s4874_s11   ;;  %s9716_s25 = sld [smem:[#allocation4_spill]] }
 0x527   : > { %p16_p7 = scmp.ge.s32.totalorder %s19_s11, 4   ;;  %s9717_s30 = smov %s4870_s10 }
 0x529   :  { %18 = sbr.rel (!%p16_p7) target bundleno = 2 (0x2), region = 119 }
 0x52c   : > { %s9718_s10 = smov %s9716_s25 }

</bundles_post_ra>
